<compile_context>
chip_gen: v7x
topology: tpu7x:2x2x1
jax: 0.10.0
libtpu: 0.0.40
codegen_flags: <defaults>
</compile_context>

<pallas_src>
import math

import jax
import jax.numpy as jnp
from jax.experimental import pallas as pl
from jax.experimental.pallas import tpu as pltpu

filters_42x42 = [[16, [4, 4], 2], [32, [4, 4], 2], [256, [11, 11], 1]]
filters_84x84 = [[16, [8, 8], 4], [32, [4, 4], 2], [256, [11, 11], 1]]


# --------------------------------------------------------------------------- #
# Parameter construction / packing into the fused-kernel layout.
# --------------------------------------------------------------------------- #
def make_convnet_params(key, directions, action_size, in_channels=3, big=False):
    """Torch-equivalent random params, pre-packed for the fused Pallas kernel."""
    # TODO(synk): base.PermutedConv2d's `directions` weight permutation is not
    # reproducible without its source; implemented as a standard Conv2d.
    del directions
    filters = filters_84x84 if big else filters_42x42
    in_hw = 84 if big else 42

    c1, (k1, _), s1 = filters[0]
    c2, (k2, _), s2 = filters[1]
    c3, (k3, _), s3 = filters[2]
    pad1 = math.ceil((k1 - 1) / 2)
    pad2 = math.ceil((k2 - 1) / 2)
    oh1 = (in_hw + 2 * pad1 - k1) // s1 + 1          # 22
    oh2 = (oh1 + 2 * pad2 - k2) // s2 + 1            # 12
    oh3 = (oh2 - k3) // s3 + 1                       # 2
    A = action_size

    # Geometry the phase-plane / banded-weight layout relies on.
    assert oh1 % 2 == 0 and k2 == 4 and s2 == 2 and pad2 == 2 and s3 == 1
    nb = oh1 // 2          # within-phase spatial extent (11)
    pp = nb + 2            # zero-padded phase-plane side (13)

    ks = jax.random.split(key, 14)

    def conv(kw_, kb_, cout, cin, k):
        fan = cin * k * k
        w = jax.random.normal(kw_, (cout, cin, k, k), jnp.float32) / math.sqrt(fan)
        b = 0.01 * jax.random.normal(kb_, (cout,), jnp.float32)
        return w, b

    def bn(kg, kb, c):
        # TODO(synk): eval-mode folded affine only (running_mean=0, running_var=1).
        gamma = 1.0 + 0.1 * jax.random.normal(kg, (c,), jnp.float32)
        beta = 0.1 * jax.random.normal(kb, (c,), jnp.float32)
        mean = jnp.zeros((c,), jnp.float32)
        var = jnp.ones((c,), jnp.float32)
        scale = gamma * jax.lax.rsqrt(var + 1e-5)
        return scale, beta - mean * scale

    w1, b1 = conv(ks[0], ks[1], c1, in_channels, k1)
    sc1, sh1 = bn(ks[2], ks[3], c1)
    w2, b2 = conv(ks[4], ks[5], c2, c1, k2)
    sc2, sh2 = bn(ks[6], ks[7], c2)
    w3, b3 = conv(ks[8], ks[9], c3, c2, k3)
    sc3, sh3 = bn(ks[10], ks[11], c3)
    w4, b4 = conv(ks[12], ks[13], A, c3, 1)

    # ---- layer 1: block-diagonal weight that emits full zero-padded plane rows.
    #      K order (kh, kw, cin); output columns = (plane col block, c1); the two
    #      padding column blocks get zero weight and zero affine (so tanh epilogue
    #      keeps them exactly zero).
    w1_kc = w1.transpose(2, 3, 1, 0).reshape(k1 * k1 * in_channels, c1)
    pmap = jnp.eye(nb, pp, k=1, dtype=jnp.float32)           # out col block = b + 1
    w1bd = jnp.kron(pmap, w1_kc).astype(jnp.bfloat16)        # (nb*K1, pp*c1)
    zc1 = jnp.zeros((c1,), jnp.float32)
    tile1 = lambda v: jnp.concatenate([zc1, jnp.tile(v, nb), zc1])
    aff1 = jnp.stack([tile1(b1), tile1(sc1), tile1(sh1)], axis=0)      # (3, pp*c1)

    # ---- layer 2: 8 block-banded weights, one per (kernel row i, column phase pj).
    m0 = jnp.eye(pp, oh2, dtype=jnp.float32)          # plane col == out col
    m1 = jnp.eye(pp, oh2, k=-1, dtype=jnp.float32)    # plane col == out col + 1
    bands = []
    for i in range(k2):
        for pj in range(2):
            wa = w2[:, :, i, pj].T                    # tap (i, pj)      (c1, c2)
            wb = w2[:, :, i, pj + 2].T                # tap (i, pj + 2)
            bands.append(jnp.kron(m0, wa) + jnp.kron(m1, wb))
    w2band = jnp.stack(bands, axis=0).astype(jnp.bfloat16)    # (2*k2, pp*c1, oh2*c2)
    aff2 = jnp.stack([jnp.tile(b2, oh2), jnp.tile(sc2, oh2),
                      jnp.tile(sh2, oh2)], axis=0)             # (3, oh2*c2)

    # ---- layer 3 (11x11) weights per kernel row; BN3 folded into the 1x1 head.
    w3s = w3.transpose(2, 3, 1, 0).reshape(k3, k3 * c2, c3).astype(jnp.bfloat16)
    b3r = b3.reshape(1, c3)
    w4_kc = w4.reshape(A, c3).T                                # (c3, A)
    w4eff = (sc3[:, None] * w4_kc).astype(jnp.float32)         # BN3 scale folded
    b4eff = (sh3 @ w4_kc + b4).reshape(1, A).astype(jnp.float32)

    params = dict(w1bd=w1bd, aff1=aff1, w2band=w2band, aff2=aff2,
                  w3s=w3s, b3=b3r, w4eff=w4eff, b4eff=b4eff)
    cfg = dict(in_channels=in_channels, k1=k1, s1=s1, pad1=pad1, k2=k2, k3=k3,
               oh1=oh1, oh2=oh2, oh3=oh3, c1=c1, c2=c2, c3=c3, A=A, nb=nb, pp=pp)
    return params, cfg


# --------------------------------------------------------------------------- #
# Fused forward pass: one pallas_call for the whole network (incl. argmax).
# --------------------------------------------------------------------------- #
def convnet_forward(params, x, cfg):
    """x: (N, C, H, W) float32 -> (N, OH, OW) int32 argmax over action channel."""
    N, Cin, _, _ = x.shape
    assert Cin == cfg["in_channels"]
    k1, s1, pad1 = cfg["k1"], cfg["s1"], cfg["pad1"]
    k2, k3 = cfg["k2"], cfg["k3"]
    oh1, oh2, oh3 = cfg["oh1"], cfg["oh2"], cfg["oh3"]
    c1, c2, c3, A = cfg["c1"], cfg["c2"], cfg["c3"], cfg["A"]
    nb, pp = cfg["nb"], cfg["pp"]
    K1 = k1 * k1 * Cin

    # ---- layer-1 im2col in the wrapper (depends only on the input).  Rows are
    # grouped by output parity phase (2x2), columns by within-phase output column
    # block (block-diagonal K); K order (kh, kw, cin), cin fastest.
    xh = jnp.transpose(x, (0, 2, 3, 1))
    xh = jnp.pad(xh, ((0, 0), (pad1, pad1), (pad1, pad1), (0, 0)))
    span = s1 * (oh1 - 1) + 1
    taps = [xh[:, i:i + span:s1, j:j + span:s1, :]
            for i in range(k1) for j in range(k1)]           # (N, oh1, oh1, Cin)
    pt = jnp.stack(taps, axis=3).reshape(N, oh1, oh1, K1)
    pt = pt.reshape(N, nb, 2, nb, 2, K1).transpose(0, 2, 4, 1, 3, 5)
    patches1 = pt.reshape(N, 4 * nb, nb * K1).astype(jnp.bfloat16)

    def kernel(p1_ref, w1_ref, aff1_ref, w2_ref, aff2_ref, w3_ref, b3_ref,
               w4_ref, b4_ref, o_ref, plane_ref, h2_ref):
        # --- layer 1: conv + bias + tanh + BN1, emitted as 4 zero-padded phase
        #     planes (rows = phase-h, cols = (phase-w block, c1)).
        plane_ref[...] = jnp.zeros(plane_ref.shape, plane_ref.dtype)
        for p in range(4):                                   # phase = 2*pi + pj
            h = jnp.dot(p1_ref[nb * p:nb * (p + 1), :], w1_ref[...],
                        preferred_element_type=jnp.float32)
            h = jnp.tanh(h + aff1_ref[0:1, :]) * aff1_ref[1:2, :] + aff1_ref[2:3, :]
            plane_ref[pp * p + 1:pp * p + 1 + nb, :] = h

        # --- layer 2: conv as 8 banded matmuls (kernel row i x column phase pj),
        #     f32 accumulation, then bias + tanh + BN2.
        acc2 = jnp.zeros((oh2, oh2 * c2), jnp.float32)
        for i in range(k2):
            for pj in range(2):
                p = 2 * (i % 2) + pj
                r0 = pp * p + i // 2
                lhs = plane_ref[r0:r0 + oh2, :].astype(jnp.bfloat16)
                acc2 = acc2 + jnp.dot(lhs, w2_ref[2 * i + pj],
                                      preferred_element_type=jnp.float32)
        h2 = jnp.tanh(acc2 + aff2_ref[0:1, :]) * aff2_ref[1:2, :] + aff2_ref[2:3, :]
        h2_ref[...] = h2                                     # (oh2, oh2*c2) f32

        # --- layer 3 (11x11) + tanh (BN3 folded into head) + 1x1 head + argmax,
        #     head and argmax kept in f32.
        for ow in range(oh3):
            acc3 = jnp.zeros((oh3, c3), jnp.float32)
            for kh in range(k3):
                lhs = h2_ref[kh:kh + oh3,
                             c2 * ow:c2 * (ow + k3)].astype(jnp.bfloat16)
                acc3 = acc3 + jnp.dot(lhs, w3_ref[kh],
                                      preferred_element_type=jnp.float32)
            h3 = jnp.tanh(acc3 + b3_ref[...])
            logits = jnp.dot(h3, w4_ref[...],
                             preferred_element_type=jnp.float32) + b4_ref[...]
            ids = jax.lax.broadcasted_iota(jnp.int32, logits.shape, 1)
            mx = jnp.max(logits, axis=1, keepdims=True)
            amax = jnp.min(jnp.where(logits == mx, ids, A), axis=1, keepdims=True)
            o_ref[oh3 * ow:oh3 * (ow + 1), :] = amax          # rows = (ow, oh)

    # Advisory cost estimate (dispatch-bound regime; helps XLA schedule glue).
    flops = 2 * N * (4 * nb * (nb * K1) * (pp * c1)
                     + 2 * k2 * oh2 * (pp * c1) * (oh2 * c2)
                     + oh3 * k3 * oh3 * (k3 * c2) * c3
                     + oh3 * oh3 * c3 * A)
    trans = N * (4 * nb * pp * c1 + oh2 * oh2 * c2 + oh3 * oh3 * c3)
    weight_bytes = sum(int(v.size) * v.dtype.itemsize for v in params.values())
    bytes_accessed = int(patches1.size) * 2 + weight_bytes + N * oh3 * oh3 * 4

    out = pl.pallas_call(
        kernel,
        out_shape=jax.ShapeDtypeStruct((N, oh3 * oh3, 1), jnp.int32),
        grid=(N,),
        in_specs=[
            pl.BlockSpec((None, 4 * nb, nb * K1), lambda b: (b, 0, 0)),
            pl.BlockSpec(params["w1bd"].shape, lambda b: (0, 0)),
            pl.BlockSpec(params["aff1"].shape, lambda b: (0, 0)),
            pl.BlockSpec(params["w2band"].shape, lambda b: (0, 0, 0)),
            pl.BlockSpec(params["aff2"].shape, lambda b: (0, 0)),
            pl.BlockSpec(params["w3s"].shape, lambda b: (0, 0, 0)),
            pl.BlockSpec(params["b3"].shape, lambda b: (0, 0)),
            pl.BlockSpec(params["w4eff"].shape, lambda b: (0, 0)),
            pl.BlockSpec(params["b4eff"].shape, lambda b: (0, 0)),
        ],
        out_specs=pl.BlockSpec((None, oh3 * oh3, 1), lambda b: (b, 0, 0)),
        scratch_shapes=[
            pltpu.VMEM((4 * pp, pp * c1), jnp.float32),    # zero-padded phase planes
            pltpu.VMEM((oh2, oh2 * c2), jnp.float32),      # layer-2 output (h, w*c)
        ],
        compiler_params=pltpu.CompilerParams(dimension_semantics=("parallel",)),
        cost_estimate=pl.CostEstimate(flops=flops, transcendentals=trans,
                                      bytes_accessed=bytes_accessed),
    )(patches1, params["w1bd"], params["aff1"], params["w2band"], params["aff2"],
      params["w3s"], params["b3"], params["w4eff"], params["b4eff"])

    # Kernel emits 4 rows per sample ordered (ow, oh); torch output is (n, oh, ow).
    return jnp.swapaxes(out.reshape(N, oh3, oh3), 1, 2)


if __name__ == "__main__":
    key = jax.random.PRNGKey(0)
    kp, kx = jax.random.split(key)
    action_size, directions = 4, 4
    # small config: big=False -> 42x42 filter stack; input (2, 3, 42, 42)
    params, cfg = make_convnet_params(kp, directions, action_size,
                                      in_channels=3, big=False)
    x = jax.random.normal(kx, (2, 3, 42, 42), jnp.float32)

    fwd = jax.jit(lambda p, inp: convnet_forward(p, inp, cfg))
    out = jax.block_until_ready(fwd(params, x))
    assert out.shape == (2, 2, 2) and out.dtype == jnp.int32
    print("KERNEL_OK")
</pallas_src>

<mosaic_0001>
module attributes {stable_mosaic.version = 11 : i64} {
  func.func @kernel(%arg0: i32, %arg1: memref<1x44x528xbf16, #tpu.memory_space<vmem>>, %arg2: memref<528x208xbf16, #tpu.memory_space<vmem>>, %arg3: memref<3x208xf32, #tpu.memory_space<vmem>>, %arg4: memref<8x208x384xbf16, #tpu.memory_space<vmem>>, %arg5: memref<3x384xf32, #tpu.memory_space<vmem>>, %arg6: memref<11x352x256xbf16, #tpu.memory_space<vmem>>, %arg7: memref<1x256xf32, #tpu.memory_space<vmem>>, %arg8: memref<256x4xf32, #tpu.memory_space<vmem>>, %arg9: memref<1x4xf32, #tpu.memory_space<vmem>>, %arg10: memref<1x4x1xi32, #tpu.memory_space<vmem>>, %arg11: memref<52x208xf32, #tpu.memory_space<vmem>>, %arg12: memref<12x384xf32, #tpu.memory_space<vmem>>) attributes {dimension_semantics = [#tpu.dimension_semantics<parallel>], iteration_bounds = array<i64: 2>, scalar_prefetch = 0 : i64, scratch_operands = 2 : i64, tpu.core_type = #tpu.core_type<tc>, window_params = [{transform_indices = @transform_0, window_bounds = array<i64: 1, 44, 528>}, {pipeline_mode = #tpu.pipeline_mode<synchronous>, transform_indices = @transform_1, window_bounds = array<i64: 528, 208>}, {pipeline_mode = #tpu.pipeline_mode<synchronous>, transform_indices = @transform_2, window_bounds = array<i64: 3, 208>}, {pipeline_mode = #tpu.pipeline_mode<synchronous>, transform_indices = @transform_3, window_bounds = array<i64: 8, 208, 384>}, {pipeline_mode = #tpu.pipeline_mode<synchronous>, transform_indices = @transform_4, window_bounds = array<i64: 3, 384>}, {pipeline_mode = #tpu.pipeline_mode<synchronous>, transform_indices = @transform_5, window_bounds = array<i64: 11, 352, 256>}, {pipeline_mode = #tpu.pipeline_mode<synchronous>, transform_indices = @transform_6, window_bounds = array<i64: 1, 256>}, {pipeline_mode = #tpu.pipeline_mode<synchronous>, transform_indices = @transform_7, window_bounds = array<i64: 256, 4>}, {pipeline_mode = #tpu.pipeline_mode<synchronous>, transform_indices = @transform_8, window_bounds = array<i64: 1, 4>}, {transform_indices = @transform_9, window_bounds = array<i64: 1, 4, 1>}]} {
    %cst = arith.constant 0.000000e+00 : f32
    %0 = vector.broadcast %cst : f32 to vector<52x208xf32>
    %c0 = arith.constant 0 : index
    %c0_0 = arith.constant 0 : index
    %1 = vector.load %arg11[%c0, %c0_0] : memref<52x208xf32, #tpu.memory_space<vmem>>, vector<52x208xf32>
    tpu.vector_store %arg11[%c0, %c0_0], %0 {strides = array<i32>} : memref<52x208xf32, #tpu.memory_space<vmem>>, vector<52x208xf32>,
    %c0_1 = arith.constant 0 : index
    %c0_2 = arith.constant 0 : index
    %c0_3 = arith.constant 0 : index
    %2 = vector.load %arg1[%c0_1, %c0_2, %c0_3] : memref<1x44x528xbf16, #tpu.memory_space<vmem>>, vector<1x11x528xbf16>
    %3 = vector.shape_cast %2 : vector<1x11x528xbf16> to vector<11x528xbf16>
    %c0_4 = arith.constant 0 : index
    %c0_5 = arith.constant 0 : index
    %4 = vector.load %arg2[%c0_4, %c0_5] : memref<528x208xbf16, #tpu.memory_space<vmem>>, vector<528x208xbf16>
    %cst_6 = arith.constant dense<0.000000e+00> : vector<11x208xf32>
    %5 = tpu.matmul %3, %4, %cst_6 {dimension_numbers = #tpu.dot_dimension_numbers<[1], [0], [0], [1], [0, 0, 1, 1], [], []>} : vector<11x528xbf16>, vector<528x208xbf16>, vector<11x208xf32> -> vector<11x208xf32>
    %c0_7 = arith.constant 0 : index
    %c0_8 = arith.constant 0 : index
    %6 = vector.load %arg3[%c0_7, %c0_8] : memref<3x208xf32, #tpu.memory_space<vmem>>, vector<1x208xf32>
    %7 = vector.broadcast %6 : vector<1x208xf32> to vector<11x208xf32>
    %8 = arith.addf %5, %7 : vector<11x208xf32>
    %9 = math.tanh %8 : vector<11x208xf32>
    %c1 = arith.constant 1 : index
    %c0_9 = arith.constant 0 : index
    %10 = vector.load %arg3[%c1, %c0_9] : memref<3x208xf32, #tpu.memory_space<vmem>>, vector<1x208xf32>
    %11 = vector.broadcast %10 : vector<1x208xf32> to vector<11x208xf32>
    %12 = arith.mulf %9, %11 : vector<11x208xf32>
    %c2 = arith.constant 2 : index
    %c0_10 = arith.constant 0 : index
    %13 = vector.load %arg3[%c2, %c0_10] : memref<3x208xf32, #tpu.memory_space<vmem>>, vector<1x208xf32>
    %14 = vector.broadcast %13 : vector<1x208xf32> to vector<11x208xf32>
    %15 = arith.addf %12, %14 : vector<11x208xf32>
    %c1_11 = arith.constant 1 : index
    %c0_12 = arith.constant 0 : index
    %16 = vector.load %arg11[%c1_11, %c0_12] : memref<52x208xf32, #tpu.memory_space<vmem>>, vector<11x208xf32>
    tpu.vector_store %arg11[%c1_11, %c0_12], %15 {strides = array<i32>} : memref<52x208xf32, #tpu.memory_space<vmem>>, vector<11x208xf32>,
    %c0_13 = arith.constant 0 : index
    %c11 = arith.constant 11 : index
    %c0_14 = arith.constant 0 : index
    %17 = vector.load %arg1[%c0_13, %c11, %c0_14] : memref<1x44x528xbf16, #tpu.memory_space<vmem>>, vector<1x11x528xbf16>
    %18 = vector.shape_cast %17 : vector<1x11x528xbf16> to vector<11x528xbf16>
    %c0_15 = arith.constant 0 : index
    %c0_16 = arith.constant 0 : index
    %19 = vector.load %arg2[%c0_15, %c0_16] : memref<528x208xbf16, #tpu.memory_space<vmem>>, vector<528x208xbf16>
    %cst_17 = arith.constant dense<0.000000e+00> : vector<11x208xf32>
    %20 = tpu.matmul %18, %19, %cst_17 {dimension_numbers = #tpu.dot_dimension_numbers<[1], [0], [0], [1], [0, 0, 1, 1], [], []>} : vector<11x528xbf16>, vector<528x208xbf16>, vector<11x208xf32> -> vector<11x208xf32>
    %c0_18 = arith.constant 0 : index
    %c0_19 = arith.constant 0 : index
    %21 = vector.load %arg3[%c0_18, %c0_19] : memref<3x208xf32, #tpu.memory_space<vmem>>, vector<1x208xf32>
    %22 = vector.broadcast %21 : vector<1x208xf32> to vector<11x208xf32>
    %23 = arith.addf %20, %22 : vector<11x208xf32>
    %24 = math.tanh %23 : vector<11x208xf32>
    %c1_20 = arith.constant 1 : index
    %c0_21 = arith.constant 0 : index
    %25 = vector.load %arg3[%c1_20, %c0_21] : memref<3x208xf32, #tpu.memory_space<vmem>>, vector<1x208xf32>
    %26 = vector.broadcast %25 : vector<1x208xf32> to vector<11x208xf32>
    %27 = arith.mulf %24, %26 : vector<11x208xf32>
    %c2_22 = arith.constant 2 : index
    %c0_23 = arith.constant 0 : index
    %28 = vector.load %arg3[%c2_22, %c0_23] : memref<3x208xf32, #tpu.memory_space<vmem>>, vector<1x208xf32>
    %29 = vector.broadcast %28 : vector<1x208xf32> to vector<11x208xf32>
    %30 = arith.addf %27, %29 : vector<11x208xf32>
    %c14 = arith.constant 14 : index
    %c0_24 = arith.constant 0 : index
    %31 = vector.load %arg11[%c14, %c0_24] : memref<52x208xf32, #tpu.memory_space<vmem>>, vector<11x208xf32>
    tpu.vector_store %arg11[%c14, %c0_24], %30 {strides = array<i32>} : memref<52x208xf32, #tpu.memory_space<vmem>>, vector<11x208xf32>,
    %c0_25 = arith.constant 0 : index
    %c22 = arith.constant 22 : index
    %c0_26 = arith.constant 0 : index
    %32 = vector.load %arg1[%c0_25, %c22, %c0_26] : memref<1x44x528xbf16, #tpu.memory_space<vmem>>, vector<1x11x528xbf16>
    %33 = vector.shape_cast %32 : vector<1x11x528xbf16> to vector<11x528xbf16>
    %c0_27 = arith.constant 0 : index
    %c0_28 = arith.constant 0 : index
    %34 = vector.load %arg2[%c0_27, %c0_28] : memref<528x208xbf16, #tpu.memory_space<vmem>>, vector<528x208xbf16>
    %cst_29 = arith.constant dense<0.000000e+00> : vector<11x208xf32>
    %35 = tpu.matmul %33, %34, %cst_29 {dimension_numbers = #tpu.dot_dimension_numbers<[1], [0], [0], [1], [0, 0, 1, 1], [], []>} : vector<11x528xbf16>, vector<528x208xbf16>, vector<11x208xf32> -> vector<11x208xf32>
    %c0_30 = arith.constant 0 : index
    %c0_31 = arith.constant 0 : index
    %36 = vector.load %arg3[%c0_30, %c0_31] : memref<3x208xf32, #tpu.memory_space<vmem>>, vector<1x208xf32>
    %37 = vector.broadcast %36 : vector<1x208xf32> to vector<11x208xf32>
    %38 = arith.addf %35, %37 : vector<11x208xf32>
    %39 = math.tanh %38 : vector<11x208xf32>
    %c1_32 = arith.constant 1 : index
    %c0_33 = arith.constant 0 : index
    %40 = vector.load %arg3[%c1_32, %c0_33] : memref<3x208xf32, #tpu.memory_space<vmem>>, vector<1x208xf32>
    %41 = vector.broadcast %40 : vector<1x208xf32> to vector<11x208xf32>
    %42 = arith.mulf %39, %41 : vector<11x208xf32>
    %c2_34 = arith.constant 2 : index
    %c0_35 = arith.constant 0 : index
    %43 = vector.load %arg3[%c2_34, %c0_35] : memref<3x208xf32, #tpu.memory_space<vmem>>, vector<1x208xf32>
    %44 = vector.broadcast %43 : vector<1x208xf32> to vector<11x208xf32>
    %45 = arith.addf %42, %44 : vector<11x208xf32>
    %c27 = arith.constant 27 : index
    %c0_36 = arith.constant 0 : index
    %46 = vector.load %arg11[%c27, %c0_36] : memref<52x208xf32, #tpu.memory_space<vmem>>, vector<11x208xf32>
    tpu.vector_store %arg11[%c27, %c0_36], %45 {strides = array<i32>} : memref<52x208xf32, #tpu.memory_space<vmem>>, vector<11x208xf32>,
    %c0_37 = arith.constant 0 : index
    %c33 = arith.constant 33 : index
    %c0_38 = arith.constant 0 : index
    %47 = vector.load %arg1[%c0_37, %c33, %c0_38] : memref<1x44x528xbf16, #tpu.memory_space<vmem>>, vector<1x11x528xbf16>
    %48 = vector.shape_cast %47 : vector<1x11x528xbf16> to vector<11x528xbf16>
    %c0_39 = arith.constant 0 : index
    %c0_40 = arith.constant 0 : index
    %49 = vector.load %arg2[%c0_39, %c0_40] : memref<528x208xbf16, #tpu.memory_space<vmem>>, vector<528x208xbf16>
    %cst_41 = arith.constant dense<0.000000e+00> : vector<11x208xf32>
    %50 = tpu.matmul %48, %49, %cst_41 {dimension_numbers = #tpu.dot_dimension_numbers<[1], [0], [0], [1], [0, 0, 1, 1], [], []>} : vector<11x528xbf16>, vector<528x208xbf16>, vector<11x208xf32> -> vector<11x208xf32>
    %c0_42 = arith.constant 0 : index
    %c0_43 = arith.constant 0 : index
    %51 = vector.load %arg3[%c0_42, %c0_43] : memref<3x208xf32, #tpu.memory_space<vmem>>, vector<1x208xf32>
    %52 = vector.broadcast %51 : vector<1x208xf32> to vector<11x208xf32>
    %53 = arith.addf %50, %52 : vector<11x208xf32>
    %54 = math.tanh %53 : vector<11x208xf32>
    %c1_44 = arith.constant 1 : index
    %c0_45 = arith.constant 0 : index
    %55 = vector.load %arg3[%c1_44, %c0_45] : memref<3x208xf32, #tpu.memory_space<vmem>>, vector<1x208xf32>
    %56 = vector.broadcast %55 : vector<1x208xf32> to vector<11x208xf32>
    %57 = arith.mulf %54, %56 : vector<11x208xf32>
    %c2_46 = arith.constant 2 : index
    %c0_47 = arith.constant 0 : index
    %58 = vector.load %arg3[%c2_46, %c0_47] : memref<3x208xf32, #tpu.memory_space<vmem>>, vector<1x208xf32>
    %59 = vector.broadcast %58 : vector<1x208xf32> to vector<11x208xf32>
    %60 = arith.addf %57, %59 : vector<11x208xf32>
    %c40 = arith.constant 40 : index
    %c0_48 = arith.constant 0 : index
    %61 = vector.load %arg11[%c40, %c0_48] : memref<52x208xf32, #tpu.memory_space<vmem>>, vector<11x208xf32>
    tpu.vector_store %arg11[%c40, %c0_48], %60 {strides = array<i32>} : memref<52x208xf32, #tpu.memory_space<vmem>>, vector<11x208xf32>,
    %cst_49 = arith.constant 0.000000e+00 : f32
    %62 = vector.broadcast %cst_49 : f32 to vector<12x384xf32>
    %c0_50 = arith.constant 0 : index
    %c0_51 = arith.constant 0 : index
    %63 = vector.load %arg11[%c0_50, %c0_51] : memref<52x208xf32, #tpu.memory_space<vmem>>, vector<12x208xf32>
    %64 = arith.truncf %63 : vector<12x208xf32> to vector<12x208xbf16>
    %c0_52 = arith.constant 0 : index
    %c0_53 = arith.constant 0 : index
    %c0_54 = arith.constant 0 : index
    %65 = vector.load %arg4[%c0_52, %c0_53, %c0_54] : memref<8x208x384xbf16, #tpu.memory_space<vmem>>, vector<1x208x384xbf16>
    %66 = vector.shape_cast %65 : vector<1x208x384xbf16> to vector<208x384xbf16>
    %cst_55 = arith.constant dense<0.000000e+00> : vector<12x384xf32>
    %67 = tpu.matmul %64, %66, %cst_55 {dimension_numbers = #tpu.dot_dimension_numbers<[1], [0], [0], [1], [0, 0, 1, 1], [], []>} : vector<12x208xbf16>, vector<208x384xbf16>, vector<12x384xf32> -> vector<12x384xf32>
    %68 = arith.addf %62, %67 : vector<12x384xf32>
    %c13 = arith.constant 13 : index
    %c0_56 = arith.constant 0 : index
    %69 = vector.load %arg11[%c13, %c0_56] : memref<52x208xf32, #tpu.memory_space<vmem>>, vector<12x208xf32>
    %70 = arith.truncf %69 : vector<12x208xf32> to vector<12x208xbf16>
    %c1_57 = arith.constant 1 : index
    %c0_58 = arith.constant 0 : index
    %c0_59 = arith.constant 0 : index
    %71 = vector.load %arg4[%c1_57, %c0_58, %c0_59] : memref<8x208x384xbf16, #tpu.memory_space<vmem>>, vector<1x208x384xbf16>
    %72 = vector.shape_cast %71 : vector<1x208x384xbf16> to vector<208x384xbf16>
    %cst_60 = arith.constant dense<0.000000e+00> : vector<12x384xf32>
    %73 = tpu.matmul %70, %72, %cst_60 {dimension_numbers = #tpu.dot_dimension_numbers<[1], [0], [0], [1], [0, 0, 1, 1], [], []>} : vector<12x208xbf16>, vector<208x384xbf16>, vector<12x384xf32> -> vector<12x384xf32>
    %74 = arith.addf %68, %73 : vector<12x384xf32>
    %c26 = arith.constant 26 : index
    %c0_61 = arith.constant 0 : index
    %75 = vector.load %arg11[%c26, %c0_61] : memref<52x208xf32, #tpu.memory_space<vmem>>, vector<12x208xf32>
    %76 = arith.truncf %75 : vector<12x208xf32> to vector<12x208xbf16>
    %c2_62 = arith.constant 2 : index
    %c0_63 = arith.constant 0 : index
    %c0_64 = arith.constant 0 : index
    %77 = vector.load %arg4[%c2_62, %c0_63, %c0_64] : memref<8x208x384xbf16, #tpu.memory_space<vmem>>, vector<1x208x384xbf16>
    %78 = vector.shape_cast %77 : vector<1x208x384xbf16> to vector<208x384xbf16>
    %cst_65 = arith.constant dense<0.000000e+00> : vector<12x384xf32>
    %79 = tpu.matmul %76, %78, %cst_65 {dimension_numbers = #tpu.dot_dimension_numbers<[1], [0], [0], [1], [0, 0, 1, 1], [], []>} : vector<12x208xbf16>, vector<208x384xbf16>, vector<12x384xf32> -> vector<12x384xf32>
    %80 = arith.addf %74, %79 : vector<12x384xf32>
    %c39 = arith.constant 39 : index
    %c0_66 = arith.constant 0 : index
    %81 = vector.load %arg11[%c39, %c0_66] : memref<52x208xf32, #tpu.memory_space<vmem>>, vector<12x208xf32>
    %82 = arith.truncf %81 : vector<12x208xf32> to vector<12x208xbf16>
    %c3 = arith.constant 3 : index
    %c0_67 = arith.constant 0 : index
    %c0_68 = arith.constant 0 : index
    %83 = vector.load %arg4[%c3, %c0_67, %c0_68] : memref<8x208x384xbf16, #tpu.memory_space<vmem>>, vector<1x208x384xbf16>
    %84 = vector.shape_cast %83 : vector<1x208x384xbf16> to vector<208x384xbf16>
    %cst_69 = arith.constant dense<0.000000e+00> : vector<12x384xf32>
    %85 = tpu.matmul %82, %84, %cst_69 {dimension_numbers = #tpu.dot_dimension_numbers<[1], [0], [0], [1], [0, 0, 1, 1], [], []>} : vector<12x208xbf16>, vector<208x384xbf16>, vector<12x384xf32> -> vector<12x384xf32>
    %86 = arith.addf %80, %85 : vector<12x384xf32>
    %c1_70 = arith.constant 1 : index
    %c0_71 = arith.constant 0 : index
    %87 = vector.load %arg11[%c1_70, %c0_71] : memref<52x208xf32, #tpu.memory_space<vmem>>, vector<12x208xf32>
    %88 = arith.truncf %87 : vector<12x208xf32> to vector<12x208xbf16>
    %c4 = arith.constant 4 : index
    %c0_72 = arith.constant 0 : index
    %c0_73 = arith.constant 0 : index
    %89 = vector.load %arg4[%c4, %c0_72, %c0_73] : memref<8x208x384xbf16, #tpu.memory_space<vmem>>, vector<1x208x384xbf16>
    %90 = vector.shape_cast %89 : vector<1x208x384xbf16> to vector<208x384xbf16>
    %cst_74 = arith.constant dense<0.000000e+00> : vector<12x384xf32>
    %91 = tpu.matmul %88, %90, %cst_74 {dimension_numbers = #tpu.dot_dimension_numbers<[1], [0], [0], [1], [0, 0, 1, 1], [], []>} : vector<12x208xbf16>, vector<208x384xbf16>, vector<12x384xf32> -> vector<12x384xf32>
    %92 = arith.addf %86, %91 : vector<12x384xf32>
    %c14_75 = arith.constant 14 : index
    %c0_76 = arith.constant 0 : index
    %93 = vector.load %arg11[%c14_75, %c0_76] : memref<52x208xf32, #tpu.memory_space<vmem>>, vector<12x208xf32>
    %94 = arith.truncf %93 : vector<12x208xf32> to vector<12x208xbf16>
    %c5 = arith.constant 5 : index
    %c0_77 = arith.constant 0 : index
    %c0_78 = arith.constant 0 : index
    %95 = vector.load %arg4[%c5, %c0_77, %c0_78] : memref<8x208x384xbf16, #tpu.memory_space<vmem>>, vector<1x208x384xbf16>
    %96 = vector.shape_cast %95 : vector<1x208x384xbf16> to vector<208x384xbf16>
    %cst_79 = arith.constant dense<0.000000e+00> : vector<12x384xf32>
    %97 = tpu.matmul %94, %96, %cst_79 {dimension_numbers = #tpu.dot_dimension_numbers<[1], [0], [0], [1], [0, 0, 1, 1], [], []>} : vector<12x208xbf16>, vector<208x384xbf16>, vector<12x384xf32> -> vector<12x384xf32>
    %98 = arith.addf %92, %97 : vector<12x384xf32>
    %c27_80 = arith.constant 27 : index
    %c0_81 = arith.constant 0 : index
    %99 = vector.load %arg11[%c27_80, %c0_81] : memref<52x208xf32, #tpu.memory_space<vmem>>, vector<12x208xf32>
    %100 = arith.truncf %99 : vector<12x208xf32> to vector<12x208xbf16>
    %c6 = arith.constant 6 : index
    %c0_82 = arith.constant 0 : index
    %c0_83 = arith.constant 0 : index
    %101 = vector.load %arg4[%c6, %c0_82, %c0_83] : memref<8x208x384xbf16, #tpu.memory_space<vmem>>, vector<1x208x384xbf16>
    %102 = vector.shape_cast %101 : vector<1x208x384xbf16> to vector<208x384xbf16>
    %cst_84 = arith.constant dense<0.000000e+00> : vector<12x384xf32>
    %103 = tpu.matmul %100, %102, %cst_84 {dimension_numbers = #tpu.dot_dimension_numbers<[1], [0], [0], [1], [0, 0, 1, 1], [], []>} : vector<12x208xbf16>, vector<208x384xbf16>, vector<12x384xf32> -> vector<12x384xf32>
    %104 = arith.addf %98, %103 : vector<12x384xf32>
    %c40_85 = arith.constant 40 : index
    %c0_86 = arith.constant 0 : index
    %105 = vector.load %arg11[%c40_85, %c0_86] : memref<52x208xf32, #tpu.memory_space<vmem>>, vector<12x208xf32>
    %106 = arith.truncf %105 : vector<12x208xf32> to vector<12x208xbf16>
    %c7 = arith.constant 7 : index
    %c0_87 = arith.constant 0 : index
    %c0_88 = arith.constant 0 : index
    %107 = vector.load %arg4[%c7, %c0_87, %c0_88] : memref<8x208x384xbf16, #tpu.memory_space<vmem>>, vector<1x208x384xbf16>
    %108 = vector.shape_cast %107 : vector<1x208x384xbf16> to vector<208x384xbf16>
    %cst_89 = arith.constant dense<0.000000e+00> : vector<12x384xf32>
    %109 = tpu.matmul %106, %108, %cst_89 {dimension_numbers = #tpu.dot_dimension_numbers<[1], [0], [0], [1], [0, 0, 1, 1], [], []>} : vector<12x208xbf16>, vector<208x384xbf16>, vector<12x384xf32> -> vector<12x384xf32>
    %110 = arith.addf %104, %109 : vector<12x384xf32>
    %c0_90 = arith.constant 0 : index
    %c0_91 = arith.constant 0 : index
    %111 = vector.load %arg5[%c0_90, %c0_91] : memref<3x384xf32, #tpu.memory_space<vmem>>, vector<1x384xf32>
    %112 = vector.broadcast %111 : vector<1x384xf32> to vector<12x384xf32>
    %113 = arith.addf %110, %112 : vector<12x384xf32>
    %114 = math.tanh %113 : vector<12x384xf32>
    %c1_92 = arith.constant 1 : index
    %c0_93 = arith.constant 0 : index
    %115 = vector.load %arg5[%c1_92, %c0_93] : memref<3x384xf32, #tpu.memory_space<vmem>>, vector<1x384xf32>
    %116 = vector.broadcast %115 : vector<1x384xf32> to vector<12x384xf32>
    %117 = arith.mulf %114, %116 : vector<12x384xf32>
    %c2_94 = arith.constant 2 : index
    %c0_95 = arith.constant 0 : index
    %118 = vector.load %arg5[%c2_94, %c0_95] : memref<3x384xf32, #tpu.memory_space<vmem>>, vector<1x384xf32>
    %119 = vector.broadcast %118 : vector<1x384xf32> to vector<12x384xf32>
    %120 = arith.addf %117, %119 : vector<12x384xf32>
    %c0_96 = arith.constant 0 : index
    %c0_97 = arith.constant 0 : index
    %121 = vector.load %arg12[%c0_96, %c0_97] : memref<12x384xf32, #tpu.memory_space<vmem>>, vector<12x384xf32>
    tpu.vector_store %arg12[%c0_96, %c0_97], %120 {strides = array<i32>} : memref<12x384xf32, #tpu.memory_space<vmem>>, vector<12x384xf32>,
    %cst_98 = arith.constant 0.000000e+00 : f32
    %122 = vector.broadcast %cst_98 : f32 to vector<2x256xf32>
    %c0_99 = arith.constant 0 : index
    %c0_100 = arith.constant 0 : index
    %123 = vector.load %arg12[%c0_99, %c0_100] : memref<12x384xf32, #tpu.memory_space<vmem>>, vector<2x352xf32>
    %124 = arith.truncf %123 : vector<2x352xf32> to vector<2x352xbf16>
    %c0_101 = arith.constant 0 : index
    %c0_102 = arith.constant 0 : index
    %c0_103 = arith.constant 0 : index
    %125 = vector.load %arg6[%c0_101, %c0_102, %c0_103] : memref<11x352x256xbf16, #tpu.memory_space<vmem>>, vector<1x352x256xbf16>
    %126 = vector.shape_cast %125 : vector<1x352x256xbf16> to vector<352x256xbf16>
    %cst_104 = arith.constant dense<0.000000e+00> : vector<2x256xf32>
    %127 = tpu.matmul %124, %126, %cst_104 {dimension_numbers = #tpu.dot_dimension_numbers<[1], [0], [0], [1], [0, 0, 1, 1], [], []>} : vector<2x352xbf16>, vector<352x256xbf16>, vector<2x256xf32> -> vector<2x256xf32>
    %128 = arith.addf %122, %127 : vector<2x256xf32>
    %c1_105 = arith.constant 1 : index
    %c0_106 = arith.constant 0 : index
    %129 = vector.load %arg12[%c1_105, %c0_106] : memref<12x384xf32, #tpu.memory_space<vmem>>, vector<2x352xf32>
    %130 = arith.truncf %129 : vector<2x352xf32> to vector<2x352xbf16>
    %c1_107 = arith.constant 1 : index
    %c0_108 = arith.constant 0 : index
    %c0_109 = arith.constant 0 : index
    %131 = vector.load %arg6[%c1_107, %c0_108, %c0_109] : memref<11x352x256xbf16, #tpu.memory_space<vmem>>, vector<1x352x256xbf16>
    %132 = vector.shape_cast %131 : vector<1x352x256xbf16> to vector<352x256xbf16>
    %cst_110 = arith.constant dense<0.000000e+00> : vector<2x256xf32>
    %133 = tpu.matmul %130, %132, %cst_110 {dimension_numbers = #tpu.dot_dimension_numbers<[1], [0], [0], [1], [0, 0, 1, 1], [], []>} : vector<2x352xbf16>, vector<352x256xbf16>, vector<2x256xf32> -> vector<2x256xf32>
    %134 = arith.addf %128, %133 : vector<2x256xf32>
    %c2_111 = arith.constant 2 : index
    %c0_112 = arith.constant 0 : index
    %135 = vector.load %arg12[%c2_111, %c0_112] : memref<12x384xf32, #tpu.memory_space<vmem>>, vector<2x352xf32>
    %136 = arith.truncf %135 : vector<2x352xf32> to vector<2x352xbf16>
    %c2_113 = arith.constant 2 : index
    %c0_114 = arith.constant 0 : index
    %c0_115 = arith.constant 0 : index
    %137 = vector.load %arg6[%c2_113, %c0_114, %c0_115] : memref<11x352x256xbf16, #tpu.memory_space<vmem>>, vector<1x352x256xbf16>
    %138 = vector.shape_cast %137 : vector<1x352x256xbf16> to vector<352x256xbf16>
    %cst_116 = arith.constant dense<0.000000e+00> : vector<2x256xf32>
    %139 = tpu.matmul %136, %138, %cst_116 {dimension_numbers = #tpu.dot_dimension_numbers<[1], [0], [0], [1], [0, 0, 1, 1], [], []>} : vector<2x352xbf16>, vector<352x256xbf16>, vector<2x256xf32> -> vector<2x256xf32>
    %140 = arith.addf %134, %139 : vector<2x256xf32>
    %c3_117 = arith.constant 3 : index
    %c0_118 = arith.constant 0 : index
    %141 = vector.load %arg12[%c3_117, %c0_118] : memref<12x384xf32, #tpu.memory_space<vmem>>, vector<2x352xf32>
    %142 = arith.truncf %141 : vector<2x352xf32> to vector<2x352xbf16>
    %c3_119 = arith.constant 3 : index
    %c0_120 = arith.constant 0 : index
    %c0_121 = arith.constant 0 : index
    %143 = vector.load %arg6[%c3_119, %c0_120, %c0_121] : memref<11x352x256xbf16, #tpu.memory_space<vmem>>, vector<1x352x256xbf16>
    %144 = vector.shape_cast %143 : vector<1x352x256xbf16> to vector<352x256xbf16>
    %cst_122 = arith.constant dense<0.000000e+00> : vector<2x256xf32>
    %145 = tpu.matmul %142, %144, %cst_122 {dimension_numbers = #tpu.dot_dimension_numbers<[1], [0], [0], [1], [0, 0, 1, 1], [], []>} : vector<2x352xbf16>, vector<352x256xbf16>, vector<2x256xf32> -> vector<2x256xf32>
    %146 = arith.addf %140, %145 : vector<2x256xf32>
    %c4_123 = arith.constant 4 : index
    %c0_124 = arith.constant 0 : index
    %147 = vector.load %arg12[%c4_123, %c0_124] : memref<12x384xf32, #tpu.memory_space<vmem>>, vector<2x352xf32>
    %148 = arith.truncf %147 : vector<2x352xf32> to vector<2x352xbf16>
    %c4_125 = arith.constant 4 : index
    %c0_126 = arith.constant 0 : index
    %c0_127 = arith.constant 0 : index
    %149 = vector.load %arg6[%c4_125, %c0_126, %c0_127] : memref<11x352x256xbf16, #tpu.memory_space<vmem>>, vector<1x352x256xbf16>
    %150 = vector.shape_cast %149 : vector<1x352x256xbf16> to vector<352x256xbf16>
    %cst_128 = arith.constant dense<0.000000e+00> : vector<2x256xf32>
    %151 = tpu.matmul %148, %150, %cst_128 {dimension_numbers = #tpu.dot_dimension_numbers<[1], [0], [0], [1], [0, 0, 1, 1], [], []>} : vector<2x352xbf16>, vector<352x256xbf16>, vector<2x256xf32> -> vector<2x256xf32>
    %152 = arith.addf %146, %151 : vector<2x256xf32>
    %c5_129 = arith.constant 5 : index
    %c0_130 = arith.constant 0 : index
    %153 = vector.load %arg12[%c5_129, %c0_130] : memref<12x384xf32, #tpu.memory_space<vmem>>, vector<2x352xf32>
    %154 = arith.truncf %153 : vector<2x352xf32> to vector<2x352xbf16>
    %c5_131 = arith.constant 5 : index
    %c0_132 = arith.constant 0 : index
    %c0_133 = arith.constant 0 : index
    %155 = vector.load %arg6[%c5_131, %c0_132, %c0_133] : memref<11x352x256xbf16, #tpu.memory_space<vmem>>, vector<1x352x256xbf16>
    %156 = vector.shape_cast %155 : vector<1x352x256xbf16> to vector<352x256xbf16>
    %cst_134 = arith.constant dense<0.000000e+00> : vector<2x256xf32>
    %157 = tpu.matmul %154, %156, %cst_134 {dimension_numbers = #tpu.dot_dimension_numbers<[1], [0], [0], [1], [0, 0, 1, 1], [], []>} : vector<2x352xbf16>, vector<352x256xbf16>, vector<2x256xf32> -> vector<2x256xf32>
    %158 = arith.addf %152, %157 : vector<2x256xf32>
    %c6_135 = arith.constant 6 : index
    %c0_136 = arith.constant 0 : index
    %159 = vector.load %arg12[%c6_135, %c0_136] : memref<12x384xf32, #tpu.memory_space<vmem>>, vector<2x352xf32>
    %160 = arith.truncf %159 : vector<2x352xf32> to vector<2x352xbf16>
    %c6_137 = arith.constant 6 : index
    %c0_138 = arith.constant 0 : index
    %c0_139 = arith.constant 0 : index
    %161 = vector.load %arg6[%c6_137, %c0_138, %c0_139] : memref<11x352x256xbf16, #tpu.memory_space<vmem>>, vector<1x352x256xbf16>
    %162 = vector.shape_cast %161 : vector<1x352x256xbf16> to vector<352x256xbf16>
    %cst_140 = arith.constant dense<0.000000e+00> : vector<2x256xf32>
    %163 = tpu.matmul %160, %162, %cst_140 {dimension_numbers = #tpu.dot_dimension_numbers<[1], [0], [0], [1], [0, 0, 1, 1], [], []>} : vector<2x352xbf16>, vector<352x256xbf16>, vector<2x256xf32> -> vector<2x256xf32>
    %164 = arith.addf %158, %163 : vector<2x256xf32>
    %c7_141 = arith.constant 7 : index
    %c0_142 = arith.constant 0 : index
    %165 = vector.load %arg12[%c7_141, %c0_142] : memref<12x384xf32, #tpu.memory_space<vmem>>, vector<2x352xf32>
    %166 = arith.truncf %165 : vector<2x352xf32> to vector<2x352xbf16>
    %c7_143 = arith.constant 7 : index
    %c0_144 = arith.constant 0 : index
    %c0_145 = arith.constant 0 : index
    %167 = vector.load %arg6[%c7_143, %c0_144, %c0_145] : memref<11x352x256xbf16, #tpu.memory_space<vmem>>, vector<1x352x256xbf16>
    %168 = vector.shape_cast %167 : vector<1x352x256xbf16> to vector<352x256xbf16>
    %cst_146 = arith.constant dense<0.000000e+00> : vector<2x256xf32>
    %169 = tpu.matmul %166, %168, %cst_146 {dimension_numbers = #tpu.dot_dimension_numbers<[1], [0], [0], [1], [0, 0, 1, 1], [], []>} : vector<2x352xbf16>, vector<352x256xbf16>, vector<2x256xf32> -> vector<2x256xf32>
    %170 = arith.addf %164, %169 : vector<2x256xf32>
    %c8 = arith.constant 8 : index
    %c0_147 = arith.constant 0 : index
    %171 = vector.load %arg12[%c8, %c0_147] : memref<12x384xf32, #tpu.memory_space<vmem>>, vector<2x352xf32>
    %172 = arith.truncf %171 : vector<2x352xf32> to vector<2x352xbf16>
    %c8_148 = arith.constant 8 : index
    %c0_149 = arith.constant 0 : index
    %c0_150 = arith.constant 0 : index
    %173 = vector.load %arg6[%c8_148, %c0_149, %c0_150] : memref<11x352x256xbf16, #tpu.memory_space<vmem>>, vector<1x352x256xbf16>
    %174 = vector.shape_cast %173 : vector<1x352x256xbf16> to vector<352x256xbf16>
    %cst_151 = arith.constant dense<0.000000e+00> : vector<2x256xf32>
    %175 = tpu.matmul %172, %174, %cst_151 {dimension_numbers = #tpu.dot_dimension_numbers<[1], [0], [0], [1], [0, 0, 1, 1], [], []>} : vector<2x352xbf16>, vector<352x256xbf16>, vector<2x256xf32> -> vector<2x256xf32>
    %176 = arith.addf %170, %175 : vector<2x256xf32>
    %c9 = arith.constant 9 : index
    %c0_152 = arith.constant 0 : index
    %177 = vector.load %arg12[%c9, %c0_152] : memref<12x384xf32, #tpu.memory_space<vmem>>, vector<2x352xf32>
    %178 = arith.truncf %177 : vector<2x352xf32> to vector<2x352xbf16>
    %c9_153 = arith.constant 9 : index
    %c0_154 = arith.constant 0 : index
    %c0_155 = arith.constant 0 : index
    %179 = vector.load %arg6[%c9_153, %c0_154, %c0_155] : memref<11x352x256xbf16, #tpu.memory_space<vmem>>, vector<1x352x256xbf16>
    %180 = vector.shape_cast %179 : vector<1x352x256xbf16> to vector<352x256xbf16>
    %cst_156 = arith.constant dense<0.000000e+00> : vector<2x256xf32>
    %181 = tpu.matmul %178, %180, %cst_156 {dimension_numbers = #tpu.dot_dimension_numbers<[1], [0], [0], [1], [0, 0, 1, 1], [], []>} : vector<2x352xbf16>, vector<352x256xbf16>, vector<2x256xf32> -> vector<2x256xf32>
    %182 = arith.addf %176, %181 : vector<2x256xf32>
    %c10 = arith.constant 10 : index
    %c0_157 = arith.constant 0 : index
    %183 = vector.load %arg12[%c10, %c0_157] : memref<12x384xf32, #tpu.memory_space<vmem>>, vector<2x352xf32>
    %184 = arith.truncf %183 : vector<2x352xf32> to vector<2x352xbf16>
    %c10_158 = arith.constant 10 : index
    %c0_159 = arith.constant 0 : index
    %c0_160 = arith.constant 0 : index
    %185 = vector.load %arg6[%c10_158, %c0_159, %c0_160] : memref<11x352x256xbf16, #tpu.memory_space<vmem>>, vector<1x352x256xbf16>
    %186 = vector.shape_cast %185 : vector<1x352x256xbf16> to vector<352x256xbf16>
    %cst_161 = arith.constant dense<0.000000e+00> : vector<2x256xf32>
    %187 = tpu.matmul %184, %186, %cst_161 {dimension_numbers = #tpu.dot_dimension_numbers<[1], [0], [0], [1], [0, 0, 1, 1], [], []>} : vector<2x352xbf16>, vector<352x256xbf16>, vector<2x256xf32> -> vector<2x256xf32>
    %188 = arith.addf %182, %187 : vector<2x256xf32>
    %c0_162 = arith.constant 0 : index
    %c0_163 = arith.constant 0 : index
    %189 = vector.load %arg7[%c0_162, %c0_163] : memref<1x256xf32, #tpu.memory_space<vmem>>, vector<1x256xf32>
    %190 = vector.broadcast %189 : vector<1x256xf32> to vector<2x256xf32>
    %191 = arith.addf %188, %190 : vector<2x256xf32>
    %192 = math.tanh %191 : vector<2x256xf32>
    %c0_164 = arith.constant 0 : index
    %c0_165 = arith.constant 0 : index
    %193 = vector.load %arg8[%c0_164, %c0_165] : memref<256x4xf32, #tpu.memory_space<vmem>>, vector<256x4xf32>
    %cst_166 = arith.constant dense<0.000000e+00> : vector<2x4xf32>
    %194 = tpu.matmul %192, %193, %cst_166 {dimension_numbers = #tpu.dot_dimension_numbers<[1], [0], [0], [1], [0, 0, 1, 1], [], []>} : vector<2x256xf32>, vector<256x4xf32>, vector<2x4xf32> -> vector<2x4xf32>
    %c0_167 = arith.constant 0 : index
    %c0_168 = arith.constant 0 : index
    %195 = vector.load %arg9[%c0_167, %c0_168] : memref<1x4xf32, #tpu.memory_space<vmem>>, vector<1x4xf32>
    %196 = vector.broadcast %195 : vector<1x4xf32> to vector<2x4xf32>
    %197 = arith.addf %194, %196 : vector<2x4xf32>
    %198 = tpu.iota {dimensions = array<i32: 1>} : vector<2x4xi32>
    %cst_169 = arith.constant dense<0xFF800000> : vector<2xf32>
    %199 = vector.multi_reduction <maximumf>, %197, %cst_169 [1] : vector<2x4xf32> to vector<2xf32>
    %200 = vector.shape_cast %199 : vector<2xf32> to vector<2x1xf32>
    %201 = vector.broadcast %200 : vector<2x1xf32> to vector<2x4xf32>
    %202 = arith.cmpf oeq, %197, %201 : vector<2x4xf32>
    %c4_i32 = arith.constant 4 : i32
    %203 = vector.broadcast %c4_i32 : i32 to vector<2x4xi32>
    %204 = arith.select %202, %198, %203 : vector<2x4xi1>, vector<2x4xi32>
    %cst_170 = arith.constant dense<2147483647> : vector<2xi32>
    %205 = vector.multi_reduction <minsi>, %204, %cst_170 [1] : vector<2x4xi32> to vector<2xi32>
    %206 = vector.shape_cast %205 : vector<2xi32> to vector<2x1xi32>
    %c0_171 = arith.constant 0 : index
    %c0_172 = arith.constant 0 : index
    %c0_173 = arith.constant 0 : index
    %207 = vector.load %arg10[%c0_171, %c0_172, %c0_173] : memref<1x4x1xi32, #tpu.memory_space<vmem>>, vector<1x2x1xi32>
    %208 = vector.shape_cast %207 : vector<1x2x1xi32> to vector<2x1xi32>
    %209 = vector.shape_cast %206 : vector<2x1xi32> to vector<1x2x1xi32>
    tpu.vector_store %arg10[%c0_171, %c0_172, %c0_173], %209 {strides = array<i32>} : memref<1x4x1xi32, #tpu.memory_space<vmem>>, vector<1x2x1xi32>,
    %cst_174 = arith.constant 0.000000e+00 : f32
    %210 = vector.broadcast %cst_174 : f32 to vector<2x256xf32>
    %c0_175 = arith.constant 0 : index
    %c32 = arith.constant 32 : index
    %211 = vector.load %arg12[%c0_175, %c32] : memref<12x384xf32, #tpu.memory_space<vmem>>, vector<2x352xf32>
    %212 = arith.truncf %211 : vector<2x352xf32> to vector<2x352xbf16>
    %c0_176 = arith.constant 0 : index
    %c0_177 = arith.constant 0 : index
    %c0_178 = arith.constant 0 : index
    %213 = vector.load %arg6[%c0_176, %c0_177, %c0_178] : memref<11x352x256xbf16, #tpu.memory_space<vmem>>, vector<1x352x256xbf16>
    %214 = vector.shape_cast %213 : vector<1x352x256xbf16> to vector<352x256xbf16>
    %cst_179 = arith.constant dense<0.000000e+00> : vector<2x256xf32>
    %215 = tpu.matmul %212, %214, %cst_179 {dimension_numbers = #tpu.dot_dimension_numbers<[1], [0], [0], [1], [0, 0, 1, 1], [], []>} : vector<2x352xbf16>, vector<352x256xbf16>, vector<2x256xf32> -> vector<2x256xf32>
    %216 = arith.addf %210, %215 : vector<2x256xf32>
    %c1_180 = arith.constant 1 : index
    %c32_181 = arith.constant 32 : index
    %217 = vector.load %arg12[%c1_180, %c32_181] : memref<12x384xf32, #tpu.memory_space<vmem>>, vector<2x352xf32>
    %218 = arith.truncf %217 : vector<2x352xf32> to vector<2x352xbf16>
    %c1_182 = arith.constant 1 : index
    %c0_183 = arith.constant 0 : index
    %c0_184 = arith.constant 0 : index
    %219 = vector.load %arg6[%c1_182, %c0_183, %c0_184] : memref<11x352x256xbf16, #tpu.memory_space<vmem>>, vector<1x352x256xbf16>
    %220 = vector.shape_cast %219 : vector<1x352x256xbf16> to vector<352x256xbf16>
    %cst_185 = arith.constant dense<0.000000e+00> : vector<2x256xf32>
    %221 = tpu.matmul %218, %220, %cst_185 {dimension_numbers = #tpu.dot_dimension_numbers<[1], [0], [0], [1], [0, 0, 1, 1], [], []>} : vector<2x352xbf16>, vector<352x256xbf16>, vector<2x256xf32> -> vector<2x256xf32>
    %222 = arith.addf %216, %221 : vector<2x256xf32>
    %c2_186 = arith.constant 2 : index
    %c32_187 = arith.constant 32 : index
    %223 = vector.load %arg12[%c2_186, %c32_187] : memref<12x384xf32, #tpu.memory_space<vmem>>, vector<2x352xf32>
    %224 = arith.truncf %223 : vector<2x352xf32> to vector<2x352xbf16>
    %c2_188 = arith.constant 2 : index
    %c0_189 = arith.constant 0 : index
    %c0_190 = arith.constant 0 : index
    %225 = vector.load %arg6[%c2_188, %c0_189, %c0_190] : memref<11x352x256xbf16, #tpu.memory_space<vmem>>, vector<1x352x256xbf16>
    %226 = vector.shape_cast %225 : vector<1x352x256xbf16> to vector<352x256xbf16>
    %cst_191 = arith.constant dense<0.000000e+00> : vector<2x256xf32>
    %227 = tpu.matmul %224, %226, %cst_191 {dimension_numbers = #tpu.dot_dimension_numbers<[1], [0], [0], [1], [0, 0, 1, 1], [], []>} : vector<2x352xbf16>, vector<352x256xbf16>, vector<2x256xf32> -> vector<2x256xf32>
    %228 = arith.addf %222, %227 : vector<2x256xf32>
    %c3_192 = arith.constant 3 : index
    %c32_193 = arith.constant 32 : index
    %229 = vector.load %arg12[%c3_192, %c32_193] : memref<12x384xf32, #tpu.memory_space<vmem>>, vector<2x352xf32>
    %230 = arith.truncf %229 : vector<2x352xf32> to vector<2x352xbf16>
    %c3_194 = arith.constant 3 : index
    %c0_195 = arith.constant 0 : index
    %c0_196 = arith.constant 0 : index
    %231 = vector.load %arg6[%c3_194, %c0_195, %c0_196] : memref<11x352x256xbf16, #tpu.memory_space<vmem>>, vector<1x352x256xbf16>
    %232 = vector.shape_cast %231 : vector<1x352x256xbf16> to vector<352x256xbf16>
    %cst_197 = arith.constant dense<0.000000e+00> : vector<2x256xf32>
    %233 = tpu.matmul %230, %232, %cst_197 {dimension_numbers = #tpu.dot_dimension_numbers<[1], [0], [0], [1], [0, 0, 1, 1], [], []>} : vector<2x352xbf16>, vector<352x256xbf16>, vector<2x256xf32> -> vector<2x256xf32>
    %234 = arith.addf %228, %233 : vector<2x256xf32>
    %c4_198 = arith.constant 4 : index
    %c32_199 = arith.constant 32 : index
    %235 = vector.load %arg12[%c4_198, %c32_199] : memref<12x384xf32, #tpu.memory_space<vmem>>, vector<2x352xf32>
    %236 = arith.truncf %235 : vector<2x352xf32> to vector<2x352xbf16>
    %c4_200 = arith.constant 4 : index
    %c0_201 = arith.constant 0 : index
    %c0_202 = arith.constant 0 : index
    %237 = vector.load %arg6[%c4_200, %c0_201, %c0_202] : memref<11x352x256xbf16, #tpu.memory_space<vmem>>, vector<1x352x256xbf16>
    %238 = vector.shape_cast %237 : vector<1x352x256xbf16> to vector<352x256xbf16>
    %cst_203 = arith.constant dense<0.000000e+00> : vector<2x256xf32>
    %239 = tpu.matmul %236, %238, %cst_203 {dimension_numbers = #tpu.dot_dimension_numbers<[1], [0], [0], [1], [0, 0, 1, 1], [], []>} : vector<2x352xbf16>, vector<352x256xbf16>, vector<2x256xf32> -> vector<2x256xf32>
    %240 = arith.addf %234, %239 : vector<2x256xf32>
    %c5_204 = arith.constant 5 : index
    %c32_205 = arith.constant 32 : index
    %241 = vector.load %arg12[%c5_204, %c32_205] : memref<12x384xf32, #tpu.memory_space<vmem>>, vector<2x352xf32>
    %242 = arith.truncf %241 : vector<2x352xf32> to vector<2x352xbf16>
    %c5_206 = arith.constant 5 : index
    %c0_207 = arith.constant 0 : index
    %c0_208 = arith.constant 0 : index
    %243 = vector.load %arg6[%c5_206, %c0_207, %c0_208] : memref<11x352x256xbf16, #tpu.memory_space<vmem>>, vector<1x352x256xbf16>
    %244 = vector.shape_cast %243 : vector<1x352x256xbf16> to vector<352x256xbf16>
    %cst_209 = arith.constant dense<0.000000e+00> : vector<2x256xf32>
    %245 = tpu.matmul %242, %244, %cst_209 {dimension_numbers = #tpu.dot_dimension_numbers<[1], [0], [0], [1], [0, 0, 1, 1], [], []>} : vector<2x352xbf16>, vector<352x256xbf16>, vector<2x256xf32> -> vector<2x256xf32>
    %246 = arith.addf %240, %245 : vector<2x256xf32>
    %c6_210 = arith.constant 6 : index
    %c32_211 = arith.constant 32 : index
    %247 = vector.load %arg12[%c6_210, %c32_211] : memref<12x384xf32, #tpu.memory_space<vmem>>, vector<2x352xf32>
    %248 = arith.truncf %247 : vector<2x352xf32> to vector<2x352xbf16>
    %c6_212 = arith.constant 6 : index
    %c0_213 = arith.constant 0 : index
    %c0_214 = arith.constant 0 : index
    %249 = vector.load %arg6[%c6_212, %c0_213, %c0_214] : memref<11x352x256xbf16, #tpu.memory_space<vmem>>, vector<1x352x256xbf16>
    %250 = vector.shape_cast %249 : vector<1x352x256xbf16> to vector<352x256xbf16>
    %cst_215 = arith.constant dense<0.000000e+00> : vector<2x256xf32>
    %251 = tpu.matmul %248, %250, %cst_215 {dimension_numbers = #tpu.dot_dimension_numbers<[1], [0], [0], [1], [0, 0, 1, 1], [], []>} : vector<2x352xbf16>, vector<352x256xbf16>, vector<2x256xf32> -> vector<2x256xf32>
    %252 = arith.addf %246, %251 : vector<2x256xf32>
    %c7_216 = arith.constant 7 : index
    %c32_217 = arith.constant 32 : index
    %253 = vector.load %arg12[%c7_216, %c32_217] : memref<12x384xf32, #tpu.memory_space<vmem>>, vector<2x352xf32>
    %254 = arith.truncf %253 : vector<2x352xf32> to vector<2x352xbf16>
    %c7_218 = arith.constant 7 : index
    %c0_219 = arith.constant 0 : index
    %c0_220 = arith.constant 0 : index
    %255 = vector.load %arg6[%c7_218, %c0_219, %c0_220] : memref<11x352x256xbf16, #tpu.memory_space<vmem>>, vector<1x352x256xbf16>
    %256 = vector.shape_cast %255 : vector<1x352x256xbf16> to vector<352x256xbf16>
    %cst_221 = arith.constant dense<0.000000e+00> : vector<2x256xf32>
    %257 = tpu.matmul %254, %256, %cst_221 {dimension_numbers = #tpu.dot_dimension_numbers<[1], [0], [0], [1], [0, 0, 1, 1], [], []>} : vector<2x352xbf16>, vector<352x256xbf16>, vector<2x256xf32> -> vector<2x256xf32>
    %258 = arith.addf %252, %257 : vector<2x256xf32>
    %c8_222 = arith.constant 8 : index
    %c32_223 = arith.constant 32 : index
    %259 = vector.load %arg12[%c8_222, %c32_223] : memref<12x384xf32, #tpu.memory_space<vmem>>, vector<2x352xf32>
    %260 = arith.truncf %259 : vector<2x352xf32> to vector<2x352xbf16>
    %c8_224 = arith.constant 8 : index
    %c0_225 = arith.constant 0 : index
    %c0_226 = arith.constant 0 : index
    %261 = vector.load %arg6[%c8_224, %c0_225, %c0_226] : memref<11x352x256xbf16, #tpu.memory_space<vmem>>, vector<1x352x256xbf16>
    %262 = vector.shape_cast %261 : vector<1x352x256xbf16> to vector<352x256xbf16>
    %cst_227 = arith.constant dense<0.000000e+00> : vector<2x256xf32>
    %263 = tpu.matmul %260, %262, %cst_227 {dimension_numbers = #tpu.dot_dimension_numbers<[1], [0], [0], [1], [0, 0, 1, 1], [], []>} : vector<2x352xbf16>, vector<352x256xbf16>, vector<2x256xf32> -> vector<2x256xf32>
    %264 = arith.addf %258, %263 : vector<2x256xf32>
    %c9_228 = arith.constant 9 : index
    %c32_229 = arith.constant 32 : index
    %265 = vector.load %arg12[%c9_228, %c32_229] : memref<12x384xf32, #tpu.memory_space<vmem>>, vector<2x352xf32>
    %266 = arith.truncf %265 : vector<2x352xf32> to vector<2x352xbf16>
    %c9_230 = arith.constant 9 : index
    %c0_231 = arith.constant 0 : index
    %c0_232 = arith.constant 0 : index
    %267 = vector.load %arg6[%c9_230, %c0_231, %c0_232] : memref<11x352x256xbf16, #tpu.memory_space<vmem>>, vector<1x352x256xbf16>
    %268 = vector.shape_cast %267 : vector<1x352x256xbf16> to vector<352x256xbf16>
    %cst_233 = arith.constant dense<0.000000e+00> : vector<2x256xf32>
    %269 = tpu.matmul %266, %268, %cst_233 {dimension_numbers = #tpu.dot_dimension_numbers<[1], [0], [0], [1], [0, 0, 1, 1], [], []>} : vector<2x352xbf16>, vector<352x256xbf16>, vector<2x256xf32> -> vector<2x256xf32>
    %270 = arith.addf %264, %269 : vector<2x256xf32>
    %c10_234 = arith.constant 10 : index
    %c32_235 = arith.constant 32 : index
    %271 = vector.load %arg12[%c10_234, %c32_235] : memref<12x384xf32, #tpu.memory_space<vmem>>, vector<2x352xf32>
    %272 = arith.truncf %271 : vector<2x352xf32> to vector<2x352xbf16>
    %c10_236 = arith.constant 10 : index
    %c0_237 = arith.constant 0 : index
    %c0_238 = arith.constant 0 : index
    %273 = vector.load %arg6[%c10_236, %c0_237, %c0_238] : memref<11x352x256xbf16, #tpu.memory_space<vmem>>, vector<1x352x256xbf16>
    %274 = vector.shape_cast %273 : vector<1x352x256xbf16> to vector<352x256xbf16>
    %cst_239 = arith.constant dense<0.000000e+00> : vector<2x256xf32>
    %275 = tpu.matmul %272, %274, %cst_239 {dimension_numbers = #tpu.dot_dimension_numbers<[1], [0], [0], [1], [0, 0, 1, 1], [], []>} : vector<2x352xbf16>, vector<352x256xbf16>, vector<2x256xf32> -> vector<2x256xf32>
    %276 = arith.addf %270, %275 : vector<2x256xf32>
    %c0_240 = arith.constant 0 : index
    %c0_241 = arith.constant 0 : index
    %277 = vector.load %arg7[%c0_240, %c0_241] : memref<1x256xf32, #tpu.memory_space<vmem>>, vector<1x256xf32>
    %278 = vector.broadcast %277 : vector<1x256xf32> to vector<2x256xf32>
    %279 = arith.addf %276, %278 : vector<2x256xf32>
    %280 = math.tanh %279 : vector<2x256xf32>
    %c0_242 = arith.constant 0 : index
    %c0_243 = arith.constant 0 : index
    %281 = vector.load %arg8[%c0_242, %c0_243] : memref<256x4xf32, #tpu.memory_space<vmem>>, vector<256x4xf32>
    %cst_244 = arith.constant dense<0.000000e+00> : vector<2x4xf32>
    %282 = tpu.matmul %280, %281, %cst_244 {dimension_numbers = #tpu.dot_dimension_numbers<[1], [0], [0], [1], [0, 0, 1, 1], [], []>} : vector<2x256xf32>, vector<256x4xf32>, vector<2x4xf32> -> vector<2x4xf32>
    %c0_245 = arith.constant 0 : index
    %c0_246 = arith.constant 0 : index
    %283 = vector.load %arg9[%c0_245, %c0_246] : memref<1x4xf32, #tpu.memory_space<vmem>>, vector<1x4xf32>
    %284 = vector.broadcast %283 : vector<1x4xf32> to vector<2x4xf32>
    %285 = arith.addf %282, %284 : vector<2x4xf32>
    %286 = tpu.iota {dimensions = array<i32: 1>} : vector<2x4xi32>
    %cst_247 = arith.constant dense<0xFF800000> : vector<2xf32>
    %287 = vector.multi_reduction <maximumf>, %285, %cst_247 [1] : vector<2x4xf32> to vector<2xf32>
    %288 = vector.shape_cast %287 : vector<2xf32> to vector<2x1xf32>
    %289 = vector.broadcast %288 : vector<2x1xf32> to vector<2x4xf32>
    %290 = arith.cmpf oeq, %285, %289 : vector<2x4xf32>
    %c4_i32_248 = arith.constant 4 : i32
    %291 = vector.broadcast %c4_i32_248 : i32 to vector<2x4xi32>
    %292 = arith.select %290, %286, %291 : vector<2x4xi1>, vector<2x4xi32>
    %cst_249 = arith.constant dense<2147483647> : vector<2xi32>
    %293 = vector.multi_reduction <minsi>, %292, %cst_249 [1] : vector<2x4xi32> to vector<2xi32>
    %294 = vector.shape_cast %293 : vector<2xi32> to vector<2x1xi32>
    %c0_250 = arith.constant 0 : index
    %c2_251 = arith.constant 2 : index
    %c0_252 = arith.constant 0 : index
    %295 = vector.load %arg10[%c0_250, %c2_251, %c0_252] : memref<1x4x1xi32, #tpu.memory_space<vmem>>, vector<1x2x1xi32>
    %296 = vector.shape_cast %295 : vector<1x2x1xi32> to vector<2x1xi32>
    %297 = vector.shape_cast %294 : vector<2x1xi32> to vector<1x2x1xi32>
    tpu.vector_store %arg10[%c0_250, %c2_251, %c0_252], %297 {strides = array<i32>} : memref<1x4x1xi32, #tpu.memory_space<vmem>>, vector<1x2x1xi32>,
    return
  }
  func.func @transform_0(%arg0: i32) -> (i32, i32, i32) {
    %c0_i32 = arith.constant 0 : i32
    %c0_i32_0 = arith.constant 0 : i32
    %c0_i32_1 = arith.constant 0 : i32
    return %arg0, %c0_i32, %c0_i32_0 : i32, i32, i32
  }
  func.func @transform_1(%arg0: i32) -> (i32, i32) {
    %c0_i32 = arith.constant 0 : i32
    %c0_i32_0 = arith.constant 0 : i32
    %c0_i32_1 = arith.constant 0 : i32
    return %c0_i32, %c0_i32_0 : i32, i32
  }
  func.func @transform_2(%arg0: i32) -> (i32, i32) {
    %c0_i32 = arith.constant 0 : i32
    %c0_i32_0 = arith.constant 0 : i32
    %c0_i32_1 = arith.constant 0 : i32
    return %c0_i32, %c0_i32_0 : i32, i32
  }
  func.func @transform_3(%arg0: i32) -> (i32, i32, i32) {
    %c0_i32 = arith.constant 0 : i32
    %c0_i32_0 = arith.constant 0 : i32
    %c0_i32_1 = arith.constant 0 : i32
    %c0_i32_2 = arith.constant 0 : i32
    return %c0_i32, %c0_i32_0, %c0_i32_1 : i32, i32, i32
  }
  func.func @transform_4(%arg0: i32) -> (i32, i32) {
    %c0_i32 = arith.constant 0 : i32
    %c0_i32_0 = arith.constant 0 : i32
    %c0_i32_1 = arith.constant 0 : i32
    return %c0_i32, %c0_i32_0 : i32, i32
  }
  func.func @transform_5(%arg0: i32) -> (i32, i32, i32) {
    %c0_i32 = arith.constant 0 : i32
    %c0_i32_0 = arith.constant 0 : i32
    %c0_i32_1 = arith.constant 0 : i32
    %c0_i32_2 = arith.constant 0 : i32
    return %c0_i32, %c0_i32_0, %c0_i32_1 : i32, i32, i32
  }
  func.func @transform_6(%arg0: i32) -> (i32, i32) {
    %c0_i32 = arith.constant 0 : i32
    %c0_i32_0 = arith.constant 0 : i32
    %c0_i32_1 = arith.constant 0 : i32
    return %c0_i32, %c0_i32_0 : i32, i32
  }
  func.func @transform_7(%arg0: i32) -> (i32, i32) {
    %c0_i32 = arith.constant 0 : i32
    %c0_i32_0 = arith.constant 0 : i32
    %c0_i32_1 = arith.constant 0 : i32
    return %c0_i32, %c0_i32_0 : i32, i32
  }
  func.func @transform_8(%arg0: i32) -> (i32, i32) {
    %c0_i32 = arith.constant 0 : i32
    %c0_i32_0 = arith.constant 0 : i32
    %c0_i32_1 = arith.constant 0 : i32
    return %c0_i32, %c0_i32_0 : i32, i32
  }
  func.func @transform_9(%arg0: i32) -> (i32, i32, i32) {
    %c0_i32 = arith.constant 0 : i32
    %c0_i32_0 = arith.constant 0 : i32
    %c0_i32_1 = arith.constant 0 : i32
    return %arg0, %c0_i32, %c0_i32_0 : i32, i32, i32
  }
}

</mosaic_0001>

<bundles_post_ra>
// kernel: _lambda_.1
= control target key start
LH: loop header
LB: loop body
LE: loop exit
PB: predicated region body
PF: predicated region fallthrough
CT: control target
= control target key end

     0   :  { %s19931_s30 = smov 0   ;;  %s25056_s0 = inlined_call_operand.vmem [shape: bf16[2,44,528], index: 0, kind: input, shape index: {}]   ;;  %s25057_s1 = inlined_call_operand.vmem [shape: bf16[528,208], index: 1, kind: input, shape index: {}]   ;;  %s25058_s2 = inlined_call_operand.vmem [shape: f32[3,208], index: 2, kind: input, shape index: {}]   ;;  %s25059_s3 = inlined_call_operand.vmem [shape: bf16[8,208,384], index: 3, kind: input, shape index: {}]   ;;  %s25060_s4 = inlined_call_operand.vmem [shape: f32[3,384], index: 4, kind: input, shape index: {}]   ;;  %s25061_s5 = inlined_call_operand.vmem [shape: bf16[11,352,256], index: 5, kind: input, shape index: {}]   ;;  %s25062_s6 = inlined_call_operand.vmem [shape: f32[1,256], index: 6, kind: input, shape index: {}]   ;;  %s25063_s7 = inlined_call_operand.vmem [shape: f32[256,4], index: 7, kind: input, shape index: {}]   ;;  %s25064_s8 = inlined_call_operand.vmem [shape: f32[1,4], index: 8, kind: input, shape index: {}]   ;;  %s25065_s9 = inlined_call_operand.vmem [shape: s32[2,4,1], index: 9, kind: output, shape index: {}]  }
   0x1 LB: > { %s14650_s10 = sadd.s32 4294967295, %s19876_s30   ;;  %p14654_p0 = scmp.ge.s32.totalorder %s19876_s30, 1  ;;  %s19876_s30 = sphi %s19931_s30, %s19_s30  }
   0x2   : > { %p287_p1 = scmp.lt.s32.totalorder %s19876_s30, 3 }
   0x4   : > { %p288_p2 = pnand %p14654_p0, %p287_p1 }
   0x5   : > { %v17748_v0 = vld [vmem:[%s25057_s1 + $0x4] ss:$8 sps:$4 sm:$0xff] (!%p288_p2)   ;;  %v17750_v1 = vld [vmem:[%s25057_s1] ss:$8 sps:$4 sm:$0xff] (!%p288_p2)   ;;  %v17751_v2 = vld [vmem:[%s25057_s1 + $0x14] ss:$8 sps:$4 sm:$0xff] (!%p288_p2)  }
   0x6   : > { %291 = sbr.rel (%p288_p2) target bundleno = 3110 (0xc26), region = 56  ;;  %791 = vmatprep.subr.bf16.mxu0 (!%p288_p2), %v17748_v0  ;;  %1460 = vmatprep.subr.bf16.mxu1 (!%p288_p2), %v17748_v0  ;;  %v17753_v3 = vld [vmem:[%s25057_s1 + $0x10] ss:$8 sps:$4 sm:$0xff] (!%p288_p2)   ;;  %v17754_v4 = vld [vmem:[%s25057_s1 + $0x24] ss:$8 sps:$4 sm:$0xff] (!%p288_p2)   ;;  %p322_p3 = scmp.lt.s32.totalorder (!%p288_p2), %s14650_s10, 1 }
   0x7   : > { %792 = vmatpush1.bf16.msra.mxu0 (!%p288_p2), %v17750_v1  ;;  %1461 = vmatpush1.bf16.msra.mxu1 (!%p288_p2), %v17750_v1  ;;  %v17756_v5 = vld [vmem:[%s25057_s1 + $0x20] ss:$8 sps:$4 sm:$0xff] (!%p288_p2)   ;;  %v17757_v6 = vld [vmem:[%s25057_s1 + $0x34] ss:$8 sps:$4 sm:$0xff] (!%p288_p2)   ;;  %v17759_v7 = vld [vmem:[%s25057_s1 + $0x30] ss:$8 sps:$4 sm:$0xff] (!%p288_p2)  }
   0x8   : > { %793 = vmatprep.subr.bf16.mxu0 (!%p288_p2), %v17751_v2  ;;  %1462 = vmatprep.subr.bf16.mxu1 (!%p288_p2), %v17751_v2  ;;  %v17760_v8 = vld [vmem:[%s25057_s1 + $0x44] ss:$8 sps:$4 sm:$0xff] (!%p288_p2)   ;;  %v17762_v9 = vld [vmem:[%s25057_s1 + $0x40] ss:$8 sps:$4 sm:$0xff] (!%p288_p2)   ;;  %v17763_v10 = vld [vmem:[%s25057_s1 + $0x54] ss:$8 sps:$4 sm:$0xff] (!%p288_p2)  }
   0x9   : > { %v17765_v11 = vld [vmem:[%s25057_s1 + $0x50] ss:$8 sps:$4 sm:$0xff] (!%p288_p2)   ;;  %v17766_v12 = vld [vmem:[%s25057_s1 + $0x64] ss:$8 sps:$4 sm:$0xff] (!%p288_p2)   ;;  %v17768_v14 = vld [vmem:[%s25057_s1 + $0x60] ss:$8 sps:$4 sm:$0xff] (!%p288_p2)  }
   0xa   : > { %v17769_v15 = vld [vmem:[%s25057_s1 + $0x74] ss:$8 sps:$4 sm:$0xff] (!%p288_p2)   ;;  %v17771_v17 = vld [vmem:[%s25057_s1 + $0x70] ss:$8 sps:$4 sm:$0xff] (!%p288_p2)   ;;  %v17772_v20 = vld [vmem:[%s25057_s1 + $0x84] ss:$8 sps:$4 sm:$0xff] (!%p288_p2)  }
   0xb   : > { %794 = vmatpush1.bf16.msra.mxu0 (!%p288_p2), %v17753_v3  ;;  %1463 = vmatpush1.bf16.msra.mxu1 (!%p288_p2), %v17753_v3  ;;  %v17774_v23 = vld [vmem:[%s25057_s1 + $0x80] ss:$8 sps:$4 sm:$0xff] (!%p288_p2)   ;;  %v17775_v25 = vld [vmem:[%s25057_s1 + $0x94] ss:$8 sps:$4 sm:$0xff] (!%p288_p2)   ;;  %v17777_v26 = vld [vmem:[%s25057_s1 + $0x90] ss:$8 sps:$4 sm:$0xff] (!%p288_p2)  }
   0xc   : > { %795 = vmatprep.subr.bf16.mxu0 (!%p288_p2), %v17754_v4  ;;  %1464 = vmatprep.subr.bf16.mxu1 (!%p288_p2), %v17754_v4  ;;  %v17778_v27 = vld [vmem:[%s25057_s1 + $0xa4] ss:$8 sps:$4 sm:$0xff] (!%p288_p2)   ;;  %v17780_v28 = vld [vmem:[%s25057_s1 + $0xa0] ss:$8 sps:$4 sm:$0xff] (!%p288_p2)   ;;  %v17781_v29 = vld [vmem:[%s25057_s1 + $0xb4] ss:$8 sps:$4 sm:$0xff] (!%p288_p2)  }
   0xd   : > { %s25067_s10 = smov (!%p322_p3, %s14650_s10), 1  ;;  %v17783_v30 = vld [vmem:[%s25057_s1 + $0xb0] ss:$8 sps:$4 sm:$0xff]   ;;  %v17784_v31 = vld [vmem:[%s25057_s1 + $0xc4] ss:$8 sps:$4 sm:$0xff]   ;;  %vm787_vm0 = vcmask 130048  }
   0xe   : > { %s17736_s14 = smul.u32 120, %s25067_s10  ;;  %v17786_v32 = vld [vmem:[%s25057_s1 + $0xc0] ss:$8 sps:$4 sm:$0xff]   ;;  %v17787_v34 = vld [vmem:[%s25057_s1 + $0xd4] ss:$8 sps:$4 sm:$0xff]   ;;  %vm1771_vm1 = vcmask 1044480  }
   0xf   : > { %796 = vmatpush1.bf16.msra.mxu0 %v17756_v5  ;;  %1465 = vmatpush1.bf16.msra.mxu1 %v17756_v5  ;;  %v17789_v35 = vld [vmem:[%s25057_s1 + $0xd0] ss:$8 sps:$4 sm:$0xff]   ;;  %v17790_v38 = vld [vmem:[%s25057_s1 + $0xe4] ss:$8 sps:$4 sm:$0xff]   ;;  %v17792_v40 = vld [vmem:[%s25057_s1 + $0xe0] ss:$8 sps:$4 sm:$0xff]  }
  0x10   : > { %797 = vmatprep.subr.bf16.mxu0 %v17757_v6  ;;  %1466 = vmatprep.subr.bf16.mxu1 %v17757_v6  ;;  %s19984_s21 = scalar_lea.vmem %s25056_s0, %s17736_s14  ;;  %v17793_v41 = vld [vmem:[%s25057_s1 + $0xf4] ss:$8 sps:$4 sm:$0xff]   ;;  %v17795_v44 = vld [vmem:[%s25057_s1 + $0xf0] ss:$8 sps:$4 sm:$0xff]   ;;  %v17801_v47 = vld [vmem:[%s25057_s1 + $0x104] ss:$8 sps:$4 sm:$0xff]  }
  0x11   : > { %v17798_v13 = vld [vmem:[%s19984_s21 + $0x4] ss:$20 sps:$4 sm:$0x3f]   ;;  %v17802_v33 = vld [vmem:[%s19984_s21 + $0x14] ss:$20 sps:$4 sm:$0x7e]  }
  0x12   : > { %823 = vmatprep.mubr.bf16.mxu0 %v17798_v13  ;;  %v17804_v16 = vld [vmem:[%s19984_s21 + $0x18] ss:$20 sps:$4 sm:$0x7e]   ;;  %v1084_v36 = vshrl.u32 %v17802_v33, 16  ;;  %v1087_v37 = vshll.u32 %v17802_v33, 16  ;;  %vm333_vm2 = vcmask 654336  }
  0x13   : > { %798 = vmatpush1.bf16.msra.mxu0 %v17759_v7  ;;  %1467 = vmatpush1.bf16.msra.mxu1 %v17759_v7  ;;  %v1092_v18 = vshrl.u32 %v17804_v16, 16  ;;  %v1095_v19 = vshll.u32 %v17804_v16, 16  ;;  %v17855_v39 = vld [vmem:[%s19984_s21 + $0x20] ss:$20 sps:$4 sm:$0x7e]   ;;  %vm346_vm3 = vcmask 650240  }
  0x14   : > { %799 = vmatprep.subr.bf16.mxu0 %v17760_v8  ;;  %1468 = vmatprep.subr.bf16.mxu1 %v17760_v8  ;;  %v1086_v42 = vrot.slane %v1084_v36, 1  ;;  %v1089_v43 = vrot.slane %v1087_v37, 2  ;;  %v1108_v45 = vshrl.u32 %v17855_v39, 16  ;;  %v1111_v46 = vshll.u32 %v17855_v39, 16  ;;  %v17799_v49 = vld [vmem:[%s25057_s1 + $0x100] ss:$8 sps:$4 sm:$0xff]  }
  0x15   : > { %v1094_v21 = vrot.slane %v1092_v18, 1  ;;  %v1097_v22 = vrot.slane %v1095_v19, 2  ;;  %v17796_v48 = vld [vmem:[%s19984_s21] ss:$20 sps:$4 sm:$0x3f]   ;;  %vm974_vm4 = vcmask 654337  }
  0x16   : > { %v1110_v50 = vrot.slane %v1108_v45, 1  ;;  %v1113_v51 = vrot.slane %v1111_v46, 2  ;;  %v1090_v52 = vor.u32 %v1089_v43, %v1086_v42  ;;  %v17807_v53 = vld [vmem:[%s25057_s1 + $0x114] ss:$8 sps:$4 sm:$0xff]   ;;  %v17805_v55 = vld [vmem:[%s25057_s1 + $0x110] ss:$8 sps:$4 sm:$0xff]  }
  0x17   : > { %800 = vmatpush1.bf16.msra.mxu0 %v17762_v9  ;;  %1469 = vmatpush1.bf16.msra.mxu1 %v17762_v9  ;;  %v1098_v24 = vor.u32 %v1097_v22, %v1094_v21  ;;  %v17852_v54 = vld [vmem:[%s19984_s21 + $0xc] ss:$20 sps:$4 sm:$0x3f]   ;;  %v17813_v59 = vld [vmem:[%s25057_s1 + $0x134] ss:$8 sps:$4 sm:$0xff]   ;;  %vm1643_vm5 = vcmask 654342  }
  0x18   : > { %801 = vmatprep.subr.bf16.mxu0 %v17763_v10  ;;  %1470 = vmatprep.subr.bf16.mxu1 %v17763_v10  ;;  %v1114_v56 = vor.u32 %v1113_v51, %v1110_v50  ;;  %v17810_v57 = vld [vmem:[%s25057_s1 + $0x124] ss:$8 sps:$4 sm:$0xff]   ;;  %v17808_v58 = vld [vmem:[%s25057_s1 + $0x120] ss:$8 sps:$4 sm:$0xff]   ;;  %v17811_v60 = vld [vmem:[%s25057_s1 + $0x130] ss:$8 sps:$4 sm:$0xff]  }
  0x19   : > { %1492 = vmatprep.mubr.bf16.mxu1 %v1098_v24  ;;  %v17816_v61 = vld [vmem:[%s25057_s1 + $0x144] ss:$8 sps:$4 sm:$0xff]   ;;  %v17814_v62 = vld [vmem:[%s25057_s1 + $0x140] ss:$8 sps:$4 sm:$0xff]   ;;  %v17819_v63 = vld [vmem:[%s25057_s1 + $0x154] ss:$8 sps:$4 sm:$0xff]  }
  0x1a   : > { %v17817_v0 = vld [vmem:[%s25057_s1 + $0x150] ss:$8 sps:$4 sm:$0xff]   ;;  %v17822_v1 = vld [vmem:[%s25057_s1 + $0x164] ss:$8 sps:$4 sm:$0xff]   ;;  %v17820_v2 = vld [vmem:[%s25057_s1 + $0x160] ss:$8 sps:$4 sm:$0xff]  }
  0x1b   : > { %802 = vmatpush1.bf16.msra.mxu0 %v17765_v11  ;;  %1471 = vmatpush1.bf16.msra.mxu1 %v17765_v11  ;;  %v17825_v3 = vld [vmem:[%s25057_s1 + $0x174] ss:$8 sps:$4 sm:$0xff]   ;;  %v17823_v4 = vld [vmem:[%s25057_s1 + $0x170] ss:$8 sps:$4 sm:$0xff]   ;;  %v17828_v5 = vld [vmem:[%s25057_s1 + $0x184] ss:$8 sps:$4 sm:$0xff]  }
  0x1c   : > { %803 = vmatprep.subr.bf16.mxu0 %v17766_v12  ;;  %1472 = vmatprep.subr.bf16.mxu1 %v17766_v12  ;;  %v17826_v6 = vld [vmem:[%s25057_s1 + $0x180] ss:$8 sps:$4 sm:$0xff]   ;;  %v17831_v7 = vld [vmem:[%s25057_s1 + $0x194] ss:$8 sps:$4 sm:$0xff]   ;;  %v17829_v8 = vld [vmem:[%s25057_s1 + $0x190] ss:$8 sps:$4 sm:$0xff]  }
  0x1d   : > { %v17834_v9 = vld [vmem:[%s25057_s1 + $0x1a4] ss:$8 sps:$4 sm:$0xff]   ;;  %v17832_v10 = vld [vmem:[%s25057_s1 + $0x1a0] ss:$8 sps:$4 sm:$0xff]   ;;  %v17837_v11 = vld [vmem:[%s25057_s1 + $0x1b4] ss:$8 sps:$4 sm:$0xff]  }
  0x1e   : > { %v17835_v12 = vld [vmem:[%s25057_s1 + $0x1b0] ss:$8 sps:$4 sm:$0xff]   ;;  %v17840_v13 = vld [vmem:[%s25057_s1 + $0x1c4] ss:$8 sps:$4 sm:$0xff]   ;;  %v17844_v19 = vld [vmem:[%s25057_s1 + $0x1e0] ss:$8 sps:$4 sm:$0xff]  }
  0x1f   : > { %804 = vmatpush1.bf16.msra.mxu0 %v17768_v14  ;;  %1473 = vmatpush1.bf16.msra.mxu1 %v17768_v14  ;;  %v17838_v14 = vld [vmem:[%s25057_s1 + $0x1c0] ss:$8 sps:$4 sm:$0xff]   ;;  %v17853_v16 = vld [vmem:[%s19984_s21 + $0x1c] ss:$20 sps:$4 sm:$0x7e]   ;;  %vm962_vm6 = vcmask 1040384  }
  0x20   : > { %805 = vmatprep.subr.bf16.mxu0 %v17769_v15  ;;  %1474 = vmatprep.subr.bf16.mxu1 %v17769_v15  ;;  %v17843_v15 = vld [vmem:[%s25057_s1 + $0x1d4] ss:$8 sps:$4 sm:$0xff]   ;;  %v17846_v18 = vld [vmem:[%s25057_s1 + $0x1e4] ss:$8 sps:$4 sm:$0xff]   ;;  %v1100_v21 = vshrl.u32 %v17853_v16, 16  ;;  %v1103_v22 = vshll.u32 %v17853_v16, 16 }
  0x21   : > { %v17858_v24 = vld [vmem:[%s25057_s1 + $0x204] ss:$8 sps:$4 sm:$0xff]   ;;  %v19801_v50 = vld [vmem:[%s25057_s1] ss:$8 sps:$4 sm:$0xff]   ;;  %v19802_v51 = vld [vmem:[%s25057_s1 + $0x14] ss:$8 sps:$4 sm:$0xff]  }
  0x22   : > { %v19800_v36 = vld [vmem:[%s25057_s1 + $0x4] ss:$8 sps:$4 sm:$0xff]   ;;  %v20257_v16 = vld [vmem:[%s19984_s21 + $0x58] sm:$0x11]  ;;  %vm1629_vm7 = vcmask 1045504   ;;  %vm1648_vm8 = vcmask 647168  }
  0x23   : > { %806 = vmatpush1.bf16.msra.mxu0 %v17771_v17  ;;  %1475 = vmatpush1.bf16.msra.mxu1 %v17771_v17  ;;  %v17841_v17 = vld [vmem:[%s25057_s1 + $0x1d0] ss:$8 sps:$4 sm:$0xff]   ;;  %vm3078_vm9 = vsmask.f32 5376  ;;  %vm2305_vm10 = vcmask 654339   ;;  %vm2293_vm11 = vcmask 1042432  }
  0x24   : > { %807 = vmatprep.subr.bf16.mxu0 %v17772_v20  ;;  %1476 = vmatprep.subr.bf16.mxu1 %v17772_v20  ;;  %v17849_v20 = vld [vmem:[%s25057_s1 + $0x1f4] ss:$8 sps:$4 sm:$0xff]   ;;  %v17859_v42 = vld [vmem:[%s19984_s21 + $0x10] ss:$20 sps:$4 sm:$0x3f]   ;;  %vm2955_vm12 = vcmask 649216  }
  0x25   : > { %vm2308_vm13 = vcmask 652288   ;;  %vm4124_vm14 = vsmask.f32 4352  ;;  %s19880_s13 = smov 96   ;;  %vm6371_vm15 = vcmask 785408   ;;  %s14656_s24 = sshll.u32 %s25067_s10, 2 }
  0x26   : > { %s330_s27 = scalar_lea.vmem %s25065_s9, %s14656_s24 }
  0x27   : > { %808 = vmatpush1.bf16.msra.mxu0 %v17774_v23  ;;  %1477 = vmatpush1.bf16.msra.mxu1 %v17774_v23  ;;  %v17847_v23 = vld [vmem:[%s25057_s1 + $0x1f0] ss:$8 sps:$4 sm:$0xff]  }
  0x28   : > { %809 = vmatprep.subr.bf16.mxu0 %v17775_v25  ;;  %1478 = vmatprep.subr.bf16.mxu1 %v17775_v25  ;;  %v1102_v25 = vrot.slane %v1100_v21, 1  ;;  %v19828_v21 = vld [vmem:[%s25057_s1 + $0xe4] ss:$8 sps:$4 sm:$0xff]  }
  0x2b   : > { %810 = vmatpush1.bf16.msra.mxu0 %v17777_v26  ;;  %1479 = vmatpush1.bf16.msra.mxu1 %v17777_v26  ;;  %v1105_v26 = vrot.slane %v1103_v22, 2 }
  0x2c   : > { %811 = vmatprep.subr.bf16.mxu0 %v17778_v27  ;;  %1480 = vmatprep.subr.bf16.mxu1 %v17778_v27  ;;  %v17860_v27 = vld [vmem:[%s19984_s21 + $0x24] ss:$20 sps:$4 sm:$0x7e]  }
  0x2d   : > { %v1119_v33 = vshll.u32 %v17860_v27, 16 }
  0x2f   : > { %812 = vmatpush1.bf16.msra.mxu0 %v17780_v28  ;;  %1481 = vmatpush1.bf16.msra.mxu1 %v17780_v28  ;;  %v17850_v28 = vld [vmem:[%s19984_s21 + $0x8] ss:$20 sps:$4 sm:$0x3f]  }
  0x30   : > { %813 = vmatprep.subr.bf16.mxu0 %v17781_v29  ;;  %1482 = vmatprep.subr.bf16.mxu1 %v17781_v29  ;;  %v17856_v29 = vld [vmem:[%s25057_s1 + $0x200] ss:$8 sps:$4 sm:$0xff]  }
  0x33   : > { %814 = vmatpush1.bf16.msra.mxu0 %v17783_v30  ;;  %1483 = vmatpush1.bf16.msra.mxu1 %v17783_v30  ;;  %v1106_v30 = vor.u32 %v1105_v26, %v1102_v25  ;;  %v14813_v26 = vcombine.high %v20257_v16, %v20257_v16 }
  0x34   : > { %815 = vmatprep.subr.bf16.mxu0 %v17784_v31  ;;  %1484 = vmatprep.subr.bf16.mxu1 %v17784_v31  ;;  %v17866_v31 = vld [vmem:[%s19984_s21 + $0x54] ss:$20 sps:$4 sm:$0x3f]  }
  0x35   : > { %v2425_v39 = vshll.u32 %v17866_v31, 16  ;;  %v2423_v43 = vshrl.u32 %v17866_v31, 16 }
  0x37   : > { %816 = vmatpush1.bf16.msra.mxu0 %v17786_v32  ;;  %1485 = vmatpush1.bf16.msra.mxu1 %v17786_v32  ;;  %v1116_v32 = vshrl.u32 %v17860_v27, 16  ;;  %v19829_v27 = vld [vmem:[%s25057_s1 + $0xe0] ss:$8 sps:$4 sm:$0xff]  }
  0x38   : > { %817 = vmatprep.subr.bf16.mxu0 %v17787_v34  ;;  %1486 = vmatprep.subr.bf16.mxu1 %v17787_v34  ;;  %v20156_v34 = vld [vmem:[%s19984_s21 + $0x50] sm:$0x11] }
  0x39   : > { %v1118_v37 = vrot.slane %v1116_v32, 1 }
  0x3b   : > { %818 = vmatpush1.bf16.msra.mxu0 %v17789_v35  ;;  %1487 = vmatpush1.bf16.msra.mxu1 %v17789_v35  ;;  %v19878_v35 = vmov 0  }
  0x3c   : > { %819 = vmatprep.subr.bf16.mxu0 %v17790_v38  ;;  %1488 = vmatprep.subr.bf16.mxu1 %v17790_v38  ;;  %v1121_v38 = vrot.slane %v1119_v33, 2 }
  0x3e   : > { %v1122_v45 = vor.u32 %v1121_v38, %v1118_v37  ;;  %v19832_v38 = vld [vmem:[%s25057_s1 + $0x104] ss:$8 sps:$4 sm:$0xff]  }
  0x3f   : > { %820 = vmatpush1.bf16.msra.mxu0 %v17792_v40  ;;  %1489 = vmatpush1.bf16.msra.mxu1 %v17792_v40  ;;  %v17861_v40 = vld [vmem:[%s19984_s21 + $0x2c] ss:$20 sps:$4 sm:$0xf8]  }
  0x40   : > { %821 = vmatprep.subr.bf16.mxu0 %v17793_v41  ;;  %1490 = vmatprep.subr.bf16.mxu1 %v17793_v41  ;;  %v14811_v41 = vcombine.high %v20156_v34, %v20156_v34  ;;  %v1775_v46 = vrot.slane %v17861_v40, 3 }
  0x43   : > { %822 = vmatpush1.bf16.msra.mxu0 %v17795_v44  ;;  %1491 = vmatpush1.bf16.msra.mxu1 %v17795_v44  ;;  %v2427_v44 = vrot.slane %v2425_v39, 1 }
  0x44   : > { %834 = vmatprep.subr.bf16.mxu0 %v17801_v47  ;;  %1503 = vmatprep.subr.bf16.mxu1 %v17801_v47  ;;  %v1776_v47 = vrot.slane %v14811_v41, 3  ;;  %v19833_v41 = vld [vmem:[%s25057_s1 + $0x100] ss:$8 sps:$4 sm:$0xff]  }
  0x46   : > { %824 = vmatmul.mubr.bf16.vlgmr.msra.gmra.mrb[0].mxu0 %v17796_v48  ;;  %1493 = vmatmul.mubr.bf16.vlgmr.msra.gmra.mrb[0].mxu1 %v1090_v52  ;;  %v2428_v48 = vor.u32 %v2427_v44, %v2423_v43  ;;  %v19803_v52 = vld [vmem:[%s25057_s1 + $0x10] ss:$8 sps:$4 sm:$0xff]   ;;  %v19836_v44 = vld [vmem:[%s25057_s1 + $0x124] ss:$8 sps:$4 sm:$0xff]  }
  0x47   : > { %835 = vmatpush1.bf16.msra.mxu0 %v17799_v49  ;;  %1504 = vmatpush1.bf16.msra.mxu1 %v17799_v49  ;;  %v1777_v49 = vsel %vm1771_vm1, %v1775_v46, %v1776_v47  ;;  %v19835_v43 = vld [vmem:[%s25057_s1 + $0x110] ss:$8 sps:$4 sm:$0xff]   ;;  %v19838_v46 = vld [vmem:[%s25057_s1 + $0x134] ss:$8 sps:$4 sm:$0xff]  }
  0x48   : > { %836 = vmatprep.subr.bf16.mxu0 %v17807_v53  ;;  %1505 = vmatprep.subr.bf16.mxu1 %v17807_v53  ;;  %v19804_v53 = vld [vmem:[%s25057_s1 + $0x24] ss:$8 sps:$4 sm:$0xff]   ;;  %v19839_v47 = vld [vmem:[%s25057_s1 + $0x130] ss:$8 sps:$4 sm:$0xff]  }
  0x49   : > { %866 = vmatprep.mubr.bf16.mxu0 %v17852_v54  ;;  %1535 = vmatprep.mubr.bf16.mxu1 %v1114_v56  ;;  %v19805_v54 = vld [vmem:[%s25057_s1 + $0x20] ss:$8 sps:$4 sm:$0xff]   ;;  %v19807_v56 = vld [vmem:[%s25057_s1 + $0x30] ss:$8 sps:$4 sm:$0xff]  }
  0x4b   : > { %837 = vmatpush1.bf16.msra.mxu0 %v17805_v55  ;;  %1506 = vmatpush1.bf16.msra.mxu1 %v17805_v55  ;;  %v19806_v55 = vld [vmem:[%s25057_s1 + $0x34] ss:$8 sps:$4 sm:$0xff]  }
  0x4c   : > { %838 = vmatprep.subr.bf16.mxu0 %v17810_v57  ;;  %1507 = vmatprep.subr.bf16.mxu1 %v17810_v57  ;;  %v19808_v57 = vld [vmem:[%s25057_s1 + $0x44] ss:$8 sps:$4 sm:$0xff]  }
  0x4f   : > { %839 = vmatpush1.bf16.msra.mxu0 %v17808_v58  ;;  %1508 = vmatpush1.bf16.msra.mxu1 %v17808_v58  ;;  %v19809_v58 = vld [vmem:[%s25057_s1 + $0x40] ss:$8 sps:$4 sm:$0xff]  }
  0x50   : > { %840 = vmatprep.subr.bf16.mxu0 %v17813_v59  ;;  %1509 = vmatprep.subr.bf16.mxu1 %v17813_v59  ;;  %v19810_v59 = vld [vmem:[%s25057_s1 + $0x54] ss:$8 sps:$4 sm:$0xff]  }
  0x53   : > { %841 = vmatpush1.bf16.msra.mxu0 %v17811_v60  ;;  %1510 = vmatpush1.bf16.msra.mxu1 %v17811_v60  ;;  %v19811_v60 = vld [vmem:[%s25057_s1 + $0x50] ss:$8 sps:$4 sm:$0xff]  }
  0x54   : > { %842 = vmatprep.subr.bf16.mxu0 %v17816_v61  ;;  %1511 = vmatprep.subr.bf16.mxu1 %v17816_v61  ;;  %v19812_v61 = vld [vmem:[%s25057_s1 + $0x64] ss:$8 sps:$4 sm:$0xff]  }
  0x57   : > { %843 = vmatpush1.bf16.msra.mxu0 %v17814_v62  ;;  %1512 = vmatpush1.bf16.msra.mxu1 %v17814_v62  ;;  %v19879_v62 = vmov 0.0  }
  0x58   : > { %844 = vmatprep.subr.bf16.mxu0 %v17819_v63  ;;  %1513 = vmatprep.subr.bf16.mxu1 %v17819_v63  ;;  %332 = vst [vmem:[#allocation2] sm:$0xff] %v19879_v62  ;;  %335 = vst [vmem:[#allocation2 + $0x10] sm:$0xff] %v19879_v62  ;;  %v19813_v63 = vld [vmem:[%s25057_s1 + $0x60] ss:$8 sps:$4 sm:$0xff]  }
  0x59   : > { %339 = vst [vmem:[#allocation2 + $0x30] sm:$0xff] %v19879_v62  ;;  %341 = vst [vmem:[#allocation2 + $0x40] sm:$0xff] %v19879_v62 }
  0x5a   : > { %345 = vst [vmem:[#allocation2 + $0x60] sm:$0xf] %v19879_v62  ;;  %334 = vst.msk [vmem:[#allocation2 + $0x8] sm:$0xff] %vm333_vm2, %v19879_v62 }
  0x5b   : > { %845 = vmatpush1.bf16.msra.mxu0 %v17817_v0  ;;  %1514 = vmatpush1.bf16.msra.mxu1 %v17817_v0  ;;  %v19814_v0 = vld [vmem:[%s25057_s1 + $0x74] ss:$8 sps:$4 sm:$0xff]   ;;  %336 = vst.msk [vmem:[#allocation2 + $0x18] sm:$0xff] %vm333_vm2, %v19879_v62  ;;  %338 = vst.msk [vmem:[#allocation2 + $0x28] sm:$0xff] %vm333_vm2, %v19879_v62 }
  0x5c   : > { %846 = vmatprep.subr.bf16.mxu0 %v17822_v1  ;;  %1515 = vmatprep.subr.bf16.mxu1 %v17822_v1  ;;  %v19815_v1 = vld [vmem:[%s25057_s1 + $0x70] ss:$8 sps:$4 sm:$0xff]   ;;  %340 = vst.msk [vmem:[#allocation2 + $0x38] sm:$0xff] %vm333_vm2, %v19879_v62  ;;  %342 = vst.msk [vmem:[#allocation2 + $0x48] sm:$0xff] %vm333_vm2, %v19879_v62 }
  0x5d   : > { %344 = vst.msk [vmem:[#allocation2 + $0x58] sm:$0xff] %vm333_vm2, %v19879_v62 }
  0x5e   : > { %347 = vst.msk [vmem:[#allocation2 + $0x68] sm:$0xf] %vm346_vm3, %v19879_v62  ;;  %v14812_v62 = vcombine.low %v20257_v16, %v20257_v16 }
  0x5f   : > { %847 = vmatpush1.bf16.msra.mxu0 %v17820_v2  ;;  %1516 = vmatpush1.bf16.msra.mxu1 %v17820_v2  ;;  %v19816_v2 = vld [vmem:[%s25057_s1 + $0x84] ss:$8 sps:$4 sm:$0xff]  }
  0x60   : > { %848 = vmatprep.subr.bf16.mxu0 %v17825_v3  ;;  %1517 = vmatprep.subr.bf16.mxu1 %v17825_v3  ;;  %v19817_v3 = vld [vmem:[%s25057_s1 + $0x80] ss:$8 sps:$4 sm:$0xff]  }
  0x63   : > { %849 = vmatpush1.bf16.msra.mxu0 %v17823_v4  ;;  %1518 = vmatpush1.bf16.msra.mxu1 %v17823_v4  ;;  %v19818_v4 = vld [vmem:[%s25057_s1 + $0x94] ss:$8 sps:$4 sm:$0xff]  }
  0x64   : > { %850 = vmatprep.subr.bf16.mxu0 %v17828_v5  ;;  %1519 = vmatprep.subr.bf16.mxu1 %v17828_v5  ;;  %v19819_v5 = vld [vmem:[%s25057_s1 + $0x90] ss:$8 sps:$4 sm:$0xff]  }
  0x67   : > { %851 = vmatpush1.bf16.msra.mxu0 %v17826_v6  ;;  %1520 = vmatpush1.bf16.msra.mxu1 %v17826_v6  ;;  %v19820_v6 = vld [vmem:[%s25057_s1 + $0xa4] ss:$8 sps:$4 sm:$0xff]  }
  0x68   : > { %852 = vmatprep.subr.bf16.mxu0 %v17831_v7  ;;  %1521 = vmatprep.subr.bf16.mxu1 %v17831_v7  ;;  %v19821_v7 = vld [vmem:[%s25057_s1 + $0xa0] ss:$8 sps:$4 sm:$0xff]  }
  0x6b   : > { %853 = vmatpush1.bf16.msra.mxu0 %v17829_v8  ;;  %1522 = vmatpush1.bf16.msra.mxu1 %v17829_v8  ;;  %v19822_v8 = vld [vmem:[%s25057_s1 + $0xb4] ss:$8 sps:$4 sm:$0xff]  }
  0x6c   : > { %854 = vmatprep.subr.bf16.mxu0 %v17834_v9  ;;  %1523 = vmatprep.subr.bf16.mxu1 %v17834_v9  ;;  %v19823_v9 = vld [vmem:[%s25057_s1 + $0xb0] ss:$8 sps:$4 sm:$0xff]  }
  0x6f   : > { %855 = vmatpush1.bf16.msra.mxu0 %v17832_v10  ;;  %1524 = vmatpush1.bf16.msra.mxu1 %v17832_v10  ;;  %v19824_v10 = vld [vmem:[%s25057_s1 + $0xc4] ss:$8 sps:$4 sm:$0xff]  }
  0x70   : > { %856 = vmatprep.subr.bf16.mxu0 %v17837_v11  ;;  %1525 = vmatprep.subr.bf16.mxu1 %v17837_v11  ;;  %v17864_v11 = vld [vmem:[%s19984_s21 + $0x50] ss:$20 sps:$4 sm:$0x3f]  }
  0x71   : > { %v2416_v22 = vshrl.u32 %v17864_v11, 16 }
  0x73   : > { %857 = vmatpush1.bf16.msra.mxu0 %v17835_v12  ;;  %1526 = vmatpush1.bf16.msra.mxu1 %v17835_v12  ;;  %v19825_v12 = vld [vmem:[%s25057_s1 + $0xc0] ss:$8 sps:$4 sm:$0xff]  }
  0x74   : > { %858 = vmatprep.subr.bf16.mxu0 %v17840_v13  ;;  %1527 = vmatprep.subr.bf16.mxu1 %v17840_v13  ;;  %v17867_v13 = vld [vmem:[%s19984_s21 + $0x28] ss:$20 sps:$4 sm:$0xf8]  }
  0x77   : > { %859 = vmatpush1.bf16.msra.mxu0 %v17838_v14  ;;  %1528 = vmatpush1.bf16.msra.mxu1 %v17838_v14  ;;  %v17874_v14 = vld [vmem:[%s19984_s21 + $0x5c] ss:$20 sps:$4 sm:$0x3f]  }
  0x78   : > { %860 = vmatprep.subr.bf16.mxu0 %v17843_v15  ;;  %1529 = vmatprep.subr.bf16.mxu1 %v17843_v15  ;;  %v19826_v15 = vld [vmem:[%s25057_s1 + $0xd4] ss:$8 sps:$4 sm:$0xff]  }
  0x7b   : > { %861 = vmatpush1.bf16.msra.mxu0 %v17841_v17  ;;  %1530 = vmatpush1.bf16.msra.mxu1 %v17841_v17  ;;  %v2418_v17 = vshll.u32 %v17864_v11, 16  ;;  %v19861_v11 = vld [vmem:[%s25057_s1 + $0x1e0] ss:$8 sps:$4 sm:$0xff]  }
  0x7c   : > { %862 = vmatprep.subr.bf16.mxu0 %v17846_v18  ;;  %1531 = vmatprep.subr.bf16.mxu1 %v17846_v18  ;;  %v19827_v18 = vld [vmem:[%s25057_s1 + $0xd0] ss:$8 sps:$4 sm:$0xff]  }
  0x7d   : > { %v2420_v25 = vrot.slane %v2418_v17, 1  ;;  %v19863_v17 = vld [vmem:[%s25057_s1 + $0x1f0] ss:$8 sps:$4 sm:$0xff]  }
  0x7f   : > { %863 = vmatpush1.bf16.msra.mxu0 %v17844_v19  ;;  %1532 = vmatpush1.bf16.msra.mxu1 %v17844_v19  ;;  %v14810_v19 = vcombine.low %v20156_v34, %v20156_v34  ;;  %v2421_v33 = vor.u32 %v2420_v25, %v2416_v22  ;;  %v1782_v34 = vrot.slane %v14813_v26, 3  ;;  %v17878_v22 = vld [vmem:[%s19984_s21 + $0x60] ss:$0 sps:$4 sm:$0x11]  }
  0x80   : > { %864 = vmatprep.subr.bf16.mxu0 %v17849_v20  ;;  %1533 = vmatprep.subr.bf16.mxu1 %v17849_v20  ;;  %v17869_v20 = vld [vmem:[%s19984_s21 + $0x34] ss:$20 sps:$4 sm:$0xf8]  }
  0x81   : > { %v1781_v31 = vrot.slane %v17869_v20, 3  ;;  %v17877_v20 = vld [vmem:[%s19984_s21 + $0x38] ss:$20 sps:$4 sm:$0xf8]  }
  0x83   : > { %865 = vmatpush1.bf16.msra.mxu0 %v17847_v23  ;;  %1534 = vmatpush1.bf16.msra.mxu1 %v17847_v23  ;;  %v1772_v23 = vrot.slane %v17867_v13, 3  ;;  %v1783_v40 = vsel %vm1771_vm1, %v1781_v31, %v1782_v34  ;;  %v1779_v13 = vrot.slane %v14812_v62, 3  ;;  %v17883_v31 = vld [vmem:[%s25059_s3 + $0x140] ss:$12 sps:$4 sm:$0xff]   ;;  %v17884_v34 = vld [vmem:[%s25059_s3 + $0x150] ss:$12 sps:$4 sm:$0xff]   ;;  %v422_v62 = vlaneseq }
  0x84   : > { %877 = vmatprep.subr.bf16.mxu0 %v17858_v24  ;;  %1546 = vmatprep.subr.bf16.mxu1 %v17858_v24  ;;  %v2439_v24 = vshll.u32 %v17874_v14, 16 }
  0x86   : > { %867 = vmatmul.mubr.bf16.vlgmr.msra.gmra.mrb[0].mxu0 %v17850_v28  ;;  %1536 = vmatmul.mubr.bf16.vlgmr.msra.gmra.mrb[0].mxu1 %v1106_v30  ;;  %v1773_v28 = vrot.slane %v14810_v19, 3  ;;  %v2437_v30 = vshrl.u32 %v17874_v14, 16  ;;  %v2441_v32 = vrot.slane %v2439_v24, 1  ;;  %v19862_v14 = vld [vmem:[%s25057_s1 + $0x1f4] ss:$8 sps:$4 sm:$0xff]  }
  0x87   : > { %878 = vmatpush1.bf16.msra.mxu0 %v17856_v29  ;;  %1547 = vmatpush1.bf16.msra.mxu1 %v17856_v29  ;;  %v19830_v29 = vld [vmem:[%s25057_s1 + $0xf4] ss:$8 sps:$4 sm:$0xff]   ;;  %v19864_v19 = vld [vmem:[%s25057_s1 + $0x204] ss:$8 sps:$4 sm:$0xff]   ;;  %v19865_v24 = vld [vmem:[%s25057_s1 + $0x200] ss:$8 sps:$4 sm:$0xff]  }
  0x88   : > { %909 = vmatprep.mubr.bf16.mxu0 %v19878_v35  ;;  %1578 = vmatprep.mubr.bf16.mxu1 %v19878_v35  ;;  %v1774_v37 = vsel %vm1771_vm1, %v1772_v23, %v1773_v28  ;;  %v2442_v39 = vor.u32 %v2441_v32, %v2437_v30  ;;  %v1785_v28 = vrot.slane %v17878_v22, 3 }
  0x89   : > { %2124 = vmatprep.subr.bf16.mxu0 %v19800_v36  ;;  %2787 = vmatprep.subr.bf16.mxu1 %v19800_v36  ;;  %v19831_v36 = vld [vmem:[%s25057_s1 + $0xf0] ss:$8 sps:$4 sm:$0xff]  }
  0x92   : > { %14728 = vmatmul.mubr.msk.bf16.vlgmr.msra.gmra.mrb[0].mxu0 %vm787_vm0, %v17859_v42  ;;  %14802 = vmatmul.mubr.msk.bf16.vlgmr.msra.gmra.mrb[0].mxu1 %vm787_vm0, %v1122_v45  ;;  %v19834_v42 = vld [vmem:[%s25057_s1 + $0x114] ss:$8 sps:$4 sm:$0xff]   ;;  %v19837_v45 = vld [vmem:[%s25057_s1 + $0x120] ss:$8 sps:$4 sm:$0xff]  }
  0x93   : > { %2125 = vmatpush1.bf16.msra.mxu0 %v19801_v50  ;;  %2788 = vmatpush1.bf16.msra.mxu1 %v19801_v50  ;;  %v19842_v50 = vld [vmem:[%s25057_s1 + $0x154] ss:$8 sps:$4 sm:$0xff]  }
  0x94   : > { %2126 = vmatprep.subr.bf16.mxu0 %v19802_v51  ;;  %2789 = vmatprep.subr.bf16.mxu1 %v19802_v51  ;;  %v19843_v51 = vld [vmem:[%s25057_s1 + $0x150] ss:$8 sps:$4 sm:$0xff]  }
  0x95   : > { %2156 = vmatprep.mubr.bf16.mxu0 %v1777_v49  ;;  %2819 = vmatprep.mubr.bf16.mxu1 %v2428_v48  ;;  %v19840_v48 = vld [vmem:[%s25057_s1 + $0x144] ss:$8 sps:$4 sm:$0xff]   ;;  %v19841_v49 = vld [vmem:[%s25057_s1 + $0x140] ss:$8 sps:$4 sm:$0xff]  }
  0x97   : > { %2127 = vmatpush1.bf16.msra.mxu0 %v19803_v52  ;;  %2790 = vmatpush1.bf16.msra.mxu1 %v19803_v52  ;;  %v19844_v52 = vld [vmem:[%s25057_s1 + $0x164] ss:$8 sps:$4 sm:$0xff]  }
  0x98   : > { %2128 = vmatprep.subr.bf16.mxu0 %v19804_v53  ;;  %2791 = vmatprep.subr.bf16.mxu1 %v19804_v53  ;;  %v19845_v53 = vld [vmem:[%s25057_s1 + $0x160] ss:$8 sps:$4 sm:$0xff]  }
  0x9b   : > { %2129 = vmatpush1.bf16.msra.mxu0 %v19805_v54  ;;  %2792 = vmatpush1.bf16.msra.mxu1 %v19805_v54  ;;  %v19846_v54 = vld [vmem:[%s25057_s1 + $0x174] ss:$8 sps:$4 sm:$0xff]  }
  0x9c   : > { %2130 = vmatprep.subr.bf16.mxu0 %v19806_v55  ;;  %2793 = vmatprep.subr.bf16.mxu1 %v19806_v55  ;;  %v19847_v55 = vld [vmem:[%s25057_s1 + $0x170] ss:$8 sps:$4 sm:$0xff]  }
  0x9f   : > { %2131 = vmatpush1.bf16.msra.mxu0 %v19807_v56  ;;  %2794 = vmatpush1.bf16.msra.mxu1 %v19807_v56  ;;  %v19848_v56 = vld [vmem:[%s25057_s1 + $0x184] ss:$8 sps:$4 sm:$0xff]  }
  0xa0   : > { %2132 = vmatprep.subr.bf16.mxu0 %v19808_v57  ;;  %2795 = vmatprep.subr.bf16.mxu1 %v19808_v57  ;;  %v19849_v57 = vld [vmem:[%s25057_s1 + $0x180] ss:$8 sps:$4 sm:$0xff]  }
  0xa3   : > { %2133 = vmatpush1.bf16.msra.mxu0 %v19809_v58  ;;  %2796 = vmatpush1.bf16.msra.mxu1 %v19809_v58  ;;  %v19850_v58 = vld [vmem:[%s25057_s1 + $0x194] ss:$8 sps:$4 sm:$0xff]  }
  0xa4   : > { %2134 = vmatprep.subr.bf16.mxu0 %v19810_v59  ;;  %2797 = vmatprep.subr.bf16.mxu1 %v19810_v59  ;;  %v19851_v59 = vld [vmem:[%s25057_s1 + $0x190] ss:$8 sps:$4 sm:$0xff]  }
  0xa7   : > { %2135 = vmatpush1.bf16.msra.mxu0 %v19811_v60  ;;  %2798 = vmatpush1.bf16.msra.mxu1 %v19811_v60  ;;  %v19852_v60 = vld [vmem:[%s25057_s1 + $0x1a4] ss:$8 sps:$4 sm:$0xff]  }
  0xa8   : > { %2136 = vmatprep.subr.bf16.mxu0 %v19812_v61  ;;  %2799 = vmatprep.subr.bf16.mxu1 %v19812_v61  ;;  %v19853_v61 = vld [vmem:[%s25057_s1 + $0x1a0] ss:$8 sps:$4 sm:$0xff]  }
  0xab   : > { %2137 = vmatpush1.bf16.msra.mxu0 %v19813_v63  ;;  %2800 = vmatpush1.bf16.msra.mxu1 %v19813_v63  ;;  %v19854_v63 = vld [vmem:[%s25057_s1 + $0x1b4] ss:$8 sps:$4 sm:$0xff]  }
  0xac   : > { %2138 = vmatprep.subr.bf16.mxu0 %v19814_v0  ;;  %2801 = vmatprep.subr.bf16.mxu1 %v19814_v0  ;;  %v19855_v0 = vld [vmem:[%s25057_s1 + $0x1b0] ss:$8 sps:$4 sm:$0xff]  }
  0xaf   : > { %2139 = vmatpush1.bf16.msra.mxu0 %v19815_v1  ;;  %2802 = vmatpush1.bf16.msra.mxu1 %v19815_v1  ;;  %v19856_v1 = vld [vmem:[%s25057_s1 + $0x1c4] ss:$8 sps:$4 sm:$0xff]  }
  0xb0   : > { %2140 = vmatprep.subr.bf16.mxu0 %v19816_v2  ;;  %2803 = vmatprep.subr.bf16.mxu1 %v19816_v2  ;;  %v17872_v2 = vld [vmem:[%s19984_s21 + $0x58] ss:$20 sps:$4 sm:$0x3f]  }
  0xb3   : > { %2141 = vmatpush1.bf16.msra.mxu0 %v19817_v3  ;;  %2804 = vmatpush1.bf16.msra.mxu1 %v19817_v3  ;;  %v19857_v3 = vld [vmem:[%s25057_s1 + $0x1c0] ss:$8 sps:$4 sm:$0xff]  }
  0xb4   : > { %2142 = vmatprep.subr.bf16.mxu0 %v19818_v4  ;;  %2805 = vmatprep.subr.bf16.mxu1 %v19818_v4  ;;  %v19858_v4 = vld [vmem:[%s25057_s1 + $0x1d4] ss:$8 sps:$4 sm:$0xff]  }
  0xb7   : > { %2143 = vmatpush1.bf16.msra.mxu0 %v19819_v5  ;;  %2806 = vmatpush1.bf16.msra.mxu1 %v19819_v5  ;;  %v17875_v5 = vld [vmem:[%s19984_s21 + $0x30] ss:$20 sps:$4 sm:$0xf8]  }
  0xb8   : > { %2144 = vmatprep.subr.bf16.mxu0 %v19820_v6  ;;  %2807 = vmatprep.subr.bf16.mxu1 %v19820_v6  ;;  %v2432_v6 = vshll.u32 %v17872_v2, 16 }
  0xbb   : > { %2145 = vmatpush1.bf16.msra.mxu0 %v19821_v7  ;;  %2808 = vmatpush1.bf16.msra.mxu1 %v19821_v7  ;;  %v19859_v7 = vld [vmem:[%s25057_s1 + $0x1d0] ss:$8 sps:$4 sm:$0xff]  }
  0xbc   : > { %2146 = vmatprep.subr.bf16.mxu0 %v19822_v8  ;;  %2809 = vmatprep.subr.bf16.mxu1 %v19822_v8  ;;  %v19860_v8 = vld [vmem:[%s25057_s1 + $0x1e4] ss:$8 sps:$4 sm:$0xff]  }
  0xbf   : > { %2147 = vmatpush1.bf16.msra.mxu0 %v19823_v9  ;;  %2810 = vmatpush1.bf16.msra.mxu1 %v19823_v9  ;;  %v2430_v9 = vshrl.u32 %v17872_v2, 16  ;;  %v17924_v2 = vld [vmem:[%s25059_s3 + $0x240] ss:$12 sps:$4 sm:$0xff]  }
  0xc0   : > { %2148 = vmatprep.subr.bf16.mxu0 %v19824_v10  ;;  %2811 = vmatprep.subr.bf16.mxu1 %v19824_v10  ;;  %v2434_v10 = vrot.slane %v2432_v6, 1  ;;  %v17931_v6 = vld [vmem:[%s25059_s3 + $0x260] ss:$12 sps:$4 sm:$0xff]  }
  0xc2   : > { %v2435_v16 = vor.u32 %v2434_v10, %v2430_v9  ;;  %v420_v9 = vld [vmem:[%s25058_s2] ss:$4 sm:$0x3] }
  0xc3   : > { %2149 = vmatpush1.bf16.msra.mxu0 %v19825_v12  ;;  %2812 = vmatpush1.bf16.msra.mxu1 %v19825_v12  ;;  %v1778_v12 = vrot.slane %v17875_v5, 3  ;;  %v17928_v5 = vld [vmem:[%s25059_s3 + $0x258] ss:$12 sps:$4 sm:$0xff]  }
  0xc4   : > { %2150 = vmatprep.subr.bf16.mxu0 %v19826_v15  ;;  %2813 = vmatprep.subr.bf16.mxu1 %v19826_v15  ;;  %v17879_v15 = vld [vmem:[%s19984_s21 + $0x60] ss:$20 sps:$4 sm:$0x3f]  }
  0xc5   : > { %v2446_v23 = vshll.u32 %v17879_v15, 16  ;;  %v2444_v25 = vshrl.u32 %v17879_v15, 16  ;;  %v1050_v10 = vld [vmem:[%s25058_s2] ss:$4 sm:$0x3] }
  0xc7   : > { %2151 = vmatpush1.bf16.msra.mxu0 %v19827_v18  ;;  %2814 = vmatpush1.bf16.msra.mxu1 %v19827_v18  ;;  %v1780_v18 = vsel %vm1771_vm1, %v1778_v12, %v1779_v13  ;;  %v2448_v26 = vrot.slane %v2446_v23, 1 }
  0xc8   : > { %2152 = vmatprep.subr.bf16.mxu0 %v19828_v21  ;;  %2815 = vmatprep.subr.bf16.mxu1 %v19828_v21  ;;  %v17882_v21 = vld [vmem:[%s25059_s3 + $0x13c] ss:$12 sps:$4 sm:$0xff]  }
  0xc9   : > { %v2449_v30 = vor.u32 %v2448_v26, %v2444_v25 }
  0xcb   : > { %2153 = vmatpush1.bf16.msra.mxu0 %v19829_v27  ;;  %2816 = vmatpush1.bf16.msra.mxu1 %v19829_v27  ;;  %v1784_v27 = vrot.slane %v17877_v20, 3 }
  0xcc   : > { %2154 = vmatprep.subr.bf16.mxu0 %v19830_v29  ;;  %2817 = vmatprep.subr.bf16.mxu1 %v19830_v29  ;;  %v17880_v29 = vld [vmem:[%s25059_s3 + $0x138] ss:$12 sps:$4 sm:$0xff]  }
  0xcd   : > { %v1786_v32 = vsel %vm1771_vm1, %v1784_v27, %v1785_v28 }
  0xcf   : > { %2155 = vmatpush1.bf16.msra.mxu0 %v19831_v36  ;;  %2818 = vmatpush1.bf16.msra.mxu1 %v19831_v36  ;;  %v17887_v36 = vld [vmem:[%s25059_s3 + $0x158] ss:$12 sps:$4 sm:$0xff]  }
  0xd0   : > { %2167 = vmatprep.subr.bf16.mxu0 %v19832_v38  ;;  %2830 = vmatprep.subr.bf16.mxu1 %v19832_v38  ;;  %v17888_v38 = vld [vmem:[%s25059_s3 + $0x168] ss:$12 sps:$4 sm:$0xff]  }
  0xd2   : > { %2157 = vmatmul.mubr.bf16.vlgmr.msra.gmra.mrb[4].mxu0 %v1774_v37  ;;  %2820 = vmatmul.mubr.bf16.vlgmr.msra.gmra.mrb[4].mxu1 %v2421_v33  ;;  %v17886_v33 = vld [vmem:[%s25059_s3 + $0x154] ss:$12 sps:$4 sm:$0xff]   ;;  %v17890_v37 = vld [vmem:[%s25059_s3 + $0x16c] ss:$12 sps:$4 sm:$0xff]  }
  0xd3   : > { %2168 = vmatpush1.bf16.msra.mxu0 %v19833_v41  ;;  %2831 = vmatpush1.bf16.msra.mxu1 %v19833_v41  ;;  %v17892_v41 = vld [vmem:[%s25059_s3 + $0x180] ss:$12 sps:$4 sm:$0xff]  }
  0xd4   : > { %2169 = vmatprep.subr.bf16.mxu0 %v19834_v42  ;;  %2832 = vmatprep.subr.bf16.mxu1 %v19834_v42  ;;  %v17895_v42 = vld [vmem:[%s25059_s3 + $0x188] ss:$12 sps:$4 sm:$0xff]  }
  0xd5   : > { %2199 = vmatprep.mubr.bf16.mxu0 %v1783_v40  ;;  %2862 = vmatprep.mubr.bf16.mxu1 %v2442_v39  ;;  %v17891_v39 = vld [vmem:[%s25059_s3 + $0x170] ss:$12 sps:$4 sm:$0xff]  }
  0xd6   : > { %v17894_v40 = vld [vmem:[%s25059_s3 + $0x184] ss:$12 sps:$4 sm:$0xff]  }
  0xd7   : > { %2170 = vmatpush1.bf16.msra.mxu0 %v19835_v43  ;;  %2833 = vmatpush1.bf16.msra.mxu1 %v19835_v43  ;;  %v17898_v43 = vld [vmem:[%s25059_s3 + $0x19c] ss:$12 sps:$4 sm:$0xff]  }
  0xd8   : > { %2171 = vmatprep.subr.bf16.mxu0 %v19836_v44  ;;  %2834 = vmatprep.subr.bf16.mxu1 %v19836_v44  ;;  %v17896_v44 = vld [vmem:[%s25059_s3 + $0x198] ss:$12 sps:$4 sm:$0xff]  }
  0xdb   : > { %2172 = vmatpush1.bf16.msra.mxu0 %v19837_v45  ;;  %2835 = vmatpush1.bf16.msra.mxu1 %v19837_v45  ;;  %v17899_v45 = vld [vmem:[%s25059_s3 + $0x1a0] ss:$12 sps:$4 sm:$0xff]  }
  0xdc   : > { %2173 = vmatprep.subr.bf16.mxu0 %v19838_v46  ;;  %2836 = vmatprep.subr.bf16.mxu1 %v19838_v46  ;;  %v17902_v46 = vld [vmem:[%s25059_s3 + $0x1b4] ss:$12 sps:$4 sm:$0xff]  }
  0xdf   : > { %2174 = vmatpush1.bf16.msra.mxu0 %v19839_v47  ;;  %2837 = vmatpush1.bf16.msra.mxu1 %v19839_v47  ;;  %v17900_v47 = vld [vmem:[%s25059_s3 + $0x1b0] ss:$12 sps:$4 sm:$0xff]  }
  0xe0   : > { %2175 = vmatprep.subr.bf16.mxu0 %v19840_v48  ;;  %2838 = vmatprep.subr.bf16.mxu1 %v19840_v48  ;;  %v17903_v48 = vld [vmem:[%s25059_s3 + $0x1b8] ss:$12 sps:$4 sm:$0xff]  }
  0xe3   : > { %2176 = vmatpush1.bf16.msra.mxu0 %v19841_v49  ;;  %2839 = vmatpush1.bf16.msra.mxu1 %v19841_v49  ;;  %v17906_v49 = vld [vmem:[%s25059_s3 + $0x1cc] ss:$12 sps:$4 sm:$0xff]  }
  0xe4   : > { %2177 = vmatprep.subr.bf16.mxu0 %v19842_v50  ;;  %2840 = vmatprep.subr.bf16.mxu1 %v19842_v50  ;;  %v17904_v50 = vld [vmem:[%s25059_s3 + $0x1c8] ss:$12 sps:$4 sm:$0xff]  }
  0xe7   : > { %2178 = vmatpush1.bf16.msra.mxu0 %v19843_v51  ;;  %2841 = vmatpush1.bf16.msra.mxu1 %v19843_v51  ;;  %v17907_v51 = vld [vmem:[%s25059_s3 + $0x1d0] ss:$12 sps:$4 sm:$0xff]  }
  0xe8   : > { %2179 = vmatprep.subr.bf16.mxu0 %v19844_v52  ;;  %2842 = vmatprep.subr.bf16.mxu1 %v19844_v52  ;;  %v17910_v52 = vld [vmem:[%s25059_s3 + $0x1e4] ss:$12 sps:$4 sm:$0xff]  }
  0xeb   : > { %2180 = vmatpush1.bf16.msra.mxu0 %v19845_v53  ;;  %2843 = vmatpush1.bf16.msra.mxu1 %v19845_v53  ;;  %v17908_v53 = vld [vmem:[%s25059_s3 + $0x1e0] ss:$12 sps:$4 sm:$0xff]  }
  0xec   : > { %2181 = vmatprep.subr.bf16.mxu0 %v19846_v54  ;;  %2844 = vmatprep.subr.bf16.mxu1 %v19846_v54  ;;  %v17911_v54 = vld [vmem:[%s25059_s3 + $0x1e8] ss:$12 sps:$4 sm:$0xff]  }
  0xef   : > { %2182 = vmatpush1.bf16.msra.mxu0 %v19847_v55  ;;  %2845 = vmatpush1.bf16.msra.mxu1 %v19847_v55  ;;  %v17914_v55 = vld [vmem:[%s25059_s3 + $0x1fc] ss:$12 sps:$4 sm:$0xff]  }
  0xf0   : > { %2183 = vmatprep.subr.bf16.mxu0 %v19848_v56  ;;  %2846 = vmatprep.subr.bf16.mxu1 %v19848_v56  ;;  %v17912_v56 = vld [vmem:[%s25059_s3 + $0x1f8] ss:$12 sps:$4 sm:$0xff]  }
  0xf3   : > { %2184 = vmatpush1.bf16.msra.mxu0 %v19849_v57  ;;  %2847 = vmatpush1.bf16.msra.mxu1 %v19849_v57  ;;  %v17915_v57 = vld [vmem:[%s25059_s3 + $0x200] ss:$12 sps:$4 sm:$0xff]  }
  0xf4   : > { %2185 = vmatprep.subr.bf16.mxu0 %v19850_v58  ;;  %2848 = vmatprep.subr.bf16.mxu1 %v19850_v58  ;;  %v17918_v58 = vld [vmem:[%s25059_s3 + $0x214] ss:$12 sps:$4 sm:$0xff]  }
  0xf7   : > { %2186 = vmatpush1.bf16.msra.mxu0 %v19851_v59  ;;  %2849 = vmatpush1.bf16.msra.mxu1 %v19851_v59  ;;  %v17916_v59 = vld [vmem:[%s25059_s3 + $0x210] ss:$12 sps:$4 sm:$0xff]  }
  0xf8   : > { %2187 = vmatprep.subr.bf16.mxu0 %v19852_v60  ;;  %2850 = vmatprep.subr.bf16.mxu1 %v19852_v60  ;;  %v17919_v60 = vld [vmem:[%s25059_s3 + $0x218] ss:$12 sps:$4 sm:$0xff]  }
  0xfb   : > { %2188 = vmatpush1.bf16.msra.mxu0 %v19853_v61  ;;  %2851 = vmatpush1.bf16.msra.mxu1 %v19853_v61  ;;  %v17922_v61 = vld [vmem:[%s25059_s3 + $0x22c] ss:$12 sps:$4 sm:$0xff]  }
  0xfc   : > { %2189 = vmatprep.subr.bf16.mxu0 %v19854_v63  ;;  %2852 = vmatprep.subr.bf16.mxu1 %v19854_v63  ;;  %v17920_v63 = vld [vmem:[%s25059_s3 + $0x228] ss:$12 sps:$4 sm:$0xff]  }
  0xff   : > { %2190 = vmatpush1.bf16.msra.mxu0 %v19855_v0  ;;  %2853 = vmatpush1.bf16.msra.mxu1 %v19855_v0  ;;  %v17923_v0 = vld [vmem:[%s25059_s3 + $0x230] ss:$12 sps:$4 sm:$0xff]  }
 0x100   : > { %2191 = vmatprep.subr.bf16.mxu0 %v19856_v1  ;;  %2854 = vmatprep.subr.bf16.mxu1 %v19856_v1  ;;  %v17926_v1 = vld [vmem:[%s25059_s3 + $0x244] ss:$12 sps:$4 sm:$0xff]  }
 0x103   : > { %2192 = vmatpush1.bf16.msra.mxu0 %v19857_v3  ;;  %2855 = vmatpush1.bf16.msra.mxu1 %v19857_v3  ;;  %v17927_v3 = vld [vmem:[%s25059_s3 + $0x248] ss:$12 sps:$4 sm:$0xff]  }
 0x104   : > { %2193 = vmatprep.subr.bf16.mxu0 %v19858_v4  ;;  %2856 = vmatprep.subr.bf16.mxu1 %v19858_v4  ;;  %v17930_v4 = vld [vmem:[%s25059_s3 + $0x25c] ss:$12 sps:$4 sm:$0xff]  }
 0x107   : > { %2194 = vmatpush1.bf16.msra.mxu0 %v19859_v7  ;;  %2857 = vmatpush1.bf16.msra.mxu1 %v19859_v7  ;;  %v17934_v7 = vld [vmem:[%s25059_s3 + $0x4] ss:$12 sps:$4 sm:$0xff]  }
 0x108   : > { %2195 = vmatprep.subr.bf16.mxu0 %v19860_v8  ;;  %2858 = vmatprep.subr.bf16.mxu1 %v19860_v8  ;;  %v20545_v8 = vshrl.u32 %v422_v62, 7 }
 0x10a   : > { %v20557_v12 = vsub.s32 1, %v20545_v8 }
 0x10b   : > { %2196 = vmatpush1.bf16.msra.mxu0 %v19861_v11  ;;  %2859 = vmatpush1.bf16.msra.mxu1 %v19861_v11  ;;  %v20554_v11 = vsub.s32 0, %v20545_v8 }
 0x10c   : > { %2197 = vmatprep.subr.bf16.mxu0 %v19862_v14  ;;  %2860 = vmatprep.subr.bf16.mxu1 %v19862_v14  ;;  %v429_v15 = vrot.slane %v420_v9, %v20557_v12 }
 0x10d   : > { %v425_v13 = vrot.slane %v420_v9, %v20554_v11  ;;  %v1055_v14 = vrot.slane %v1050_v10, %v20554_v11 }
 0x10f   : > { %2198 = vmatpush1.bf16.msra.mxu0 %v19863_v17  ;;  %2861 = vmatpush1.bf16.msra.mxu1 %v19863_v17 }
 0x110   : > { %2210 = vmatprep.subr.bf16.mxu0 %v19864_v19  ;;  %2873 = vmatprep.subr.bf16.mxu1 %v19864_v19 }
 0x112   : > { %2200 = vmatmul.mubr.bf16.vlgmr.msra.gmra.mrb[4].mxu0 %v1780_v18  ;;  %2863 = vmatmul.mubr.bf16.vlgmr.msra.gmra.mrb[4].mxu1 %v2435_v16  ;;  %v1059_v16 = vrot.slane %v1050_v10, %v20557_v12 }
 0x113   : > { %2211 = vmatpush1.bf16.msra.mxu0 %v19865_v24  ;;  %2874 = vmatpush1.bf16.msra.mxu1 %v19865_v24 }
 0x114   : > { %2242 = vmatprep.mubr.bf16.mxu0 %v19878_v35  ;;  %2905 = vmatprep.mubr.bf16.mxu1 %v19878_v35 }
 0x115   : > { %3317 = vmatprep.subr.bf16.mxu0 %v17882_v21  ;;  %3360 = vmatprep.subr.bf16.mxu1 %v19878_v35 }
 0x11e   : > { %14881 = vmatmul.mubr.msk.bf16.vlgmr.msra.gmra.mrb[4].mxu0 %vm787_vm0, %v1786_v32  ;;  %14955 = vmatmul.mubr.msk.bf16.vlgmr.msra.gmra.mrb[4].mxu1 %vm787_vm0, %v2449_v30  ;;  %vm10247_vm0 = vcmask 25600  }
 0x11f   : > { %3318 = vmatpush1.bf16.msra.mxu0 %v17880_v29  ;;  %3361 = vmatpush1.bf16.msra.mxu1 %v17883_v31  ;;  %v14729_v31 = vld [vmem:[%s25058_s2 + $0x1] ss:$4 sm:$0x3] }
 0x120   : > { %3319 = vmatprep.subr.bf16.mxu0 %v17886_v33  ;;  %3362 = vmatprep.subr.bf16.mxu1 %v19878_v35  ;;  %v14803_v33 = vld [vmem:[%s25058_s2 + $0x1] ss:$4 sm:$0x3] }
 0x123   : > { %3320 = vmatpush1.bf16.msra.mxu0 %v17884_v34  ;;  %3363 = vmatpush1.bf16.msra.mxu1 %v17887_v36  ;;  %v14730_v36 = vld [vmem:[%s25058_s2 + $0x2] ss:$4 sm:$0x3] }
 0x124   : > { %3321 = vmatprep.subr.bf16.mxu0 %v17890_v37  ;;  %3364 = vmatprep.subr.bf16.mxu1 %v19878_v35  ;;  %v14804_v37 = vld [vmem:[%s25058_s2 + $0x2] ss:$4 sm:$0x3] }
 0x127   : > { %3322 = vmatpush1.bf16.msra.mxu0 %v17888_v38  ;;  %3365 = vmatpush1.bf16.msra.mxu1 %v17891_v39  ;;  %v930_v38 = vrot.slane %v14729_v31, %v20554_v11  ;;  %v1598_v39 = vrot.slane %v14803_v33, %v20554_v11 }
 0x128   : > { %3323 = vmatprep.subr.bf16.mxu0 %v17894_v40  ;;  %3366 = vmatprep.subr.bf16.mxu1 %v19878_v35  ;;  %v947_v40 = vrot.slane %v14730_v36, %v20554_v11 }
 0x12b   : > { %3324 = vmatpush1.bf16.msra.mxu0 %v17892_v41  ;;  %3367 = vmatpush1.bf16.msra.mxu1 %v17895_v42  ;;  %v934_v41 = vrot.slane %v14729_v31, %v20557_v12 }
 0x12c   : > { %3325 = vmatprep.subr.bf16.mxu0 %v17898_v43  ;;  %3368 = vmatprep.subr.bf16.mxu1 %v19878_v35  ;;  %v1614_v43 = vrot.slane %v14804_v37, %v20554_v11 }
 0x12f   : > { %3326 = vmatpush1.bf16.msra.mxu0 %v17896_v44  ;;  %3369 = vmatpush1.bf16.msra.mxu1 %v17899_v45  ;;  %v1602_v44 = vrot.slane %v14803_v33, %v20557_v12 }
 0x130   : > { %3327 = vmatprep.subr.bf16.mxu0 %v17902_v46  ;;  %3370 = vmatprep.subr.bf16.mxu1 %v19878_v35 }
 0x133   : > { %3328 = vmatpush1.bf16.msra.mxu0 %v17900_v47  ;;  %3371 = vmatpush1.bf16.msra.mxu1 %v17903_v48  ;;  %v951_v47 = vrot.slane %v14730_v36, %v20557_v12 }
 0x134   : > { %3329 = vmatprep.subr.bf16.mxu0 %v17906_v49  ;;  %3372 = vmatprep.subr.bf16.mxu1 %v19878_v35 }
 0x137   : > { %3330 = vmatpush1.bf16.msra.mxu0 %v17904_v50  ;;  %3373 = vmatpush1.bf16.msra.mxu1 %v17907_v51  ;;  %v1618_v50 = vrot.slane %v14804_v37, %v20557_v12 }
 0x138   : > { %3331 = vmatprep.subr.bf16.mxu0 %v17910_v52  ;;  %3374 = vmatprep.subr.bf16.mxu1 %v19878_v35 }
 0x13b   : > { %3332 = vmatpush1.bf16.msra.mxu0 %v17908_v53  ;;  %3375 = vmatpush1.bf16.msra.mxu1 %v17911_v54 }
 0x13c   : > { %3333 = vmatprep.subr.bf16.mxu0 %v17914_v55  ;;  %3376 = vmatprep.subr.bf16.mxu1 %v19878_v35 }
 0x13f   : > { %3334 = vmatpush1.bf16.msra.mxu0 %v17912_v56  ;;  %3377 = vmatpush1.bf16.msra.mxu1 %v17915_v57 }
 0x140   : > { %3335 = vmatprep.subr.bf16.mxu0 %v17918_v58  ;;  %3378 = vmatprep.subr.bf16.mxu1 %v19878_v35 }
 0x143   : > { %3336 = vmatpush1.bf16.msra.mxu0 %v17916_v59  ;;  %3379 = vmatpush1.bf16.msra.mxu1 %v17919_v60 }
 0x144   : > { %3337 = vmatprep.subr.bf16.mxu0 %v17922_v61  ;;  %3380 = vmatprep.subr.bf16.mxu1 %v19878_v35 }
 0x147   : > { %3338 = vmatpush1.bf16.msra.mxu0 %v17920_v63  ;;  %3381 = vmatpush1.bf16.msra.mxu1 %v17923_v0 }
 0x148   : > { %3339 = vmatprep.subr.bf16.mxu0 %v17926_v1  ;;  %3382 = vmatprep.subr.bf16.mxu1 %v19878_v35 }
 0x14b   : > { %3340 = vmatpush1.bf16.msra.mxu0 %v17924_v2  ;;  %3383 = vmatpush1.bf16.msra.mxu1 %v17927_v3 }
 0x14c   : > { %3341 = vmatprep.subr.bf16.mxu0 %v17930_v4  ;;  %3384 = vmatprep.subr.bf16.mxu1 %v19878_v35 }
 0x14f   : > { %3342 = vmatpush1.bf16.msra.mxu0 %v17928_v5  ;;  %3385 = vmatpush1.bf16.msra.mxu1 %v17931_v6 }
 0x150   : > { %3612 = vmatprep.subr.bf16.mxu0 %v17934_v7  ;;  %3655 = vmatprep.subr.bf16.mxu1 %v19878_v35 }
 0x165   : > { %v911_v17 = vpop.f32.mrb[0].mxu0  ;;  %v1580_v18 = vpop.f32.mrb[0].mxu1 }
 0x166   : > { %v17660_v19 = vadd.f32 %v911_v17, %v425_v13  ;;  %v17664_v20 = vadd.f32 %v1580_v18, %v1055_v14  ;;  %v913_v21 = vpop.f32.mrb[1].mxu0  ;;  %v1582_v22 = vpop.f32.mrb[1].mxu1 }
 0x167   : > { %v17661_v23 = vadd.f32 %v913_v21, %v429_v15  ;;  %v17665_v24 = vadd.f32 %v1582_v22, %v1059_v16  ;;  %v915_v25 = vpop.f32.mrb[2].mxu0  ;;  %v1584_v26 = vpop.f32.mrb[2].mxu1 }
 0x168   : > { %19748 = vtanh.f32 %v17660_v19  ;;  %v17662_v27 = vadd.f32 %v915_v25, %v425_v13  ;;  %v917_v28 = vpop.f32.mrb[3].mxu0  ;;  %v1586_v29 = vpop.f32.mrb[3].mxu1  ;;  %v17666_v30 = vadd.f32 %v1584_v26, %v1055_v14 }
 0x169   : > { %19750 = vtanh.f32 %v17664_v20  ;;  %v17663_v32 = vadd.f32 %v917_v28, %v429_v15  ;;  %v17667_v34 = vadd.f32 %v1586_v29, %v1059_v16 }
 0x16a   : > { %19752 = vtanh.f32 %v17661_v23 }
 0x16b   : > { %19754 = vtanh.f32 %v17665_v24 }
 0x16c   : > { %19756 = vtanh.f32 %v17662_v27 }
 0x16d   : > { %19758 = vtanh.f32 %v17666_v30 }
 0x16e   : > { %19760 = vtanh.f32 %v17663_v32 }
 0x16f   : > { %19762 = vtanh.f32 %v17667_v34 }
 0x172   : > { %v19749_v42 = vpop.eup %19748 }
 0x173   : > { %v19751_v45 = vpop.eup %19750  ;;  %v937_v46 = vmul.f32 %v19749_v42, %v930_v38 }
 0x174   : > { %v19753_v48 = vpop.eup %19752  ;;  %v1605_v49 = vmul.f32 %v19751_v45, %v1598_v39 }
 0x175   : > { %v19755_v51 = vpop.eup %19754  ;;  %v954_v52 = vadd.f32 %v947_v40, %v937_v46  ;;  %v938_v53 = vmul.f32 %v19753_v48, %v934_v41  ;;  %v17932_v46 = vld [vmem:[%s25059_s3] ss:$12 sps:$4 sm:$0xff]  }
 0x176   : > { %v19757_v54 = vpop.eup %19756  ;;  %v1621_v55 = vadd.f32 %v1614_v43, %v1605_v49  ;;  %v1606_v56 = vmul.f32 %v19755_v51, %v1602_v44 }
 0x177   : > { %v19759_v57 = vpop.eup %19758  ;;  %v963_v58 = vrot.slane %v954_v52, 7  ;;  %v955_v59 = vadd.f32 %v951_v47, %v938_v53  ;;  %v939_v60 = vmul.f32 %v19757_v54, %v930_v38  ;;  %v17936_v53 = vld [vmem:[%s25059_s3 + $0x18] ss:$12 sps:$4 sm:$0xff]   ;;  %v17939_v54 = vld [vmem:[%s25059_s3 + $0x20] ss:$12 sps:$4 sm:$0xff]  }
 0x178   : > { %v19761_v61 = vpop.eup %19760  ;;  %v1630_v63 = vrot.slane %v1621_v55, 2  ;;  %v1622_v0 = vadd.f32 %v1618_v50, %v1606_v56  ;;  %v1607_v1 = vmul.f32 %v19759_v57, %v1598_v39  ;;  %v17942_v56 = vld [vmem:[%s25059_s3 + $0x34] ss:$12 sps:$4 sm:$0xff]   ;;  %v17940_v57 = vld [vmem:[%s25059_s3 + $0x30] ss:$12 sps:$4 sm:$0xff]  }
 0x179   : > { %v19763_v2 = vpop.eup %19762  ;;  %973 = vst [vmem:[#allocation2] sm:$0xfe] %v963_v58  ;;  %v964_v3 = vrot.slane %v955_v59, 7  ;;  %v956_v4 = vadd.f32 %v947_v40, %v939_v60  ;;  %v940_v5 = vmul.f32 %v19761_v61, %v934_v41  ;;  %v17946_v59 = vld [vmem:[%s25059_s3 + $0x4c] ss:$12 sps:$4 sm:$0xff]  }
 0x17a   : > { %1642 = vst [vmem:[#allocation2 + $0x10] sm:$0xc0] %v1630_v63  ;;  %v1631_v6 = vrot.slane %v1622_v0, 2  ;;  %v1623_v7 = vadd.f32 %v1614_v43, %v1607_v1  ;;  %v1608_v9 = vmul.f32 %v19763_v2, %v1602_v44  ;;  %v17944_v60 = vld [vmem:[%s25059_s3 + $0x48] ss:$12 sps:$4 sm:$0xff]  }
 0x17b   : > { %975 = vst.msk [vmem:[#allocation2 + $0x8] sm:$0xfe] %vm974_vm4, %v964_v3  ;;  %v965_v10 = vrot.slane %v956_v4, 7  ;;  %v957_v13 = vadd.f32 %v951_v47, %v940_v5  ;;  %v17935_v47 = vld [vmem:[%s25059_s3 + $0x8] ss:$12 sps:$4 sm:$0xff]   ;;  %vm10268_vm4 = vcmask 1024  }
 0x17c   : > { %1644 = vst.msk [vmem:[#allocation2 + $0x18] sm:$0xc0] %vm1643_vm5, %v1631_v6  ;;  %v1632_v14 = vrot.slane %v1623_v7, 2  ;;  %v1624_v15 = vadd.f32 %v1618_v50, %v1608_v9  ;;  %v17938_v50 = vld [vmem:[%s25059_s3 + $0x1c] ss:$12 sps:$4 sm:$0xff]  }
 0x17d   : > { %v966_v16 = vsel %vm962_vm6, %v963_v58, %v965_v10  ;;  %v967_v17 = vrot.slane %v957_v13, 7  ;;  %v17943_v58 = vld [vmem:[%s25059_s3 + $0x38] ss:$12 sps:$4 sm:$0xff]   ;;  %v17947_v61 = vld [vmem:[%s25059_s3 + $0x50] ss:$12 sps:$4 sm:$0xff]  }
 0x17e   : > { %976 = vst [vmem:[#allocation2 + $0x10] sm:$0xf] %v966_v16  ;;  %v1633_v18 = vsel %vm1629_vm7, %v1630_v63, %v1632_v14  ;;  %1647 = vst [vmem:[#allocation2 + $0x30] sm:$0x1] %v1632_v14  ;;  %v1634_v19 = vrot.slane %v1624_v15, 2 }
 0x17f   : > { %1645 = vst [vmem:[#allocation2 + $0x20] sm:$0xff] %v1633_v18  ;;  %v968_v20 = vsel %vm962_vm6, %v964_v3, %v967_v17  ;;  %v17950_v63 = vld [vmem:[%s25059_s3 + $0x64] ss:$12 sps:$4 sm:$0xff]   ;;  %v17948_v0 = vld [vmem:[%s25059_s3 + $0x60] ss:$12 sps:$4 sm:$0xff]  }
 0x180   : > { %977 = vst.msk [vmem:[#allocation2 + $0x18] sm:$0xf] %vm346_vm3, %v968_v20  ;;  %v1635_v21 = vsel %vm1629_vm7, %v1631_v6, %v1634_v19  ;;  %v17951_v1 = vld [vmem:[%s25059_s3 + $0x68] ss:$12 sps:$4 sm:$0xff]   ;;  %v17952_v3 = vld [vmem:[%s25059_s3 + $0x78] ss:$12 sps:$4 sm:$0xff]  }
 0x181   : > { %1649 = vst.msk [vmem:[#allocation2 + $0x38] sm:$0x1] %vm1648_vm8, %v1634_v19  ;;  %v3015_v22 = vld [vmem:[#allocation2 + $0x10] sm:$0xe0]  ;;  %v17954_v2 = vld [vmem:[%s25059_s3 + $0x7c] ss:$12 sps:$4 sm:$0xff]  }
 0x182   : > { %1646 = vst.msk [vmem:[#allocation2 + $0x28] sm:$0xff] %vm333_vm2, %v1635_v21  ;;  %v3021_v23 = vpack.c.bf16 %v1633_v18, %v3015_v22  ;;  %v2958_v48 = vld [vmem:[#allocation2 + $0x8] sm:$0xff]  ;;  %v17958_v5 = vld [vmem:[%s25059_s3 + $0x94] ss:$12 sps:$4 sm:$0xff]   ;;  %v17956_v6 = vld [vmem:[%s25059_s3 + $0x90] ss:$12 sps:$4 sm:$0xff]  }
 0x183   : > { %v3016_v29 = vld [vmem:[#allocation2 + $0x18] sm:$0xe0]  ;;  %v17955_v4 = vld [vmem:[%s25059_s3 + $0x80] ss:$12 sps:$4 sm:$0xff]   ;;  %v17959_v7 = vld [vmem:[%s25059_s3 + $0x98] ss:$12 sps:$4 sm:$0xff]  }
 0x184   : > { %v3080_v26 = vshrl.u32 %v3021_v23, 16  ;;  %v3083_v27 = vshll.u32 %v3021_v23, 16  ;;  %v17962_v9 = vld [vmem:[%s25059_s3 + $0xac] ss:$12 sps:$4 sm:$0xff]   ;;  %v17960_v10 = vld [vmem:[%s25059_s3 + $0xa8] ss:$12 sps:$4 sm:$0xff]  }
 0x185   : > { %v3019_v24 = vld [vmem:[#allocation2 + $0x30] sm:$0x1]  ;;  %v17964_v15 = vld [vmem:[%s25059_s3 + $0xc0] ss:$12 sps:$4 sm:$0xff]   ;;  %v17967_v16 = vld [vmem:[%s25059_s3 + $0xc8] ss:$12 sps:$4 sm:$0xff]  }
 0x186   : > { %v3023_v25 = vpack.c.bf16 %v3019_v24, %v3019_v24  ;;  %v3082_v33 = vrot.slane %v3080_v26, 2  ;;  %v3085_v34 = vrot.slane %v3083_v27, 3  ;;  %v17963_v13 = vld [vmem:[%s25059_s3 + $0xb0] ss:$12 sps:$4 sm:$0xff]   ;;  %v17968_v18 = vld [vmem:[%s25059_s3 + $0xd8] ss:$12 sps:$4 sm:$0xff]  }
 0x187   : > { %v2960_v49 = vld [vmem:[#allocation2 + $0x18] sm:$0xf]  ;;  %v17966_v14 = vld [vmem:[%s25059_s3 + $0xc4] ss:$12 sps:$4 sm:$0xff]   ;;  %v17970_v17 = vld [vmem:[%s25059_s3 + $0xdc] ss:$12 sps:$4 sm:$0xff]  }
 0x188   : > { %v3020_v28 = vld [vmem:[#allocation2 + $0x38] sm:$0x1]  ;;  %v3088_v36 = vshll.u32 %v3023_v25, 16  ;;  %v3086_v42 = vor.u32 %v3085_v34, %v3082_v33  ;;  %v2962_v55 = vpack.c.bf16 %v2960_v49, %v2958_v48  ;;  %v17971_v19 = vld [vmem:[%s25059_s3 + $0xe0] ss:$12 sps:$4 sm:$0xff]  }
 0x189   : > { %v3018_v30 = vld [vmem:[#allocation2 + $0x28] sm:$0xff]  ;;  %v3024_v31 = vpack.c.bf16 %v3020_v28, %v3020_v28  ;;  %v17974_v20 = vld [vmem:[%s25059_s3 + $0xf4] ss:$12 sps:$4 sm:$0xff]   ;;  %v17972_v21 = vld [vmem:[%s25059_s3 + $0xf0] ss:$12 sps:$4 sm:$0xff]  }
 0x18a   : > { %v3022_v32 = vpack.c.bf16 %v3018_v30, %v3016_v29  ;;  %v3090_v43 = vrot.slane %v3088_v36, 3  ;;  %v17975_v22 = vld [vmem:[%s25059_s3 + $0xf8] ss:$12 sps:$4 sm:$0xff]   ;;  %v17976_v24 = vld [vmem:[%s25059_s3 + $0x108] ss:$12 sps:$4 sm:$0xff]  }
 0x18b   : > { %v3101_v39 = vshll.u32 %v3024_v31, 16  ;;  %v17978_v23 = vld [vmem:[%s25059_s3 + $0x10c] ss:$12 sps:$4 sm:$0xff]   ;;  %v17979_v25 = vld [vmem:[%s25059_s3 + $0x110] ss:$12 sps:$4 sm:$0xff]   ;;  %v2957_v30 = vld [vmem:[#allocation2] sm:$0xff] }
 0x18c   : > { %v3093_v37 = vshrl.u32 %v3022_v32, 16  ;;  %v3096_v38 = vshll.u32 %v3022_v32, 16  ;;  %v3091_v52 = vsel %vm3078_vm9, %v3086_v42, %v3090_v43  ;;  %v17982_v26 = vld [vmem:[%s25059_s3 + $0x124] ss:$12 sps:$4 sm:$0xff]   ;;  %v17980_v27 = vld [vmem:[%s25059_s3 + $0x120] ss:$12 sps:$4 sm:$0xff]  }
 0x18d   : > { %v3103_v45 = vrot.slane %v3101_v39, 3  ;;  %v17983_v28 = vld [vmem:[%s25059_s3 + $0x128] ss:$12 sps:$4 sm:$0xff]   ;;  %v2959_v31 = vld [vmem:[#allocation2 + $0x10] sm:$0xf] }
 0x18e   : > { %v3095_v40 = vrot.slane %v3093_v37, 2  ;;  %v3098_v41 = vrot.slane %v3096_v38, 3  ;;  %v17986_v29 = vld [vmem:[%s25059_s3 + $0x274] ss:$12 sps:$4 sm:$0xff]   ;;  %v17984_v32 = vld [vmem:[%s25059_s3 + $0x270] ss:$12 sps:$4 sm:$0xff]   ;;  %v2961_v34 = vpack.c.bf16 %v2959_v31, %v2957_v30 }
 0x18f   : > { %v17987_v33 = vld [vmem:[%s25059_s3 + $0x278] ss:$12 sps:$4 sm:$0xff]   ;;  %v17988_v37 = vld [vmem:[%s25059_s3 + $0x288] ss:$12 sps:$4 sm:$0xff]   ;;  %v17991_v38 = vld [vmem:[%s25059_s3 + $0x290] ss:$12 sps:$4 sm:$0xff]  }
 0x190   : > { %v3099_v44 = vor.u32 %v3098_v41, %v3095_v40  ;;  %v17990_v36 = vld [vmem:[%s25059_s3 + $0x28c] ss:$12 sps:$4 sm:$0xff]   ;;  %v17994_v39 = vld [vmem:[%s25059_s3 + $0x2a4] ss:$12 sps:$4 sm:$0xff]   ;;  %v17995_v41 = vld [vmem:[%s25059_s3 + $0x2a8] ss:$12 sps:$4 sm:$0xff]  }
 0x191   : > { %v17992_v40 = vld [vmem:[%s25059_s3 + $0x2a0] ss:$12 sps:$4 sm:$0xff]   ;;  %v17998_v42 = vld [vmem:[%s25059_s3 + $0x2bc] ss:$12 sps:$4 sm:$0xff]   ;;  %v17996_v43 = vld [vmem:[%s25059_s3 + $0x2b8] ss:$12 sps:$4 sm:$0xff]  }
 0x192   : > { %v3104_v51 = vsel %vm3078_vm9, %v3099_v44, %v3103_v45  ;;  %v17999_v44 = vld [vmem:[%s25059_s3 + $0x2c0] ss:$12 sps:$4 sm:$0xff]   ;;  %v18004_v49 = vld [vmem:[%s25059_s3 + $0x2e8] ss:$12 sps:$4 sm:$0xff]  }
 0x193   : > { %15049 = vmatprep.mubr.msk.bf16.mxu0 %vm333_vm2, %v3104_v51  ;;  %15050 = vmatprep.mubr.msk.bf16.mxu1 %vm333_vm2, %v3104_v51  ;;  %v18002_v45 = vld [vmem:[%s25059_s3 + $0x2d4] ss:$12 sps:$4 sm:$0xff]   ;;  %v18006_v48 = vld [vmem:[%s25059_s3 + $0x2ec] ss:$12 sps:$4 sm:$0xff]   ;;  %v18010_v51 = vld [vmem:[%s25059_s3 + $0x304] ss:$12 sps:$4 sm:$0xff]  }
 0x194   : > { %3350 = vmatmul.mubr.bf16.vlgmr.msra.gmra.mrb[8].mxu0 %v3091_v52  ;;  %3393 = vmatmul.mubr.bf16.vlgmr.msra.gmra.mrb[8].mxu1 %v3091_v52  ;;  %v18008_v52 = vld [vmem:[%s25059_s3 + $0x300] ss:$12 sps:$4 sm:$0xff]  }
 0x195   : > { %3613 = vmatpush1.bf16.msra.mxu0 %v17932_v46  ;;  %3656 = vmatpush1.bf16.msra.mxu1 %v17935_v47  ;;  %v18000_v46 = vld [vmem:[%s25059_s3 + $0x2d0] ss:$12 sps:$4 sm:$0xff]   ;;  %v18003_v47 = vld [vmem:[%s25059_s3 + $0x2d8] ss:$12 sps:$4 sm:$0xff]  }
 0x196   : > { %15090 = vmatprep.mubr.msk.bf16.mxu0 %vm333_vm2, %v2962_v55  ;;  %15091 = vmatprep.mubr.msk.bf16.mxu1 %vm333_vm2, %v2962_v55  ;;  %v18012_v55 = vld [vmem:[%s25059_s3 + $0x318] ss:$12 sps:$4 sm:$0xff]  }
 0x197   : > { %3614 = vmatprep.subr.bf16.mxu0 %v17938_v50  ;;  %3657 = vmatprep.subr.bf16.mxu1 %v19878_v35  ;;  %v18007_v50 = vld [vmem:[%s25059_s3 + $0x2f0] ss:$12 sps:$4 sm:$0xff]  }
 0x199   : > { %3615 = vmatpush1.bf16.msra.mxu0 %v17936_v53  ;;  %3658 = vmatpush1.bf16.msra.mxu1 %v17939_v54  ;;  %v18011_v53 = vld [vmem:[%s25059_s3 + $0x308] ss:$12 sps:$4 sm:$0xff]  }
 0x19a   : > { %3616 = vmatprep.subr.bf16.mxu0 %v17942_v56  ;;  %3659 = vmatprep.subr.bf16.mxu1 %v19878_v35  ;;  %v18014_v54 = vld [vmem:[%s25059_s3 + $0x31c] ss:$12 sps:$4 sm:$0xff]   ;;  %v18015_v56 = vld [vmem:[%s25059_s3 + $0x320] ss:$12 sps:$4 sm:$0xff]  }
 0x19d   : > { %3617 = vmatpush1.bf16.msra.mxu0 %v17940_v57  ;;  %3660 = vmatpush1.bf16.msra.mxu1 %v17943_v58  ;;  %v18018_v57 = vld [vmem:[%s25059_s3 + $0x334] ss:$12 sps:$4 sm:$0xff]   ;;  %v18016_v58 = vld [vmem:[%s25059_s3 + $0x330] ss:$12 sps:$4 sm:$0xff]  }
 0x19e   : > { %3618 = vmatprep.subr.bf16.mxu0 %v17946_v59  ;;  %3661 = vmatprep.subr.bf16.mxu1 %v19878_v35  ;;  %v18019_v59 = vld [vmem:[%s25059_s3 + $0x338] ss:$12 sps:$4 sm:$0xff]  }
 0x1a1   : > { %3619 = vmatpush1.bf16.msra.mxu0 %v17944_v60  ;;  %3662 = vmatpush1.bf16.msra.mxu1 %v17947_v61  ;;  %v18022_v60 = vld [vmem:[%s25059_s3 + $0x34c] ss:$12 sps:$4 sm:$0xff]   ;;  %v18020_v61 = vld [vmem:[%s25059_s3 + $0x348] ss:$12 sps:$4 sm:$0xff]  }
 0x1a2   : > { %3620 = vmatprep.subr.bf16.mxu0 %v17950_v63  ;;  %3663 = vmatprep.subr.bf16.mxu1 %v19878_v35  ;;  %v18023_v63 = vld [vmem:[%s25059_s3 + $0x350] ss:$12 sps:$4 sm:$0xff]  }
 0x1a5   : > { %3621 = vmatpush1.bf16.msra.mxu0 %v17948_v0  ;;  %3664 = vmatpush1.bf16.msra.mxu1 %v17951_v1  ;;  %v18026_v0 = vld [vmem:[%s25059_s3 + $0x364] ss:$12 sps:$4 sm:$0xff]  }
 0x1a6   : > { %3622 = vmatprep.subr.bf16.mxu0 %v17954_v2  ;;  %3665 = vmatprep.subr.bf16.mxu1 %v19878_v35  ;;  %v1725_v1 = vld [vmem:[%s25058_s2] ss:$4 sm:$0x3] }
 0x1a7   : > { %v2382_v2 = vld [vmem:[%s25058_s2] ss:$4 sm:$0x3] }
 0x1a9   : > { %3623 = vmatpush1.bf16.msra.mxu0 %v17952_v3  ;;  %3666 = vmatpush1.bf16.msra.mxu1 %v17955_v4  ;;  %v18024_v3 = vld [vmem:[%s25059_s3 + $0x360] ss:$12 sps:$4 sm:$0xff]   ;;  %v18027_v4 = vld [vmem:[%s25059_s3 + $0x368] ss:$12 sps:$4 sm:$0xff]  }
 0x1aa   : > { %3624 = vmatprep.subr.bf16.mxu0 %v17958_v5  ;;  %3667 = vmatprep.subr.bf16.mxu1 %v19878_v35  ;;  %v18030_v5 = vld [vmem:[%s25059_s3 + $0x37c] ss:$12 sps:$4 sm:$0xff]  }
 0x1ad   : > { %3625 = vmatpush1.bf16.msra.mxu0 %v17956_v6  ;;  %3668 = vmatpush1.bf16.msra.mxu1 %v17959_v7  ;;  %v1730_v6 = vrot.slane %v1725_v1, %v20554_v11  ;;  %v2387_v7 = vrot.slane %v2382_v2, %v20554_v11 }
 0x1ae   : > { %3626 = vmatprep.subr.bf16.mxu0 %v17962_v9  ;;  %3669 = vmatprep.subr.bf16.mxu1 %v19878_v35  ;;  %v18028_v9 = vld [vmem:[%s25059_s3 + $0x378] ss:$12 sps:$4 sm:$0xff]  }
 0x1b1   : > { %3627 = vmatpush1.bf16.msra.mxu0 %v17960_v10  ;;  %3670 = vmatpush1.bf16.msra.mxu1 %v17963_v13  ;;  %v1734_v10 = vrot.slane %v1725_v1, %v20557_v12  ;;  %v2391_v13 = vrot.slane %v2382_v2, %v20557_v12 }
 0x1b2   : > { %3628 = vmatprep.subr.bf16.mxu0 %v17966_v14  ;;  %3671 = vmatprep.subr.bf16.mxu1 %v19878_v35  ;;  %v18031_v14 = vld [vmem:[%s25059_s3 + $0x380] ss:$12 sps:$4 sm:$0xff]  }
 0x1b5   : > { %3629 = vmatpush1.bf16.msra.mxu0 %v17964_v15  ;;  %3672 = vmatpush1.bf16.msra.mxu1 %v17967_v16  ;;  %v18034_v15 = vld [vmem:[%s25059_s3 + $0x394] ss:$12 sps:$4 sm:$0xff]  }
 0x1b6   : > { %3630 = vmatprep.subr.bf16.mxu0 %v17970_v17  ;;  %3673 = vmatprep.subr.bf16.mxu1 %v19878_v35 }
 0x1b9   : > { %3631 = vmatpush1.bf16.msra.mxu0 %v17968_v18  ;;  %3674 = vmatpush1.bf16.msra.mxu1 %v17971_v19 }
 0x1ba   : > { %3632 = vmatprep.subr.bf16.mxu0 %v17974_v20  ;;  %3675 = vmatprep.subr.bf16.mxu1 %v19878_v35 }
 0x1bd   : > { %3633 = vmatpush1.bf16.msra.mxu0 %v17972_v21  ;;  %3676 = vmatpush1.bf16.msra.mxu1 %v17975_v22  ;;  %v18032_v22 = vld [vmem:[%s25059_s3 + $0x390] ss:$12 sps:$4 sm:$0xff]  }
 0x1be   : > { %3634 = vmatprep.subr.bf16.mxu0 %v17978_v23  ;;  %3677 = vmatprep.subr.bf16.mxu1 %v19878_v35 }
 0x1c1   : > { %3635 = vmatpush1.bf16.msra.mxu0 %v17976_v24  ;;  %3678 = vmatpush1.bf16.msra.mxu1 %v17979_v25 }
 0x1c2   : > { %3636 = vmatprep.subr.bf16.mxu0 %v17982_v26  ;;  %3679 = vmatprep.subr.bf16.mxu1 %v19878_v35 }
 0x1c5   : > { %3637 = vmatpush1.bf16.msra.mxu0 %v17980_v27  ;;  %3680 = vmatpush1.bf16.msra.mxu1 %v17983_v28  ;;  %v18035_v27 = vld [vmem:[%s25059_s3 + $0x398] ss:$12 sps:$4 sm:$0xff]  }
 0x1c6   : > { %3971 = vmatprep.subr.bf16.mxu0 %v17986_v29  ;;  %4014 = vmatprep.subr.bf16.mxu1 %v19878_v35  ;;  %v18038_v28 = vld [vmem:[%s25059_s3 + $0x3ac] ss:$12 sps:$4 sm:$0xff]  }
 0x1c8   : > { %3645 = vmatmul.mubr.bf16.vlgmr.msra.gmra.mrb[8].mxu0 %v2961_v34  ;;  %3688 = vmatmul.mubr.bf16.vlgmr.msra.gmra.mrb[12].mxu1 %v2961_v34 }
 0x1c9   : > { %3972 = vmatpush1.bf16.msra.mxu0 %v17984_v32  ;;  %4015 = vmatpush1.bf16.msra.mxu1 %v17987_v33  ;;  %v14882_v33 = vld [vmem:[%s25058_s2 + $0x1] ss:$4 sm:$0x3] }
 0x1ca   : > { %3973 = vmatprep.subr.bf16.mxu0 %v17990_v36  ;;  %4016 = vmatprep.subr.bf16.mxu1 %v19878_v35  ;;  %v14956_v36 = vld [vmem:[%s25058_s2 + $0x1] ss:$4 sm:$0x3] }
 0x1cd   : > { %3974 = vmatpush1.bf16.msra.mxu0 %v17988_v37  ;;  %4017 = vmatpush1.bf16.msra.mxu1 %v17991_v38  ;;  %v14883_v38 = vld [vmem:[%s25058_s2 + $0x2] ss:$4 sm:$0x3] }
 0x1ce   : > { %3975 = vmatprep.subr.bf16.mxu0 %v17994_v39  ;;  %4018 = vmatprep.subr.bf16.mxu1 %v19878_v35  ;;  %v2262_v39 = vrot.slane %v14882_v33, %v20554_v11 }
 0x1d1   : > { %3976 = vmatpush1.bf16.msra.mxu0 %v17992_v40  ;;  %4019 = vmatpush1.bf16.msra.mxu1 %v17995_v41  ;;  %v14957_v40 = vld [vmem:[%s25058_s2 + $0x2] ss:$4 sm:$0x3]  ;;  %v2925_v41 = vrot.slane %v14956_v36, %v20554_v11 }
 0x1d2   : > { %3977 = vmatprep.subr.bf16.mxu0 %v17998_v42  ;;  %4020 = vmatprep.subr.bf16.mxu1 %v19878_v35  ;;  %v2278_v42 = vrot.slane %v14883_v38, %v20554_v11 }
 0x1d5   : > { %3978 = vmatpush1.bf16.msra.mxu0 %v17996_v43  ;;  %4021 = vmatpush1.bf16.msra.mxu1 %v17999_v44  ;;  %v2266_v43 = vrot.slane %v14882_v33, %v20557_v12 }
 0x1d6   : > { %3979 = vmatprep.subr.bf16.mxu0 %v18002_v45  ;;  %4022 = vmatprep.subr.bf16.mxu1 %v19878_v35  ;;  %v2941_v45 = vrot.slane %v14957_v40, %v20554_v11 }
 0x1d9   : > { %3980 = vmatpush1.bf16.msra.mxu0 %v18000_v46  ;;  %4023 = vmatpush1.bf16.msra.mxu1 %v18003_v47  ;;  %v2929_v46 = vrot.slane %v14956_v36, %v20557_v12 }
 0x1da   : > { %3981 = vmatprep.subr.bf16.mxu0 %v18006_v48  ;;  %4024 = vmatprep.subr.bf16.mxu1 %v19878_v35 }
 0x1dd   : > { %3982 = vmatpush1.bf16.msra.mxu0 %v18004_v49  ;;  %4025 = vmatpush1.bf16.msra.mxu1 %v18007_v50  ;;  %v2282_v49 = vrot.slane %v14883_v38, %v20557_v12  ;;  %v18039_v38 = vld [vmem:[%s25059_s3 + $0x3b0] ss:$12 sps:$4 sm:$0xff]  }
 0x1de   : > { %3983 = vmatprep.subr.bf16.mxu0 %v18010_v51  ;;  %4026 = vmatprep.subr.bf16.mxu1 %v19878_v35 }
 0x1e1   : > { %3984 = vmatpush1.bf16.msra.mxu0 %v18008_v52  ;;  %4027 = vmatpush1.bf16.msra.mxu1 %v18011_v53  ;;  %v2945_v52 = vrot.slane %v14957_v40, %v20557_v12 }
 0x1e2   : > { %3985 = vmatprep.subr.bf16.mxu0 %v18014_v54  ;;  %4028 = vmatprep.subr.bf16.mxu1 %v19878_v35 }
 0x1e5   : > { %3986 = vmatpush1.bf16.msra.mxu0 %v18012_v55  ;;  %4029 = vmatpush1.bf16.msra.mxu1 %v18015_v56 }
 0x1e6   : > { %3987 = vmatprep.subr.bf16.mxu0 %v18018_v57  ;;  %4030 = vmatprep.subr.bf16.mxu1 %v19878_v35 }
 0x1e9   : > { %3988 = vmatpush1.bf16.msra.mxu0 %v18016_v58  ;;  %4031 = vmatpush1.bf16.msra.mxu1 %v18019_v59 }
 0x1ea   : > { %3989 = vmatprep.subr.bf16.mxu0 %v18022_v60  ;;  %4032 = vmatprep.subr.bf16.mxu1 %v19878_v35 }
 0x1ed   : > { %3990 = vmatpush1.bf16.msra.mxu0 %v18020_v61  ;;  %4033 = vmatpush1.bf16.msra.mxu1 %v18023_v63 }
 0x1ee   : > { %3991 = vmatprep.subr.bf16.mxu0 %v18026_v0  ;;  %4034 = vmatprep.subr.bf16.mxu1 %v19878_v35 }
 0x1f1   : > { %3992 = vmatpush1.bf16.msra.mxu0 %v18024_v3  ;;  %4035 = vmatpush1.bf16.msra.mxu1 %v18027_v4  ;;  %v2244_v16 = vpop.f32.mrb[4].mxu0  ;;  %v2907_v17 = vpop.f32.mrb[4].mxu1 }
 0x1f2   : > { %3993 = vmatprep.subr.bf16.mxu0 %v18030_v5  ;;  %4036 = vmatprep.subr.bf16.mxu1 %v19878_v35  ;;  %v17668_v18 = vadd.f32 %v2244_v16, %v1730_v6  ;;  %v17672_v19 = vadd.f32 %v2907_v17, %v2387_v7  ;;  %v2246_v20 = vpop.f32.mrb[5].mxu0  ;;  %v2909_v21 = vpop.f32.mrb[5].mxu1 }
 0x1f3   : > { %v17669_v23 = vadd.f32 %v2246_v20, %v1734_v10  ;;  %v17673_v24 = vadd.f32 %v2909_v21, %v2391_v13  ;;  %v2248_v25 = vpop.f32.mrb[6].mxu0  ;;  %v2911_v26 = vpop.f32.mrb[6].mxu1 }
 0x1f4   : > { %19764 = vtanh.f32 %v17668_v18  ;;  %v17670_v29 = vadd.f32 %v2248_v25, %v1730_v6  ;;  %v2250_v30 = vpop.f32.mrb[7].mxu0  ;;  %v2913_v31 = vpop.f32.mrb[7].mxu1  ;;  %v17674_v32 = vadd.f32 %v2911_v26, %v2387_v7  ;;  %v4062_v18 = vld [vmem:[#allocation2 + $0x48] sm:$0x80] }
 0x1f5   : > { %3994 = vmatpush1.bf16.msra.mxu0 %v18028_v9  ;;  %4037 = vmatpush1.bf16.msra.mxu1 %v18031_v14  ;;  %19766 = vtanh.f32 %v17672_v19  ;;  %v17671_v34 = vadd.f32 %v2250_v30, %v1734_v10  ;;  %v17675_v37 = vadd.f32 %v2913_v31, %v2391_v13 }
 0x1f6   : > { %3995 = vmatprep.subr.bf16.mxu0 %v18034_v15  ;;  %4038 = vmatprep.subr.bf16.mxu1 %v19878_v35  ;;  %19768 = vtanh.f32 %v17669_v23 }
 0x1f7   : > { %19770 = vtanh.f32 %v17673_v24 }
 0x1f8   : > { %19772 = vtanh.f32 %v17670_v29 }
 0x1f9   : > { %3996 = vmatpush1.bf16.msra.mxu0 %v18032_v22  ;;  %4039 = vmatpush1.bf16.msra.mxu1 %v18035_v27  ;;  %19774 = vtanh.f32 %v17674_v32 }
 0x1fa   : > { %4371 = vmatprep.subr.bf16.mxu0 %v18038_v28  ;;  %4414 = vmatprep.subr.bf16.mxu1 %v19878_v35  ;;  %19776 = vtanh.f32 %v17671_v34 }
 0x1fb   : > { %19778 = vtanh.f32 %v17675_v37  ;;  %v18036_v37 = vld [vmem:[%s25059_s3 + $0x3a8] ss:$12 sps:$4 sm:$0xff]  }
 0x1fe   : > { %v19765_v44 = vpop.eup %19764 }
 0x1ff   : > { %v19767_v47 = vpop.eup %19766  ;;  %v2269_v48 = vmul.f32 %v19765_v44, %v2262_v39  ;;  %v18043_v44 = vld [vmem:[%s25059_s3 + $0x3c8] ss:$12 sps:$4 sm:$0xff]  }
 0x200   : > { %v19769_v50 = vpop.eup %19768  ;;  %v2932_v51 = vmul.f32 %v19767_v47, %v2925_v41 }
 0x201   : > { %v19771_v53 = vpop.eup %19770  ;;  %v2285_v54 = vadd.f32 %v2278_v42, %v2269_v48  ;;  %v2270_v55 = vmul.f32 %v19769_v50, %v2266_v43  ;;  %v18046_v48 = vld [vmem:[%s25059_s3 + $0x3dc] ss:$12 sps:$4 sm:$0xff]   ;;  %v18047_v50 = vld [vmem:[%s25059_s3 + $0x3e0] ss:$12 sps:$4 sm:$0xff]  }
 0x202   : > { %v19773_v56 = vpop.eup %19772  ;;  %v20881_v57 = vadd.f32 %v2941_v45, %v2932_v51  ;;  %v2933_v58 = vmul.f32 %v19771_v53, %v2929_v46  ;;  %v18050_v51 = vld [vmem:[%s25059_s3 + $0x3f4] ss:$12 sps:$4 sm:$0xff]   ;;  %v18051_v53 = vld [vmem:[%s25059_s3 + $0x3f8] ss:$12 sps:$4 sm:$0xff]  }
 0x203   : > { %v19775_v59 = vpop.eup %19774  ;;  %v2294_v60 = vrot.slane %v2285_v54, 5  ;;  %v2286_v61 = vadd.f32 %v2282_v49, %v2270_v55  ;;  %v2271_v63 = vmul.f32 %v19773_v56, %v2262_v39  ;;  %v18054_v54 = vld [vmem:[%s25059_s3 + $0x40c] ss:$12 sps:$4 sm:$0xff]   ;;  %v18052_v55 = vld [vmem:[%s25059_s3 + $0x408] ss:$12 sps:$4 sm:$0xff]  }
 0x204   : > { %v19777_v0 = vpop.eup %19776  ;;  %2952 = vst [vmem:[#allocation2 + $0x50] sm:$0xff] %v20881_v57  ;;  %v2949_v1 = vadd.f32 %v2945_v52, %v2933_v58  ;;  %v2934_v2 = vmul.f32 %v19775_v59, %v2925_v41  ;;  %v18055_v56 = vld [vmem:[%s25059_s3 + $0x410] ss:$12 sps:$4 sm:$0xff]   ;;  %v18056_v59 = vld [vmem:[%s25059_s3 + $0x420] ss:$12 sps:$4 sm:$0xff]  }
 0x205   : > { %v19779_v3 = vpop.eup %19778  ;;  %2304 = vst [vmem:[#allocation2 + $0x30] sm:$0xf8] %v2294_v60  ;;  %v2295_v4 = vrot.slane %v2286_v61, 5  ;;  %v2287_v5 = vadd.f32 %v2278_v42, %v2271_v63  ;;  %v2272_v6 = vmul.f32 %v19777_v0, %v2266_v43  ;;  %v18042_v42 = vld [vmem:[%s25059_s3 + $0x3c4] ss:$12 sps:$4 sm:$0xff]  }
 0x206   : > { %2953 = vst.msk [vmem:[#allocation2 + $0x58] sm:$0xff] %vm333_vm2, %v2949_v1  ;;  %v2950_v7 = vadd.f32 %v2941_v45, %v2934_v2  ;;  %v2935_v9 = vmul.f32 %v19779_v3, %v2929_v46  ;;  %v18040_v43 = vld [vmem:[%s25059_s3 + $0x3c0] ss:$12 sps:$4 sm:$0xff]   ;;  %v18058_v58 = vld [vmem:[%s25059_s3 + $0x424] ss:$12 sps:$4 sm:$0xff]  }
 0x207   : > { %2306 = vst.msk [vmem:[#allocation2 + $0x38] sm:$0xf8] %vm2305_vm10, %v2295_v4  ;;  %v2296_v10 = vrot.slane %v2287_v5, 5  ;;  %v2288_v13 = vadd.f32 %v2282_v49, %v2272_v6  ;;  %v18044_v49 = vld [vmem:[%s25059_s3 + $0x3d8] ss:$12 sps:$4 sm:$0xff]  }
 0x208   : > { %2954 = vst [vmem:[#allocation2 + $0x60] sm:$0x7] %v2950_v7  ;;  %v2951_v14 = vadd.f32 %v2945_v52, %v2935_v9  ;;  %v18048_v52 = vld [vmem:[%s25059_s3 + $0x3f0] ss:$12 sps:$4 sm:$0xff]   ;;  %v18060_v63 = vld [vmem:[%s25059_s3 + $0x438] ss:$12 sps:$4 sm:$0xff]  }
 0x209   : > { %v2297_v15 = vsel %vm2293_vm11, %v2294_v60, %v2296_v10  ;;  %v2298_v16 = vrot.slane %v2288_v13, 5  ;;  %v18059_v60 = vld [vmem:[%s25059_s3 + $0x428] ss:$12 sps:$4 sm:$0xff]   ;;  %v18063_v0 = vld [vmem:[%s25059_s3 + $0x440] ss:$12 sps:$4 sm:$0xff]  }
 0x20a   : > { %2307 = vst [vmem:[#allocation2 + $0x40] sm:$0x3f] %v2297_v15  ;;  %2956 = vst.msk [vmem:[#allocation2 + $0x68] sm:$0x7] %vm2955_vm12, %v2951_v14  ;;  %v18062_v61 = vld [vmem:[%s25059_s3 + $0x43c] ss:$12 sps:$4 sm:$0xff]  }
 0x20b   : > { %v2299_v17 = vsel %vm2293_vm11, %v2295_v4, %v2298_v16  ;;  %v18066_v1 = vld [vmem:[%s25059_s3 + $0x454] ss:$12 sps:$4 sm:$0xff]   ;;  %v18064_v2 = vld [vmem:[%s25059_s3 + $0x450] ss:$12 sps:$4 sm:$0xff]   ;;  %v18067_v3 = vld [vmem:[%s25059_s3 + $0x458] ss:$12 sps:$4 sm:$0xff]  }
 0x20c   : > { %2309 = vst.msk [vmem:[#allocation2 + $0x48] sm:$0x3f] %vm2308_vm13, %v2299_v17  ;;  %v3696_v25 = vld [vmem:[#allocation2 + $0x30] sm:$0xfc]  ;;  %v18070_v4 = vld [vmem:[%s25059_s3 + $0x46c] ss:$12 sps:$4 sm:$0xff]  }
 0x20d   : > { %v4064_v19 = vld [vmem:[#allocation2 + $0x58] sm:$0xff]  ;;  %v18068_v5 = vld [vmem:[%s25059_s3 + $0x468] ss:$12 sps:$4 sm:$0xff]   ;;  %v18074_v7 = vld [vmem:[%s25059_s3 + $0x484] ss:$12 sps:$4 sm:$0xff]  }
 0x20e   : > { %v4068_v20 = vpack.c.bf16 %v4064_v19, %v4062_v18  ;;  %v3697_v27 = vld [vmem:[#allocation2 + $0x38] sm:$0xfc]  ;;  %v18072_v9 = vld [vmem:[%s25059_s3 + $0x480] ss:$12 sps:$4 sm:$0xff]   ;;  %v4061_v13 = vld [vmem:[#allocation2 + $0x40] sm:$0x80] }
 0x20f   : > { %v18071_v6 = vld [vmem:[%s25059_s3 + $0x470] ss:$12 sps:$4 sm:$0xff]   ;;  %v4065_v10 = vld [vmem:[#allocation2 + $0x60] sm:$0x7]  ;;  %v18075_v14 = vld [vmem:[%s25059_s3 + $0x488] ss:$12 sps:$4 sm:$0xff]  }
 0x210   : > { %v4143_v23 = vshrl.u32 %v4068_v20, 16  ;;  %v4146_v24 = vshll.u32 %v4068_v20, 16  ;;  %v18078_v15 = vld [vmem:[%s25059_s3 + $0x49c] ss:$12 sps:$4 sm:$0xff]   ;;  %v18076_v17 = vld [vmem:[%s25059_s3 + $0x498] ss:$12 sps:$4 sm:$0xff]   ;;  %v4069_v18 = vpack.c.bf16 %v4065_v10, %v4065_v10  ;;  %v4067_v20 = vpack.c.bf16 %v20881_v57, %v4061_v13 }
 0x211   : > { %v3698_v21 = vld [vmem:[#allocation2 + $0x40] sm:$0x3f]  ;;  %v4066_v22 = vld [vmem:[#allocation2 + $0x68] sm:$0x7]  ;;  %v4464_v16 = vld [vmem:[#allocation2 + $0x18] sm:$0x1f] }
 0x212   : > { %v4070_v26 = vpack.c.bf16 %v4066_v22, %v4066_v22  ;;  %v3700_v29 = vpack.c.bf16 %v3698_v21, %v3696_v25  ;;  %v4145_v32 = vrot.slane %v4143_v23, 3  ;;  %v4148_v33 = vrot.slane %v4146_v24, 4  ;;  %v18079_v19 = vld [vmem:[%s25059_s3 + $0x4a0] ss:$12 sps:$4 sm:$0xff]   ;;  %v18080_v23 = vld [vmem:[%s25059_s3 + $0x4b0] ss:$12 sps:$4 sm:$0xff]  }
 0x213   : > { %v3699_v28 = vld [vmem:[#allocation2 + $0x48] sm:$0x3f]  ;;  %v18082_v21 = vld [vmem:[%s25059_s3 + $0x4b4] ss:$12 sps:$4 sm:$0xff]   ;;  %v4134_v24 = vshrl.u32 %v4069_v18, 16  ;;  %v4137_v25 = vshll.u32 %v4069_v18, 16 }
 0x214   : > { %v3701_v30 = vpack.c.bf16 %v3699_v28, %v3697_v27  ;;  %v4151_v31 = vshrl.u32 %v4070_v26, 16  ;;  %v4154_v34 = vshll.u32 %v4070_v26, 16  ;;  %v3757_v40 = vrot.slane %v3700_v29, 1  ;;  %v4462_v22 = vld [vmem:[#allocation2 + $0x8] sm:$0xfe] }
 0x215   : > { %v4149_v45 = vor.u32 %v4148_v33, %v4145_v32  ;;  %v4466_v26 = vpack.c.bf16 %v4464_v16, %v4462_v22  ;;  %v18083_v57 = vld [vmem:[%s25059_s3 + $0x4b8] ss:$12 sps:$4 sm:$0xff]   ;;  %v4126_v27 = vshrl.u32 %v4067_v20, 16  ;;  %v4129_v28 = vshll.u32 %v4067_v20, 16  ;;  %v18126_v16 = vld [vmem:[%s25059_s3 + $0x5bc] ss:$12 sps:$4 sm:$0xff]  }
 0x216   : > { %v3758_v36 = vrot.slane %v3701_v30, 1  ;;  %v4153_v39 = vrot.slane %v4151_v31, 3  ;;  %v4156_v41 = vrot.slane %v4154_v34, 4  ;;  %v18086_v29 = vld [vmem:[%s25059_s3 + $0x4cc] ss:$12 sps:$4 sm:$0xff]   ;;  %v4136_v31 = vrot.slane %v4134_v24, 3 }
 0x217   : > { %v18084_v30 = vld [vmem:[%s25059_s3 + $0x4c8] ss:$12 sps:$4 sm:$0xff]   ;;  %v4139_v32 = vrot.slane %v4137_v25, 4  ;;  %v4530_v33 = vshll.u32 %v4466_v26, 16  ;;  %v18087_v34 = vld [vmem:[%s25059_s3 + $0x4d0] ss:$12 sps:$4 sm:$0xff]  }
 0x218   : > { %15183 = vmatprep.mubr.msk.bf16.mxu0 %vm333_vm2, %v3758_v36  ;;  %15184 = vmatprep.mubr.msk.bf16.mxu1 %vm333_vm2, %v3758_v36  ;;  %v4157_v46 = vor.u32 %v4156_v41, %v4153_v39  ;;  %v4128_v36 = vrot.slane %v4126_v27, 3  ;;  %v4463_v18 = vld [vmem:[#allocation2 + $0x10] sm:$0x1f]  ;;  %v18134_v24 = vld [vmem:[%s25059_s3 + $0x5ec] ss:$12 sps:$4 sm:$0xff]  }
 0x219   : > { %4004 = vmatmul.mubr.bf16.vlgmr.msra.gmra.mrb[8].mxu0 %v3757_v40  ;;  %4047 = vmatmul.mubr.bf16.vlgmr.msra.gmra.mrb[16].mxu1 %v3757_v40  ;;  %v4140_v39 = vor.u32 %v4139_v32, %v4136_v31  ;;  %v4532_v40 = vrot.slane %v4530_v33, 1  ;;  %v18130_v20 = vld [vmem:[%s25059_s3 + $0x5d4] ss:$12 sps:$4 sm:$0xff]   ;;  %v18128_v22 = vld [vmem:[%s25059_s3 + $0x5d0] ss:$12 sps:$4 sm:$0xff]   ;;  %v19866_v32 = vld [vmem:[#allocation2 + $0x28] sm:$0xff] }
 0x21a   : > { %4372 = vmatpush1.bf16.msra.mxu0 %v18036_v37  ;;  %4415 = vmatpush1.bf16.msra.mxu1 %v18039_v38  ;;  %v4158_v47 = vsel %vm4124_vm14, %v4149_v45, %v4157_v46  ;;  %v4131_v37 = vrot.slane %v4129_v28, 4  ;;  %v18090_v38 = vld [vmem:[%s25059_s3 + $0x4e4] ss:$12 sps:$4 sm:$0xff]   ;;  %v18094_v45 = vld [vmem:[%s25059_s3 + $0x4fc] ss:$12 sps:$4 sm:$0xff]  }
 0x21b   : > { %4373 = vmatprep.subr.bf16.mxu0 %v18042_v42  ;;  %4416 = vmatprep.subr.bf16.mxu1 %v19878_v35  ;;  %v18088_v42 = vld [vmem:[%s25059_s3 + $0x4e0] ss:$12 sps:$4 sm:$0xff]   ;;  %v18135_v27 = vld [vmem:[%s25059_s3 + $0x5f0] ss:$12 sps:$4 sm:$0xff]  }
 0x21c   : > { %15276 = vmatprep.mubr.msk.bf16.mxu0 %vm333_vm2, %v4158_v47  ;;  %15277 = vmatprep.mubr.msk.bf16.mxu1 %vm333_vm2, %v4158_v47  ;;  %v4132_v41 = vor.u32 %v4131_v37, %v4128_v36  ;;  %v18138_v28 = vld [vmem:[%s25059_s3 + $0x604] ss:$12 sps:$4 sm:$0xff]   ;;  %v18136_v31 = vld [vmem:[%s25059_s3 + $0x600] ss:$12 sps:$4 sm:$0xff]   ;;  %v18139_v36 = vld [vmem:[%s25059_s3 + $0x608] ss:$12 sps:$4 sm:$0xff]  }
 0x21e   : > { %4374 = vmatpush1.bf16.msra.mxu0 %v18040_v43  ;;  %4417 = vmatpush1.bf16.msra.mxu1 %v18043_v44  ;;  %v4528_v43 = vshrl.u32 %v4466_v26, 16  ;;  %v18091_v44 = vld [vmem:[%s25059_s3 + $0x4e8] ss:$12 sps:$4 sm:$0xff]   ;;  %v4141_v46 = vsel %vm4124_vm14, %v4132_v41, %v4140_v39  ;;  %v4839_v26 = vld [vmem:[#allocation2 + $0x38] sm:$0x3] }
 0x21f   : > { %4375 = vmatprep.subr.bf16.mxu0 %v18046_v48  ;;  %4418 = vmatprep.subr.bf16.mxu1 %v19878_v35  ;;  %v18092_v48 = vld [vmem:[%s25059_s3 + $0x4f8] ss:$12 sps:$4 sm:$0xff]  }
 0x220   : > { %v4533_v47 = vor.u32 %v4532_v40, %v4528_v43  ;;  %v18140_v40 = vld [vmem:[%s25059_s3 + $0x618] ss:$12 sps:$4 sm:$0xff]  }
 0x222   : > { %4376 = vmatpush1.bf16.msra.mxu0 %v18044_v49  ;;  %4419 = vmatpush1.bf16.msra.mxu1 %v18047_v50  ;;  %v18095_v49 = vld [vmem:[%s25059_s3 + $0x500] ss:$12 sps:$4 sm:$0xff]  }
 0x223   : > { %4377 = vmatprep.subr.bf16.mxu0 %v18050_v51  ;;  %4420 = vmatprep.subr.bf16.mxu1 %v19878_v35  ;;  %v18098_v50 = vld [vmem:[%s25059_s3 + $0x514] ss:$12 sps:$4 sm:$0xff]   ;;  %v18096_v51 = vld [vmem:[%s25059_s3 + $0x510] ss:$12 sps:$4 sm:$0xff]  }
 0x226   : > { %4378 = vmatpush1.bf16.msra.mxu0 %v18048_v52  ;;  %4421 = vmatpush1.bf16.msra.mxu1 %v18051_v53  ;;  %v18099_v52 = vld [vmem:[%s25059_s3 + $0x518] ss:$12 sps:$4 sm:$0xff]  }
 0x227   : > { %4379 = vmatprep.subr.bf16.mxu0 %v18054_v54  ;;  %4422 = vmatprep.subr.bf16.mxu1 %v19878_v35  ;;  %v18102_v53 = vld [vmem:[%s25059_s3 + $0x52c] ss:$12 sps:$4 sm:$0xff]   ;;  %v18100_v54 = vld [vmem:[%s25059_s3 + $0x528] ss:$12 sps:$4 sm:$0xff]  }
 0x22a   : > { %4380 = vmatpush1.bf16.msra.mxu0 %v18052_v55  ;;  %4423 = vmatpush1.bf16.msra.mxu1 %v18055_v56  ;;  %v18103_v55 = vld [vmem:[%s25059_s3 + $0x530] ss:$12 sps:$4 sm:$0xff]  }
 0x22b   : > { %4381 = vmatprep.subr.bf16.mxu0 %v18058_v58  ;;  %4424 = vmatprep.subr.bf16.mxu1 %v19878_v35  ;;  %v18106_v56 = vld [vmem:[%s25059_s3 + $0x544] ss:$12 sps:$4 sm:$0xff]   ;;  %v18104_v58 = vld [vmem:[%s25059_s3 + $0x540] ss:$12 sps:$4 sm:$0xff]  }
 0x22e   : > { %4382 = vmatpush1.bf16.msra.mxu0 %v18056_v59  ;;  %4425 = vmatpush1.bf16.msra.mxu1 %v18059_v60  ;;  %v18107_v59 = vld [vmem:[%s25059_s3 + $0x548] ss:$12 sps:$4 sm:$0xff]  }
 0x22f   : > { %4383 = vmatprep.subr.bf16.mxu0 %v18062_v61  ;;  %4426 = vmatprep.subr.bf16.mxu1 %v19878_v35  ;;  %v18110_v60 = vld [vmem:[%s25059_s3 + $0x55c] ss:$12 sps:$4 sm:$0xff]   ;;  %v18108_v61 = vld [vmem:[%s25059_s3 + $0x558] ss:$12 sps:$4 sm:$0xff]  }
 0x232   : > { %4384 = vmatpush1.bf16.msra.mxu0 %v18060_v63  ;;  %4427 = vmatpush1.bf16.msra.mxu1 %v18063_v0  ;;  %v18111_v63 = vld [vmem:[%s25059_s3 + $0x560] ss:$12 sps:$4 sm:$0xff]  }
 0x233   : > { %4385 = vmatprep.subr.bf16.mxu0 %v18066_v1  ;;  %4428 = vmatprep.subr.bf16.mxu1 %v19878_v35  ;;  %v18114_v0 = vld [vmem:[%s25059_s3 + $0x574] ss:$12 sps:$4 sm:$0xff]   ;;  %v18112_v1 = vld [vmem:[%s25059_s3 + $0x570] ss:$12 sps:$4 sm:$0xff]  }
 0x236   : > { %4386 = vmatpush1.bf16.msra.mxu0 %v18064_v2  ;;  %4429 = vmatpush1.bf16.msra.mxu1 %v18067_v3  ;;  %v18115_v2 = vld [vmem:[%s25059_s3 + $0x578] ss:$12 sps:$4 sm:$0xff]  }
 0x237   : > { %4387 = vmatprep.subr.bf16.mxu0 %v18070_v4  ;;  %4430 = vmatprep.subr.bf16.mxu1 %v19878_v35  ;;  %v18118_v3 = vld [vmem:[%s25059_s3 + $0x58c] ss:$12 sps:$4 sm:$0xff]   ;;  %v18116_v4 = vld [vmem:[%s25059_s3 + $0x588] ss:$12 sps:$4 sm:$0xff]  }
 0x23a   : > { %4388 = vmatpush1.bf16.msra.mxu0 %v18068_v5  ;;  %4431 = vmatpush1.bf16.msra.mxu1 %v18071_v6  ;;  %v18119_v5 = vld [vmem:[%s25059_s3 + $0x590] ss:$12 sps:$4 sm:$0xff]  }
 0x23b   : > { %4389 = vmatprep.subr.bf16.mxu0 %v18074_v7  ;;  %4432 = vmatprep.subr.bf16.mxu1 %v19878_v35  ;;  %v18122_v7 = vld [vmem:[%s25059_s3 + $0x5a4] ss:$12 sps:$4 sm:$0xff]  }
 0x23e   : > { %4390 = vmatpush1.bf16.msra.mxu0 %v18072_v9  ;;  %4433 = vmatpush1.bf16.msra.mxu1 %v18075_v14  ;;  %v18120_v14 = vld [vmem:[%s25059_s3 + $0x5a0] ss:$12 sps:$4 sm:$0xff]  }
 0x23f   : > { %4391 = vmatprep.subr.bf16.mxu0 %v18078_v15  ;;  %4434 = vmatprep.subr.bf16.mxu1 %v19878_v35  ;;  %v18123_v15 = vld [vmem:[%s25059_s3 + $0x5a8] ss:$12 sps:$4 sm:$0xff]  }
 0x242   : > { %4392 = vmatpush1.bf16.msra.mxu0 %v18076_v17  ;;  %4435 = vmatpush1.bf16.msra.mxu1 %v18079_v19  ;;  %v18124_v17 = vld [vmem:[%s25059_s3 + $0x5b8] ss:$12 sps:$4 sm:$0xff]   ;;  %v18127_v19 = vld [vmem:[%s25059_s3 + $0x5c0] ss:$12 sps:$4 sm:$0xff]  }
 0x243   : > { %4393 = vmatprep.subr.bf16.mxu0 %v18082_v21  ;;  %4436 = vmatprep.subr.bf16.mxu1 %v19878_v35  ;;  %v4461_v21 = vld [vmem:[#allocation2] sm:$0xfe] }
 0x244   : > { %v4465_v25 = vpack.c.bf16 %v4463_v18, %v4461_v21  ;;  %v18178_v18 = vld [vmem:[%s25059_s3 + $0x6f4] ss:$12 sps:$4 sm:$0xff]  }
 0x245   : > { %v18180_v21 = vld [vmem:[%s25059_s3 + $0x708] ss:$12 sps:$4 sm:$0xff]  }
 0x246   : > { %4394 = vmatpush1.bf16.msra.mxu0 %v18080_v23  ;;  %4437 = vmatpush1.bf16.msra.mxu1 %v18083_v57  ;;  %v18131_v23 = vld [vmem:[%s25059_s3 + $0x5d8] ss:$12 sps:$4 sm:$0xff]   ;;  %v18132_v57 = vld [vmem:[%s25059_s3 + $0x5e8] ss:$12 sps:$4 sm:$0xff]   ;;  %v4521_v39 = vshrl.u32 %v4465_v25, 16 }
 0x247   : > { %4395 = vmatprep.subr.bf16.mxu0 %v18086_v29  ;;  %4438 = vmatprep.subr.bf16.mxu1 %v19878_v35  ;;  %v4523_v29 = vshll.u32 %v4465_v25, 16  ;;  %v5210_v25 = vld [vmem:[#allocation2 + $0x38] sm:$0xf8] }
 0x249   : > { %v4525_v37 = vrot.slane %v4523_v29, 1  ;;  %v18190_v29 = vld [vmem:[%s25059_s3 + $0x73c] ss:$12 sps:$4 sm:$0xff]  }
 0x24a   : > { %4396 = vmatpush1.bf16.msra.mxu0 %v18084_v30  ;;  %4439 = vmatpush1.bf16.msra.mxu1 %v18087_v34  ;;  %v4837_v30 = vld [vmem:[#allocation2 + $0x18] sm:$0xc0]  ;;  %v4843_v34 = vpack.c.bf16 %v4839_v26, %v4839_v26  ;;  %v4838_v26 = vld [vmem:[#allocation2 + $0x30] sm:$0x3] }
 0x24b   : > { %4746 = vmatprep.subr.bf16.mxu0 %v18090_v38  ;;  %4789 = vmatprep.subr.bf16.mxu1 %v19878_v35  ;;  %v4841_v33 = vpack.c.bf16 %v19866_v32, %v4837_v30  ;;  %v18142_v38 = vld [vmem:[%s25059_s3 + $0x61c] ss:$12 sps:$4 sm:$0xff]   ;;  %v4526_v43 = vor.u32 %v4525_v37, %v4521_v39  ;;  %v4836_v30 = vld [vmem:[#allocation2 + $0x10] sm:$0xc0] }
 0x24c   : > { %v18194_v39 = vld [vmem:[%s25059_s3 + $0x754] ss:$12 sps:$4 sm:$0xff]  }
 0x24d   : > { %4404 = vmatmul.mubr.bf16.vlgmr.msra.gmra.mrb[8].mxu0 %v4141_v46  ;;  %4447 = vmatmul.mubr.bf16.vlgmr.msra.gmra.mrb[20].mxu1 %v4141_v46  ;;  %v4904_v41 = vrot.slane %v4841_v33, 3 }
 0x24e   : > { %4747 = vmatpush1.bf16.msra.mxu0 %v18088_v42  ;;  %15369 = vmatprep.mubr.msk.bf16.mxu0 %vm333_vm2, %v4533_v47  ;;  %v4905_v42 = vrot.slane %v4843_v34, 3  ;;  %v18188_v34 = vld [vmem:[%s25059_s3 + $0x738] ss:$12 sps:$4 sm:$0xff]  }
 0x24f   : > { %4790 = vmatpush1.bf16.msra.mxu1 %v18091_v44  ;;  %15370 = vmatprep.mubr.msk.bf16.mxu1 %vm333_vm2, %v4533_v47  ;;  %v18143_v44 = vld [vmem:[%s25059_s3 + $0x620] ss:$12 sps:$4 sm:$0xff]   ;;  %v18144_v47 = vld [vmem:[%s25059_s3 + $0x630] ss:$12 sps:$4 sm:$0xff]  }
 0x250   : > { %4748 = vmatprep.subr.bf16.mxu0 %v18094_v45  ;;  %4791 = vmatprep.subr.bf16.mxu1 %v19878_v35  ;;  %v18146_v45 = vld [vmem:[%s25059_s3 + $0x634] ss:$12 sps:$4 sm:$0xff]   ;;  %v4906_v46 = vsel %vm1771_vm1, %v4904_v41, %v4905_v42 }
 0x252   : > { %4749 = vmatpush1.bf16.msra.mxu0 %v18092_v48  ;;  %v18147_v48 = vld [vmem:[%s25059_s3 + $0x638] ss:$12 sps:$4 sm:$0xff]  }
 0x253   : > { %4792 = vmatpush1.bf16.msra.mxu1 %v18095_v49  ;;  %4750 = vmatprep.subr.bf16.mxu0 %v18098_v50  ;;  %v18150_v49 = vld [vmem:[%s25059_s3 + $0x64c] ss:$12 sps:$4 sm:$0xff]   ;;  %v18148_v50 = vld [vmem:[%s25059_s3 + $0x648] ss:$12 sps:$4 sm:$0xff]  }
 0x254   : > { %4793 = vmatprep.subr.bf16.mxu1 %v19878_v35 }
 0x256   : > { %4751 = vmatpush1.bf16.msra.mxu0 %v18096_v51  ;;  %v18151_v51 = vld [vmem:[%s25059_s3 + $0x650] ss:$12 sps:$4 sm:$0xff]  }
 0x257   : > { %4794 = vmatpush1.bf16.msra.mxu1 %v18099_v52  ;;  %4752 = vmatprep.subr.bf16.mxu0 %v18102_v53  ;;  %v18154_v52 = vld [vmem:[%s25059_s3 + $0x664] ss:$12 sps:$4 sm:$0xff]   ;;  %v18152_v53 = vld [vmem:[%s25059_s3 + $0x660] ss:$12 sps:$4 sm:$0xff]  }
 0x258   : > { %4795 = vmatprep.subr.bf16.mxu1 %v19878_v35 }
 0x25a   : > { %4753 = vmatpush1.bf16.msra.mxu0 %v18100_v54  ;;  %v18155_v54 = vld [vmem:[%s25059_s3 + $0x668] ss:$12 sps:$4 sm:$0xff]  }
 0x25b   : > { %4796 = vmatpush1.bf16.msra.mxu1 %v18103_v55  ;;  %4754 = vmatprep.subr.bf16.mxu0 %v18106_v56  ;;  %v18158_v55 = vld [vmem:[%s25059_s3 + $0x67c] ss:$12 sps:$4 sm:$0xff]   ;;  %v18156_v56 = vld [vmem:[%s25059_s3 + $0x678] ss:$12 sps:$4 sm:$0xff]  }
 0x25c   : > { %4797 = vmatprep.subr.bf16.mxu1 %v19878_v35 }
 0x25e   : > { %4755 = vmatpush1.bf16.msra.mxu0 %v18104_v58  ;;  %v18159_v58 = vld [vmem:[%s25059_s3 + $0x680] ss:$12 sps:$4 sm:$0xff]  }
 0x25f   : > { %4798 = vmatpush1.bf16.msra.mxu1 %v18107_v59  ;;  %4756 = vmatprep.subr.bf16.mxu0 %v18110_v60  ;;  %v18162_v59 = vld [vmem:[%s25059_s3 + $0x694] ss:$12 sps:$4 sm:$0xff]   ;;  %v18160_v60 = vld [vmem:[%s25059_s3 + $0x690] ss:$12 sps:$4 sm:$0xff]  }
 0x260   : > { %4799 = vmatprep.subr.bf16.mxu1 %v19878_v35 }
 0x262   : > { %4757 = vmatpush1.bf16.msra.mxu0 %v18108_v61  ;;  %v18163_v61 = vld [vmem:[%s25059_s3 + $0x698] ss:$12 sps:$4 sm:$0xff]  }
 0x263   : > { %4800 = vmatpush1.bf16.msra.mxu1 %v18111_v63  ;;  %4758 = vmatprep.subr.bf16.mxu0 %v18114_v0  ;;  %v18166_v63 = vld [vmem:[%s25059_s3 + $0x6ac] ss:$12 sps:$4 sm:$0xff]   ;;  %v18164_v0 = vld [vmem:[%s25059_s3 + $0x6a8] ss:$12 sps:$4 sm:$0xff]  }
 0x264   : > { %4801 = vmatprep.subr.bf16.mxu1 %v19878_v35 }
 0x266   : > { %4759 = vmatpush1.bf16.msra.mxu0 %v18112_v1  ;;  %v18167_v1 = vld [vmem:[%s25059_s3 + $0x6b0] ss:$12 sps:$4 sm:$0xff]  }
 0x267   : > { %v21099_v6 = vpop.f32.mrb[8].mxu1  ;;  %4802 = vmatpush1.bf16.msra.mxu1 %v18115_v2  ;;  %4760 = vmatprep.subr.bf16.mxu0 %v18118_v3  ;;  %v18170_v2 = vld [vmem:[%s25059_s3 + $0x6c4] ss:$12 sps:$4 sm:$0xff]  }
 0x268   : > { %v3396_v9 = vpop.f32.mrb[9].mxu1  ;;  %4803 = vmatprep.subr.bf16.mxu1 %v19878_v35 }
 0x269   : > { %v21104_v10 = vpop.f32.mrb[10].mxu1  ;;  %v18171_v9 = vld [vmem:[%s25059_s3 + $0x6c8] ss:$12 sps:$4 sm:$0xff]  }
 0x26a   : > { %v3399_v13 = vpop.f32.mrb[11].mxu1  ;;  %4761 = vmatpush1.bf16.msra.mxu0 %v18116_v4  ;;  %v18168_v4 = vld [vmem:[%s25059_s3 + $0x6c0] ss:$12 sps:$4 sm:$0xff]  }
 0x26b   : > { %4804 = vmatpush1.bf16.msra.mxu1 %v18119_v5  ;;  %4762 = vmatprep.subr.bf16.mxu0 %v18122_v7  ;;  %v18174_v13 = vld [vmem:[%s25059_s3 + $0x6dc] ss:$12 sps:$4 sm:$0xff]  }
 0x26c   : > { %4805 = vmatprep.subr.bf16.mxu1 %v19878_v35 }
 0x26e   : > { %4763 = vmatpush1.bf16.msra.mxu0 %v18120_v14 }
 0x26f   : > { %4806 = vmatpush1.bf16.msra.mxu1 %v18123_v15  ;;  %4764 = vmatprep.subr.bf16.mxu0 %v18126_v16 }
 0x270   : > { %4807 = vmatprep.subr.bf16.mxu1 %v19878_v35 }
 0x272   : > { %4765 = vmatpush1.bf16.msra.mxu0 %v18124_v17  ;;  %v18175_v17 = vld [vmem:[%s25059_s3 + $0x6e0] ss:$12 sps:$4 sm:$0xff]  }
 0x273   : > { %4808 = vmatpush1.bf16.msra.mxu1 %v18127_v19  ;;  %4766 = vmatprep.subr.bf16.mxu0 %v18130_v20  ;;  %v18179_v19 = vld [vmem:[%s25059_s3 + $0x6f8] ss:$12 sps:$4 sm:$0xff]  }
 0x274   : > { %4809 = vmatprep.subr.bf16.mxu1 %v19878_v35  ;;  %v18182_v20 = vld [vmem:[%s25059_s3 + $0x70c] ss:$12 sps:$4 sm:$0xff]  }
 0x276   : > { %4767 = vmatpush1.bf16.msra.mxu0 %v18128_v22  ;;  %v5212_v22 = vld [vmem:[#allocation2 + $0x48] sm:$0x7f] }
 0x277   : > { %4810 = vmatpush1.bf16.msra.mxu1 %v18131_v23  ;;  %4768 = vmatprep.subr.bf16.mxu0 %v18134_v24  ;;  %v18183_v23 = vld [vmem:[%s25059_s3 + $0x710] ss:$12 sps:$4 sm:$0xff]  }
 0x278   : > { %4811 = vmatprep.subr.bf16.mxu1 %v19878_v35  ;;  %v18186_v24 = vld [vmem:[%s25059_s3 + $0x724] ss:$12 sps:$4 sm:$0xff]  }
 0x27a   : > { %4769 = vmatpush1.bf16.msra.mxu0 %v18132_v57  ;;  %v5214_v57 = vpack.c.bf16 %v5212_v22, %v5210_v25  ;;  %v18235_v22 = vld [vmem:[%s25059_s3 + $0x848] ss:$12 sps:$4 sm:$0xff]   ;;  %v18236_v25 = vld [vmem:[%s25059_s3 + $0x858] ss:$12 sps:$4 sm:$0xff]  }
 0x27b   : > { %4812 = vmatpush1.bf16.msra.mxu1 %v18135_v27  ;;  %4770 = vmatprep.subr.bf16.mxu0 %v18138_v28  ;;  %v18184_v27 = vld [vmem:[%s25059_s3 + $0x720] ss:$12 sps:$4 sm:$0xff]   ;;  %v18187_v28 = vld [vmem:[%s25059_s3 + $0x728] ss:$12 sps:$4 sm:$0xff]  }
 0x27c   : > { %4813 = vmatprep.subr.bf16.mxu1 %v19878_v35  ;;  %v5277_v32 = vshrl.u32 %v5214_v57, 16  ;;  %v5280_v33 = vshll.u32 %v5214_v57, 16  ;;  %v18242_v57 = vld [vmem:[%s25059_s3 + $0x874] ss:$12 sps:$4 sm:$0xff]  }
 0x27e   : > { %4771 = vmatpush1.bf16.msra.mxu0 %v18136_v31  ;;  %v4842_v31 = vpack.c.bf16 %v4838_v26, %v4838_v26  ;;  %v5279_v41 = vrot.slane %v5277_v32, 1  ;;  %v5282_v42 = vrot.slane %v5280_v33, 2  ;;  %v18239_v26 = vld [vmem:[%s25059_s3 + $0x860] ss:$12 sps:$4 sm:$0xff]  }
 0x27f   : > { %4814 = vmatpush1.bf16.msra.mxu1 %v18139_v36  ;;  %5119 = vmatprep.subr.bf16.mxu0 %v18142_v38  ;;  %v19867_v36 = vld [vmem:[#allocation2 + $0x20] sm:$0xff]  ;;  %v18246_v33 = vld [vmem:[%s25059_s3 + $0x88c] ss:$12 sps:$4 sm:$0xff]  }
 0x280   : > { %5162 = vmatprep.subr.bf16.mxu1 %v19878_v35  ;;  %v4840_v37 = vpack.c.bf16 %v19867_v36, %v4836_v30  ;;  %v18191_v38 = vld [vmem:[%s25059_s3 + $0x740] ss:$12 sps:$4 sm:$0xff]   ;;  %v18243_v30 = vld [vmem:[%s25059_s3 + $0x878] ss:$12 sps:$4 sm:$0xff]   ;;  %v5587_v36 = vld [vmem:[#allocation2 + $0x68] sm:$0xf] }
 0x281   : > { %4779 = vmatmul.mubr.bf16.vlgmr.msra.gmra.mrb[8].mxu0 %v4526_v43 }
 0x282   : > { %4822 = vmatmul.mubr.bf16.vlgmr.msra.gmra.mrb[24].mxu1 %v4526_v43  ;;  %5120 = vmatpush1.bf16.msra.mxu0 %v18140_v40  ;;  %v4902_v40 = vrot.slane %v4842_v31, 3  ;;  %v4901_v43 = vrot.slane %v4840_v37, 3 }
 0x283   : > { %15462 = vmatprep.mubr.msk.bf16.mxu0 %vm333_vm2, %v4906_v46  ;;  %5163 = vmatpush1.bf16.msra.mxu1 %v18143_v44  ;;  %v18192_v44 = vld [vmem:[%s25059_s3 + $0x750] ss:$12 sps:$4 sm:$0xff]  }
 0x284   : > { %15463 = vmatprep.mubr.msk.bf16.mxu1 %vm333_vm2, %v4906_v46  ;;  %5121 = vmatprep.subr.bf16.mxu0 %v18146_v45  ;;  %v18195_v45 = vld [vmem:[%s25059_s3 + $0x758] ss:$12 sps:$4 sm:$0xff]   ;;  %v4903_v46 = vsel %vm1771_vm1, %v4901_v43, %v4902_v40  ;;  %v18251_v43 = vld [vmem:[%s25059_s3 + $0x8a8] ss:$12 sps:$4 sm:$0xff]  }
 0x285   : > { %5164 = vmatprep.subr.bf16.mxu1 %v19878_v35  ;;  %v19868_v40 = vld [vmem:[#allocation2 + $0x58] sm:$0xff] }
 0x286   : > { %5122 = vmatpush1.bf16.msra.mxu0 %v18144_v47  ;;  %v18198_v47 = vld [vmem:[%s25059_s3 + $0x76c] ss:$12 sps:$4 sm:$0xff]  }
 0x287   : > { %5165 = vmatpush1.bf16.msra.mxu1 %v18147_v48  ;;  %5123 = vmatprep.subr.bf16.mxu0 %v18150_v49  ;;  %v5283_v48 = vor.u32 %v5282_v42, %v5279_v41  ;;  %v18196_v49 = vld [vmem:[%s25059_s3 + $0x768] ss:$12 sps:$4 sm:$0xff]   ;;  %v5589_v41 = vpack.c.bf16 %v5587_v36, %v19868_v40  ;;  %v18248_v42 = vld [vmem:[%s25059_s3 + $0x8a0] ss:$12 sps:$4 sm:$0xff]   ;;  %v18299_v36 = vld [vmem:[%s25061_s5 + $0x170] ss:$8 sps:$4 sm:$0xff]  }
 0x288   : > { %5166 = vmatprep.subr.bf16.mxu1 %v19878_v35  ;;  %v18305_v40 = vld [vmem:[%s25061_s5 + $0x190] ss:$8 sps:$4 sm:$0xff]  }
 0x28a   : > { %5124 = vmatpush1.bf16.msra.mxu0 %v18148_v50  ;;  %v18199_v50 = vld [vmem:[%s25059_s3 + $0x770] ss:$12 sps:$4 sm:$0xff]  }
 0x28b   : > { %5167 = vmatpush1.bf16.msra.mxu1 %v18151_v51  ;;  %5125 = vmatprep.subr.bf16.mxu0 %v18154_v52  ;;  %v18202_v51 = vld [vmem:[%s25059_s3 + $0x784] ss:$12 sps:$4 sm:$0xff]   ;;  %v18200_v52 = vld [vmem:[%s25059_s3 + $0x780] ss:$12 sps:$4 sm:$0xff]  }
 0x28c   : > { %5168 = vmatprep.subr.bf16.mxu1 %v19878_v35 }
 0x28e   : > { %5126 = vmatpush1.bf16.msra.mxu0 %v18152_v53  ;;  %v18203_v53 = vld [vmem:[%s25059_s3 + $0x788] ss:$12 sps:$4 sm:$0xff]  }
 0x28f   : > { %5169 = vmatpush1.bf16.msra.mxu1 %v18155_v54  ;;  %5127 = vmatprep.subr.bf16.mxu0 %v18158_v55  ;;  %v18206_v54 = vld [vmem:[%s25059_s3 + $0x79c] ss:$12 sps:$4 sm:$0xff]   ;;  %v18204_v55 = vld [vmem:[%s25059_s3 + $0x798] ss:$12 sps:$4 sm:$0xff]  }
 0x290   : > { %5170 = vmatprep.subr.bf16.mxu1 %v19878_v35 }
 0x292   : > { %5128 = vmatpush1.bf16.msra.mxu0 %v18156_v56  ;;  %v18207_v56 = vld [vmem:[%s25059_s3 + $0x7a0] ss:$12 sps:$4 sm:$0xff]  }
 0x293   : > { %5171 = vmatpush1.bf16.msra.mxu1 %v18159_v58  ;;  %5129 = vmatprep.subr.bf16.mxu0 %v18162_v59  ;;  %v18210_v58 = vld [vmem:[%s25059_s3 + $0x7b4] ss:$12 sps:$4 sm:$0xff]   ;;  %v18208_v59 = vld [vmem:[%s25059_s3 + $0x7b0] ss:$12 sps:$4 sm:$0xff]  }
 0x294   : > { %5172 = vmatprep.subr.bf16.mxu1 %v19878_v35 }
 0x296   : > { %5130 = vmatpush1.bf16.msra.mxu0 %v18160_v60  ;;  %v18211_v60 = vld [vmem:[%s25059_s3 + $0x7b8] ss:$12 sps:$4 sm:$0xff]  }
 0x297   : > { %5173 = vmatpush1.bf16.msra.mxu1 %v18163_v61  ;;  %5131 = vmatprep.subr.bf16.mxu0 %v18166_v63  ;;  %v18214_v61 = vld [vmem:[%s25059_s3 + $0x7cc] ss:$12 sps:$4 sm:$0xff]   ;;  %v18212_v63 = vld [vmem:[%s25059_s3 + $0x7c8] ss:$12 sps:$4 sm:$0xff]  }
 0x298   : > { %5174 = vmatprep.subr.bf16.mxu1 %v19878_v35 }
 0x29a   : > { %5132 = vmatpush1.bf16.msra.mxu0 %v18164_v0  ;;  %v18215_v0 = vld [vmem:[%s25059_s3 + $0x7d0] ss:$12 sps:$4 sm:$0xff]  }
 0x29b   : > { %v3689_v3 = vpop.f32.mrb[12].mxu1  ;;  %5175 = vmatpush1.bf16.msra.mxu1 %v18167_v1  ;;  %5133 = vmatprep.subr.bf16.mxu0 %v18170_v2  ;;  %v18218_v1 = vld [vmem:[%s25059_s3 + $0x7e4] ss:$12 sps:$4 sm:$0xff]   ;;  %v18216_v2 = vld [vmem:[%s25059_s3 + $0x7e0] ss:$12 sps:$4 sm:$0xff]  }
 0x29c   : > { %v21234_v5 = vadd.f32 %v3689_v3, %v21099_v6  ;;  %v3691_v7 = vpop.f32.mrb[13].mxu1  ;;  %5176 = vmatprep.subr.bf16.mxu1 %v19878_v35  ;;  %v18172_v6 = vld [vmem:[%s25059_s3 + $0x6d8] ss:$12 sps:$4 sm:$0xff]   ;;  %v18219_v3 = vld [vmem:[%s25059_s3 + $0x7e8] ss:$12 sps:$4 sm:$0xff]  }
 0x29d   : > { %v3692_v14 = vpop.f32.mrb[14].mxu1  ;;  %v18220_v7 = vld [vmem:[%s25059_s3 + $0x7f8] ss:$12 sps:$4 sm:$0xff]  }
 0x29e   : > { %v21244_v15 = vadd.f32 %v3692_v14, %v21104_v10  ;;  %v3694_v16 = vpop.f32.mrb[15].mxu1  ;;  %5134 = vmatpush1.bf16.msra.mxu0 %v18168_v4  ;;  %v18176_v10 = vld [vmem:[%s25059_s3 + $0x6f0] ss:$12 sps:$4 sm:$0xff]  }
 0x29f   : > { %5177 = vmatpush1.bf16.msra.mxu1 %v18171_v9  ;;  %5135 = vmatprep.subr.bf16.mxu0 %v18174_v13  ;;  %v18222_v4 = vld [vmem:[%s25059_s3 + $0x7fc] ss:$12 sps:$4 sm:$0xff]   ;;  %v18223_v9 = vld [vmem:[%s25059_s3 + $0x800] ss:$12 sps:$4 sm:$0xff]   ;;  %v18227_v16 = vld [vmem:[%s25059_s3 + $0x818] ss:$12 sps:$4 sm:$0xff]  }
 0x2a0   : > { %5178 = vmatprep.subr.bf16.mxu1 %v19878_v35  ;;  %v18226_v13 = vld [vmem:[%s25059_s3 + $0x814] ss:$12 sps:$4 sm:$0xff]   ;;  %v18224_v14 = vld [vmem:[%s25059_s3 + $0x810] ss:$12 sps:$4 sm:$0xff]  }
 0x2a2   : > { %5136 = vmatpush1.bf16.msra.mxu0 %v18172_v6  ;;  %v18230_v6 = vld [vmem:[%s25059_s3 + $0x82c] ss:$12 sps:$4 sm:$0xff]  }
 0x2a3   : > { %5179 = vmatpush1.bf16.msra.mxu1 %v18175_v17  ;;  %5137 = vmatprep.subr.bf16.mxu0 %v18178_v18  ;;  %v18228_v17 = vld [vmem:[%s25059_s3 + $0x828] ss:$12 sps:$4 sm:$0xff]   ;;  %v18231_v18 = vld [vmem:[%s25059_s3 + $0x830] ss:$12 sps:$4 sm:$0xff]  }
 0x2a4   : > { %5180 = vmatprep.subr.bf16.mxu1 %v19878_v35 }
 0x2a6   : > { %5138 = vmatpush1.bf16.msra.mxu0 %v18176_v10  ;;  %v18234_v10 = vld [vmem:[%s25059_s3 + $0x844] ss:$12 sps:$4 sm:$0xff]  }
 0x2a7   : > { %5181 = vmatpush1.bf16.msra.mxu1 %v18179_v19  ;;  %5139 = vmatprep.subr.bf16.mxu0 %v18182_v20  ;;  %v5211_v19 = vld [vmem:[#allocation2 + $0x40] sm:$0x7f] }
 0x2a8   : > { %5182 = vmatprep.subr.bf16.mxu1 %v19878_v35  ;;  %v18232_v20 = vld [vmem:[%s25059_s3 + $0x840] ss:$12 sps:$4 sm:$0xff]  }
 0x2aa   : > { %5140 = vmatpush1.bf16.msra.mxu0 %v18180_v21  ;;  %v5209_v21 = vld [vmem:[#allocation2 + $0x30] sm:$0xf8] }
 0x2ab   : > { %5183 = vmatpush1.bf16.msra.mxu1 %v18183_v23  ;;  %5141 = vmatprep.subr.bf16.mxu0 %v18186_v24  ;;  %v18238_v23 = vld [vmem:[%s25059_s3 + $0x85c] ss:$12 sps:$4 sm:$0xff]   ;;  %v5213_v24 = vpack.c.bf16 %v5211_v19, %v5209_v21  ;;  %v18294_v21 = vld [vmem:[%s25059_s3 + $0x9ac] ss:$12 sps:$4 sm:$0xff]  }
 0x2ac   : > { %5184 = vmatprep.subr.bf16.mxu1 %v19878_v35  ;;  %v18288_v19 = vld [vmem:[%s25059_s3 + $0x990] ss:$12 sps:$4 sm:$0xff]  }
 0x2ae   : > { %5142 = vmatpush1.bf16.msra.mxu0 %v18184_v27  ;;  %v5269_v27 = vshrl.u32 %v5213_v24, 16 }
 0x2af   : > { %5185 = vmatpush1.bf16.msra.mxu1 %v18187_v28  ;;  %5143 = vmatprep.subr.bf16.mxu0 %v18190_v29  ;;  %v5272_v28 = vshll.u32 %v5213_v24, 16  ;;  %v18240_v29 = vld [vmem:[%s25059_s3 + $0x870] ss:$12 sps:$4 sm:$0xff]   ;;  %v5586_v24 = vld [vmem:[#allocation2 + $0x60] sm:$0xf] }
 0x2b0   : > { %5186 = vmatprep.subr.bf16.mxu1 %v19878_v35  ;;  %v5271_v31 = vrot.slane %v5269_v27, 1 }
 0x2b1   : > { %v5274_v32 = vrot.slane %v5272_v28, 2 }
 0x2b2   : > { %5144 = vmatpush1.bf16.msra.mxu0 %v18188_v34  ;;  %v18244_v34 = vld [vmem:[%s25059_s3 + $0x888] ss:$12 sps:$4 sm:$0xff]  }
 0x2b3   : > { %5187 = vmatpush1.bf16.msra.mxu1 %v18191_v38  ;;  %5496 = vmatprep.subr.bf16.mxu0 %v18194_v39  ;;  %v5275_v37 = vor.u32 %v5274_v32, %v5271_v31  ;;  %v18247_v38 = vld [vmem:[%s25059_s3 + $0x890] ss:$12 sps:$4 sm:$0xff]   ;;  %v18296_v32 = vld [vmem:[%s25061_s5 + $0x160] ss:$8 sps:$4 sm:$0xff]  }
 0x2b4   : > { %5539 = vmatprep.subr.bf16.mxu1 %v19878_v35  ;;  %v18250_v39 = vld [vmem:[%s25059_s3 + $0x8a4] ss:$12 sps:$4 sm:$0xff]  }
 0x2b5   : > { %5152 = vmatmul.mubr.bf16.vlgmr.msra.gmra.mrb[8].mxu0 %v4903_v46 }
 0x2b6   : > { %5195 = vmatmul.mubr.bf16.vlgmr.msra.gmra.mrb[28].mxu1 %v4903_v46  ;;  %5497 = vmatpush1.bf16.msra.mxu0 %v18192_v44  ;;  %v18254_v44 = vld [vmem:[%s25059_s3 + $0x8bc] ss:$12 sps:$4 sm:$0xff]  }
 0x2b7   : > { %15555 = vmatprep.mubr.msk.bf16.mxu0 %vm333_vm2, %v5283_v48  ;;  %5540 = vmatpush1.bf16.msra.mxu1 %v18195_v45 }
 0x2b8   : > { %15556 = vmatprep.mubr.msk.bf16.mxu1 %vm333_vm2, %v5283_v48  ;;  %5498 = vmatprep.subr.bf16.mxu0 %v18198_v47 }
 0x2b9   : > { %5541 = vmatprep.subr.bf16.mxu1 %v19878_v35 }
 0x2ba   : > { %5499 = vmatpush1.bf16.msra.mxu0 %v18196_v49  ;;  %v18252_v49 = vld [vmem:[%s25059_s3 + $0x8b8] ss:$12 sps:$4 sm:$0xff]  }
 0x2bb   : > { %5542 = vmatpush1.bf16.msra.mxu1 %v18199_v50  ;;  %5500 = vmatprep.subr.bf16.mxu0 %v18202_v51 }
 0x2bc   : > { %5543 = vmatprep.subr.bf16.mxu1 %v19878_v35 }
 0x2be   : > { %5501 = vmatpush1.bf16.msra.mxu0 %v18200_v52  ;;  %v18258_v52 = vld [vmem:[%s25059_s3 + $0x8d4] ss:$12 sps:$4 sm:$0xff]  }
 0x2bf   : > { %5544 = vmatpush1.bf16.msra.mxu1 %v18203_v53  ;;  %5502 = vmatprep.subr.bf16.mxu0 %v18206_v54  ;;  %v18256_v53 = vld [vmem:[%s25059_s3 + $0x8d0] ss:$12 sps:$4 sm:$0xff]   ;;  %v18262_v54 = vld [vmem:[%s25059_s3 + $0x8ec] ss:$12 sps:$4 sm:$0xff]  }
 0x2c0   : > { %5545 = vmatprep.subr.bf16.mxu1 %v19878_v35 }
 0x2c2   : > { %5503 = vmatpush1.bf16.msra.mxu0 %v18204_v55  ;;  %v18260_v55 = vld [vmem:[%s25059_s3 + $0x8e8] ss:$12 sps:$4 sm:$0xff]  }
 0x2c3   : > { %5546 = vmatpush1.bf16.msra.mxu1 %v18207_v56  ;;  %5504 = vmatprep.subr.bf16.mxu0 %v18210_v58  ;;  %v18263_v56 = vld [vmem:[%s25059_s3 + $0x8f0] ss:$12 sps:$4 sm:$0xff]  }
 0x2c4   : > { %5547 = vmatprep.subr.bf16.mxu1 %v19878_v35  ;;  %v18266_v58 = vld [vmem:[%s25059_s3 + $0x904] ss:$12 sps:$4 sm:$0xff]  }
 0x2c6   : > { %5505 = vmatpush1.bf16.msra.mxu0 %v18208_v59  ;;  %v18264_v59 = vld [vmem:[%s25059_s3 + $0x900] ss:$12 sps:$4 sm:$0xff]  }
 0x2c7   : > { %5548 = vmatpush1.bf16.msra.mxu1 %v18211_v60  ;;  %5506 = vmatprep.subr.bf16.mxu0 %v18214_v61  ;;  %v18267_v60 = vld [vmem:[%s25059_s3 + $0x908] ss:$12 sps:$4 sm:$0xff]  }
 0x2c8   : > { %5549 = vmatprep.subr.bf16.mxu1 %v19878_v35  ;;  %v18270_v61 = vld [vmem:[%s25059_s3 + $0x91c] ss:$12 sps:$4 sm:$0xff]  }
 0x2ca   : > { %5507 = vmatpush1.bf16.msra.mxu0 %v18212_v63  ;;  %v18268_v63 = vld [vmem:[%s25059_s3 + $0x918] ss:$12 sps:$4 sm:$0xff]  }
 0x2cb   : > { %5550 = vmatpush1.bf16.msra.mxu1 %v18215_v0  ;;  %5508 = vmatprep.subr.bf16.mxu0 %v18218_v1  ;;  %v18271_v0 = vld [vmem:[%s25059_s3 + $0x920] ss:$12 sps:$4 sm:$0xff]  }
 0x2cc   : > { %5551 = vmatprep.subr.bf16.mxu1 %v19878_v35  ;;  %v18274_v1 = vld [vmem:[%s25059_s3 + $0x934] ss:$12 sps:$4 sm:$0xff]  }
 0x2ce   : > { %5509 = vmatpush1.bf16.msra.mxu0 %v18216_v2  ;;  %v18272_v2 = vld [vmem:[%s25059_s3 + $0x930] ss:$12 sps:$4 sm:$0xff]  }
 0x2cf   : > { %5552 = vmatpush1.bf16.msra.mxu1 %v18219_v3  ;;  %5510 = vmatprep.subr.bf16.mxu0 %v18222_v4  ;;  %v18275_v3 = vld [vmem:[%s25059_s3 + $0x938] ss:$12 sps:$4 sm:$0xff]  }
 0x2d0   : > { %5553 = vmatprep.subr.bf16.mxu1 %v19878_v35  ;;  %v18278_v4 = vld [vmem:[%s25059_s3 + $0x94c] ss:$12 sps:$4 sm:$0xff]  }
 0x2d2   : > { %5511 = vmatpush1.bf16.msra.mxu0 %v18220_v7  ;;  %v18276_v7 = vld [vmem:[%s25059_s3 + $0x948] ss:$12 sps:$4 sm:$0xff]  }
 0x2d3   : > { %5554 = vmatpush1.bf16.msra.mxu1 %v18223_v9  ;;  %5512 = vmatprep.subr.bf16.mxu0 %v18226_v13  ;;  %v18279_v9 = vld [vmem:[%s25059_s3 + $0x950] ss:$12 sps:$4 sm:$0xff]  }
 0x2d4   : > { %5555 = vmatprep.subr.bf16.mxu1 %v19878_v35  ;;  %v18282_v13 = vld [vmem:[%s25059_s3 + $0x964] ss:$12 sps:$4 sm:$0xff]  }
 0x2d6   : > { %5513 = vmatpush1.bf16.msra.mxu0 %v18224_v14  ;;  %v18280_v14 = vld [vmem:[%s25059_s3 + $0x960] ss:$12 sps:$4 sm:$0xff]  }
 0x2d7   : > { %5556 = vmatpush1.bf16.msra.mxu1 %v18227_v16  ;;  %5514 = vmatprep.subr.bf16.mxu0 %v18230_v6  ;;  %v18283_v16 = vld [vmem:[%s25059_s3 + $0x968] ss:$12 sps:$4 sm:$0xff]  }
 0x2d8   : > { %5557 = vmatprep.subr.bf16.mxu1 %v19878_v35  ;;  %v18286_v6 = vld [vmem:[%s25059_s3 + $0x97c] ss:$12 sps:$4 sm:$0xff]  }
 0x2da   : > { %5515 = vmatpush1.bf16.msra.mxu0 %v18228_v17  ;;  %v18284_v17 = vld [vmem:[%s25059_s3 + $0x978] ss:$12 sps:$4 sm:$0xff]  }
 0x2db   : > { %5558 = vmatpush1.bf16.msra.mxu1 %v18231_v18  ;;  %5516 = vmatprep.subr.bf16.mxu0 %v18234_v10  ;;  %v18287_v18 = vld [vmem:[%s25059_s3 + $0x980] ss:$12 sps:$4 sm:$0xff]  }
 0x2dc   : > { %5559 = vmatprep.subr.bf16.mxu1 %v19878_v35  ;;  %v18290_v10 = vld [vmem:[%s25059_s3 + $0x994] ss:$12 sps:$4 sm:$0xff]  }
 0x2de   : > { %5517 = vmatpush1.bf16.msra.mxu0 %v18232_v20  ;;  %v18291_v20 = vld [vmem:[%s25059_s3 + $0x998] ss:$12 sps:$4 sm:$0xff]  }
 0x2df   : > { %5560 = vmatpush1.bf16.msra.mxu1 %v18235_v22  ;;  %5518 = vmatprep.subr.bf16.mxu0 %v18238_v23  ;;  %v18292_v22 = vld [vmem:[%s25059_s3 + $0x9a8] ss:$12 sps:$4 sm:$0xff]   ;;  %v18295_v23 = vld [vmem:[%s25059_s3 + $0x9b0] ss:$12 sps:$4 sm:$0xff]  }
 0x2e0   : > { %5561 = vmatprep.subr.bf16.mxu1 %v19878_v35 }
 0x2e2   : > { %5519 = vmatpush1.bf16.msra.mxu0 %v18236_v25  ;;  %v19869_v25 = vld [vmem:[#allocation2 + $0x50] sm:$0xff] }
 0x2e3   : > { %5562 = vmatpush1.bf16.msra.mxu1 %v18239_v26  ;;  %5520 = vmatprep.subr.bf16.mxu0 %v18242_v57  ;;  %v5588_v26 = vpack.c.bf16 %v5586_v24, %v19869_v25  ;;  %v18350_v24 = vld [vmem:[%s25061_s5 + $0x240] ss:$8 sps:$4 sm:$0xff]  }
 0x2e4   : > { %5563 = vmatprep.subr.bf16.mxu1 %v19878_v35  ;;  %v18353_v25 = vld [vmem:[%s25061_s5 + $0x2a0] ss:$8 sps:$4 sm:$0xff]  }
 0x2e6   : > { %5521 = vmatpush1.bf16.msra.mxu0 %v18240_v29 }
 0x2e7   : > { %5564 = vmatpush1.bf16.msra.mxu1 %v18243_v30  ;;  %5854 = vmatprep.subr.bf16.mxu0 %v18246_v33  ;;  %v18298_v33 = vld [vmem:[%s25061_s5 + $0x164] ss:$8 sps:$4 sm:$0xff]  }
 0x2e8   : > { %5897 = vmatprep.subr.bf16.mxu1 %v19878_v35 }
 0x2e9   : > { %5529 = vmatmul.mubr.bf16.vlgmr.msra.gmra.mrb[8].mxu0 %v5275_v37 }
 0x2ea   : > { %5572 = vmatmul.mubr.bf16.vlgmr.msra.gmra.mrb[32].mxu1 %v5275_v37  ;;  %5855 = vmatpush1.bf16.msra.mxu0 %v18244_v34  ;;  %v18301_v34 = vld [vmem:[%s25061_s5 + $0x174] ss:$8 sps:$4 sm:$0xff]   ;;  %v18304_v37 = vld [vmem:[%s25061_s5 + $0x184] ss:$8 sps:$4 sm:$0xff]  }
 0x2eb   : > { %15648 = vmatprep.mubr.msk.bf16.mxu0 %vm333_vm2, %v5589_v41  ;;  %5898 = vmatpush1.bf16.msra.mxu1 %v18247_v38  ;;  %v18302_v38 = vld [vmem:[%s25061_s5 + $0x180] ss:$8 sps:$4 sm:$0xff]  }
 0x2ec   : > { %15649 = vmatprep.mubr.msk.bf16.mxu1 %vm333_vm2, %v5589_v41  ;;  %v4048_v45 = vpop.f32.mrb[16].mxu1  ;;  %5856 = vmatprep.subr.bf16.mxu0 %v18250_v39  ;;  %v18307_v39 = vld [vmem:[%s25061_s5 + $0x194] ss:$8 sps:$4 sm:$0xff]   ;;  %v18310_v41 = vld [vmem:[%s25061_s5 + $0x1a4] ss:$8 sps:$4 sm:$0xff]  }
 0x2ed   : > { %v21451_v46 = vadd.f32 %v4048_v45, %v21234_v5  ;;  %5899 = vmatprep.subr.bf16.mxu1 %v19878_v35  ;;  %v4050_v47 = vpop.f32.mrb[17].mxu1  ;;  %v18255_v5 = vld [vmem:[%s25059_s3 + $0x8c0] ss:$12 sps:$4 sm:$0xff]  }
 0x2ee   : > { %5857 = vmatpush1.bf16.msra.mxu0 %v18248_v42  ;;  %v4051_v48 = vpop.f32.mrb[18].mxu1  ;;  %v18308_v42 = vld [vmem:[%s25061_s5 + $0x1a0] ss:$8 sps:$4 sm:$0xff]   ;;  %v18316_v45 = vld [vmem:[%s25061_s5 + $0x1c4] ss:$8 sps:$4 sm:$0xff]  }
 0x2ef   : > { %5900 = vmatpush1.bf16.msra.mxu1 %v18251_v43  ;;  %v21458_v50 = vadd.f32 %v4051_v48, %v21244_v15  ;;  %v4053_v51 = vpop.f32.mrb[19].mxu1  ;;  %5858 = vmatprep.subr.bf16.mxu0 %v18254_v44  ;;  %v18259_v15 = vld [vmem:[%s25059_s3 + $0x8d8] ss:$12 sps:$4 sm:$0xff]   ;;  %v18313_v43 = vld [vmem:[%s25061_s5 + $0x1b4] ss:$8 sps:$4 sm:$0xff]  }
 0x2f0   : > { %5901 = vmatprep.subr.bf16.mxu1 %v19878_v35  ;;  %v18311_v44 = vld [vmem:[%s25061_s5 + $0x1b0] ss:$8 sps:$4 sm:$0xff]  }
 0x2f2   : > { %5859 = vmatpush1.bf16.msra.mxu0 %v18252_v49 }
 0x2f3   : > { %5902 = vmatpush1.bf16.msra.mxu1 %v18255_v5  ;;  %5860 = vmatprep.subr.bf16.mxu0 %v18258_v52  ;;  %v18319_v52 = vld [vmem:[%s25061_s5 + $0x1d4] ss:$8 sps:$4 sm:$0xff]  }
 0x2f4   : > { %5903 = vmatprep.subr.bf16.mxu1 %v19878_v35 }
 0x2f6   : > { %5861 = vmatpush1.bf16.msra.mxu0 %v18256_v53  ;;  %v18317_v53 = vld [vmem:[%s25061_s5 + $0x1d0] ss:$8 sps:$4 sm:$0xff]  }
 0x2f7   : > { %5904 = vmatpush1.bf16.msra.mxu1 %v18259_v15  ;;  %5862 = vmatprep.subr.bf16.mxu0 %v18262_v54  ;;  %v18322_v15 = vld [vmem:[%s25061_s5 + $0x1e4] ss:$8 sps:$4 sm:$0xff]   ;;  %v18320_v54 = vld [vmem:[%s25061_s5 + $0x1e0] ss:$8 sps:$4 sm:$0xff]  }
 0x2f8   : > { %5905 = vmatprep.subr.bf16.mxu1 %v19878_v35 }
 0x2fa   : > { %5863 = vmatpush1.bf16.msra.mxu0 %v18260_v55  ;;  %v18325_v55 = vld [vmem:[%s25061_s5 + $0x1f4] ss:$8 sps:$4 sm:$0xff]  }
 0x2fb   : > { %5906 = vmatpush1.bf16.msra.mxu1 %v18263_v56  ;;  %5864 = vmatprep.subr.bf16.mxu0 %v18266_v58  ;;  %v18323_v56 = vld [vmem:[%s25061_s5 + $0x1f0] ss:$8 sps:$4 sm:$0xff]   ;;  %v18328_v58 = vld [vmem:[%s25061_s5 + $0x204] ss:$8 sps:$4 sm:$0xff]  }
 0x2fc   : > { %5907 = vmatprep.subr.bf16.mxu1 %v19878_v35 }
 0x2fe   : > { %5865 = vmatpush1.bf16.msra.mxu0 %v18264_v59  ;;  %v18331_v59 = vld [vmem:[%s25061_s5 + $0x264] ss:$8 sps:$4 sm:$0xff]  }
 0x2ff   : > { %5908 = vmatpush1.bf16.msra.mxu1 %v18267_v60  ;;  %5866 = vmatprep.subr.bf16.mxu0 %v18270_v61  ;;  %v18326_v60 = vld [vmem:[%s25061_s5 + $0x200] ss:$8 sps:$4 sm:$0xff]  }
 0x300   : > { %5909 = vmatprep.subr.bf16.mxu1 %v19878_v35  ;;  %v18329_v61 = vld [vmem:[%s25061_s5 + $0x260] ss:$8 sps:$4 sm:$0xff]  }
 0x302   : > { %5867 = vmatpush1.bf16.msra.mxu0 %v18268_v63  ;;  %v18334_v63 = vld [vmem:[%s25061_s5 + $0x214] ss:$8 sps:$4 sm:$0xff]  }
 0x303   : > { %5910 = vmatpush1.bf16.msra.mxu1 %v18271_v0  ;;  %5868 = vmatprep.subr.bf16.mxu0 %v18274_v1  ;;  %v18337_v0 = vld [vmem:[%s25061_s5 + $0x274] ss:$8 sps:$4 sm:$0xff]   ;;  %v18332_v1 = vld [vmem:[%s25061_s5 + $0x210] ss:$8 sps:$4 sm:$0xff]  }
 0x304   : > { %5911 = vmatprep.subr.bf16.mxu1 %v19878_v35 }
 0x306   : > { %5869 = vmatpush1.bf16.msra.mxu0 %v18272_v2  ;;  %v18335_v2 = vld [vmem:[%s25061_s5 + $0x270] ss:$8 sps:$4 sm:$0xff]  }
 0x307   : > { %5912 = vmatpush1.bf16.msra.mxu1 %v18275_v3  ;;  %5870 = vmatprep.subr.bf16.mxu0 %v18278_v4  ;;  %v18340_v3 = vld [vmem:[%s25061_s5 + $0x224] ss:$8 sps:$4 sm:$0xff]  }
 0x308   : > { %5913 = vmatprep.subr.bf16.mxu1 %v19878_v35  ;;  %v18343_v4 = vld [vmem:[%s25061_s5 + $0x284] ss:$8 sps:$4 sm:$0xff]  }
 0x30a   : > { %5871 = vmatpush1.bf16.msra.mxu0 %v18276_v7 }
 0x30b   : > { %5914 = vmatpush1.bf16.msra.mxu1 %v18279_v9  ;;  %5872 = vmatprep.subr.bf16.mxu0 %v18282_v13  ;;  %v18338_v9 = vld [vmem:[%s25061_s5 + $0x220] ss:$8 sps:$4 sm:$0xff]  }
 0x30c   : > { %5915 = vmatprep.subr.bf16.mxu1 %v19878_v35  ;;  %v18341_v13 = vld [vmem:[%s25061_s5 + $0x280] ss:$8 sps:$4 sm:$0xff]  }
 0x30e   : > { %5873 = vmatpush1.bf16.msra.mxu0 %v18280_v14 }
 0x30f   : > { %5916 = vmatpush1.bf16.msra.mxu1 %v18283_v16  ;;  %5874 = vmatprep.subr.bf16.mxu0 %v18286_v6  ;;  %v18346_v6 = vld [vmem:[%s25061_s5 + $0x234] ss:$8 sps:$4 sm:$0xff]  }
 0x310   : > { %5917 = vmatprep.subr.bf16.mxu1 %v19878_v35 }
 0x312   : > { %5875 = vmatpush1.bf16.msra.mxu0 %v18284_v17  ;;  %v18349_v17 = vld [vmem:[%s25061_s5 + $0x294] ss:$8 sps:$4 sm:$0xff]  }
 0x313   : > { %5918 = vmatpush1.bf16.msra.mxu1 %v18287_v18  ;;  %5876 = vmatprep.subr.bf16.mxu0 %v18290_v10 }
 0x314   : > { %5919 = vmatprep.subr.bf16.mxu1 %v19878_v35 }
 0x316   : > { %5877 = vmatpush1.bf16.msra.mxu0 %v18288_v19 }
 0x317   : > { %5920 = vmatpush1.bf16.msra.mxu1 %v18291_v20  ;;  %5878 = vmatprep.subr.bf16.mxu0 %v18294_v21  ;;  %v18344_v20 = vld [vmem:[%s25061_s5 + $0x230] ss:$8 sps:$4 sm:$0xff]  }
 0x318   : > { %5921 = vmatprep.subr.bf16.mxu1 %v19878_v35  ;;  %v18347_v21 = vld [vmem:[%s25061_s5 + $0x290] ss:$8 sps:$4 sm:$0xff]  }
 0x31a   : > { %5879 = vmatpush1.bf16.msra.mxu0 %v18292_v22  ;;  %v18352_v22 = vld [vmem:[%s25061_s5 + $0x244] ss:$8 sps:$4 sm:$0xff]  }
 0x31b   : > { %5922 = vmatpush1.bf16.msra.mxu1 %v18295_v23  ;;  %6375 = vmatprep.subr.bf16.mxu0 %v18298_v33  ;;  %v18355_v23 = vld [vmem:[%s25061_s5 + $0x2a4] ss:$8 sps:$4 sm:$0xff]  }
 0x31c   : > { %6416 = vmatprep.subr.bf16.mxu1 %v18331_v59 }
 0x31d   : > { %5887 = vmatmul.mubr.bf16.vlgmr.msra.gmra.mrb[8].mxu0 %v5588_v26 }
 0x31e   : > { %5930 = vmatmul.mubr.bf16.vlgmr.msra.gmra.mrb[36].mxu1 %v5588_v26  ;;  %6376 = vmatpush1.bf16.msra.mxu0 %v18296_v32  ;;  %v18358_v26 = vld [vmem:[%s25061_s5 + $0x254] ss:$8 sps:$4 sm:$0xff]  }
 0x31f   : > { %6448 = vmatprep.mubr.bf16.mxu1 %v19878_v35  ;;  %6377 = vmatprep.subr.bf16.mxu0 %v18301_v34 }
 0x320   : > { %v4448_v57 = vpop.f32.mrb[20].mxu1  ;;  %6417 = vmatpush1.bf16.msra.mxu1 %v18329_v61 }
 0x321   : > { %v4457_v27 = vadd.f32 %v4448_v57, %v21451_v46  ;;  %v4450_v28 = vpop.f32.mrb[21].mxu1  ;;  %6418 = vmatprep.subr.bf16.mxu1 %v18337_v0  ;;  %v18361_v57 = vld [vmem:[%s25061_s5 + $0x2b4] ss:$8 sps:$4 sm:$0xff]  }
 0x322   : > { %v4451_v29 = vpop.f32.mrb[22].mxu1  ;;  %6378 = vmatpush1.bf16.msra.mxu0 %v18299_v36  ;;  %v18359_v28 = vld [vmem:[%s25061_s5 + $0x2b0] ss:$8 sps:$4 sm:$0xff]  }
 0x323   : > { %v4460_v30 = vadd.f32 %v4451_v29, %v21458_v50  ;;  %v4453_v31 = vpop.f32.mrb[23].mxu1  ;;  %6379 = vmatprep.subr.bf16.mxu0 %v18304_v37  ;;  %v18314_v50 = vld [vmem:[%s25061_s5 + $0x1c0] ss:$8 sps:$4 sm:$0xff]   ;;  %v18364_v29 = vld [vmem:[%s25061_s5 + $0x4] ss:$8 sps:$4 sm:$0xff]  }
 0x324   : > { %6419 = vmatpush1.bf16.msra.mxu1 %v18335_v2 }
 0x325   : > { %6420 = vmatprep.subr.bf16.mxu1 %v18343_v4 }
 0x326   : > { %6380 = vmatpush1.bf16.msra.mxu0 %v18302_v38  ;;  %v5944_v38 = vld [vmem:[%s25060_s4] ss:$4 sm:$0x7] }
 0x327   : > { %6381 = vmatprep.subr.bf16.mxu0 %v18307_v39  ;;  %v5956_v39 = vsub.s32 2, %v20545_v8 }
 0x328   : > { %6421 = vmatpush1.bf16.msra.mxu1 %v18341_v13 }
 0x329   : > { %6422 = vmatprep.subr.bf16.mxu1 %v18349_v17 }
 0x32a   : > { %6382 = vmatpush1.bf16.msra.mxu0 %v18305_v40  ;;  %v5949_v40 = vrot.slane %v5944_v38, %v20554_v11 }
 0x32b   : > { %6383 = vmatprep.subr.bf16.mxu0 %v18310_v41  ;;  %v5953_v41 = vrot.slane %v5944_v38, %v20557_v12 }
 0x32c   : > { %6423 = vmatpush1.bf16.msra.mxu1 %v18347_v21 }
 0x32d   : > { %6424 = vmatprep.subr.bf16.mxu1 %v18355_v23 }
 0x32e   : > { %6384 = vmatpush1.bf16.msra.mxu0 %v18308_v42 }
 0x32f   : > { %6385 = vmatprep.subr.bf16.mxu0 %v18313_v43  ;;  %v5957_v43 = vrot.slane %v5944_v38, %v5956_v39 }
 0x330   : > { %6425 = vmatpush1.bf16.msra.mxu1 %v18353_v25 }
 0x331   : > { %6426 = vmatprep.subr.bf16.mxu1 %v18361_v57 }
 0x332   : > { %6386 = vmatpush1.bf16.msra.mxu0 %v18311_v44 }
 0x333   : > { %6387 = vmatprep.subr.bf16.mxu0 %v18316_v45 }
 0x334   : > { %6427 = vmatpush1.bf16.msra.mxu1 %v18359_v28 }
 0x335   : > { %6680 = vmatprep.subr.bf16.mxu1 %v18364_v29 }
 0x336   : > { %6388 = vmatpush1.bf16.msra.mxu0 %v18314_v50 }
 0x337   : > { %6389 = vmatprep.subr.bf16.mxu0 %v18319_v52 }
 0x33a   : > { %6390 = vmatpush1.bf16.msra.mxu0 %v18317_v53 }
 0x33b   : > { %6391 = vmatprep.subr.bf16.mxu0 %v18322_v15 }
 0x33e   : > { %6392 = vmatpush1.bf16.msra.mxu0 %v18320_v54 }
 0x33f   : > { %6393 = vmatprep.subr.bf16.mxu0 %v18325_v55 }
 0x342   : > { %6394 = vmatpush1.bf16.msra.mxu0 %v18323_v56  ;;  %v15650_v56 = vld [vmem:[%s25060_s4 + $0x1] ss:$4 sm:$0x7] }
 0x343   : > { %6395 = vmatprep.subr.bf16.mxu0 %v18328_v58  ;;  %v15651_v58 = vld [vmem:[%s25060_s4 + $0x2] ss:$4 sm:$0x7]  ;;  %v5979_v59 = vrot.slane %v15650_v56, %v20554_v11  ;;  %v5987_v0 = vrot.slane %v15650_v56, %v5956_v39 }
 0x344   : > { %v6003_v61 = vrot.slane %v15651_v58, %v20554_v11 }
 0x346   : > { %6396 = vmatpush1.bf16.msra.mxu0 %v18326_v60  ;;  %v5983_v60 = vrot.slane %v15650_v56, %v20557_v12 }
 0x347   : > { %6397 = vmatprep.subr.bf16.mxu0 %v18334_v63 }
 0x34a   : > { %6398 = vmatpush1.bf16.msra.mxu0 %v18332_v1  ;;  %v6007_v1 = vrot.slane %v15651_v58, %v20557_v12 }
 0x34b   : > { %6399 = vmatprep.subr.bf16.mxu0 %v18340_v3 }
 0x34e   : > { %6400 = vmatpush1.bf16.msra.mxu0 %v18338_v9 }
 0x34f   : > { %6401 = vmatprep.subr.bf16.mxu0 %v18346_v6 }
 0x352   : > { %6402 = vmatpush1.bf16.msra.mxu0 %v18344_v20 }
 0x353   : > { %6403 = vmatprep.subr.bf16.mxu0 %v18352_v22 }
 0x355   : > { %v4823_v46 = vpop.f32.mrb[24].mxu1 }
 0x356   : > { %v4832_v47 = vadd.f32 %v4823_v46, %v4457_v27  ;;  %v4825_v48 = vpop.f32.mrb[25].mxu1  ;;  %6404 = vmatpush1.bf16.msra.mxu0 %v18350_v24  ;;  %v18356_v27 = vld [vmem:[%s25061_s5 + $0x250] ss:$8 sps:$4 sm:$0xff]  }
 0x357   : > { %v4826_v49 = vpop.f32.mrb[26].mxu1  ;;  %6405 = vmatprep.subr.bf16.mxu0 %v18358_v26 }
 0x358   : > { %v4835_v51 = vadd.f32 %v4826_v49, %v4460_v30  ;;  %v4828_v5 = vpop.f32.mrb[27].mxu1  ;;  %v18367_v30 = vld [vmem:[%s25061_s5 + $0x104] ss:$8 sps:$4 sm:$0xff]  }
 0x35a   : > { %6406 = vmatpush1.bf16.msra.mxu0 %v18356_v27 }
 0x35b   : > { %6721 = vmatprep.subr.bf16.mxu0 %v18367_v30 }
 0x389   : > { %v5196_v7 = vpop.f32.mrb[28].mxu1 }
 0x38a   : > { %v5205_v14 = vadd.f32 %v5196_v7, %v4832_v47  ;;  %v5198_v16 = vpop.f32.mrb[29].mxu1  ;;  %v6011_v7 = vrot.slane %v15651_v58, %v5956_v39 }
 0x38b   : > { %v5199_v18 = vpop.f32.mrb[30].mxu1 }
 0x38c   : > { %v5208_v10 = vadd.f32 %v5199_v18, %v4835_v51  ;;  %v5201_v19 = vpop.f32.mrb[31].mxu1 }
 0x3bd   : > { %v5573_v31 = vpop.f32.mrb[32].mxu1 }
 0x3be   : > { %v5582_v32 = vadd.f32 %v5573_v31, %v5205_v14  ;;  %v5575_v33 = vpop.f32.mrb[33].mxu1 }
 0x3bf   : > { %v5576_v34 = vpop.f32.mrb[34].mxu1 }
 0x3c0   : > { %v5585_v36 = vadd.f32 %v5576_v34, %v5208_v10  ;;  %v5578_v37 = vpop.f32.mrb[35].mxu1 }
 0x3f0   : > { %v5888_v42 = vpop.f32.mrb[8].mxu0 }
 0x3f1   : > { %v5961_v44 = vadd.f32 %v5949_v40, %v5888_v42  ;;  %v5931_v45 = vpop.f32.mrb[36].mxu1  ;;  %v5890_v46 = vpop.f32.mrb[9].mxu0 }
 0x3f2   : > { %v5940_v47 = vadd.f32 %v5931_v45, %v5582_v32  ;;  %v5962_v48 = vadd.f32 %v5953_v41, %v5890_v46  ;;  %v5933_v49 = vpop.f32.mrb[37].mxu1  ;;  %v5892_v50 = vpop.f32.mrb[10].mxu0 }
 0x3f3   : > { %19780 = vtanh.f32 %v5961_v44  ;;  %v5964_v51 = vadd.f32 %v5949_v40, %v5892_v50  ;;  %v5934_v5 = vpop.f32.mrb[38].mxu1  ;;  %v5894_v52 = vpop.f32.mrb[11].mxu0  ;;  %v18365_v49 = vld [vmem:[%s25061_s5 + $0x100] ss:$8 sps:$4 sm:$0xff]  }
 0x3f4   : > { %v5963_v53 = vadd.f32 %v5957_v43, %v5940_v47  ;;  %19782 = vtanh.f32 %v5962_v48  ;;  %v5943_v8 = vadd.f32 %v5934_v5, %v5585_v36  ;;  %v5965_v15 = vadd.f32 %v5953_v41, %v5894_v52  ;;  %v5936_v54 = vpop.f32.mrb[39].mxu1 }
 0x3f5   : > { %19784 = vtanh.f32 %v5964_v51 }
 0x3f6   : > { %19786 = vtanh.f32 %v5963_v53  ;;  %v5966_v55 = vadd.f32 %v5957_v43, %v5943_v8 }
 0x3f7   : > { %19788 = vtanh.f32 %v5965_v15 }
 0x3f8   : > { %19790 = vtanh.f32 %v5966_v55 }
 0x3fd   : > { %v19781_v63 = vpop.eup %19780 }
 0x3fe   : > { %v19783_v2 = vpop.eup %19782  ;;  %v5991_v3 = vmul.f32 %v19781_v63, %v5979_v59 }
 0x3ff   : > { %v19785_v4 = vpop.eup %19784  ;;  %v5992_v9 = vmul.f32 %v19783_v2, %v5983_v60 }
 0x400   : > { %v19787_v13 = vpop.eup %19786  ;;  %v6015_v14 = vadd.f32 %v6003_v61, %v5991_v3  ;;  %v5994_v16 = vmul.f32 %v19785_v4, %v5979_v59  ;;  %v18362_v59 = vld [vmem:[%s25061_s5] ss:$8 sps:$4 sm:$0xff]  }
 0x401   : > { %v19789_v6 = vpop.eup %19788  ;;  %v5993_v17 = vmul.f32 %v19787_v13, %v5987_v0  ;;  %v6016_v18 = vadd.f32 %v6007_v1, %v5992_v9 }
 0x402   : > { %v19791_v10 = vpop.eup %19790  ;;  %6021 = vst [vmem:[#allocation3] sm:$0xff] %v6015_v14  ;;  %v6018_v19 = vadd.f32 %v6003_v61, %v5994_v16  ;;  %v5995_v20 = vmul.f32 %v19789_v6, %v5983_v60  ;;  %v18368_v14 = vld [vmem:[%s25061_s5 + $0x10] ss:$8 sps:$4 sm:$0xff]  }
 0x403   : > { %v6017_v21 = vadd.f32 %v6011_v7, %v5993_v17  ;;  %6022 = vst [vmem:[#allocation3 + $0x8] sm:$0xff] %v6016_v18  ;;  %v5996_v22 = vmul.f32 %v19791_v10, %v5987_v0  ;;  %v18370_v0 = vld [vmem:[%s25061_s5 + $0x14] ss:$8 sps:$4 sm:$0xff]   ;;  %v18371_v6 = vld [vmem:[%s25061_s5 + $0x110] ss:$8 sps:$4 sm:$0xff]  }
 0x404   : > { %6024 = vst [vmem:[#allocation3 + $0x18] sm:$0xf] %v6018_v19  ;;  %v6019_v23 = vadd.f32 %v6007_v1, %v5995_v20  ;;  %v18379_v17 = vld [vmem:[%s25061_s5 + $0x124] ss:$8 sps:$4 sm:$0xff]  }
 0x405   : > { %6023 = vst [vmem:[#allocation3 + $0x10] sm:$0xff] %v6017_v21  ;;  %v6020_v24 = vadd.f32 %v6011_v7, %v5996_v22  ;;  %v18373_v7 = vld [vmem:[%s25061_s5 + $0x114] ss:$8 sps:$4 sm:$0xff]   ;;  %v18376_v22 = vld [vmem:[%s25061_s5 + $0x24] ss:$8 sps:$4 sm:$0xff]  }
 0x406   : > { %6025 = vst [vmem:[#allocation3 + $0x20] sm:$0xf] %v6019_v23 }
 0x407   : > { %6026 = vst [vmem:[#allocation3 + $0x28] sm:$0xf] %v6020_v24 }
 0x409   : > { %v10320_v25 = vld [vmem:[#allocation3] sm:$0x6]  ;;  %v11398_v13 = vld [vmem:[#allocation3] sm:$0x18] }
 0x40a   : > { %v6077_v26 = vld [vmem:[#allocation3] sm:$0x6]  ;;  %v10323_v57 = vpack.c.bf16 %v10320_v25, %v10320_v25  ;;  %v10321_v27 = vld [vmem:[#allocation3 + $0x8] sm:$0x6]  ;;  %v11399_v20 = vld [vmem:[#allocation3 + $0x8] sm:$0x18]  ;;  %v11401_v25 = vpack.c.bf16 %v11398_v13, %v11398_v13 }
 0x40b   : > { %v6078_v28 = vld [vmem:[#allocation3 + $0x8] sm:$0x6]  ;;  %v6080_v29 = vpack.c.bf16 %v6077_v26, %v6077_v26  ;;  %v10324_v30 = vpack.c.bf16 %v10321_v27, %v10321_v27  ;;  %v10270_v9 = vld [vmem:[#allocation3] sm:$0x3]  ;;  %v18374_v26 = vld [vmem:[%s25061_s5 + $0x20] ss:$8 sps:$4 sm:$0xff]  }
 0x40c   : > { %v6081_v31 = vpack.c.bf16 %v6078_v28, %v6078_v28  ;;  %v10373_v32 = vshll.u32 %v10323_v57, 16  ;;  %v6079_v34 = vld [vmem:[#allocation3 + $0x10] sm:$0x6]  ;;  %v10371_v36 = vshrl.u32 %v10323_v57, 16  ;;  %v11400_v15 = vld [vmem:[#allocation3 + $0x10] sm:$0x18]  ;;  %v10273_v21 = vpack.c.bf16 %v10270_v9, %v10270_v9 }
 0x40d   : > { %v6131_v33 = vshll.u32 %v6080_v29, 16  ;;  %v10380_v37 = vshll.u32 %v10324_v30, 16  ;;  %v10378_v40 = vshrl.u32 %v10324_v30, 16  ;;  %v6082_v42 = vpack.c.bf16 %v6079_v34, %v6079_v34  ;;  %v10322_v43 = vld [vmem:[#allocation3 + $0x10] sm:$0x6] }
 0x40e   : > { %v6138_v38 = vshll.u32 %v6081_v31, 16  ;;  %v10375_v39 = vrot.slane %v10373_v32, 1  ;;  %v6136_v45 = vshrl.u32 %v6081_v31, 16  ;;  %v10325_v47 = vpack.c.bf16 %v10322_v43, %v10322_v43  ;;  %v10272_v53 = vld [vmem:[#allocation3 + $0x10] sm:$0x3] }
 0x40f   : > { %v6133_v41 = vrot.slane %v6131_v33, 1  ;;  %v10382_v44 = vrot.slane %v10380_v37, 1  ;;  %v6129_v50 = vshrl.u32 %v6080_v29, 16  ;;  %v6145_v51 = vshll.u32 %v6082_v42, 16  ;;  %v6028_v58 = vld [vmem:[#allocation3 + $0x8] sm:$0x3] }
 0x410   : > { %v6140_v46 = vrot.slane %v6138_v38, 1  ;;  %v10376_v48 = vor.u32 %v10375_v39, %v10371_v36  ;;  %v10387_v8 = vshll.u32 %v10325_v47, 16  ;;  %v6143_v55 = vshrl.u32 %v6082_v42, 16  ;;  %v11027_v2 = vld [vmem:[#allocation3 + $0x10] sm:$0xc] }
 0x411   : > { %v10383_v5 = vor.u32 %v10382_v44, %v10378_v40  ;;  %v6134_v54 = vor.u32 %v6133_v41, %v6129_v50  ;;  %v6147_v56 = vrot.slane %v6145_v51, 1  ;;  %v10275_v63 = vpack.c.bf16 %v10272_v53, %v10272_v53  ;;  %v10271_v18 = vld [vmem:[#allocation3 + $0x8] sm:$0x3]  ;;  %v11026_v19 = vld [vmem:[#allocation3 + $0x8] sm:$0xc] }
 0x412   : > { %v6141_v52 = vor.u32 %v6140_v46, %v6136_v45  ;;  %10391 = vrot.lane.b32.xlu1 %v10376_v48, %s19880_s13  ;;  %v10389_v60 = vrot.slane %v10387_v8, 1  ;;  %v10385_v1 = vshrl.u32 %v10325_v47, 16  ;;  %v11403_v3 = vpack.c.bf16 %v11400_v15, %v11400_v15  ;;  %v18377_v27 = vld [vmem:[%s25061_s5 + $0x120] ss:$8 sps:$4 sm:$0xff]   ;;  %v18385_v31 = vld [vmem:[%s25061_s5 + $0x134] ss:$8 sps:$4 sm:$0xff]  }
 0x413   : > { %10393 = vrot.lane.b32.xlu0 %v10383_v5, %s19880_s13  ;;  %v6148_v61 = vor.u32 %v6147_v56, %v6143_v55  ;;  %v6031_v4 = vpack.c.bf16 %v6028_v58, %v6028_v58  ;;  %v11030_v10 = vpack.c.bf16 %v11027_v2, %v11027_v2  ;;  %v10274_v57 = vpack.c.bf16 %v10271_v18, %v10271_v18  ;;  %v11025_v32 = vld [vmem:[#allocation3] sm:$0xc]  ;;  %v18382_v33 = vld [vmem:[%s25061_s5 + $0x34] ss:$8 sps:$4 sm:$0xff]   ;;  %v12164_v44 = vld [vmem:[#allocation3 + $0x10] sm:$0x60] }
 0x414   : > { %6407 = vmatprep.mubr.bf16.mxu0 %v6141_v52  ;;  %v10390_v16 = vor.u32 %v10389_v60, %v10385_v1  ;;  %v11465_v23 = vshrl.u32 %v11403_v3, 16  ;;  %v11468_v24 = vshll.u32 %v11403_v3, 16  ;;  %v11029_v28 = vpack.c.bf16 %v11026_v19, %v11026_v19  ;;  %v18383_v39 = vld [vmem:[%s25061_s5 + $0x130] ss:$8 sps:$4 sm:$0xff]   ;;  %v18391_v46 = vld [vmem:[%s25061_s5 + $0x144] ss:$8 sps:$4 sm:$0xff]  }
 0x415   : > { %6408 = vmatmul.mubr.bf16.vlgmr.msra.gmra.mrb[12].mxu0 %v6134_v54  ;;  %15740 = vmatmul.mubr.msk.bf16.vlgmr.msra.gmra.mrb[40].mxu1 %vm6371_vm15, %v6148_v61  ;;  %v11402_v29 = vpack.c.bf16 %v11399_v20, %v11399_v20  ;;  %v11080_v30 = vrot.slane %v11030_v10, 1  ;;  %v11449_v37 = vshrl.u32 %v11401_v25, 16  ;;  %v11452_v38 = vshll.u32 %v11401_v25, 16  ;;  %v18380_v45 = vld [vmem:[%s25061_s5 + $0x30] ss:$8 sps:$4 sm:$0xff]  }
 0x416   : > { %6722 = vmatpush1.bf16.msra.mxu0 %v18365_v49  ;;  %6753 = vmatprep.mubr.bf16.mxu0 %v19878_v35  ;;  %v11467_v34 = vrot.slane %v11465_v23, 1  ;;  %v11470_v36 = vrot.slane %v11468_v24, 2  ;;  %v11079_v40 = vrot.slane %v11029_v28, 1  ;;  %v11028_v41 = vpack.c.bf16 %v11025_v32, %v11025_v32  ;;  %v18388_v48 = vld [vmem:[%s25061_s5 + $0x44] ss:$8 sps:$4 sm:$0xff]  }
 0x417   : > { %10714 = vrot.lane.b32.xlu1 %v10275_v63, %s19880_s13  ;;  %6681 = vmatpush1.bf16.msra.mxu1 %v18362_v59  ;;  %v11457_v42 = vshrl.u32 %v11402_v29, 16  ;;  %v11460_v43 = vshll.u32 %v11402_v29, 16  ;;  %v11451_v49 = vrot.slane %v11449_v37, 1  ;;  %v11454_v50 = vrot.slane %v11452_v38, 2  ;;  %v18386_v51 = vld [vmem:[%s25061_s5 + $0x40] ss:$8 sps:$4 sm:$0xff]  }
 0x418   : > { %6712 = vmatprep.mubr.bf16.mxu1 %v6031_v4  ;;  %6682 = vmatprep.subr.bf16.mxu1 %v18370_v0  ;;  %v11471_v47 = vor.u32 %v11470_v36, %v11467_v34  ;;  %v18389_v5 = vld [vmem:[%s25061_s5 + $0x140] ss:$8 sps:$4 sm:$0xff]   ;;  %v11791_v52 = vld [vmem:[#allocation3 + $0x10] sm:$0x30]  ;;  %v12167_v53 = vpack.c.bf16 %v12164_v44, %v12164_v44  ;;  %v11078_v8 = vrot.slane %v11028_v41, 1 }
 0x419   : > { %10395 = vrot.lane.b32.xlu0 %v10390_v16, %s19880_s13  ;;  %6723 = vmatprep.subr.bf16.mxu0 %v18373_v7  ;;  %v11459_v15 = vrot.slane %v11457_v42, 1  ;;  %v11462_v54 = vrot.slane %v11460_v43, 2  ;;  %v12162_v55 = vld [vmem:[#allocation3] sm:$0x60]  ;;  %v11790_v58 = vld [vmem:[#allocation3 + $0x8] sm:$0x30]  ;;  %v11455_v60 = vor.u32 %v11454_v50, %v11451_v49  ;;  %v11794_v63 = vpack.c.bf16 %v11791_v52, %v11791_v52 }
 0x41a   : > { %6724 = vmatpush1.bf16.msra.mxu0 %v18371_v6  ;;  %v18397_v56 = vld [vmem:[%s25061_s5 + $0x154] ss:$8 sps:$4 sm:$0xff]   ;;  %v6763_v0 = vld [vmem:[#allocation3 + $0x8] sm:$0xc]  ;;  %v12229_v1 = vshrl.u32 %v12167_v53, 16  ;;  %v12232_v2 = vshll.u32 %v12167_v53, 16  ;;  %v12165_v3 = vpack.c.bf16 %v12162_v55, %v12162_v55  ;;  %v11793_v9 = vpack.c.bf16 %v11790_v58, %v11790_v58 }
 0x41b   : > { %10710 = vrot.lane.b32.xlu1 %v10273_v21, %s19880_s13  ;;  %6683 = vmatpush1.bf16.msra.mxu1 %v18368_v14  ;;  %v12163_v59 = vld [vmem:[#allocation3 + $0x8] sm:$0x60]  ;;  %v11463_v4 = vor.u32 %v11462_v54, %v11459_v15  ;;  %v18395_v7 = vld [vmem:[%s25061_s5 + $0x150] ss:$8 sps:$4 sm:$0xff]   ;;  %v18403_v16 = vld [vmem:[%s25061_s5 + $0x2c4] ss:$8 sps:$4 sm:$0xff]   ;;  %v6766_v19 = vpack.c.bf16 %v6763_v0, %v6763_v0 }
 0x41c   : > { %6725 = vmatprep.subr.bf16.mxu0 %v18379_v17  ;;  %6684 = vmatprep.subr.bf16.mxu1 %v18376_v22  ;;  %v18394_v61 = vld [vmem:[%s25061_s5 + $0x54] ss:$8 sps:$4 sm:$0xff]   ;;  %v12166_v13 = vpack.c.bf16 %v12163_v59, %v12163_v59  ;;  %v18392_v14 = vld [vmem:[%s25061_s5 + $0x50] ss:$8 sps:$4 sm:$0xff]   ;;  %v11844_v17 = vrot.slane %v11794_v63, 2  ;;  %v12231_v21 = vrot.slane %v12229_v1, 2 }
 0x41d   : > { %10712 = vrot.lane.b32.xlu0 %v10274_v57, %s19880_s13  ;;  %v11789_v6 = vld [vmem:[#allocation3] sm:$0x30]  ;;  %v18400_v18 = vld [vmem:[%s25061_s5 + $0x64] ss:$8 sps:$4 sm:$0xff]   ;;  %v6029_v10 = vld [vmem:[#allocation3 + $0x10] sm:$0x3] }
 0x41e   : > { %6726 = vmatpush1.bf16.msra.mxu0 %v18377_v27  ;;  %v18401_v20 = vld [vmem:[%s25061_s5 + $0x2c0] ss:$8 sps:$4 sm:$0xff]   ;;  %v12234_v22 = vrot.slane %v12232_v2, 3  ;;  %v12213_v23 = vshrl.u32 %v12165_v3, 16  ;;  %v12216_v24 = vshll.u32 %v12165_v3, 16  ;;  %v11843_v25 = vrot.slane %v11793_v9, 2 }
 0x41f   : > { %11085 = vrot.lane.b32.xlu1 %v11080_v30, %s19880_s13  ;;  %6685 = vmatpush1.bf16.msra.mxu1 %v18374_v26  ;;  %v11792_v26 = vpack.c.bf16 %v11789_v6, %v11789_v6  ;;  %v12221_v57 = vshrl.u32 %v12166_v13, 16  ;;  %v12224_v27 = vshll.u32 %v12166_v13, 16  ;;  %v12931_v28 = vld [vmem:[#allocation3 + $0x28] sm:$0x1]  ;;  %v18398_v29 = vld [vmem:[%s25061_s5 + $0x60] ss:$8 sps:$4 sm:$0xff]   ;;  %v6032_v30 = vpack.c.bf16 %v6029_v10, %v6029_v10 }
 0x420   : > { %6727 = vmatprep.subr.bf16.mxu0 %v18385_v31  ;;  %6686 = vmatprep.subr.bf16.mxu1 %v18382_v33  ;;  %v18406_v31 = vld [vmem:[%s25061_s5 + $0x74] ss:$8 sps:$4 sm:$0xff]   ;;  %v6817_v32 = vrot.slane %v6766_v19, 1  ;;  %v18407_v33 = vld [vmem:[%s25061_s5 + $0x2d0] ss:$8 sps:$4 sm:$0xff]   ;;  %v12235_v36 = vor.u32 %v12234_v22, %v12231_v21  ;;  %v12215_v38 = vrot.slane %v12213_v23, 2 }
 0x421   : > { %11083 = vrot.lane.b32.xlu0 %v11079_v40, %s19880_s13  ;;  %v12928_v34 = vld [vmem:[#allocation3 + $0x10] sm:$0x80]  ;;  %v18409_v37 = vld [vmem:[%s25061_s5 + $0x2d4] ss:$8 sps:$4 sm:$0xff]   ;;  %v11842_v42 = vrot.slane %v11792_v26, 2  ;;  %v12223_v43 = vrot.slane %v12221_v57, 2 }
 0x422   : > { %6728 = vmatpush1.bf16.msra.mxu0 %v18383_v39  ;;  %v12218_v39 = vrot.slane %v12216_v24, 3  ;;  %v12555_v40 = vld [vmem:[#allocation3 + $0x10] sm:$0xc0]  ;;  %v12934_v41 = vpack.c.bf16 %v12931_v28, %v12928_v34  ;;  %v12226_v44 = vrot.slane %v12224_v27, 3  ;;  %v12926_v50 = vld [vmem:[#allocation3] sm:$0x80] }
 0x423   : > { %11476 = vrot.lane.b32.xlu1 %v11471_v47, %s19880_s13  ;;  %6687 = vmatpush1.bf16.msra.mxu1 %v18380_v45  ;;  %v12929_v45 = vld [vmem:[#allocation3 + $0x18] sm:$0x1]  ;;  %v12554_v47 = vld [vmem:[#allocation3 + $0x8] sm:$0xc0]  ;;  %v12558_v49 = vpack.c.bf16 %v12555_v40, %v12555_v40  ;;  %v18415_v52 = vld [vmem:[%s25061_s5 + $0x2e4] ss:$8 sps:$4 sm:$0xff]  }
 0x424   : > { %6729 = vmatprep.subr.bf16.mxu0 %v18391_v46  ;;  %6688 = vmatprep.subr.bf16.mxu1 %v18388_v48  ;;  %v18404_v46 = vld [vmem:[%s25061_s5 + $0x70] ss:$8 sps:$4 sm:$0xff]   ;;  %v18412_v48 = vld [vmem:[%s25061_s5 + $0x84] ss:$8 sps:$4 sm:$0xff]   ;;  %v12996_v53 = vshrl.u32 %v12934_v41, 16  ;;  %v12932_v15 = vpack.c.bf16 %v12929_v45, %v12926_v50  ;;  %v12227_v54 = vor.u32 %v12226_v44, %v12223_v43 }
 0x425   : > { %11081 = vrot.lane.b32.xlu0 %v11078_v8, %s19880_s13  ;;  %v12999_v8 = vshll.u32 %v12934_v41, 16  ;;  %v18413_v55 = vld [vmem:[%s25061_s5 + $0x2e0] ss:$8 sps:$4 sm:$0xff]   ;;  %v12927_v58 = vld [vmem:[#allocation3 + $0x8] sm:$0x80]  ;;  %v12608_v63 = vrot.slane %v12558_v49, 3 }
 0x426   : > { %6730 = vmatpush1.bf16.msra.mxu0 %v18389_v5  ;;  %v12219_v5 = vor.u32 %v12218_v39, %v12215_v38  ;;  %v18410_v59 = vld [vmem:[%s25061_s5 + $0x80] ss:$8 sps:$4 sm:$0xff]   ;;  %v18418_v0 = vld [vmem:[%s25061_s5 + $0x94] ss:$8 sps:$4 sm:$0xff]   ;;  %v12998_v2 = vrot.slane %v12996_v53, 3 }
 0x427   : > { %11472 = vrot.lane.b32.xlu1 %v11455_v60, %s19880_s13  ;;  %6689 = vmatpush1.bf16.msra.mxu1 %v18386_v51  ;;  %v12930_v51 = vld [vmem:[#allocation3 + $0x20] sm:$0x1]  ;;  %v12553_v60 = vld [vmem:[#allocation3] sm:$0xc0]  ;;  %v13001_v3 = vrot.slane %v12999_v8, 4 }
 0x428   : > { %6731 = vmatprep.subr.bf16.mxu0 %v18397_v56  ;;  %6690 = vmatprep.subr.bf16.mxu1 %v18394_v61  ;;  %v12557_v56 = vpack.c.bf16 %v12554_v47, %v12554_v47  ;;  %v12933_v61 = vpack.c.bf16 %v12930_v51, %v12927_v58  ;;  %v18421_v1 = vld [vmem:[%s25061_s5 + $0x2f4] ss:$8 sps:$4 sm:$0xff]   ;;  %v18419_v13 = vld [vmem:[%s25061_s5 + $0x2f0] ss:$8 sps:$4 sm:$0xff]   ;;  %v18424_v10 = vld [vmem:[%s25061_s5 + $0xa4] ss:$8 sps:$4 sm:$0xff]  }
 0x429   : > { %11474 = vrot.lane.b32.xlu0 %v11463_v4, %s19880_s13  ;;  %v12980_v4 = vshrl.u32 %v12932_v15, 16  ;;  %v18416_v6 = vld [vmem:[%s25061_s5 + $0x90] ss:$8 sps:$4 sm:$0xff]   ;;  %v13002_v19 = vor.u32 %v13001_v3, %v12998_v2  ;;  %v13690_v26 = vld [vmem:[#allocation3 + $0x18] sm:$0x6] }
 0x42a   : > { %6732 = vmatpush1.bf16.msra.mxu0 %v18395_v7  ;;  %v12983_v7 = vshll.u32 %v12932_v15, 16  ;;  %v12607_v9 = vrot.slane %v12557_v56, 3  ;;  %v18422_v57 = vld [vmem:[%s25061_s5 + $0xa0] ss:$8 sps:$4 sm:$0xff]   ;;  %v13693_v34 = vpack.c.bf16 %v13690_v26, %v13690_v26  ;;  %v18428_v38 = vld [vmem:[%s25061_s5 + $0xb0] ss:$8 sps:$4 sm:$0xff]  }
 0x42b   : > { %11849 = vrot.lane.b32.xlu1 %v11844_v17, %s19880_s13  ;;  %6691 = vmatpush1.bf16.msra.mxu1 %v18392_v14  ;;  %v12556_v14 = vpack.c.bf16 %v12553_v60, %v12553_v60  ;;  %v12988_v17 = vshrl.u32 %v12933_v61, 16  ;;  %v12982_v21 = vrot.slane %v12980_v4, 3  ;;  %v18436_v41 = vld [vmem:[%s25061_s5 + $0xc4] ss:$8 sps:$4 sm:$0xff]   ;;  %v13321_v43 = vld [vmem:[#allocation3 + $0x20] sm:$0x3] }
 0x42c   : > { %7044 = vmatprep.subr.bf16.mxu0 %v18403_v16  ;;  %6692 = vmatprep.subr.bf16.mxu1 %v18400_v18  ;;  %v13692_v16 = vld [vmem:[#allocation3 + $0x28] sm:$0x6]  ;;  %v12991_v18 = vshll.u32 %v12933_v61, 16  ;;  %v12985_v22 = vrot.slane %v12983_v7, 4  ;;  %v18437_v47 = vld [vmem:[%s25061_s5 + $0x320] ss:$8 sps:$4 sm:$0xff]   ;;  %v13324_v49 = vpack.c.bf16 %v13321_v43, %v13321_v43 }
 0x42d   : > { %11847 = vrot.lane.b32.xlu0 %v11843_v25, %s19880_s13  ;;  %15785 = vmatmul.mubr.msk.bf16.vlgmr.msra.gmra.mrb[16].mxu0 %vm6371_vm15, %v6032_v30  ;;  %v13695_v23 = vpack.c.bf16 %v13692_v16, %v13692_v16  ;;  %v12606_v24 = vrot.slane %v12556_v14, 3  ;;  %v18425_v25 = vld [vmem:[%s25061_s5 + $0x300] ss:$8 sps:$4 sm:$0xff]   ;;  %v12990_v27 = vrot.slane %v12988_v17, 3  ;;  %v18433_v30 = vld [vmem:[%s25061_s5 + $0x314] ss:$8 sps:$4 sm:$0xff]  }
 0x42e   : > { %7045 = vmatpush1.bf16.msra.mxu0 %v18401_v20  ;;  %7076 = vmatprep.mubr.bf16.mxu0 %v6817_v32  ;;  %v18427_v20 = vld [vmem:[%s25061_s5 + $0x304] ss:$8 sps:$4 sm:$0xff]   ;;  %v12993_v28 = vrot.slane %v12991_v18, 4  ;;  %v12986_v32 = vor.u32 %v12985_v22, %v12982_v21  ;;  %v13320_v53 = vld [vmem:[#allocation3 + $0x18] sm:$0x3] }
 0x42f   : > { %6693 = vmatpush1.bf16.msra.mxu1 %v18398_v29  ;;  %12240 = vrot.lane.b32.xlu1 %v12235_v36, %s19880_s13  ;;  %v18430_v29 = vld [vmem:[%s25061_s5 + $0xb4] ss:$8 sps:$4 sm:$0xff]   ;;  %v18431_v36 = vld [vmem:[%s25061_s5 + $0x310] ss:$8 sps:$4 sm:$0xff]   ;;  %v13755_v50 = vshrl.u32 %v13695_v23, 16  ;;  %v13323_v58 = vpack.c.bf16 %v13320_v53, %v13320_v53 }
 0x430   : > { %6694 = vmatprep.subr.bf16.mxu1 %v18406_v31  ;;  %7046 = vmatprep.subr.bf16.mxu0 %v18409_v37  ;;  %v13691_v31 = vld [vmem:[#allocation3 + $0x20] sm:$0x6]  ;;  %v13322_v37 = vld [vmem:[#allocation3 + $0x28] sm:$0x3]  ;;  %v12994_v39 = vor.u32 %v12993_v28, %v12990_v27  ;;  %v18448_v61 = vld [vmem:[%s25061_s5 + $0xe4] ss:$8 sps:$4 sm:$0xff]  }
 0x431   : > { %11845 = vrot.lane.b32.xlu0 %v11842_v42, %s19880_s13  ;;  %v13694_v40 = vpack.c.bf16 %v13691_v31, %v13691_v31  ;;  %v18439_v42 = vld [vmem:[%s25061_s5 + $0x324] ss:$8 sps:$4 sm:$0xff]   ;;  %v13325_v44 = vpack.c.bf16 %v13322_v37, %v13322_v37  ;;  %v18440_v56 = vld [vmem:[%s25061_s5 + $0xd0] ss:$8 sps:$4 sm:$0xff]   ;;  %v18449_v4 = vld [vmem:[%s25061_s5 + $0x340] ss:$8 sps:$4 sm:$0xff]  }
 0x432   : > { %7047 = vmatpush1.bf16.msra.mxu0 %v18407_v33  ;;  %v13757_v33 = vshll.u32 %v13695_v23, 16  ;;  %v18446_v7 = vld [vmem:[%s25061_s5 + $0xe0] ss:$8 sps:$4 sm:$0xff]   ;;  %v18454_v14 = vld [vmem:[%s25061_s5 + $0xf4] ss:$8 sps:$4 sm:$0xff]  }
 0x433   : > { %6695 = vmatpush1.bf16.msra.mxu1 %v18404_v46  ;;  %12236 = vrot.lane.b32.xlu1 %v12219_v5, %s19880_s13  ;;  %v13743_v46 = vshll.u32 %v13693_v34, 16  ;;  %v13750_v51 = vshll.u32 %v13694_v40, 16  ;;  %v18442_v5 = vld [vmem:[%s25061_s5 + $0xd4] ss:$8 sps:$4 sm:$0xff]   ;;  %v13748_v2 = vshrl.u32 %v13694_v40, 16 }
 0x434   : > { %6696 = vmatprep.subr.bf16.mxu1 %v18412_v48  ;;  %7048 = vmatprep.subr.bf16.mxu0 %v18415_v52  ;;  %v13759_v45 = vrot.slane %v13757_v33, 1  ;;  %v18434_v48 = vld [vmem:[%s25061_s5 + $0xc0] ss:$8 sps:$4 sm:$0xff]   ;;  %v18445_v52 = vld [vmem:[%s25061_s5 + $0x334] ss:$8 sps:$4 sm:$0xff]  }
 0x435   : > { %12238 = vrot.lane.b32.xlu0 %v12227_v54, %s19880_s13  ;;  %v13745_v15 = vrot.slane %v13743_v46, 1  ;;  %v18443_v54 = vld [vmem:[%s25061_s5 + $0x330] ss:$8 sps:$4 sm:$0xff]   ;;  %v13752_v60 = vrot.slane %v13750_v51, 1  ;;  %v18457_v16 = vld [vmem:[%s25061_s5 + $0x354] ss:$8 sps:$4 sm:$0xff]  }
 0x436   : > { %7049 = vmatpush1.bf16.msra.mxu0 %v18413_v55  ;;  %v13760_v8 = vor.u32 %v13759_v45, %v13755_v50  ;;  %v14080_v55 = vld [vmem:[#allocation3 + $0x28] sm:$0xc]  ;;  %v18463_v22 = vld [vmem:[%s25061_s5 + $0x3c4] ss:$8 sps:$4 sm:$0xff]   ;;  %v6027_v23 = vld [vmem:[#allocation3] sm:$0x3] }
 0x437   : > { %6697 = vmatpush1.bf16.msra.mxu1 %v18410_v59  ;;  %12613 = vrot.lane.b32.xlu1 %v12608_v63, %s19880_s13  ;;  %v13741_v59 = vshrl.u32 %v13693_v34, 16  ;;  %v18451_v63 = vld [vmem:[%s25061_s5 + $0x344] ss:$8 sps:$4 sm:$0xff]   ;;  %v14083_v3 = vpack.c.bf16 %v14080_v55, %v14080_v55  ;;  %v18455_v18 = vld [vmem:[%s25061_s5 + $0x350] ss:$8 sps:$4 sm:$0xff]   ;;  %v6030_v27 = vpack.c.bf16 %v6027_v23, %v6027_v23 }
 0x438   : > { %6698 = vmatprep.subr.bf16.mxu1 %v18418_v0  ;;  %7050 = vmatprep.subr.bf16.mxu0 %v18421_v1  ;;  %v14079_v0 = vld [vmem:[#allocation3 + $0x20] sm:$0xc]  ;;  %v18469_v28 = vld [vmem:[%s25061_s5 + $0x3d4] ss:$8 sps:$4 sm:$0xff]   ;;  %v18472_v31 = vld [vmem:[%s25061_s5 + $0x384] ss:$8 sps:$4 sm:$0xff]  }
 0x439   : > { %12611 = vrot.lane.b32.xlu0 %v12607_v9, %s19880_s13  ;;  %v13746_v1 = vor.u32 %v13745_v15, %v13741_v59  ;;  %v13753_v9 = vor.u32 %v13752_v60, %v13748_v2  ;;  %v14133_v17 = vrot.slane %v14083_v3, 1  ;;  %v18470_v33 = vld [vmem:[%s25061_s5 + $0x380] ss:$8 sps:$4 sm:$0xff]   ;;  %v18481_v37 = vld [vmem:[%s25061_s5 + $0x3f4] ss:$8 sps:$4 sm:$0xff]  }
 0x43a   : > { %7051 = vmatpush1.bf16.msra.mxu0 %v18419_v13  ;;  %v14082_v13 = vpack.c.bf16 %v14079_v0, %v14079_v0  ;;  %v18473_v34 = vld [vmem:[%s25061_s5 + $0x3e0] ss:$8 sps:$4 sm:$0xff]   ;;  %v18479_v40 = vld [vmem:[%s25061_s5 + $0x3f0] ss:$8 sps:$4 sm:$0xff]   ;;  %v18490_v46 = vld [vmem:[%s25061_s5 + $0x3b4] ss:$8 sps:$4 sm:$0xff]  }
 0x43b   : > { %6699 = vmatpush1.bf16.msra.mxu1 %v18416_v6  ;;  %13007 = vrot.lane.b32.xlu1 %v13002_v19, %s19880_s13  ;;  %v14078_v6 = vld [vmem:[#allocation3 + $0x18] sm:$0xc]  ;;  %v18505_v0 = vld [vmem:[%s25061_s5 + $0x534] ss:$8 sps:$4 sm:$0xff]   ;;  %v18503_v2 = vld [vmem:[%s25061_s5 + $0x530] ss:$8 sps:$4 sm:$0xff]  }
 0x43c   : > { %6700 = vmatprep.subr.bf16.mxu1 %v18424_v10  ;;  %7052 = vmatprep.subr.bf16.mxu0 %v18427_v20  ;;  %v18452_v10 = vld [vmem:[%s25061_s5 + $0xf0] ss:$8 sps:$4 sm:$0xff]   ;;  %v14132_v19 = vrot.slane %v14082_v13, 1  ;;  %v18460_v20 = vld [vmem:[%s25061_s5 + $0x364] ss:$8 sps:$4 sm:$0xff]   ;;  %v14081_v21 = vpack.c.bf16 %v14078_v6, %v14078_v6 }
 0x43d   : > { %12609 = vrot.lane.b32.xlu0 %v12606_v24, %s19880_s13  ;;  %v18458_v24 = vld [vmem:[%s25061_s5 + $0x360] ss:$8 sps:$4 sm:$0xff]   ;;  %v18500_v3 = vld [vmem:[%s25061_s5 + $0x430] ss:$8 sps:$4 sm:$0xff]   ;;  %v18529_v23 = vld [vmem:[%s25061_s5 + $0x574] ss:$8 sps:$4 sm:$0xff]  }
 0x43e   : > { %7053 = vmatpush1.bf16.msra.mxu0 %v18425_v25  ;;  %v18461_v25 = vld [vmem:[%s25061_s5 + $0x3c0] ss:$8 sps:$4 sm:$0xff]   ;;  %v14131_v26 = vrot.slane %v14081_v21, 1 }
 0x43f   : > { %6701 = vmatpush1.bf16.msra.mxu1 %v18422_v57  ;;  %13003 = vrot.lane.b32.xlu1 %v12986_v32, %s19880_s13  ;;  %v18466_v57 = vld [vmem:[%s25061_s5 + $0x374] ss:$8 sps:$4 sm:$0xff]   ;;  %v18475_v32 = vld [vmem:[%s25061_s5 + $0x3e4] ss:$8 sps:$4 sm:$0xff]   ;;  %v18485_v45 = vld [vmem:[%s25061_s5 + $0x400] ss:$8 sps:$4 sm:$0xff]  }
 0x440   : > { %6702 = vmatprep.subr.bf16.mxu1 %v18430_v29  ;;  %7054 = vmatprep.subr.bf16.mxu0 %v18433_v30  ;;  %v18464_v29 = vld [vmem:[%s25061_s5 + $0x370] ss:$8 sps:$4 sm:$0xff]   ;;  %v18494_v60 = vld [vmem:[%s25061_s5 + $0x420] ss:$8 sps:$4 sm:$0xff]  }
 0x441   : > { %13005 = vrot.lane.b32.xlu0 %v12994_v39, %s19880_s13  ;;  %v18467_v30 = vld [vmem:[%s25061_s5 + $0x3d0] ss:$8 sps:$4 sm:$0xff]   ;;  %v18506_v13 = vld [vmem:[%s25061_s5 + $0x440] ss:$8 sps:$4 sm:$0xff]  }
 0x442   : > { %7055 = vmatpush1.bf16.msra.mxu0 %v18431_v36  ;;  %v18478_v36 = vld [vmem:[%s25061_s5 + $0x394] ss:$8 sps:$4 sm:$0xff]   ;;  %v7130_v6 = vld [vmem:[#allocation3 + $0x10] sm:$0x18] }
 0x443   : > { %6703 = vmatpush1.bf16.msra.mxu1 %v18428_v38  ;;  %13377 = vrot.lane.b32.xlu1 %v13325_v44, %s19880_s13  ;;  %v18476_v38 = vld [vmem:[%s25061_s5 + $0x390] ss:$8 sps:$4 sm:$0xff]   ;;  %v18482_v44 = vld [vmem:[%s25061_s5 + $0x3a0] ss:$8 sps:$4 sm:$0xff]  }
 0x444   : > { %6704 = vmatprep.subr.bf16.mxu1 %v18436_v41  ;;  %7056 = vmatprep.subr.bf16.mxu0 %v18439_v42  ;;  %v7129_v39 = vld [vmem:[#allocation3 + $0x8] sm:$0x18]  ;;  %v18484_v41 = vld [vmem:[%s25061_s5 + $0x3a4] ss:$8 sps:$4 sm:$0xff]   ;;  %v18521_v21 = vld [vmem:[%s25061_s5 + $0x560] ss:$8 sps:$4 sm:$0xff]  }
 0x445   : > { %13375 = vrot.lane.b32.xlu0 %v13324_v49, %s19880_s13  ;;  %v18487_v42 = vld [vmem:[%s25061_s5 + $0x404] ss:$8 sps:$4 sm:$0xff]   ;;  %v7132_v43 = vpack.c.bf16 %v7129_v39, %v7129_v39  ;;  %v6764_v49 = vld [vmem:[#allocation3 + $0x10] sm:$0xc] }
 0x446   : > { %7057 = vmatpush1.bf16.msra.mxu0 %v18437_v47  ;;  %v18493_v47 = vld [vmem:[%s25061_s5 + $0x414] ss:$8 sps:$4 sm:$0xff]   ;;  %v6767_v15 = vpack.c.bf16 %v6764_v49, %v6764_v49  ;;  %v18545_v49 = vld [vmem:[%s25061_s5 + $0x5a0] ss:$8 sps:$4 sm:$0xff]  }
 0x447   : > { %6705 = vmatpush1.bf16.msra.mxu1 %v18434_v48  ;;  %13765 = vrot.lane.b32.xlu1 %v13760_v8, %s19880_s13  ;;  %v6762_v48 = vld [vmem:[#allocation3] sm:$0xc]  ;;  %v7188_v50 = vshrl.u32 %v7132_v43, 16  ;;  %v7191_v51 = vshll.u32 %v7132_v43, 16  ;;  %v18499_v8 = vld [vmem:[%s25061_s5 + $0x524] ss:$8 sps:$4 sm:$0xff]  }
 0x448   : > { %6706 = vmatprep.subr.bf16.mxu1 %v18442_v5  ;;  %7058 = vmatprep.subr.bf16.mxu0 %v18445_v52  ;;  %v18488_v5 = vld [vmem:[%s25061_s5 + $0x3b0] ss:$8 sps:$4 sm:$0xff]   ;;  %v6765_v53 = vpack.c.bf16 %v6762_v48, %v6762_v48 }
 0x449   : > { %13373 = vrot.lane.b32.xlu0 %v13323_v58, %s19880_s13  ;;  %v18491_v52 = vld [vmem:[%s25061_s5 + $0x410] ss:$8 sps:$4 sm:$0xff]   ;;  %v7190_v55 = vrot.slane %v7188_v50, 1  ;;  %v18497_v58 = vld [vmem:[%s25061_s5 + $0x520] ss:$8 sps:$4 sm:$0xff]  }
 0x44a   : > { %7059 = vmatpush1.bf16.msra.mxu0 %v18443_v54  ;;  %v18496_v54 = vld [vmem:[%s25061_s5 + $0x424] ss:$8 sps:$4 sm:$0xff]   ;;  %v6816_v59 = vrot.slane %v6765_v53, 1  ;;  %v18542_v50 = vld [vmem:[%s25061_s5 + $0x4a0] ss:$8 sps:$4 sm:$0xff]  }
 0x44b   : > { %6707 = vmatpush1.bf16.msra.mxu1 %v18440_v56  ;;  %13761 = vrot.lane.b32.xlu1 %v13746_v1, %s19880_s13  ;;  %v7193_v56 = vrot.slane %v7191_v51, 2  ;;  %v18553_v51 = vld [vmem:[%s25061_s5 + $0x5b4] ss:$8 sps:$4 sm:$0xff]   ;;  %v18551_v53 = vld [vmem:[%s25061_s5 + $0x5b0] ss:$8 sps:$4 sm:$0xff]  }
 0x44c   : > { %6708 = vmatprep.subr.bf16.mxu1 %v18448_v61  ;;  %7060 = vmatprep.subr.bf16.mxu0 %v18451_v63  ;;  %v6818_v61 = vrot.slane %v6767_v15, 1  ;;  %v18502_v63 = vld [vmem:[%s25061_s5 + $0x434] ss:$8 sps:$4 sm:$0xff]   ;;  %v18559_v15 = vld [vmem:[%s25061_s5 + $0x5c4] ss:$8 sps:$4 sm:$0xff]  }
 0x44d   : > { %13763 = vrot.lane.b32.xlu0 %v13753_v9, %s19880_s13  ;;  %v7194_v1 = vor.u32 %v7193_v56, %v7190_v55  ;;  %v18509_v9 = vld [vmem:[%s25061_s5 + $0x540] ss:$8 sps:$4 sm:$0xff]  }
 0x44e   : > { %7061 = vmatpush1.bf16.msra.mxu0 %v18449_v4  ;;  %v18511_v4 = vld [vmem:[%s25061_s5 + $0x544] ss:$8 sps:$4 sm:$0xff]   ;;  %v18557_v56 = vld [vmem:[%s25061_s5 + $0x5c0] ss:$8 sps:$4 sm:$0xff]  }
 0x44f   : > { %6709 = vmatpush1.bf16.msra.mxu1 %v18446_v7  ;;  %14138 = vrot.lane.b32.xlu1 %v14133_v17, %s19880_s13  ;;  %v18508_v7 = vld [vmem:[%s25061_s5 + $0x444] ss:$8 sps:$4 sm:$0xff]   ;;  %v18515_v17 = vld [vmem:[%s25061_s5 + $0x550] ss:$8 sps:$4 sm:$0xff]  }
 0x450   : > { %6710 = vmatprep.subr.bf16.mxu1 %v18454_v14  ;;  %7062 = vmatprep.subr.bf16.mxu0 %v18457_v16  ;;  %v18517_v14 = vld [vmem:[%s25061_s5 + $0x554] ss:$8 sps:$4 sm:$0xff]  }
 0x451   : > { %14136 = vrot.lane.b32.xlu0 %v14132_v19, %s19880_s13  ;;  %v18514_v16 = vld [vmem:[%s25061_s5 + $0x454] ss:$8 sps:$4 sm:$0xff]   ;;  %v7133_v19 = vpack.c.bf16 %v7130_v6, %v7130_v6 }
 0x452   : > { %7063 = vmatpush1.bf16.msra.mxu0 %v18455_v18  ;;  %v18512_v18 = vld [vmem:[%s25061_s5 + $0x450] ss:$8 sps:$4 sm:$0xff]  }
 0x453   : > { %6711 = vmatpush1.bf16.msra.mxu1 %v18452_v10  ;;  %7064 = vmatprep.subr.bf16.mxu0 %v18460_v20  ;;  %v18523_v10 = vld [vmem:[%s25061_s5 + $0x564] ss:$8 sps:$4 sm:$0xff]  }
 0x454   : > { %7085 = vmatprep.subr.bf16.mxu1 %v18463_v22  ;;  %v18520_v20 = vld [vmem:[%s25061_s5 + $0x464] ss:$8 sps:$4 sm:$0xff]   ;;  %v18518_v22 = vld [vmem:[%s25061_s5 + $0x460] ss:$8 sps:$4 sm:$0xff]  }
 0x455   : > { %14134 = vrot.lane.b32.xlu0 %v14131_v26, %s19880_s13  ;;  %v18526_v26 = vld [vmem:[%s25061_s5 + $0x474] ss:$8 sps:$4 sm:$0xff]  }
 0x456   : > { %6713 = vmatmul.mubr.bf16.vlgmr.msra.gmra.mrb[44].mxu1 %v6030_v27  ;;  %7065 = vmatpush1.bf16.msra.mxu0 %v18458_v24  ;;  %v7196_v24 = vshrl.u32 %v7133_v19, 16  ;;  %v18527_v27 = vld [vmem:[%s25061_s5 + $0x570] ss:$8 sps:$4 sm:$0xff]  }
 0x457   : > { %7086 = vmatpush1.bf16.msra.mxu1 %v18461_v25  ;;  %7066 = vmatprep.subr.bf16.mxu0 %v18466_v57  ;;  %v7199_v25 = vshll.u32 %v7133_v19, 16  ;;  %v7513_v57 = vld [vmem:[#allocation3 + $0x8] sm:$0x30]  ;;  %v18580_v19 = vld [vmem:[%s25061_s5 + $0x504] ss:$8 sps:$4 sm:$0xff]  }
 0x458   : > { %7087 = vmatprep.subr.bf16.mxu1 %v18469_v28  ;;  %7117 = vmatprep.mubr.bf16.mxu1 %v19878_v35  ;;  %v18524_v28 = vld [vmem:[%s25061_s5 + $0x470] ss:$8 sps:$4 sm:$0xff]  }
 0x45a   : > { %7067 = vmatpush1.bf16.msra.mxu0 %v18464_v29  ;;  %v7198_v29 = vrot.slane %v7196_v24, 1  ;;  %v18578_v24 = vld [vmem:[%s25061_s5 + $0x500] ss:$8 sps:$4 sm:$0xff]  }
 0x45b   : > { %7088 = vmatpush1.bf16.msra.mxu1 %v18467_v30  ;;  %7068 = vmatprep.subr.bf16.mxu0 %v18472_v31  ;;  %v7201_v30 = vrot.slane %v7199_v25, 2  ;;  %v18535_v31 = vld [vmem:[%s25061_s5 + $0x584] ss:$8 sps:$4 sm:$0xff]   ;;  %v18589_v25 = vld [vmem:[%s25061_s5 + $0x614] ss:$8 sps:$4 sm:$0xff]  }
 0x45c   : > { %7089 = vmatprep.subr.bf16.mxu1 %v18475_v32  ;;  %v18532_v32 = vld [vmem:[%s25061_s5 + $0x484] ss:$8 sps:$4 sm:$0xff]  }
 0x45e   : > { %7069 = vmatpush1.bf16.msra.mxu0 %v18470_v33  ;;  %v7516_v33 = vpack.c.bf16 %v7513_v57, %v7513_v57 }
 0x45f   : > { %7090 = vmatpush1.bf16.msra.mxu1 %v18473_v34  ;;  %7070 = vmatprep.subr.bf16.mxu0 %v18478_v36  ;;  %v18533_v34 = vld [vmem:[%s25061_s5 + $0x580] ss:$8 sps:$4 sm:$0xff]  }
 0x460   : > { %7091 = vmatprep.subr.bf16.mxu1 %v18481_v37  ;;  %v18530_v36 = vld [vmem:[%s25061_s5 + $0x480] ss:$8 sps:$4 sm:$0xff]   ;;  %v7202_v37 = vor.u32 %v7201_v30, %v7198_v29  ;;  %v18587_v29 = vld [vmem:[%s25061_s5 + $0x610] ss:$8 sps:$4 sm:$0xff]  }
 0x461   : > { %v18584_v30 = vld [vmem:[%s25061_s5 + $0x510] ss:$8 sps:$4 sm:$0xff]  }
 0x462   : > { %7071 = vmatpush1.bf16.msra.mxu0 %v18476_v38  ;;  %v18541_v38 = vld [vmem:[%s25061_s5 + $0x594] ss:$8 sps:$4 sm:$0xff]  }
 0x463   : > { %7092 = vmatpush1.bf16.msra.mxu1 %v18479_v40  ;;  %7072 = vmatprep.subr.bf16.mxu0 %v18484_v41  ;;  %v7567_v40 = vrot.slane %v7516_v33, 2  ;;  %v18538_v41 = vld [vmem:[%s25061_s5 + $0x494] ss:$8 sps:$4 sm:$0xff]  }
 0x464   : > { %7093 = vmatprep.subr.bf16.mxu1 %v18487_v42 }
 0x466   : > { %7073 = vmatpush1.bf16.msra.mxu0 %v18482_v44  ;;  %v18539_v44 = vld [vmem:[%s25061_s5 + $0x590] ss:$8 sps:$4 sm:$0xff]  }
 0x467   : > { %7094 = vmatpush1.bf16.msra.mxu1 %v18485_v45  ;;  %7074 = vmatprep.subr.bf16.mxu0 %v18490_v46  ;;  %v18536_v45 = vld [vmem:[%s25061_s5 + $0x490] ss:$8 sps:$4 sm:$0xff]   ;;  %v18547_v46 = vld [vmem:[%s25061_s5 + $0x5a4] ss:$8 sps:$4 sm:$0xff]  }
 0x468   : > { %7095 = vmatprep.subr.bf16.mxu1 %v18493_v47  ;;  %v18544_v47 = vld [vmem:[%s25061_s5 + $0x4a4] ss:$8 sps:$4 sm:$0xff]  }
 0x46a   : > { %7075 = vmatpush1.bf16.msra.mxu0 %v18488_v5  ;;  %v18550_v5 = vld [vmem:[%s25061_s5 + $0x4b4] ss:$8 sps:$4 sm:$0xff]  }
 0x46b   : > { %7096 = vmatpush1.bf16.msra.mxu1 %v18491_v52  ;;  %7469 = vmatprep.subr.bf16.mxu0 %v18499_v8  ;;  %v18548_v8 = vld [vmem:[%s25061_s5 + $0x4b0] ss:$8 sps:$4 sm:$0xff]  }
 0x46c   : > { %7428 = vmatprep.subr.bf16.mxu1 %v18496_v54  ;;  %v18556_v54 = vld [vmem:[%s25061_s5 + $0x4c4] ss:$8 sps:$4 sm:$0xff]  }
 0x46d   : > { %7077 = vmatmul.mubr.bf16.vlgmr.msra.gmra.mrb[20].mxu0 %v6816_v59  ;;  %v18565_v59 = vld [vmem:[%s25061_s5 + $0x5d4] ss:$8 sps:$4 sm:$0xff]  }
 0x46e   : > { %15874 = vmatmul.mubr.msk.bf16.vlgmr.msra.gmra.mrb[48].mxu1 %vm6371_vm15, %v6818_v61  ;;  %7470 = vmatpush1.bf16.msra.mxu0 %v18497_v58  ;;  %v18554_v58 = vld [vmem:[%s25061_s5 + $0x4c0] ss:$8 sps:$4 sm:$0xff]  }
 0x46f   : > { %7429 = vmatpush1.bf16.msra.mxu1 %v18494_v60  ;;  %7460 = vmatprep.mubr.bf16.mxu1 %v7194_v1  ;;  %v18562_v60 = vld [vmem:[%s25061_s5 + $0x4d4] ss:$8 sps:$4 sm:$0xff]   ;;  %v18560_v1 = vld [vmem:[%s25061_s5 + $0x4d0] ss:$8 sps:$4 sm:$0xff]  }
 0x470   : > { %7430 = vmatprep.subr.bf16.mxu1 %v18502_v63  ;;  %7471 = vmatprep.subr.bf16.mxu0 %v18505_v0  ;;  %v18563_v63 = vld [vmem:[%s25061_s5 + $0x5d0] ss:$8 sps:$4 sm:$0xff]  }
 0x471   : > { %7501 = vmatprep.mubr.bf16.mxu0 %v19878_v35 }
 0x472   : > { %7472 = vmatpush1.bf16.msra.mxu0 %v18503_v2  ;;  %v18571_v2 = vld [vmem:[%s25061_s5 + $0x5e4] ss:$8 sps:$4 sm:$0xff]  }
 0x473   : > { %7431 = vmatpush1.bf16.msra.mxu1 %v18500_v3  ;;  %7473 = vmatprep.subr.bf16.mxu0 %v18511_v4  ;;  %v18568_v3 = vld [vmem:[%s25061_s5 + $0x4e4] ss:$8 sps:$4 sm:$0xff]  }
 0x474   : > { %7432 = vmatprep.subr.bf16.mxu1 %v18508_v7  ;;  %v18569_v7 = vld [vmem:[%s25061_s5 + $0x5e0] ss:$8 sps:$4 sm:$0xff]  }
 0x476   : > { %7474 = vmatpush1.bf16.msra.mxu0 %v18509_v9  ;;  %v18566_v9 = vld [vmem:[%s25061_s5 + $0x4e0] ss:$8 sps:$4 sm:$0xff]  }
 0x477   : > { %7433 = vmatpush1.bf16.msra.mxu1 %v18506_v13  ;;  %7475 = vmatprep.subr.bf16.mxu0 %v18517_v14  ;;  %v18577_v13 = vld [vmem:[%s25061_s5 + $0x5f4] ss:$8 sps:$4 sm:$0xff]  }
 0x478   : > { %7434 = vmatprep.subr.bf16.mxu1 %v18514_v16  ;;  %v18574_v14 = vld [vmem:[%s25061_s5 + $0x4f4] ss:$8 sps:$4 sm:$0xff]  }
 0x479   : > { %v7128_v16 = vld [vmem:[#allocation3] sm:$0x18] }
 0x47a   : > { %7476 = vmatpush1.bf16.msra.mxu0 %v18515_v17  ;;  %v18575_v17 = vld [vmem:[%s25061_s5 + $0x5f0] ss:$8 sps:$4 sm:$0xff]  }
 0x47b   : > { %7435 = vmatpush1.bf16.msra.mxu1 %v18512_v18  ;;  %7477 = vmatprep.subr.bf16.mxu0 %v18523_v10  ;;  %v18572_v18 = vld [vmem:[%s25061_s5 + $0x4f0] ss:$8 sps:$4 sm:$0xff]   ;;  %v18583_v10 = vld [vmem:[%s25061_s5 + $0x604] ss:$8 sps:$4 sm:$0xff]  }
 0x47c   : > { %7436 = vmatprep.subr.bf16.mxu1 %v18520_v20  ;;  %v7131_v20 = vpack.c.bf16 %v7128_v16, %v7128_v16  ;;  %v7514_v16 = vld [vmem:[#allocation3 + $0x10] sm:$0x30] }
 0x47e   : > { %7478 = vmatpush1.bf16.msra.mxu0 %v18521_v21  ;;  %v7180_v57 = vshrl.u32 %v7131_v20, 16 }
 0x47f   : > { %7437 = vmatpush1.bf16.msra.mxu1 %v18518_v22  ;;  %7479 = vmatprep.subr.bf16.mxu0 %v18529_v23  ;;  %v18581_v22 = vld [vmem:[%s25061_s5 + $0x600] ss:$8 sps:$4 sm:$0xff]  }
 0x480   : > { %7438 = vmatprep.subr.bf16.mxu1 %v18526_v26  ;;  %v18586_v26 = vld [vmem:[%s25061_s5 + $0x514] ss:$8 sps:$4 sm:$0xff]  }
 0x482   : > { %7480 = vmatpush1.bf16.msra.mxu0 %v18527_v27  ;;  %v7183_v27 = vshll.u32 %v7131_v20, 16 }
 0x483   : > { %7439 = vmatpush1.bf16.msra.mxu1 %v18524_v28  ;;  %7794 = vmatprep.subr.bf16.mxu0 %v18535_v31  ;;  %v18592_v31 = vld [vmem:[%s25061_s5 + $0x624] ss:$8 sps:$4 sm:$0xff]  }
 0x484   : > { %7440 = vmatprep.subr.bf16.mxu1 %v18532_v32  ;;  %v10392_v39 = vpop.permute.xlu1 %10391  ;;  %v7182_v32 = vrot.slane %v7180_v57, 1  ;;  %v7185_v33 = vrot.slane %v7183_v27, 2  ;;  %v18629_v57 = vld [vmem:[%s25061_s5 + $0x7e0] ss:$8 sps:$4 sm:$0xff]  }
 0x485   : > { %15963 = vmatmul.mubr.msk.bf16.vlgmr.msra.gmra.mrb[24].mxu0 %vm6371_vm15, %v7202_v37  ;;  %v22109_v42 = vpop.permute.xlu0 %10393  ;;  %v18590_v37 = vld [vmem:[%s25061_s5 + $0x620] ss:$8 sps:$4 sm:$0xff]  }
 0x486   : > { %7795 = vmatpush1.bf16.msra.mxu0 %v18533_v34  ;;  %7826 = vmatprep.mubr.bf16.mxu0 %v7567_v40  ;;  %v22113_v43 = vsel %vm6371_vm15, %v10392_v39, %v22109_v42  ;;  %v18595_v34 = vld [vmem:[%s25061_s5 + $0x684] ss:$8 sps:$4 sm:$0xff]   ;;  %v18598_v39 = vld [vmem:[%s25061_s5 + $0x634] ss:$8 sps:$4 sm:$0xff]   ;;  %v7186_v40 = vor.u32 %v7185_v33, %v7182_v32 }
 0x487   : > { %7441 = vmatpush1.bf16.msra.mxu1 %v18530_v36  ;;  %7796 = vmatprep.subr.bf16.mxu0 %v18541_v38  ;;  %v18593_v38 = vld [vmem:[%s25061_s5 + $0x680] ss:$8 sps:$4 sm:$0xff]   ;;  %v18637_v32 = vld [vmem:[%s25061_s5 + $0x7f4] ss:$8 sps:$4 sm:$0xff]  }
 0x488   : > { %7442 = vmatprep.subr.bf16.mxu1 %v18538_v41  ;;  %v18601_v41 = vld [vmem:[%s25061_s5 + $0x694] ss:$8 sps:$4 sm:$0xff]  }
 0x48a   : > { %7797 = vmatpush1.bf16.msra.mxu0 %v18539_v44 }
 0x48b   : > { %v22127_v48 = vpop.permute.xlu0 %10395  ;;  %7443 = vmatpush1.bf16.msra.mxu1 %v18536_v45  ;;  %7798 = vmatprep.subr.bf16.mxu0 %v18547_v46  ;;  %v18596_v45 = vld [vmem:[%s25061_s5 + $0x630] ss:$8 sps:$4 sm:$0xff]  }
 0x48c   : > { %7444 = vmatprep.subr.bf16.mxu1 %v18544_v47  ;;  %v18599_v47 = vld [vmem:[%s25061_s5 + $0x690] ss:$8 sps:$4 sm:$0xff]  }
 0x48e   : > { %7799 = vmatpush1.bf16.msra.mxu0 %v18545_v49  ;;  %v18604_v49 = vld [vmem:[%s25061_s5 + $0x644] ss:$8 sps:$4 sm:$0xff]  }
 0x48f   : > { %v22141_v52 = vpop.permute.xlu0 %10712  ;;  %7445 = vmatpush1.bf16.msra.mxu1 %v18542_v50  ;;  %7800 = vmatprep.subr.bf16.mxu0 %v18553_v51  ;;  %v18607_v50 = vld [vmem:[%s25061_s5 + $0x6a4] ss:$8 sps:$4 sm:$0xff]   ;;  %v18602_v51 = vld [vmem:[%s25061_s5 + $0x640] ss:$8 sps:$4 sm:$0xff]  }
 0x490   : > { %7446 = vmatprep.subr.bf16.mxu1 %v18550_v5 }
 0x492   : > { %7801 = vmatpush1.bf16.msra.mxu0 %v18551_v53  ;;  %v18605_v53 = vld [vmem:[%s25061_s5 + $0x6a0] ss:$8 sps:$4 sm:$0xff]  }
 0x493   : > { %v22155_v55 = vpop.permute.xlu0 %11083  ;;  %7447 = vmatpush1.bf16.msra.mxu1 %v18548_v8  ;;  %7802 = vmatprep.subr.bf16.mxu0 %v18559_v15  ;;  %v18610_v8 = vld [vmem:[%s25061_s5 + $0x654] ss:$8 sps:$4 sm:$0xff]  }
 0x494   : > { %7448 = vmatprep.subr.bf16.mxu1 %v18556_v54  ;;  %v18613_v15 = vld [vmem:[%s25061_s5 + $0x6b4] ss:$8 sps:$4 sm:$0xff]   ;;  %v18608_v54 = vld [vmem:[%s25061_s5 + $0x650] ss:$8 sps:$4 sm:$0xff]  }
 0x496   : > { %7803 = vmatpush1.bf16.msra.mxu0 %v18557_v56  ;;  %v7879_v56 = vld [vmem:[#allocation3 + $0x8] sm:$0x60] }
 0x497   : > { %v11082_v61 = vpop.permute.xlu0 %11081  ;;  %7449 = vmatpush1.bf16.msra.mxu1 %v18554_v58  ;;  %7804 = vmatprep.subr.bf16.mxu0 %v18565_v59  ;;  %v18611_v59 = vld [vmem:[%s25061_s5 + $0x6b0] ss:$8 sps:$4 sm:$0xff]  }
 0x498   : > { %v22174_v0 = vsel %vm6371_vm15, %v11082_v61, %v22155_v55  ;;  %7450 = vmatprep.subr.bf16.mxu1 %v18562_v60  ;;  %v18616_v60 = vld [vmem:[%s25061_s5 + $0x664] ss:$8 sps:$4 sm:$0xff]  }
 0x499   : > { %v18619_v61 = vld [vmem:[%s25061_s5 + $0x6c4] ss:$8 sps:$4 sm:$0xff]  }
 0x49a   : > { %7805 = vmatpush1.bf16.msra.mxu0 %v18563_v63  ;;  %v7882_v63 = vpack.c.bf16 %v7879_v56, %v7879_v56  ;;  %v18661_v56 = vld [vmem:[%s25061_s5 + $0x834] ss:$8 sps:$4 sm:$0xff]  }
 0x49b   : > { %v22185_v4 = vpop.permute.xlu0 %11474  ;;  %7451 = vmatpush1.bf16.msra.mxu1 %v18560_v1  ;;  %7806 = vmatprep.subr.bf16.mxu0 %v18571_v2  ;;  %v18614_v1 = vld [vmem:[%s25061_s5 + $0x660] ss:$8 sps:$4 sm:$0xff]  }
 0x49c   : > { %7452 = vmatprep.subr.bf16.mxu1 %v18568_v3  ;;  %v18617_v3 = vld [vmem:[%s25061_s5 + $0x6c0] ss:$8 sps:$4 sm:$0xff]  }
 0x49e   : > { %7807 = vmatpush1.bf16.msra.mxu0 %v18569_v7  ;;  %v18622_v7 = vld [vmem:[%s25061_s5 + $0x674] ss:$8 sps:$4 sm:$0xff]  }
 0x49f   : > { %v22199_v6 = vpop.permute.xlu0 %11847  ;;  %7453 = vmatpush1.bf16.msra.mxu1 %v18566_v9  ;;  %7808 = vmatprep.subr.bf16.mxu0 %v18577_v13  ;;  %v18625_v13 = vld [vmem:[%s25061_s5 + $0x6d4] ss:$8 sps:$4 sm:$0xff]  }
 0x4a0   : > { %7454 = vmatprep.subr.bf16.mxu1 %v18574_v14  ;;  %v7512_v14 = vld [vmem:[#allocation3] sm:$0x30] }
 0x4a1   : > { %v7515_v20 = vpack.c.bf16 %v7512_v14, %v7512_v14  ;;  %v18664_v14 = vld [vmem:[%s25061_s5 + $0x744] ss:$8 sps:$4 sm:$0xff]  }
 0x4a2   : > { %7809 = vmatpush1.bf16.msra.mxu0 %v18575_v17  ;;  %v7938_v17 = vshrl.u32 %v7882_v63, 16 }
 0x4a3   : > { %v11846_v21 = vpop.permute.xlu0 %11845  ;;  %7455 = vmatpush1.bf16.msra.mxu1 %v18572_v18  ;;  %7810 = vmatprep.subr.bf16.mxu0 %v18583_v10  ;;  %v7941_v18 = vshll.u32 %v7882_v63, 16  ;;  %v18620_v10 = vld [vmem:[%s25061_s5 + $0x670] ss:$8 sps:$4 sm:$0xff]   ;;  %v7566_v27 = vrot.slane %v7515_v20, 2  ;;  %v8263_v63 = vld [vmem:[#allocation3 + $0x8] sm:$0xc0] }
 0x4a4   : > { %v22218_v23 = vsel %vm6371_vm15, %v11846_v21, %v22199_v6  ;;  %7456 = vmatprep.subr.bf16.mxu1 %v18580_v19  ;;  %v18623_v19 = vld [vmem:[%s25061_s5 + $0x6d0] ss:$8 sps:$4 sm:$0xff]   ;;  %v18631_v21 = vld [vmem:[%s25061_s5 + $0x7e4] ss:$8 sps:$4 sm:$0xff]  }
 0x4a6   : > { %7811 = vmatpush1.bf16.msra.mxu0 %v18581_v22  ;;  %v7517_v22 = vpack.c.bf16 %v7514_v16, %v7514_v16  ;;  %v8266_v16 = vpack.c.bf16 %v8263_v63, %v8263_v63  ;;  %v18698_v63 = vld [vmem:[%s25061_s5 + $0x7a0] ss:$8 sps:$4 sm:$0xff]  }
 0x4a7   : > { %v22229_v28 = vpop.permute.xlu0 %12238  ;;  %7457 = vmatpush1.bf16.msra.mxu1 %v18578_v24  ;;  %7812 = vmatprep.subr.bf16.mxu0 %v18589_v25  ;;  %v18628_v24 = vld [vmem:[%s25061_s5 + $0x6e4] ss:$8 sps:$4 sm:$0xff]   ;;  %v7940_v25 = vrot.slane %v7938_v17, 2  ;;  %v18665_v17 = vld [vmem:[%s25061_s5 + $0x840] ss:$8 sps:$4 sm:$0xff]  }
 0x4a8   : > { %7458 = vmatprep.subr.bf16.mxu1 %v18586_v26  ;;  %v7943_v26 = vrot.slane %v7941_v18, 3  ;;  %v18662_v18 = vld [vmem:[%s25061_s5 + $0x740] ss:$8 sps:$4 sm:$0xff]   ;;  %v8317_v20 = vrot.slane %v8266_v16, 3  ;;  %v18712_v16 = vld [vmem:[%s25061_s5 + $0x7c4] ss:$8 sps:$4 sm:$0xff]  }
 0x4aa   : > { %7813 = vmatpush1.bf16.msra.mxu0 %v18587_v29  ;;  %v18626_v29 = vld [vmem:[%s25061_s5 + $0x6e0] ss:$8 sps:$4 sm:$0xff]   ;;  %v7944_v33 = vor.u32 %v7943_v26, %v7940_v25  ;;  %v18679_v25 = vld [vmem:[%s25061_s5 + $0x864] ss:$8 sps:$4 sm:$0xff]  }
 0x4ab   : > { %v22243_v36 = vpop.permute.xlu0 %12611  ;;  %7459 = vmatpush1.bf16.msra.mxu1 %v18584_v30  ;;  %7814 = vmatprep.subr.bf16.mxu0 %v18592_v31  ;;  %v7568_v30 = vrot.slane %v7517_v22, 2  ;;  %v18634_v31 = vld [vmem:[%s25061_s5 + $0x6f4] ss:$8 sps:$4 sm:$0xff]   ;;  %v18671_v22 = vld [vmem:[%s25061_s5 + $0x850] ss:$8 sps:$4 sm:$0xff]  }
 0x4ac   : > { %7835 = vmatprep.subr.bf16.mxu1 %v18595_v34  ;;  %v18635_v34 = vld [vmem:[%s25061_s5 + $0x7f0] ss:$8 sps:$4 sm:$0xff]   ;;  %v18676_v26 = vld [vmem:[%s25061_s5 + $0x764] ss:$8 sps:$4 sm:$0xff]  }
 0x4ae   : > { %7461 = vmatmul.mubr.bf16.vlgmr.msra.gmra.mrb[52].mxu1 %v7186_v40  ;;  %7815 = vmatpush1.bf16.msra.mxu0 %v18590_v37  ;;  %v18632_v37 = vld [vmem:[%s25061_s5 + $0x6f0] ss:$8 sps:$4 sm:$0xff]   ;;  %v18641_v40 = vld [vmem:[%s25061_s5 + $0x800] ss:$8 sps:$4 sm:$0xff]  }
 0x4af   : > { %v12610_v44 = vpop.permute.xlu0 %12609  ;;  %7836 = vmatpush1.bf16.msra.mxu1 %v18593_v38  ;;  %7816 = vmatprep.subr.bf16.mxu0 %v18598_v39  ;;  %v18643_v38 = vld [vmem:[%s25061_s5 + $0x804] ss:$8 sps:$4 sm:$0xff]  }
 0x4b0   : > { %v22262_v46 = vsel %vm6371_vm15, %v12610_v44, %v22243_v36  ;;  %7837 = vmatprep.subr.bf16.mxu1 %v18601_v41  ;;  %7867 = vmatprep.mubr.bf16.mxu1 %v19878_v35  ;;  %v18640_v39 = vld [vmem:[%s25061_s5 + $0x704] ss:$8 sps:$4 sm:$0xff]   ;;  %v18638_v41 = vld [vmem:[%s25061_s5 + $0x700] ss:$8 sps:$4 sm:$0xff]   ;;  %v18649_v44 = vld [vmem:[%s25061_s5 + $0x814] ss:$8 sps:$4 sm:$0xff]  }
 0x4b2   : > { %7817 = vmatpush1.bf16.msra.mxu0 %v18596_v45  ;;  %v18646_v45 = vld [vmem:[%s25061_s5 + $0x714] ss:$8 sps:$4 sm:$0xff]  }
 0x4b3   : > { %7838 = vmatpush1.bf16.msra.mxu1 %v18599_v47  ;;  %v22277_v5 = vpop.permute.xlu0 %13005  ;;  %7818 = vmatprep.subr.bf16.mxu0 %v18604_v49  ;;  %v7880_v47 = vld [vmem:[#allocation3 + $0x10] sm:$0x60]  ;;  %v18647_v49 = vld [vmem:[%s25061_s5 + $0x810] ss:$8 sps:$4 sm:$0xff]  }
 0x4b4   : > { %7839 = vmatprep.subr.bf16.mxu1 %v18607_v50  ;;  %v18644_v50 = vld [vmem:[%s25061_s5 + $0x710] ss:$8 sps:$4 sm:$0xff]  }
 0x4b6   : > { %7819 = vmatpush1.bf16.msra.mxu0 %v18602_v51  ;;  %v18655_v51 = vld [vmem:[%s25061_s5 + $0x824] ss:$8 sps:$4 sm:$0xff]  }
 0x4b7   : > { %7840 = vmatpush1.bf16.msra.mxu1 %v18605_v53  ;;  %v22291_v58 = vpop.permute.xlu0 %13375  ;;  %7820 = vmatprep.subr.bf16.mxu0 %v18610_v8  ;;  %v7883_v53 = vpack.c.bf16 %v7880_v47, %v7880_v47  ;;  %v18652_v8 = vld [vmem:[%s25061_s5 + $0x724] ss:$8 sps:$4 sm:$0xff]   ;;  %v18689_v47 = vld [vmem:[%s25061_s5 + $0x880] ss:$8 sps:$4 sm:$0xff]  }
 0x4b8   : > { %7841 = vmatprep.subr.bf16.mxu1 %v18613_v15  ;;  %v18653_v15 = vld [vmem:[%s25061_s5 + $0x820] ss:$8 sps:$4 sm:$0xff]  }
 0x4ba   : > { %7821 = vmatpush1.bf16.msra.mxu0 %v18608_v54  ;;  %v18650_v54 = vld [vmem:[%s25061_s5 + $0x720] ss:$8 sps:$4 sm:$0xff]  }
 0x4bb   : > { %7842 = vmatpush1.bf16.msra.mxu1 %v18611_v59  ;;  %v13374_v2 = vpop.permute.xlu0 %13373  ;;  %7822 = vmatprep.subr.bf16.mxu0 %v18616_v60  ;;  %v7946_v59 = vshrl.u32 %v7883_v53, 16  ;;  %v7949_v60 = vshll.u32 %v7883_v53, 16  ;;  %v18697_v53 = vld [vmem:[%s25061_s5 + $0x894] ss:$8 sps:$4 sm:$0xff]  }
 0x4bc   : > { %v22313_v9 = vsel %vm6371_vm15, %v13374_v2, %v22291_v58  ;;  %7843 = vmatprep.subr.bf16.mxu1 %v18619_v61  ;;  %v18658_v61 = vld [vmem:[%s25061_s5 + $0x734] ss:$8 sps:$4 sm:$0xff]   ;;  %v18656_v2 = vld [vmem:[%s25061_s5 + $0x730] ss:$8 sps:$4 sm:$0xff]  }
 0x4be   : > { %7823 = vmatpush1.bf16.msra.mxu0 %v18614_v1  ;;  %v18659_v1 = vld [vmem:[%s25061_s5 + $0x830] ss:$8 sps:$4 sm:$0xff]  }
 0x4bf   : > { %7844 = vmatpush1.bf16.msra.mxu1 %v18617_v3  ;;  %7824 = vmatprep.subr.bf16.mxu0 %v18622_v7  ;;  %v7948_v3 = vrot.slane %v7946_v59, 2  ;;  %v7951_v7 = vrot.slane %v7949_v60, 3  ;;  %v18703_v59 = vld [vmem:[%s25061_s5 + $0x8a4] ss:$8 sps:$4 sm:$0xff]  }
 0x4c0   : > { %7845 = vmatprep.subr.bf16.mxu1 %v18625_v13  ;;  %v18667_v13 = vld [vmem:[%s25061_s5 + $0x844] ss:$8 sps:$4 sm:$0xff]  }
 0x4c1   : > { %v18700_v60 = vld [vmem:[%s25061_s5 + $0x7a4] ss:$8 sps:$4 sm:$0xff]  }
 0x4c2   : > { %7825 = vmatpush1.bf16.msra.mxu0 %v18620_v10  ;;  %v7952_v10 = vor.u32 %v7951_v7, %v7948_v3  ;;  %v7878_v3 = vld [vmem:[#allocation3] sm:$0x60]  ;;  %v18707_v7 = vld [vmem:[%s25061_s5 + $0x8b0] ss:$8 sps:$4 sm:$0xff]  }
 0x4c3   : > { %7846 = vmatpush1.bf16.msra.mxu1 %v18623_v19  ;;  %8219 = vmatprep.subr.bf16.mxu0 %v18631_v21  ;;  %v18673_v19 = vld [vmem:[%s25061_s5 + $0x854] ss:$8 sps:$4 sm:$0xff]  }
 0x4c4   : > { %8178 = vmatprep.subr.bf16.mxu1 %v18628_v24  ;;  %v18670_v21 = vld [vmem:[%s25061_s5 + $0x754] ss:$8 sps:$4 sm:$0xff]   ;;  %v18668_v24 = vld [vmem:[%s25061_s5 + $0x750] ss:$8 sps:$4 sm:$0xff]  }
 0x4c5   : > { %7827 = vmatmul.mubr.bf16.vlgmr.msra.gmra.mrb[28].mxu0 %v7566_v27  ;;  %v18674_v27 = vld [vmem:[%s25061_s5 + $0x760] ss:$8 sps:$4 sm:$0xff]  }
 0x4c6   : > { %16052 = vmatmul.mubr.msk.bf16.vlgmr.msra.gmra.mrb[56].mxu1 %vm6371_vm15, %v7568_v30  ;;  %8220 = vmatpush1.bf16.msra.mxu0 %v18629_v57  ;;  %v18677_v57 = vld [vmem:[%s25061_s5 + $0x860] ss:$8 sps:$4 sm:$0xff]   ;;  %v18682_v30 = vld [vmem:[%s25061_s5 + $0x774] ss:$8 sps:$4 sm:$0xff]  }
 0x4c7   : > { %8179 = vmatpush1.bf16.msra.mxu1 %v18626_v29  ;;  %8210 = vmatprep.mubr.bf16.mxu1 %v7944_v33  ;;  %v18685_v29 = vld [vmem:[%s25061_s5 + $0x874] ss:$8 sps:$4 sm:$0xff]   ;;  %v18680_v33 = vld [vmem:[%s25061_s5 + $0x770] ss:$8 sps:$4 sm:$0xff]  }
 0x4c8   : > { %8180 = vmatprep.subr.bf16.mxu1 %v18634_v31  ;;  %8221 = vmatprep.subr.bf16.mxu0 %v18637_v32  ;;  %v18683_v31 = vld [vmem:[%s25061_s5 + $0x870] ss:$8 sps:$4 sm:$0xff]  }
 0x4c9   : > { %8251 = vmatprep.mubr.bf16.mxu0 %v19878_v35 }
 0x4ca   : > { %8222 = vmatpush1.bf16.msra.mxu0 %v18635_v34  ;;  %v18691_v34 = vld [vmem:[%s25061_s5 + $0x884] ss:$8 sps:$4 sm:$0xff]  }
 0x4cb   : > { %8181 = vmatpush1.bf16.msra.mxu1 %v18632_v37  ;;  %8223 = vmatprep.subr.bf16.mxu0 %v18643_v38  ;;  %v18688_v38 = vld [vmem:[%s25061_s5 + $0x784] ss:$8 sps:$4 sm:$0xff]  }
 0x4cc   : > { %8182 = vmatprep.subr.bf16.mxu1 %v18640_v39 }
 0x4ce   : > { %8224 = vmatpush1.bf16.msra.mxu0 %v18641_v40 }
 0x4cf   : > { %8183 = vmatpush1.bf16.msra.mxu1 %v18638_v41  ;;  %8225 = vmatprep.subr.bf16.mxu0 %v18649_v44 }
 0x4d0   : > { %8184 = vmatprep.subr.bf16.mxu1 %v18646_v45 }
 0x4d2   : > { %8226 = vmatpush1.bf16.msra.mxu0 %v18647_v49 }
 0x4d3   : > { %8185 = vmatpush1.bf16.msra.mxu1 %v18644_v50  ;;  %8227 = vmatprep.subr.bf16.mxu0 %v18655_v51  ;;  %v18686_v51 = vld [vmem:[%s25061_s5 + $0x780] ss:$8 sps:$4 sm:$0xff]  }
 0x4d4   : > { %8186 = vmatprep.subr.bf16.mxu1 %v18652_v8 }
 0x4d6   : > { %8228 = vmatpush1.bf16.msra.mxu0 %v18653_v15  ;;  %v18694_v15 = vld [vmem:[%s25061_s5 + $0x794] ss:$8 sps:$4 sm:$0xff]  }
 0x4d7   : > { %8187 = vmatpush1.bf16.msra.mxu1 %v18650_v54  ;;  %8229 = vmatprep.subr.bf16.mxu0 %v18661_v56  ;;  %v18695_v54 = vld [vmem:[%s25061_s5 + $0x890] ss:$8 sps:$4 sm:$0xff]  }
 0x4d8   : > { %8188 = vmatprep.subr.bf16.mxu1 %v18658_v61  ;;  %v18692_v56 = vld [vmem:[%s25061_s5 + $0x790] ss:$8 sps:$4 sm:$0xff]   ;;  %v18701_v61 = vld [vmem:[%s25061_s5 + $0x8a0] ss:$8 sps:$4 sm:$0xff]  }
 0x4da   : > { %8230 = vmatpush1.bf16.msra.mxu0 %v18659_v1  ;;  %v18709_v1 = vld [vmem:[%s25061_s5 + $0x8b4] ss:$8 sps:$4 sm:$0xff]  }
 0x4db   : > { %8189 = vmatpush1.bf16.msra.mxu1 %v18656_v2  ;;  %8544 = vmatprep.subr.bf16.mxu0 %v18667_v13  ;;  %v18706_v2 = vld [vmem:[%s25061_s5 + $0x7b4] ss:$8 sps:$4 sm:$0xff]   ;;  %v18704_v13 = vld [vmem:[%s25061_s5 + $0x7b0] ss:$8 sps:$4 sm:$0xff]  }
 0x4dc   : > { %8190 = vmatprep.subr.bf16.mxu1 %v18664_v14  ;;  %v18715_v14 = vld [vmem:[%s25061_s5 + $0x8c4] ss:$8 sps:$4 sm:$0xff]  }
 0x4dd   : > { %16141 = vmatmul.mubr.msk.bf16.vlgmr.msra.gmra.mrb[32].mxu0 %vm6371_vm15, %v7952_v10  ;;  %v18710_v10 = vld [vmem:[%s25061_s5 + $0x7c0] ss:$8 sps:$4 sm:$0xff]  }
 0x4de   : > { %8545 = vmatpush1.bf16.msra.mxu0 %v18665_v17  ;;  %8576 = vmatprep.mubr.bf16.mxu0 %v8317_v20  ;;  %v7881_v17 = vpack.c.bf16 %v7878_v3, %v7878_v3  ;;  %v18718_v20 = vld [vmem:[%s25061_s5 + $0x7d4] ss:$8 sps:$4 sm:$0xff]   ;;  %v18749_v3 = vld [vmem:[%s25061_s5 + $0x980] ss:$8 sps:$4 sm:$0xff]  }
 0x4df   : > { %8191 = vmatpush1.bf16.msra.mxu1 %v18662_v18  ;;  %8546 = vmatprep.subr.bf16.mxu0 %v18673_v19  ;;  %v18713_v18 = vld [vmem:[%s25061_s5 + $0x8c0] ss:$8 sps:$4 sm:$0xff]   ;;  %v18721_v19 = vld [vmem:[%s25061_s5 + $0x8d4] ss:$8 sps:$4 sm:$0xff]  }
 0x4e0   : > { %8192 = vmatprep.subr.bf16.mxu1 %v18670_v21  ;;  %v7930_v21 = vshrl.u32 %v7881_v17, 16 }
 0x4e2   : > { %8547 = vmatpush1.bf16.msra.mxu0 %v18671_v22  ;;  %v7933_v22 = vshll.u32 %v7881_v17, 16 }
 0x4e3   : > { %8193 = vmatpush1.bf16.msra.mxu1 %v18668_v24  ;;  %8548 = vmatprep.subr.bf16.mxu0 %v18679_v25  ;;  %v18719_v24 = vld [vmem:[%s25061_s5 + $0x8d0] ss:$8 sps:$4 sm:$0xff]  }
 0x4e4   : > { %8194 = vmatprep.subr.bf16.mxu1 %v18676_v26  ;;  %v18716_v25 = vld [vmem:[%s25061_s5 + $0x7d0] ss:$8 sps:$4 sm:$0xff]   ;;  %v18724_v26 = vld [vmem:[%s25061_s5 + $0x8e4] ss:$8 sps:$4 sm:$0xff]  }
 0x4e6   : > { %8549 = vmatpush1.bf16.msra.mxu0 %v18677_v57 }
 0x4e7   : > { %8195 = vmatpush1.bf16.msra.mxu1 %v18674_v27  ;;  %8550 = vmatprep.subr.bf16.mxu0 %v18685_v29  ;;  %v7932_v27 = vrot.slane %v7930_v21, 2  ;;  %v7935_v29 = vrot.slane %v7933_v22, 3  ;;  %v18763_v21 = vld [vmem:[%s25061_s5 + $0xaa4] ss:$8 sps:$4 sm:$0xff]  }
 0x4e8   : > { %v6409_v32 = vpop.f32.mrb[12].mxu0  ;;  %8196 = vmatprep.subr.bf16.mxu1 %v18682_v30  ;;  %v6450_v39 = vpop.f32.mrb[40].mxu1  ;;  %v18727_v30 = vld [vmem:[%s25061_s5 + $0x944] ss:$8 sps:$4 sm:$0xff]  }
 0x4e9   : > { %v6411_v37 = vpop.f32.mrb[13].mxu0  ;;  %v22453_v41 = vadd.f32 %v6450_v39, %v6409_v32  ;;  %v6452_v44 = vpop.f32.mrb[41].mxu1  ;;  %v7936_v39 = vor.u32 %v7935_v29, %v7932_v27  ;;  %v18761_v27 = vld [vmem:[%s25061_s5 + $0xaa0] ss:$8 sps:$4 sm:$0xff]  }
 0x4ea   : > { %v6413_v40 = vpop.f32.mrb[14].mxu0  ;;  %8551 = vmatpush1.bf16.msra.mxu0 %v18683_v31  ;;  %v22458_v49 = vadd.f32 %v6452_v44, %v6411_v37  ;;  %v6454_v50 = vpop.f32.mrb[42].mxu1  ;;  %v18725_v37 = vld [vmem:[%s25061_s5 + $0x940] ss:$8 sps:$4 sm:$0xff]   ;;  %v18728_v44 = vld [vmem:[%s25061_s5 + $0x8f0] ss:$8 sps:$4 sm:$0xff]  }
 0x4eb   : > { %v6414_v45 = vpop.f32.mrb[15].mxu0  ;;  %8197 = vmatpush1.bf16.msra.mxu1 %v18680_v33  ;;  %8552 = vmatprep.subr.bf16.mxu0 %v18691_v34  ;;  %v6455_v8 = vpop.f32.mrb[43].mxu1  ;;  %v18722_v33 = vld [vmem:[%s25061_s5 + $0x8e0] ss:$8 sps:$4 sm:$0xff]   ;;  %v18733_v40 = vld [vmem:[%s25061_s5 + $0x954] ss:$8 sps:$4 sm:$0xff]  }
 0x4ec   : > { %8198 = vmatprep.subr.bf16.mxu1 %v18688_v38  ;;  %v18730_v38 = vld [vmem:[%s25061_s5 + $0x8f4] ss:$8 sps:$4 sm:$0xff]   ;;  %v18731_v45 = vld [vmem:[%s25061_s5 + $0x950] ss:$8 sps:$4 sm:$0xff]   ;;  %v18739_v50 = vld [vmem:[%s25061_s5 + $0x964] ss:$8 sps:$4 sm:$0xff]  }
 0x4ed   : > { %v18742_v8 = vld [vmem:[%s25061_s5 + $0x914] ss:$8 sps:$4 sm:$0xff]  }
 0x4ee   : > { %8553 = vmatpush1.bf16.msra.mxu0 %v18689_v47  ;;  %v18736_v47 = vld [vmem:[%s25061_s5 + $0x904] ss:$8 sps:$4 sm:$0xff]  }
 0x4ef   : > { %8199 = vmatpush1.bf16.msra.mxu1 %v18686_v51  ;;  %8554 = vmatprep.subr.bf16.mxu0 %v18697_v53  ;;  %v18734_v51 = vld [vmem:[%s25061_s5 + $0x900] ss:$8 sps:$4 sm:$0xff]  }
 0x4f0   : > { %8200 = vmatprep.subr.bf16.mxu1 %v18694_v15  ;;  %v18737_v53 = vld [vmem:[%s25061_s5 + $0x960] ss:$8 sps:$4 sm:$0xff]   ;;  %v18745_v15 = vld [vmem:[%s25061_s5 + $0x974] ss:$8 sps:$4 sm:$0xff]  }
 0x4f2   : > { %8555 = vmatpush1.bf16.msra.mxu0 %v18695_v54  ;;  %v18740_v54 = vld [vmem:[%s25061_s5 + $0x910] ss:$8 sps:$4 sm:$0xff]  }
 0x4f3   : > { %8201 = vmatpush1.bf16.msra.mxu1 %v18692_v56  ;;  %8556 = vmatprep.subr.bf16.mxu0 %v18703_v59  ;;  %v8632_v56 = vld [vmem:[#allocation3 + $0x20] sm:$0x1] }
 0x4f4   : > { %8202 = vmatprep.subr.bf16.mxu1 %v18700_v60  ;;  %v18743_v59 = vld [vmem:[%s25061_s5 + $0x970] ss:$8 sps:$4 sm:$0xff]   ;;  %v18748_v60 = vld [vmem:[%s25061_s5 + $0x924] ss:$8 sps:$4 sm:$0xff]  }
 0x4f6   : > { %8557 = vmatpush1.bf16.msra.mxu0 %v18701_v61  ;;  %v18751_v61 = vld [vmem:[%s25061_s5 + $0x984] ss:$8 sps:$4 sm:$0xff]  }
 0x4f7   : > { %8203 = vmatpush1.bf16.msra.mxu1 %v18698_v63  ;;  %8558 = vmatprep.subr.bf16.mxu0 %v18709_v1  ;;  %v8629_v63 = vld [vmem:[#allocation3 + $0x8] sm:$0x80] }
 0x4f8   : > { %8204 = vmatprep.subr.bf16.mxu1 %v18706_v2  ;;  %v8635_v1 = vpack.c.bf16 %v8632_v56, %v8629_v63  ;;  %v18746_v2 = vld [vmem:[%s25061_s5 + $0x920] ss:$8 sps:$4 sm:$0xff]   ;;  %v18776_v56 = vld [vmem:[%s25061_s5 + $0x9d0] ss:$8 sps:$4 sm:$0xff]  }
 0x4fa   : > { %8559 = vmatpush1.bf16.msra.mxu0 %v18707_v7  ;;  %v18754_v7 = vld [vmem:[%s25061_s5 + $0x934] ss:$8 sps:$4 sm:$0xff]   ;;  %v8691_v17 = vshrl.u32 %v8635_v1, 16 }
 0x4fb   : > { %8205 = vmatpush1.bf16.msra.mxu1 %v18704_v13  ;;  %8560 = vmatprep.subr.bf16.mxu0 %v18715_v14  ;;  %v18757_v13 = vld [vmem:[%s25061_s5 + $0x994] ss:$8 sps:$4 sm:$0xff]  }
 0x4fc   : > { %8206 = vmatprep.subr.bf16.mxu1 %v18712_v16  ;;  %v8262_v14 = vld [vmem:[#allocation3] sm:$0xc0]  ;;  %v8264_v16 = vld [vmem:[#allocation3 + $0x10] sm:$0xc0] }
 0x4fd   : > { %v8267_v22 = vpack.c.bf16 %v8264_v16, %v8264_v16 }
 0x4fe   : > { %8561 = vmatpush1.bf16.msra.mxu0 %v18713_v18  ;;  %v8694_v18 = vshll.u32 %v8635_v1, 16 }
 0x4ff   : > { %8207 = vmatpush1.bf16.msra.mxu1 %v18710_v10  ;;  %8562 = vmatprep.subr.bf16.mxu0 %v18721_v19  ;;  %v18752_v10 = vld [vmem:[%s25061_s5 + $0x930] ss:$8 sps:$4 sm:$0xff]  }
 0x500   : > { %v22526_v57 = vpop.f32.mrb[16].mxu0  ;;  %8208 = vmatprep.subr.bf16.mxu1 %v18718_v20  ;;  %v18755_v19 = vld [vmem:[%s25061_s5 + $0x990] ss:$8 sps:$4 sm:$0xff]   ;;  %v8265_v20 = vpack.c.bf16 %v8262_v14, %v8262_v14  ;;  %v18782_v14 = vld [vmem:[%s25061_s5 + $0x9e0] ss:$8 sps:$4 sm:$0xff]  }
 0x501   : > { %v22531_v31 = vpop.f32.mrb[17].mxu0 }
 0x502   : > { %v6759_v32 = vpop.f32.mrb[18].mxu0  ;;  %8563 = vmatpush1.bf16.msra.mxu0 %v18719_v24  ;;  %v18760_v24 = vld [vmem:[%s25061_s5 + $0x9a4] ss:$8 sps:$4 sm:$0xff]   ;;  %v8316_v29 = vrot.slane %v8265_v20, 3 }
 0x503   : > { %8209 = vmatpush1.bf16.msra.mxu1 %v18716_v25  ;;  %v6760_v34 = vpop.f32.mrb[19].mxu0  ;;  %8564 = vmatprep.subr.bf16.mxu0 %v18724_v26  ;;  %v8693_v25 = vrot.slane %v8691_v17, 3  ;;  %v8696_v26 = vrot.slane %v8694_v18, 4  ;;  %v8318_v32 = vrot.slane %v8267_v22, 3  ;;  %v18799_v22 = vld [vmem:[%s25061_s5 + $0xb04] ss:$8 sps:$4 sm:$0xff]  }
 0x504   : > { %8585 = vmatprep.subr.bf16.mxu1 %v18727_v30  ;;  %v18758_v30 = vld [vmem:[%s25061_s5 + $0x9a0] ss:$8 sps:$4 sm:$0xff]   ;;  %v18769_v34 = vld [vmem:[%s25061_s5 + $0xab4] ss:$8 sps:$4 sm:$0xff]  }
 0x506   : > { %8211 = vmatmul.mubr.bf16.vlgmr.msra.gmra.mrb[60].mxu1 %v7936_v39  ;;  %8565 = vmatpush1.bf16.msra.mxu0 %v18722_v33  ;;  %v18766_v33 = vld [vmem:[%s25061_s5 + $0x9b4] ss:$8 sps:$4 sm:$0xff]   ;;  %v18764_v39 = vld [vmem:[%s25061_s5 + $0x9b0] ss:$8 sps:$4 sm:$0xff]  }
 0x507   : > { %8586 = vmatpush1.bf16.msra.mxu1 %v18725_v37  ;;  %8566 = vmatprep.subr.bf16.mxu0 %v18730_v38  ;;  %v8697_v37 = vor.u32 %v8696_v26, %v8693_v25  ;;  %v18767_v38 = vld [vmem:[%s25061_s5 + $0xab0] ss:$8 sps:$4 sm:$0xff]   ;;  %v18797_v25 = vld [vmem:[%s25061_s5 + $0xb00] ss:$8 sps:$4 sm:$0xff]  }
 0x508   : > { %8587 = vmatprep.subr.bf16.mxu1 %v18733_v40  ;;  %8617 = vmatprep.mubr.bf16.mxu1 %v19878_v35  ;;  %v18775_v40 = vld [vmem:[%s25061_s5 + $0xac4] ss:$8 sps:$4 sm:$0xff]   ;;  %v18794_v26 = vld [vmem:[%s25061_s5 + $0xa00] ss:$8 sps:$4 sm:$0xff]  }
 0x50a   : > { %8567 = vmatpush1.bf16.msra.mxu0 %v18728_v44  ;;  %v18772_v44 = vld [vmem:[%s25061_s5 + $0x9c4] ss:$8 sps:$4 sm:$0xff]  }
 0x50b   : > { %8588 = vmatpush1.bf16.msra.mxu1 %v18731_v45  ;;  %8568 = vmatprep.subr.bf16.mxu0 %v18736_v47  ;;  %v18773_v45 = vld [vmem:[%s25061_s5 + $0xac0] ss:$8 sps:$4 sm:$0xff]  }
 0x50c   : > { %8589 = vmatprep.subr.bf16.mxu1 %v18739_v50  ;;  %v18770_v47 = vld [vmem:[%s25061_s5 + $0x9c0] ss:$8 sps:$4 sm:$0xff]   ;;  %v18781_v50 = vld [vmem:[%s25061_s5 + $0xad4] ss:$8 sps:$4 sm:$0xff]  }
 0x50e   : > { %8569 = vmatpush1.bf16.msra.mxu0 %v18734_v51  ;;  %v8633_v51 = vld [vmem:[#allocation3 + $0x28] sm:$0x1] }
 0x50f   : > { %8590 = vmatpush1.bf16.msra.mxu1 %v18737_v53  ;;  %8570 = vmatprep.subr.bf16.mxu0 %v18742_v8  ;;  %v18778_v53 = vld [vmem:[%s25061_s5 + $0x9d4] ss:$8 sps:$4 sm:$0xff]   ;;  %v8630_v8 = vld [vmem:[#allocation3 + $0x10] sm:$0x80] }
 0x510   : > { %8591 = vmatprep.subr.bf16.mxu1 %v18745_v15  ;;  %v18779_v15 = vld [vmem:[%s25061_s5 + $0xad0] ss:$8 sps:$4 sm:$0xff]  }
 0x512   : > { %8571 = vmatpush1.bf16.msra.mxu0 %v18740_v54  ;;  %v8636_v54 = vpack.c.bf16 %v8633_v51, %v8630_v8  ;;  %v18823_v51 = vld [vmem:[%s25061_s5 + $0xb44] ss:$8 sps:$4 sm:$0xff]  }
 0x513   : > { %8592 = vmatpush1.bf16.msra.mxu1 %v18743_v59  ;;  %8572 = vmatprep.subr.bf16.mxu0 %v18748_v60  ;;  %v18787_v59 = vld [vmem:[%s25061_s5 + $0xae4] ss:$8 sps:$4 sm:$0xff]  }
 0x514   : > { %8593 = vmatprep.subr.bf16.mxu1 %v18751_v61  ;;  %v18784_v60 = vld [vmem:[%s25061_s5 + $0x9e4] ss:$8 sps:$4 sm:$0xff]   ;;  %v8702_v16 = vshll.u32 %v8636_v54, 16 }
 0x515   : > { %v18820_v8 = vld [vmem:[%s25061_s5 + $0xa44] ss:$8 sps:$4 sm:$0xff]  }
 0x516   : > { %8573 = vmatpush1.bf16.msra.mxu0 %v18746_v2  ;;  %v18785_v2 = vld [vmem:[%s25061_s5 + $0xae0] ss:$8 sps:$4 sm:$0xff]  }
 0x517   : > { %8594 = vmatpush1.bf16.msra.mxu1 %v18749_v3  ;;  %8574 = vmatprep.subr.bf16.mxu0 %v18754_v7  ;;  %v8699_v3 = vshrl.u32 %v8636_v54, 16 }
 0x518   : > { %8595 = vmatprep.subr.bf16.mxu1 %v18757_v13 }
 0x519   : > { %v8701_v20 = vrot.slane %v8699_v3, 3  ;;  %v18818_v3 = vld [vmem:[%s25061_s5 + $0xa40] ss:$8 sps:$4 sm:$0xff]  }
 0x51a   : > { %8575 = vmatpush1.bf16.msra.mxu0 %v18752_v10 }
 0x51b   : > { %8596 = vmatpush1.bf16.msra.mxu1 %v18755_v19  ;;  %8972 = vmatprep.subr.bf16.mxu0 %v18763_v21  ;;  %v18791_v19 = vld [vmem:[%s25061_s5 + $0xaf0] ss:$8 sps:$4 sm:$0xff]   ;;  %v8704_v21 = vrot.slane %v8702_v16, 4 }
 0x51c   : > { %8931 = vmatprep.subr.bf16.mxu1 %v18760_v24  ;;  %v9016_v24 = vld [vmem:[#allocation3 + $0x20] sm:$0x3] }
 0x51d   : > { %8577 = vmatmul.mubr.bf16.vlgmr.msra.gmra.mrb[36].mxu0 %v8316_v29  ;;  %v18805_v29 = vld [vmem:[%s25061_s5 + $0xb14] ss:$8 sps:$4 sm:$0xff]  }
 0x51e   : > { %16230 = vmatmul.mubr.msk.bf16.vlgmr.msra.gmra.mrb[64].mxu1 %vm6371_vm15, %v8318_v32  ;;  %8973 = vmatpush1.bf16.msra.mxu0 %v18761_v27  ;;  %v8705_v27 = vor.u32 %v8704_v21, %v8701_v20  ;;  %v18802_v32 = vld [vmem:[%s25061_s5 + $0xa14] ss:$8 sps:$4 sm:$0xff]  }
 0x51f   : > { %8932 = vmatpush1.bf16.msra.mxu1 %v18758_v30  ;;  %8963 = vmatprep.mubr.bf16.mxu1 %v8697_v37  ;;  %v9019_v30 = vpack.c.bf16 %v9016_v24, %v9016_v24  ;;  %v18811_v37 = vld [vmem:[%s25061_s5 + $0xb24] ss:$8 sps:$4 sm:$0xff]   ;;  %v18841_v20 = vld [vmem:[%s25061_s5 + $0xb74] ss:$8 sps:$4 sm:$0xff]   ;;  %v18836_v24 = vld [vmem:[%s25061_s5 + $0xa70] ss:$8 sps:$4 sm:$0xff]  }
 0x520   : > { %8933 = vmatprep.subr.bf16.mxu1 %v18766_v33  ;;  %8974 = vmatprep.subr.bf16.mxu0 %v18769_v34  ;;  %v18803_v33 = vld [vmem:[%s25061_s5 + $0xb10] ss:$8 sps:$4 sm:$0xff]   ;;  %v18838_v21 = vld [vmem:[%s25061_s5 + $0xa74] ss:$8 sps:$4 sm:$0xff]  }
 0x521   : > { %9004 = vmatprep.mubr.bf16.mxu0 %v19878_v35  ;;  %v18800_v34 = vld [vmem:[%s25061_s5 + $0xa10] ss:$8 sps:$4 sm:$0xff]  }
 0x522   : > { %8975 = vmatpush1.bf16.msra.mxu0 %v18767_v38  ;;  %v18808_v38 = vld [vmem:[%s25061_s5 + $0xa24] ss:$8 sps:$4 sm:$0xff]  }
 0x523   : > { %8934 = vmatpush1.bf16.msra.mxu1 %v18764_v39  ;;  %8976 = vmatprep.subr.bf16.mxu0 %v18775_v40  ;;  %v18809_v39 = vld [vmem:[%s25061_s5 + $0xb20] ss:$8 sps:$4 sm:$0xff]  }
 0x524   : > { %8935 = vmatprep.subr.bf16.mxu1 %v18772_v44  ;;  %v18806_v40 = vld [vmem:[%s25061_s5 + $0xa20] ss:$8 sps:$4 sm:$0xff]   ;;  %v18817_v44 = vld [vmem:[%s25061_s5 + $0xb34] ss:$8 sps:$4 sm:$0xff]  }
 0x526   : > { %8977 = vmatpush1.bf16.msra.mxu0 %v18773_v45  ;;  %v18814_v45 = vld [vmem:[%s25061_s5 + $0xa34] ss:$8 sps:$4 sm:$0xff]  }
 0x527   : > { %8936 = vmatpush1.bf16.msra.mxu1 %v18770_v47  ;;  %8978 = vmatprep.subr.bf16.mxu0 %v18781_v50  ;;  %v18815_v47 = vld [vmem:[%s25061_s5 + $0xb30] ss:$8 sps:$4 sm:$0xff]  }
 0x528   : > { %8937 = vmatprep.subr.bf16.mxu1 %v18778_v53  ;;  %v18812_v50 = vld [vmem:[%s25061_s5 + $0xa30] ss:$8 sps:$4 sm:$0xff]  }
 0x529   : > { %v6714_v61 = vpop.f32.mrb[44].mxu1 }
 0x52a   : > { %v6715_v63 = vadd.f32 %v6714_v61, %v22453_v41  ;;  %v6716_v1 = vpop.f32.mrb[45].mxu1  ;;  %8979 = vmatpush1.bf16.msra.mxu0 %v18779_v15  ;;  %v18793_v41 = vld [vmem:[%s25061_s5 + $0xaf4] ss:$8 sps:$4 sm:$0xff]   ;;  %v18821_v61 = vld [vmem:[%s25061_s5 + $0xb40] ss:$8 sps:$4 sm:$0xff]  }
 0x52b   : > { %v6717_v7 = vadd.f32 %v6716_v1, %v22458_v49  ;;  %v6718_v13 = vpop.f32.mrb[46].mxu1  ;;  %8938 = vmatpush1.bf16.msra.mxu1 %v18776_v56  ;;  %8980 = vmatprep.subr.bf16.mxu0 %v18787_v59  ;;  %v18790_v49 = vld [vmem:[%s25061_s5 + $0x9f4] ss:$8 sps:$4 sm:$0xff]  }
 0x52c   : > { %v22668_v17 = vadd.f32 %v22526_v57, %v6715_v63  ;;  %v6719_v18 = vpop.f32.mrb[47].mxu1  ;;  %8939 = vmatprep.subr.bf16.mxu1 %v18784_v60  ;;  %v18788_v57 = vld [vmem:[%s25061_s5 + $0x9f0] ss:$8 sps:$4 sm:$0xff]  }
 0x52d   : > { %v22674_v10 = vadd.f32 %v22531_v31, %v6717_v7  ;;  %v18796_v31 = vld [vmem:[%s25061_s5 + $0xa04] ss:$8 sps:$4 sm:$0xff]   ;;  %v18829_v7 = vld [vmem:[%s25061_s5 + $0xb54] ss:$8 sps:$4 sm:$0xff]   ;;  %v18827_v18 = vld [vmem:[%s25061_s5 + $0xb50] ss:$8 sps:$4 sm:$0xff]  }
 0x52e   : > { %8981 = vmatpush1.bf16.msra.mxu0 %v18785_v2 }
 0x52f   : > { %8940 = vmatpush1.bf16.msra.mxu1 %v18782_v14  ;;  %8982 = vmatprep.subr.bf16.mxu0 %v18793_v41  ;;  %v18826_v41 = vld [vmem:[%s25061_s5 + $0xa54] ss:$8 sps:$4 sm:$0xff]  }
 0x530   : > { %8941 = vmatprep.subr.bf16.mxu1 %v18790_v49  ;;  %v18835_v49 = vld [vmem:[%s25061_s5 + $0xb64] ss:$8 sps:$4 sm:$0xff]  }
 0x532   : > { %8983 = vmatpush1.bf16.msra.mxu0 %v18791_v19  ;;  %v18833_v19 = vld [vmem:[%s25061_s5 + $0xb60] ss:$8 sps:$4 sm:$0xff]  }
 0x533   : > { %8942 = vmatpush1.bf16.msra.mxu1 %v18788_v57  ;;  %9289 = vmatprep.subr.bf16.mxu0 %v18799_v22  ;;  %v18830_v57 = vld [vmem:[%s25061_s5 + $0xa60] ss:$8 sps:$4 sm:$0xff]  }
 0x534   : > { %8943 = vmatprep.subr.bf16.mxu1 %v18796_v31  ;;  %v8631_v22 = vld [vmem:[#allocation3 + $0x18] sm:$0x1]  ;;  %v18839_v31 = vld [vmem:[%s25061_s5 + $0xb70] ss:$8 sps:$4 sm:$0xff]  }
 0x535   : > { %16319 = vmatmul.mubr.msk.bf16.vlgmr.msra.gmra.mrb[40].mxu0 %vm6371_vm15, %v8705_v27  ;;  %v18844_v27 = vld [vmem:[%s25061_s5 + $0xa84] ss:$8 sps:$4 sm:$0xff]  }
 0x536   : > { %9290 = vmatpush1.bf16.msra.mxu0 %v18797_v25  ;;  %9321 = vmatprep.mubr.bf16.mxu0 %v9019_v30  ;;  %v18847_v25 = vld [vmem:[%s25061_s5 + $0xb84] ss:$8 sps:$4 sm:$0xff]   ;;  %v18845_v30 = vld [vmem:[%s25061_s5 + $0xb80] ss:$8 sps:$4 sm:$0xff]  }
 0x537   : > { %8944 = vmatpush1.bf16.msra.mxu1 %v18794_v26  ;;  %9291 = vmatprep.subr.bf16.mxu0 %v18805_v29  ;;  %v8628_v26 = vld [vmem:[#allocation3] sm:$0x80] }
 0x538   : > { %8945 = vmatprep.subr.bf16.mxu1 %v18802_v32  ;;  %v8634_v29 = vpack.c.bf16 %v8631_v22, %v8628_v26  ;;  %v18842_v32 = vld [vmem:[%s25061_s5 + $0xa80] ss:$8 sps:$4 sm:$0xff]   ;;  %v18884_v26 = vld [vmem:[%s25061_s5 + $0xbf0] ss:$8 sps:$4 sm:$0xff]  }
 0x539   : > { %v18881_v22 = vld [vmem:[%s25061_s5 + $0xc40] ss:$8 sps:$4 sm:$0xff]  }
 0x53a   : > { %9292 = vmatpush1.bf16.msra.mxu0 %v18803_v33  ;;  %v18853_v33 = vld [vmem:[%s25061_s5 + $0xb94] ss:$8 sps:$4 sm:$0xff]  }
 0x53b   : > { %8946 = vmatpush1.bf16.msra.mxu1 %v18800_v34  ;;  %9293 = vmatprep.subr.bf16.mxu0 %v18811_v37  ;;  %v18850_v34 = vld [vmem:[%s25061_s5 + $0xa94] ss:$8 sps:$4 sm:$0xff]   ;;  %v8683_v37 = vshrl.u32 %v8634_v29, 16 }
 0x53c   : > { %8947 = vmatprep.subr.bf16.mxu1 %v18808_v38  ;;  %v8686_v38 = vshll.u32 %v8634_v29, 16  ;;  %v18895_v29 = vld [vmem:[%s25061_s5 + $0xd64] ss:$8 sps:$4 sm:$0xff]  }
 0x53e   : > { %9294 = vmatpush1.bf16.msra.mxu0 %v18809_v39  ;;  %v18851_v39 = vld [vmem:[%s25061_s5 + $0xb90] ss:$8 sps:$4 sm:$0xff]  }
 0x53f   : > { %8948 = vmatpush1.bf16.msra.mxu1 %v18806_v40  ;;  %9295 = vmatprep.subr.bf16.mxu0 %v18817_v44  ;;  %v18848_v40 = vld [vmem:[%s25061_s5 + $0xa90] ss:$8 sps:$4 sm:$0xff]   ;;  %v18856_v44 = vld [vmem:[%s25061_s5 + $0xba4] ss:$8 sps:$4 sm:$0xff]  }
 0x540   : > { %v7078_v53 = vpop.f32.mrb[20].mxu0  ;;  %8949 = vmatprep.subr.bf16.mxu1 %v18814_v45 }
 0x541   : > { %v7119_v15 = vpop.f32.mrb[48].mxu1  ;;  %v7080_v54 = vpop.f32.mrb[21].mxu0 }
 0x542   : > { %v7120_v56 = vadd.f32 %v7119_v15, %v7078_v53  ;;  %v7121_v59 = vpop.f32.mrb[49].mxu1  ;;  %v7082_v60 = vpop.f32.mrb[22].mxu0  ;;  %9296 = vmatpush1.bf16.msra.mxu0 %v18815_v47  ;;  %v8685_v47 = vrot.slane %v8683_v37, 3  ;;  %v18854_v15 = vld [vmem:[%s25061_s5 + $0xba0] ss:$8 sps:$4 sm:$0xff]  }
 0x543   : > { %v7122_v63 = vadd.f32 %v7121_v59, %v7080_v54  ;;  %v7123_v1 = vpop.f32.mrb[50].mxu1  ;;  %8950 = vmatpush1.bf16.msra.mxu1 %v18812_v50  ;;  %v7083_v2 = vpop.f32.mrb[23].mxu0  ;;  %9297 = vmatprep.subr.bf16.mxu0 %v18823_v51  ;;  %v8688_v50 = vrot.slane %v8686_v38, 4  ;;  %v18859_v51 = vld [vmem:[%s25061_s5 + $0xc04] ss:$8 sps:$4 sm:$0xff]  }
 0x544   : > { %v22747_v13 = vadd.f32 %v7120_v56, %v22668_v17  ;;  %v7124_v14 = vpop.f32.mrb[51].mxu1  ;;  %8951 = vmatprep.subr.bf16.mxu1 %v18820_v8  ;;  %v18824_v17 = vld [vmem:[%s25061_s5 + $0xa50] ss:$8 sps:$4 sm:$0xff]   ;;  %v18857_v56 = vld [vmem:[%s25061_s5 + $0xc00] ss:$8 sps:$4 sm:$0xff]  }
 0x545   : > { %v22753_v16 = vadd.f32 %v7122_v63, %v22674_v10  ;;  %v18832_v10 = vld [vmem:[%s25061_s5 + $0xa64] ss:$8 sps:$4 sm:$0xff]   ;;  %v18862_v59 = vld [vmem:[%s25061_s5 + $0xbb4] ss:$8 sps:$4 sm:$0xff]   ;;  %v8689_v60 = vor.u32 %v8688_v50, %v8685_v47  ;;  %v18860_v63 = vld [vmem:[%s25061_s5 + $0xbb0] ss:$8 sps:$4 sm:$0xff]  }
 0x546   : > { %9298 = vmatpush1.bf16.msra.mxu0 %v18821_v61  ;;  %v18865_v61 = vld [vmem:[%s25061_s5 + $0xc14] ss:$8 sps:$4 sm:$0xff]   ;;  %v18863_v1 = vld [vmem:[%s25061_s5 + $0xc10] ss:$8 sps:$4 sm:$0xff]   ;;  %v18868_v2 = vld [vmem:[%s25061_s5 + $0xbc4] ss:$8 sps:$4 sm:$0xff]  }
 0x547   : > { %8952 = vmatpush1.bf16.msra.mxu1 %v18818_v3  ;;  %9299 = vmatprep.subr.bf16.mxu0 %v18829_v7  ;;  %v18871_v3 = vld [vmem:[%s25061_s5 + $0xc24] ss:$8 sps:$4 sm:$0xff]   ;;  %v18866_v7 = vld [vmem:[%s25061_s5 + $0xbc0] ss:$8 sps:$4 sm:$0xff]   ;;  %v18898_v47 = vld [vmem:[%s25061_s5 + $0xc74] ss:$8 sps:$4 sm:$0xff]  }
 0x548   : > { %8953 = vmatprep.subr.bf16.mxu1 %v18826_v41  ;;  %v18869_v14 = vld [vmem:[%s25061_s5 + $0xc20] ss:$8 sps:$4 sm:$0xff]   ;;  %v18874_v41 = vld [vmem:[%s25061_s5 + $0xbd4] ss:$8 sps:$4 sm:$0xff]  }
 0x549   : > { %v18893_v37 = vld [vmem:[%s25061_s5 + $0xd60] ss:$8 sps:$4 sm:$0xff]   ;;  %v18901_v50 = vld [vmem:[%s25061_s5 + $0xd74] ss:$8 sps:$4 sm:$0xff]  }
 0x54a   : > { %9300 = vmatpush1.bf16.msra.mxu0 %v18827_v18  ;;  %v18877_v18 = vld [vmem:[%s25061_s5 + $0xc34] ss:$8 sps:$4 sm:$0xff]  }
 0x54b   : > { %8954 = vmatpush1.bf16.msra.mxu1 %v18824_v17  ;;  %9301 = vmatprep.subr.bf16.mxu0 %v18835_v49  ;;  %v18872_v17 = vld [vmem:[%s25061_s5 + $0xbd0] ss:$8 sps:$4 sm:$0xff]  }
 0x54c   : > { %8955 = vmatprep.subr.bf16.mxu1 %v18832_v10  ;;  %v9374_v49 = vld [vmem:[#allocation3 + $0x20] sm:$0x6] }
 0x54d   : > { %v18875_v10 = vld [vmem:[%s25061_s5 + $0xc30] ss:$8 sps:$4 sm:$0xff]  }
 0x54e   : > { %9302 = vmatpush1.bf16.msra.mxu0 %v18833_v19  ;;  %v18880_v19 = vld [vmem:[%s25061_s5 + $0xbe4] ss:$8 sps:$4 sm:$0xff]  }
 0x54f   : > { %8956 = vmatpush1.bf16.msra.mxu1 %v18830_v57  ;;  %9303 = vmatprep.subr.bf16.mxu0 %v18841_v20  ;;  %v18883_v57 = vld [vmem:[%s25061_s5 + $0xc44] ss:$8 sps:$4 sm:$0xff]   ;;  %v9377_v20 = vpack.c.bf16 %v9374_v49, %v9374_v49 }
 0x550   : > { %8957 = vmatprep.subr.bf16.mxu1 %v18838_v21  ;;  %v18878_v21 = vld [vmem:[%s25061_s5 + $0xbe0] ss:$8 sps:$4 sm:$0xff]  }
 0x552   : > { %9304 = vmatpush1.bf16.msra.mxu0 %v18839_v31  ;;  %v18886_v31 = vld [vmem:[%s25061_s5 + $0xbf4] ss:$8 sps:$4 sm:$0xff]  }
 0x553   : > { %8958 = vmatpush1.bf16.msra.mxu1 %v18836_v24  ;;  %9305 = vmatprep.subr.bf16.mxu0 %v18847_v25  ;;  %v18889_v24 = vld [vmem:[%s25061_s5 + $0xc54] ss:$8 sps:$4 sm:$0xff]   ;;  %v9434_v25 = vshll.u32 %v9377_v20, 16 }
 0x554   : > { %8959 = vmatprep.subr.bf16.mxu1 %v18844_v27  ;;  %v18887_v27 = vld [vmem:[%s25061_s5 + $0xc50] ss:$8 sps:$4 sm:$0xff]  }
 0x556   : > { %9306 = vmatpush1.bf16.msra.mxu0 %v18845_v30  ;;  %v9015_v30 = vld [vmem:[#allocation3 + $0x18] sm:$0x3] }
 0x557   : > { %8960 = vmatpush1.bf16.msra.mxu1 %v18842_v32  ;;  %9307 = vmatprep.subr.bf16.mxu0 %v18853_v33  ;;  %v18892_v32 = vld [vmem:[%s25061_s5 + $0xc64] ss:$8 sps:$4 sm:$0xff]   ;;  %v9017_v33 = vld [vmem:[#allocation3 + $0x28] sm:$0x3]  ;;  %v9018_v38 = vpack.c.bf16 %v9015_v30, %v9015_v30 }
 0x558   : > { %v22812_v45 = vpop.f32.mrb[24].mxu0  ;;  %8961 = vmatprep.subr.bf16.mxu1 %v18850_v34  ;;  %v9436_v34 = vrot.slane %v9434_v25, 1  ;;  %v9755_v25 = vld [vmem:[#allocation3 + $0x20] sm:$0xc] }
 0x559   : > { %v22817_v53 = vpop.f32.mrb[25].mxu0  ;;  %v9758_v30 = vpack.c.bf16 %v9755_v25, %v9755_v25  ;;  %v18967_v25 = vld [vmem:[%s25061_s5 + $0xe24] ss:$8 sps:$4 sm:$0xff]  }
 0x55a   : > { %v7507_v8 = vpop.f32.mrb[26].mxu0  ;;  %9308 = vmatpush1.bf16.msra.mxu0 %v18851_v39  ;;  %v18890_v39 = vld [vmem:[%s25061_s5 + $0xc60] ss:$8 sps:$4 sm:$0xff]  }
 0x55b   : > { %8962 = vmatpush1.bf16.msra.mxu1 %v18848_v40  ;;  %v7508_v54 = vpop.f32.mrb[27].mxu0  ;;  %9309 = vmatprep.subr.bf16.mxu0 %v18856_v44  ;;  %v9432_v40 = vshrl.u32 %v9377_v20, 16  ;;  %v9020_v44 = vpack.c.bf16 %v9017_v33, %v9017_v33  ;;  %v18899_v8 = vld [vmem:[%s25061_s5 + $0xd70] ss:$8 sps:$4 sm:$0xff]   ;;  %v18914_v20 = vld [vmem:[%s25061_s5 + $0xca0] ss:$8 sps:$4 sm:$0xff]  }
 0x55c   : > { %9330 = vmatprep.subr.bf16.mxu1 %v18859_v51  ;;  %v18907_v54 = vld [vmem:[%s25061_s5 + $0xd84] ss:$8 sps:$4 sm:$0xff]   ;;  %v18929_v33 = vld [vmem:[%s25061_s5 + $0xdc0] ss:$8 sps:$4 sm:$0xff]  }
 0x55d   : > { %v9437_v51 = vor.u32 %v9436_v34, %v9432_v40  ;;  %v18926_v34 = vld [vmem:[%s25061_s5 + $0xcc0] ss:$8 sps:$4 sm:$0xff]   ;;  %v18934_v40 = vld [vmem:[%s25061_s5 + $0xcd4] ss:$8 sps:$4 sm:$0xff]  }
 0x55e   : > { %8964 = vmatmul.mubr.bf16.vlgmr.msra.gmra.mrb[68].mxu1 %v8689_v60  ;;  %9310 = vmatpush1.bf16.msra.mxu0 %v18854_v15  ;;  %v18896_v15 = vld [vmem:[%s25061_s5 + $0xc70] ss:$8 sps:$4 sm:$0xff]   ;;  %v18902_v60 = vld [vmem:[%s25061_s5 + $0xc80] ss:$8 sps:$4 sm:$0xff]  }
 0x55f   : > { %9331 = vmatpush1.bf16.msra.mxu1 %v18857_v56  ;;  %9311 = vmatprep.subr.bf16.mxu0 %v18862_v59  ;;  %v18904_v56 = vld [vmem:[%s25061_s5 + $0xc84] ss:$8 sps:$4 sm:$0xff]   ;;  %v18905_v59 = vld [vmem:[%s25061_s5 + $0xd80] ss:$8 sps:$4 sm:$0xff]  }
 0x560   : > { %9332 = vmatprep.subr.bf16.mxu1 %v18865_v61  ;;  %9362 = vmatprep.mubr.bf16.mxu1 %v19878_v35  ;;  %v18913_v61 = vld [vmem:[%s25061_s5 + $0xd94] ss:$8 sps:$4 sm:$0xff]  }
 0x562   : > { %9312 = vmatpush1.bf16.msra.mxu0 %v18860_v63  ;;  %v18910_v63 = vld [vmem:[%s25061_s5 + $0xc94] ss:$8 sps:$4 sm:$0xff]  }
 0x563   : > { %9333 = vmatpush1.bf16.msra.mxu1 %v18863_v1  ;;  %9313 = vmatprep.subr.bf16.mxu0 %v18868_v2  ;;  %v9375_v1 = vld [vmem:[#allocation3 + $0x28] sm:$0x6] }
 0x564   : > { %9334 = vmatprep.subr.bf16.mxu1 %v18871_v3  ;;  %v18911_v2 = vld [vmem:[%s25061_s5 + $0xd90] ss:$8 sps:$4 sm:$0xff]  }
 0x565   : > { %v18908_v3 = vld [vmem:[%s25061_s5 + $0xc90] ss:$8 sps:$4 sm:$0xff]  }
 0x566   : > { %9314 = vmatpush1.bf16.msra.mxu0 %v18866_v7  ;;  %v18919_v7 = vld [vmem:[%s25061_s5 + $0xda4] ss:$8 sps:$4 sm:$0xff]  }
 0x567   : > { %9335 = vmatpush1.bf16.msra.mxu1 %v18869_v14  ;;  %9315 = vmatprep.subr.bf16.mxu0 %v18874_v41  ;;  %v9378_v14 = vpack.c.bf16 %v9375_v1, %v9375_v1  ;;  %v18916_v41 = vld [vmem:[%s25061_s5 + $0xca4] ss:$8 sps:$4 sm:$0xff]  }
 0x568   : > { %9336 = vmatprep.subr.bf16.mxu1 %v18877_v18  ;;  %v18952_v1 = vld [vmem:[%s25061_s5 + $0xd04] ss:$8 sps:$4 sm:$0xff]  }
 0x56a   : > { %9316 = vmatpush1.bf16.msra.mxu0 %v18872_v17 }
 0x56b   : > { %9337 = vmatpush1.bf16.msra.mxu1 %v18875_v10  ;;  %9317 = vmatprep.subr.bf16.mxu0 %v18880_v19  ;;  %v18917_v10 = vld [vmem:[%s25061_s5 + $0xda0] ss:$8 sps:$4 sm:$0xff]  }
 0x56c   : > { %9338 = vmatprep.subr.bf16.mxu1 %v18883_v57 }
 0x56e   : > { %9318 = vmatpush1.bf16.msra.mxu0 %v18878_v21  ;;  %v18925_v21 = vld [vmem:[%s25061_s5 + $0xdb4] ss:$8 sps:$4 sm:$0xff]  }
 0x56f   : > { %9339 = vmatpush1.bf16.msra.mxu1 %v18881_v22  ;;  %9319 = vmatprep.subr.bf16.mxu0 %v18886_v31 }
 0x570   : > { %9340 = vmatprep.subr.bf16.mxu1 %v18889_v24 }
 0x572   : > { %9320 = vmatpush1.bf16.msra.mxu0 %v18884_v26  ;;  %v18923_v26 = vld [vmem:[%s25061_s5 + $0xdb0] ss:$8 sps:$4 sm:$0xff]  }
 0x573   : > { %9341 = vmatpush1.bf16.msra.mxu1 %v18887_v27  ;;  %9711 = vmatprep.subr.bf16.mxu0 %v18895_v29  ;;  %v18931_v29 = vld [vmem:[%s25061_s5 + $0xdc4] ss:$8 sps:$4 sm:$0xff]  }
 0x574   : > { %9670 = vmatprep.subr.bf16.mxu1 %v18892_v32  ;;  %v9439_v32 = vshrl.u32 %v9378_v14, 16 }
 0x575   : > { %9322 = vmatmul.mubr.bf16.vlgmr.msra.gmra.mrb[44].mxu0 %v9018_v38  ;;  %v18937_v38 = vld [vmem:[%s25061_s5 + $0xdd4] ss:$8 sps:$4 sm:$0xff]  }
 0x576   : > { %16408 = vmatmul.mubr.msk.bf16.vlgmr.msra.gmra.mrb[72].mxu1 %vm6371_vm15, %v9020_v44  ;;  %9712 = vmatpush1.bf16.msra.mxu0 %v18893_v37  ;;  %v18935_v44 = vld [vmem:[%s25061_s5 + $0xdd0] ss:$8 sps:$4 sm:$0xff]  }
 0x577   : > { %9671 = vmatpush1.bf16.msra.mxu1 %v18890_v39  ;;  %9702 = vmatprep.mubr.bf16.mxu1 %v9437_v51  ;;  %v9809_v39 = vrot.slane %v9758_v30, 1  ;;  %v18940_v51 = vld [vmem:[%s25061_s5 + $0xce4] ss:$8 sps:$4 sm:$0xff]   ;;  %v18971_v30 = vld [vmem:[%s25061_s5 + $0xe30] ss:$8 sps:$4 sm:$0xff]  }
 0x578   : > { %9672 = vmatprep.subr.bf16.mxu1 %v18898_v47  ;;  %9713 = vmatprep.subr.bf16.mxu0 %v18901_v50  ;;  %v18932_v47 = vld [vmem:[%s25061_s5 + $0xcd0] ss:$8 sps:$4 sm:$0xff]   ;;  %v18943_v50 = vld [vmem:[%s25061_s5 + $0xde4] ss:$8 sps:$4 sm:$0xff]  }
 0x579   : > { %9743 = vmatprep.mubr.bf16.mxu0 %v19878_v35 }
 0x57a   : > { %9714 = vmatpush1.bf16.msra.mxu0 %v18899_v8  ;;  %v18941_v8 = vld [vmem:[%s25061_s5 + $0xde0] ss:$8 sps:$4 sm:$0xff]  }
 0x57b   : > { %9673 = vmatpush1.bf16.msra.mxu1 %v18896_v15  ;;  %9715 = vmatprep.subr.bf16.mxu0 %v18907_v54  ;;  %v18938_v15 = vld [vmem:[%s25061_s5 + $0xce0] ss:$8 sps:$4 sm:$0xff]   ;;  %v18949_v54 = vld [vmem:[%s25061_s5 + $0xdf4] ss:$8 sps:$4 sm:$0xff]  }
 0x57c   : > { %9674 = vmatprep.subr.bf16.mxu1 %v18904_v56  ;;  %v18946_v56 = vld [vmem:[%s25061_s5 + $0xcf4] ss:$8 sps:$4 sm:$0xff]  }
 0x57e   : > { %9716 = vmatpush1.bf16.msra.mxu0 %v18905_v59  ;;  %v18947_v59 = vld [vmem:[%s25061_s5 + $0xdf0] ss:$8 sps:$4 sm:$0xff]  }
 0x57f   : > { %9675 = vmatpush1.bf16.msra.mxu1 %v18902_v60  ;;  %9717 = vmatprep.subr.bf16.mxu0 %v18913_v61  ;;  %v18944_v60 = vld [vmem:[%s25061_s5 + $0xcf0] ss:$8 sps:$4 sm:$0xff]   ;;  %v18955_v61 = vld [vmem:[%s25061_s5 + $0xe04] ss:$8 sps:$4 sm:$0xff]  }
 0x580   : > { %9676 = vmatprep.subr.bf16.mxu1 %v18910_v63 }
 0x581   : > { %v7462_v18 = vpop.f32.mrb[52].mxu1 }
 0x582   : > { %v7504_v17 = vadd.f32 %v22812_v45, %v7462_v18  ;;  %v7464_v49 = vpop.f32.mrb[53].mxu1  ;;  %9718 = vmatpush1.bf16.msra.mxu0 %v18911_v2  ;;  %v9441_v45 = vshll.u32 %v9378_v14, 16  ;;  %v18953_v18 = vld [vmem:[%s25061_s5 + $0xe00] ss:$8 sps:$4 sm:$0xff]  }
 0x583   : > { %v7506_v19 = vadd.f32 %v22817_v53, %v7464_v49  ;;  %v7466_v57 = vpop.f32.mrb[54].mxu1  ;;  %9677 = vmatpush1.bf16.msra.mxu1 %v18908_v3  ;;  %9719 = vmatprep.subr.bf16.mxu0 %v18919_v7  ;;  %v18922_v53 = vld [vmem:[%s25061_s5 + $0xcb4] ss:$8 sps:$4 sm:$0xff]  }
 0x584   : > { %v22954_v22 = vadd.f32 %v7504_v17, %v22747_v13  ;;  %v7467_v31 = vpop.f32.mrb[55].mxu1  ;;  %9678 = vmatprep.subr.bf16.mxu1 %v18916_v41  ;;  %v18920_v13 = vld [vmem:[%s25061_s5 + $0xcb0] ss:$8 sps:$4 sm:$0xff]   ;;  %v9443_v27 = vrot.slane %v9441_v45, 1  ;;  %v18961_v57 = vld [vmem:[%s25061_s5 + $0xe14] ss:$8 sps:$4 sm:$0xff]  }
 0x585   : > { %v22960_v24 = vadd.f32 %v7506_v19, %v22753_v16  ;;  %v18928_v16 = vld [vmem:[%s25061_s5 + $0xcc4] ss:$8 sps:$4 sm:$0xff]   ;;  %v18950_v19 = vld [vmem:[%s25061_s5 + $0xd00] ss:$8 sps:$4 sm:$0xff]   ;;  %v18958_v45 = vld [vmem:[%s25061_s5 + $0xd14] ss:$8 sps:$4 sm:$0xff]  }
 0x586   : > { %9720 = vmatpush1.bf16.msra.mxu0 %v18917_v10  ;;  %v9444_v37 = vor.u32 %v9443_v27, %v9439_v32  ;;  %v18973_v27 = vld [vmem:[%s25061_s5 + $0xe34] ss:$8 sps:$4 sm:$0xff]   ;;  %v18968_v32 = vld [vmem:[%s25061_s5 + $0xd30] ss:$8 sps:$4 sm:$0xff]  }
 0x587   : > { %9679 = vmatpush1.bf16.msra.mxu1 %v18914_v20  ;;  %9721 = vmatprep.subr.bf16.mxu0 %v18925_v21 }
 0x588   : > { %9680 = vmatprep.subr.bf16.mxu1 %v18922_v53  ;;  %v18959_v53 = vld [vmem:[%s25061_s5 + $0xe10] ss:$8 sps:$4 sm:$0xff]  }
 0x58a   : > { %9722 = vmatpush1.bf16.msra.mxu0 %v18923_v26  ;;  %v18965_v26 = vld [vmem:[%s25061_s5 + $0xe20] ss:$8 sps:$4 sm:$0xff]  }
 0x58b   : > { %9681 = vmatpush1.bf16.msra.mxu1 %v18920_v13  ;;  %10036 = vmatprep.subr.bf16.mxu0 %v18931_v29  ;;  %v18962_v13 = vld [vmem:[%s25061_s5 + $0xd20] ss:$8 sps:$4 sm:$0xff]   ;;  %v18970_v29 = vld [vmem:[%s25061_s5 + $0xd34] ss:$8 sps:$4 sm:$0xff]  }
 0x58c   : > { %9682 = vmatprep.subr.bf16.mxu1 %v18928_v16  ;;  %v9373_v16 = vld [vmem:[#allocation3 + $0x18] sm:$0x6] }
 0x58d   : > { %16497 = vmatmul.mubr.msk.bf16.vlgmr.msra.gmra.mrb[48].mxu0 %vm6371_vm15, %v9444_v37  ;;  %v9376_v37 = vpack.c.bf16 %v9373_v16, %v9373_v16  ;;  %v9756_v16 = vld [vmem:[#allocation3 + $0x28] sm:$0xc] }
 0x58e   : > { %10037 = vmatpush1.bf16.msra.mxu0 %v18929_v33  ;;  %10068 = vmatprep.mubr.bf16.mxu0 %v9809_v39  ;;  %v18979_v33 = vld [vmem:[%s25061_s5 + $0xe44] ss:$8 sps:$4 sm:$0xff]   ;;  %v18974_v39 = vld [vmem:[%s25061_s5 + $0xd40] ss:$8 sps:$4 sm:$0xff]  }
 0x58f   : > { %9683 = vmatpush1.bf16.msra.mxu1 %v18926_v34  ;;  %10038 = vmatprep.subr.bf16.mxu0 %v18937_v38  ;;  %v18976_v34 = vld [vmem:[%s25061_s5 + $0xd44] ss:$8 sps:$4 sm:$0xff]   ;;  %v18977_v38 = vld [vmem:[%s25061_s5 + $0xe40] ss:$8 sps:$4 sm:$0xff]  }
 0x590   : > { %9684 = vmatprep.subr.bf16.mxu1 %v18934_v40  ;;  %v18985_v40 = vld [vmem:[%s25061_s5 + $0xe54] ss:$8 sps:$4 sm:$0xff]  }
 0x592   : > { %10039 = vmatpush1.bf16.msra.mxu0 %v18935_v44  ;;  %v18982_v44 = vld [vmem:[%s25061_s5 + $0xd54] ss:$8 sps:$4 sm:$0xff]  }
 0x593   : > { %9685 = vmatpush1.bf16.msra.mxu1 %v18932_v47  ;;  %10040 = vmatprep.subr.bf16.mxu0 %v18943_v50  ;;  %v9427_v47 = vshll.u32 %v9376_v37, 16  ;;  %v18983_v50 = vld [vmem:[%s25061_s5 + $0xe50] ss:$8 sps:$4 sm:$0xff]  }
 0x594   : > { %9686 = vmatprep.subr.bf16.mxu1 %v18940_v51  ;;  %v18980_v51 = vld [vmem:[%s25061_s5 + $0xd50] ss:$8 sps:$4 sm:$0xff]  }
 0x596   : > { %10041 = vmatpush1.bf16.msra.mxu0 %v18941_v8  ;;  %v18988_v8 = vld [vmem:[%s25061_s5 + $0xe64] ss:$8 sps:$4 sm:$0xff]  }
 0x597   : > { %9687 = vmatpush1.bf16.msra.mxu1 %v18938_v15  ;;  %10042 = vmatprep.subr.bf16.mxu0 %v18949_v54  ;;  %v9429_v54 = vrot.slane %v9427_v47, 1  ;;  %v19025_v47 = vld [vmem:[%s25061_s5 + $0x270] ss:$8 sps:$4 sm:$0xff]  }
 0x598   : > { %v7828_v63 = vpop.f32.mrb[28].mxu0  ;;  %9688 = vmatprep.subr.bf16.mxu1 %v18946_v56  ;;  %v18991_v56 = vld [vmem:[%s25061_s5 + $0xec4] ss:$8 sps:$4 sm:$0xff]  }
 0x599   : > { %v7869_v2 = vpop.f32.mrb[56].mxu1  ;;  %v7830_v3 = vpop.f32.mrb[29].mxu0 }
 0x59a   : > { %v7870_v7 = vadd.f32 %v7869_v2, %v7828_v63  ;;  %v7871_v14 = vpop.f32.mrb[57].mxu1  ;;  %v7832_v41 = vpop.f32.mrb[30].mxu0  ;;  %10043 = vmatpush1.bf16.msra.mxu0 %v18947_v59  ;;  %v18986_v63 = vld [vmem:[%s25061_s5 + $0xe60] ss:$8 sps:$4 sm:$0xff]  }
 0x59b   : > { %v7872_v17 = vadd.f32 %v7871_v14, %v7830_v3  ;;  %v7873_v49 = vpop.f32.mrb[58].mxu1  ;;  %9689 = vmatpush1.bf16.msra.mxu1 %v18944_v60  ;;  %v7833_v10 = vpop.f32.mrb[31].mxu0  ;;  %10044 = vmatprep.subr.bf16.mxu0 %v18955_v61  ;;  %v9425_v61 = vshrl.u32 %v9376_v37, 16  ;;  %v18989_v2 = vld [vmem:[%s25061_s5 + $0xec0] ss:$8 sps:$4 sm:$0xff]   ;;  %v9759_v37 = vpack.c.bf16 %v9756_v16, %v9756_v16 }
 0x59c   : > { %v23033_v20 = vadd.f32 %v7870_v7, %v22954_v22  ;;  %v7874_v21 = vpop.f32.mrb[59].mxu1  ;;  %9690 = vmatprep.subr.bf16.mxu1 %v18952_v1  ;;  %v18956_v22 = vld [vmem:[%s25061_s5 + $0xd10] ss:$8 sps:$4 sm:$0xff]   ;;  %v18994_v3 = vld [vmem:[%s25061_s5 + $0xe74] ss:$8 sps:$4 sm:$0xff]  }
 0x59d   : > { %v23039_v31 = vadd.f32 %v7872_v17, %v22960_v24  ;;  %v18964_v24 = vld [vmem:[%s25061_s5 + $0xd24] ss:$8 sps:$4 sm:$0xff]   ;;  %v9430_v7 = vor.u32 %v9429_v54, %v9425_v61  ;;  %v18997_v14 = vld [vmem:[%s25061_s5 + $0xed4] ss:$8 sps:$4 sm:$0xff]   ;;  %v18992_v41 = vld [vmem:[%s25061_s5 + $0xe70] ss:$8 sps:$4 sm:$0xff]  }
 0x59e   : > { %10045 = vmatpush1.bf16.msra.mxu0 %v18953_v18  ;;  %v18995_v18 = vld [vmem:[%s25061_s5 + $0xed0] ss:$8 sps:$4 sm:$0xff]   ;;  %v19000_v17 = vld [vmem:[%s25061_s5 + $0xe84] ss:$8 sps:$4 sm:$0xff]   ;;  %v18998_v10 = vld [vmem:[%s25061_s5 + $0xe80] ss:$8 sps:$4 sm:$0xff]  }
 0x59f   : > { %9691 = vmatpush1.bf16.msra.mxu1 %v18950_v19  ;;  %10046 = vmatprep.subr.bf16.mxu0 %v18961_v57  ;;  %v19003_v49 = vld [vmem:[%s25061_s5 + $0xee4] ss:$8 sps:$4 sm:$0xff]   ;;  %v19001_v19 = vld [vmem:[%s25061_s5 + $0xee0] ss:$8 sps:$4 sm:$0xff]   ;;  %v19006_v57 = vld [vmem:[%s25061_s5 + $0xe94] ss:$8 sps:$4 sm:$0xff]  }
 0x5a0   : > { %9692 = vmatprep.subr.bf16.mxu1 %v18958_v45  ;;  %v19009_v21 = vld [vmem:[%s25061_s5 + $0xef4] ss:$8 sps:$4 sm:$0xff]   ;;  %v19004_v45 = vld [vmem:[%s25061_s5 + $0xe90] ss:$8 sps:$4 sm:$0xff]  }
 0x5a1   : > { %v19031_v54 = vld [vmem:[%s25061_s5 + $0x290] ss:$8 sps:$4 sm:$0xff]  }
 0x5a2   : > { %10047 = vmatpush1.bf16.msra.mxu0 %v18959_v53  ;;  %v19007_v53 = vld [vmem:[%s25061_s5 + $0xef0] ss:$8 sps:$4 sm:$0xff]  }
 0x5a3   : > { %9693 = vmatpush1.bf16.msra.mxu1 %v18956_v22  ;;  %10048 = vmatprep.subr.bf16.mxu0 %v18967_v25  ;;  %v19012_v22 = vld [vmem:[%s25061_s5 + $0xea4] ss:$8 sps:$4 sm:$0xff]  }
 0x5a4   : > { %9694 = vmatprep.subr.bf16.mxu1 %v18964_v24  ;;  %v19015_v25 = vld [vmem:[%s25061_s5 + $0xf04] ss:$8 sps:$4 sm:$0xff]   ;;  %v19010_v24 = vld [vmem:[%s25061_s5 + $0xea0] ss:$8 sps:$4 sm:$0xff]  }
 0x5a6   : > { %10049 = vmatpush1.bf16.msra.mxu0 %v18965_v26  ;;  %v19013_v26 = vld [vmem:[%s25061_s5 + $0xf00] ss:$8 sps:$4 sm:$0xff]  }
 0x5a7   : > { %9695 = vmatpush1.bf16.msra.mxu1 %v18962_v13  ;;  %10050 = vmatprep.subr.bf16.mxu0 %v18973_v27  ;;  %v19018_v13 = vld [vmem:[%s25061_s5 + $0xeb4] ss:$8 sps:$4 sm:$0xff]  }
 0x5a8   : > { %9696 = vmatprep.subr.bf16.mxu1 %v18970_v29  ;;  %v19021_v27 = vld [vmem:[%s25061_s5 + $0xf14] ss:$8 sps:$4 sm:$0xff]   ;;  %v9754_v29 = vld [vmem:[#allocation3 + $0x18] sm:$0xc] }
 0x5aa   : > { %10051 = vmatpush1.bf16.msra.mxu0 %v18971_v30  ;;  %v19016_v30 = vld [vmem:[%s25061_s5 + $0xeb0] ss:$8 sps:$4 sm:$0xff]  }
 0x5ab   : > { %9697 = vmatpush1.bf16.msra.mxu1 %v18968_v32  ;;  %10052 = vmatprep.subr.bf16.mxu0 %v18979_v33  ;;  %v19019_v32 = vld [vmem:[%s25061_s5 + $0xf10] ss:$8 sps:$4 sm:$0xff]   ;;  %v9757_v33 = vpack.c.bf16 %v9754_v29, %v9754_v29  ;;  %v19052_v29 = vld [vmem:[%s25061_s5 + $0x40] ss:$8 sps:$4 sm:$0xff]  }
 0x5ac   : > { %9698 = vmatprep.subr.bf16.mxu1 %v18976_v34  ;;  %v19024_v34 = vld [vmem:[%s25061_s5 + $0x264] ss:$8 sps:$4 sm:$0xff]  }
 0x5ae   : > { %10053 = vmatpush1.bf16.msra.mxu0 %v18977_v38  ;;  %v19022_v38 = vld [vmem:[%s25061_s5 + $0x260] ss:$8 sps:$4 sm:$0xff]  }
 0x5af   : > { %9699 = vmatpush1.bf16.msra.mxu1 %v18974_v39  ;;  %10054 = vmatprep.subr.bf16.mxu0 %v18985_v40  ;;  %v9808_v39 = vrot.slane %v9757_v33, 1  ;;  %v19027_v40 = vld [vmem:[%s25061_s5 + $0x274] ss:$8 sps:$4 sm:$0xff]  }
 0x5b0   : > { %v23098_v15 = vpop.f32.mrb[32].mxu0  ;;  %9700 = vmatprep.subr.bf16.mxu1 %v18982_v44  ;;  %v9810_v44 = vrot.slane %v9759_v37, 1  ;;  %v19057_v33 = vld [vmem:[%s25061_s5 + $0x54] ss:$8 sps:$4 sm:$0xff]  }
 0x5b1   : > { %v23103_v59 = vpop.f32.mrb[33].mxu0 }
 0x5b2   : > { %v8257_v60 = vpop.f32.mrb[34].mxu0  ;;  %10055 = vmatpush1.bf16.msra.mxu0 %v18983_v50  ;;  %v19030_v50 = vld [vmem:[%s25061_s5 + $0x284] ss:$8 sps:$4 sm:$0xff]  }
 0x5b3   : > { %9701 = vmatpush1.bf16.msra.mxu1 %v18980_v51  ;;  %v8258_v1 = vpop.f32.mrb[35].mxu0  ;;  %10056 = vmatprep.subr.bf16.mxu0 %v18988_v8  ;;  %v19028_v51 = vld [vmem:[%s25061_s5 + $0x280] ss:$8 sps:$4 sm:$0xff]   ;;  %v19033_v8 = vld [vmem:[%s25061_s5 + $0x294] ss:$8 sps:$4 sm:$0xff]  }
 0x5b4   : > { %10077 = vmatprep.subr.bf16.mxu1 %v18991_v56  ;;  %v19036_v56 = vld [vmem:[%s25061_s5 + $0x2a4] ss:$8 sps:$4 sm:$0xff]   ;;  %v19034_v1 = vld [vmem:[%s25061_s5 + $0x2a0] ss:$8 sps:$4 sm:$0xff]  }
 0x5b6   : > { %9703 = vmatmul.mubr.bf16.vlgmr.msra.gmra.mrb[76].mxu1 %v9430_v7  ;;  %10057 = vmatpush1.bf16.msra.mxu0 %v18986_v63  ;;  %v19039_v7 = vld [vmem:[%s25061_s5 + $0x2b4] ss:$8 sps:$4 sm:$0xff]  }
 0x5b7   : > { %10078 = vmatpush1.bf16.msra.mxu1 %v18989_v2  ;;  %10058 = vmatprep.subr.bf16.mxu0 %v18994_v3 }
 0x5b8   : > { %10079 = vmatprep.subr.bf16.mxu1 %v18997_v14  ;;  %10109 = vmatprep.mubr.bf16.mxu1 %v19878_v35 }
 0x5ba   : > { %10059 = vmatpush1.bf16.msra.mxu0 %v18992_v41 }
 0x5bb   : > { %10080 = vmatpush1.bf16.msra.mxu1 %v18995_v18  ;;  %10060 = vmatprep.subr.bf16.mxu0 %v19000_v17  ;;  %v19040_v17 = vld [vmem:[%s25061_s5] ss:$8 sps:$4 sm:$0xff]  }
 0x5bc   : > { %10081 = vmatprep.subr.bf16.mxu1 %v19003_v49 }
 0x5be   : > { %10061 = vmatpush1.bf16.msra.mxu0 %v18998_v10  ;;  %v19043_v10 = vld [vmem:[%s25061_s5 + $0x10] ss:$8 sps:$4 sm:$0xff]  }
 0x5bf   : > { %10082 = vmatpush1.bf16.msra.mxu1 %v19001_v19  ;;  %10062 = vmatprep.subr.bf16.mxu0 %v19006_v57  ;;  %v19048_v19 = vld [vmem:[%s25061_s5 + $0x24] ss:$8 sps:$4 sm:$0xff]   ;;  %v19046_v57 = vld [vmem:[%s25061_s5 + $0x20] ss:$8 sps:$4 sm:$0xff]  }
 0x5c0   : > { %10083 = vmatprep.subr.bf16.mxu1 %v19009_v21  ;;  %v19051_v21 = vld [vmem:[%s25061_s5 + $0x34] ss:$8 sps:$4 sm:$0xff]  }
 0x5c2   : > { %10063 = vmatpush1.bf16.msra.mxu0 %v19004_v45  ;;  %v19049_v45 = vld [vmem:[%s25061_s5 + $0x30] ss:$8 sps:$4 sm:$0xff]  }
 0x5c3   : > { %10084 = vmatpush1.bf16.msra.mxu1 %v19007_v53  ;;  %10064 = vmatprep.subr.bf16.mxu0 %v19012_v22  ;;  %v19054_v53 = vld [vmem:[%s25061_s5 + $0x44] ss:$8 sps:$4 sm:$0xff]  }
 0x5c4   : > { %10085 = vmatprep.subr.bf16.mxu1 %v19015_v25 }
 0x5c6   : > { %10065 = vmatpush1.bf16.msra.mxu0 %v19010_v24 }
 0x5c7   : > { %10086 = vmatpush1.bf16.msra.mxu1 %v19013_v26  ;;  %10066 = vmatprep.subr.bf16.mxu0 %v19018_v13 }
 0x5c8   : > { %10087 = vmatprep.subr.bf16.mxu1 %v19021_v27 }
 0x5ca   : > { %10067 = vmatpush1.bf16.msra.mxu0 %v19016_v30 }
 0x5cb   : > { %10088 = vmatpush1.bf16.msra.mxu1 %v19019_v32  ;;  %10666 = vmatprep.subr.bf16.mxu0 %v19024_v34 }
 0x5cd   : > { %10069 = vmatmul.mubr.bf16.vlgmr.msra.gmra.mrb[52].mxu0 %v9808_v39  ;;  %v19055_v39 = vld [vmem:[%s25061_s5 + $0x50] ss:$8 sps:$4 sm:$0xff]  }
 0x5ce   : > { %16586 = vmatmul.mubr.msk.bf16.vlgmr.msra.gmra.mrb[80].mxu1 %vm6371_vm15, %v9810_v44  ;;  %10667 = vmatpush1.bf16.msra.mxu0 %v19022_v38  ;;  %v19058_v44 = vld [vmem:[%s25061_s5 + $0x60] ss:$8 sps:$4 sm:$0xff]  }
 0x5cf   : > { %10668 = vmatprep.subr.bf16.mxu0 %v19027_v40  ;;  %10698 = vmatprep.mubr.bf16.mxu0 %v19878_v35  ;;  %v19060_v40 = vld [vmem:[%s25061_s5 + $0x64] ss:$8 sps:$4 sm:$0xff]  }
 0x5d2   : > { %10669 = vmatpush1.bf16.msra.mxu0 %v19025_v47  ;;  %v19063_v47 = vld [vmem:[%s25061_s5 + $0x74] ss:$8 sps:$4 sm:$0xff]  }
 0x5d3   : > { %10670 = vmatprep.subr.bf16.mxu0 %v19030_v50  ;;  %v19061_v50 = vld [vmem:[%s25061_s5 + $0x70] ss:$8 sps:$4 sm:$0xff]  }
 0x5d6   : > { %10671 = vmatpush1.bf16.msra.mxu0 %v19028_v51  ;;  %v19066_v51 = vld [vmem:[%s25061_s5 + $0x84] ss:$8 sps:$4 sm:$0xff]  }
 0x5d7   : > { %10672 = vmatprep.subr.bf16.mxu0 %v19033_v8  ;;  %v19064_v8 = vld [vmem:[%s25061_s5 + $0x80] ss:$8 sps:$4 sm:$0xff]  }
 0x5d9   : > { %v8212_v60 = vpop.f32.mrb[60].mxu1 }
 0x5da   : > { %v8254_v61 = vadd.f32 %v23098_v15, %v8212_v60  ;;  %v8214_v63 = vpop.f32.mrb[61].mxu1  ;;  %10673 = vmatpush1.bf16.msra.mxu0 %v19031_v54  ;;  %v19037_v15 = vld [vmem:[%s25061_s5 + $0x2b0] ss:$8 sps:$4 sm:$0xff]   ;;  %v19069_v54 = vld [vmem:[%s25061_s5 + $0x94] ss:$8 sps:$4 sm:$0xff]  }
 0x5db   : > { %v8256_v2 = vadd.f32 %v23103_v59, %v8214_v63  ;;  %v8216_v3 = vpop.f32.mrb[62].mxu1  ;;  %10674 = vmatprep.subr.bf16.mxu0 %v19036_v56  ;;  %v19042_v59 = vld [vmem:[%s25061_s5 + $0x4] ss:$8 sps:$4 sm:$0xff]   ;;  %v19067_v56 = vld [vmem:[%s25061_s5 + $0x90] ss:$8 sps:$4 sm:$0xff]  }
 0x5dc   : > { %v8260_v14 = vadd.f32 %v8254_v61, %v23033_v20  ;;  %v8217_v41 = vpop.f32.mrb[63].mxu1  ;;  %v19045_v20 = vld [vmem:[%s25061_s5 + $0x14] ss:$8 sps:$4 sm:$0xff]   ;;  %v19072_v60 = vld [vmem:[%s25061_s5 + $0xa4] ss:$8 sps:$4 sm:$0xff]  }
 0x5dd   : > { %v8261_v18 = vadd.f32 %v8256_v2, %v23039_v31  ;;  %v23223_v31 = vpop.permute.xlu1 %10714  ;;  %v19070_v2 = vld [vmem:[%s25061_s5 + $0xa0] ss:$8 sps:$4 sm:$0xff]   ;;  %v19078_v41 = vld [vmem:[%s25061_s5 + $0xc4] ss:$8 sps:$4 sm:$0xff]  }
 0x5de   : > { %10675 = vmatpush1.bf16.msra.mxu0 %v19034_v1  ;;  %v10717_v49 = vsel %vm6371_vm15, %v22141_v52, %v23223_v31 }
 0x5df   : > { %10676 = vmatprep.subr.bf16.mxu0 %v19039_v7  ;;  %v19075_v7 = vld [vmem:[%s25061_s5 + $0xb4] ss:$8 sps:$4 sm:$0xff]  }
 0x5e2   : > { %10677 = vmatpush1.bf16.msra.mxu0 %v19037_v15  ;;  %v10152_v15 = vld [vmem:[%s25063_s7 + $0x80] sm:$0xff] }
 0x5e3   : > { %10943 = vmatprep.subr.bf16.mxu0 %v19042_v59  ;;  %v10153_v59 = vld [vmem:[%s25063_s7 + $0x88] sm:$0xff] }
 0x5e5   : > { %16676 = vmatmul.mubr.msk.bf16.vlgmr.msra.gmra.mrb[56].mxu0 %vm6371_vm15, %v22127_v48 }
 0x5e6   : > { %10944 = vmatpush1.bf16.msra.mxu0 %v19040_v17  ;;  %10975 = vmatprep.mubr.bf16.mxu0 %v10717_v49  ;;  %v10136_v17 = vld [vmem:[%s25063_s7] sm:$0xff]  ;;  %v17596_v49 = vpack.c.bf16 %v10153_v59, %v10152_v15  ;;  %v10145_v15 = vld [vmem:[%s25063_s7 + $0x48] sm:$0xff]  ;;  %v19099_v59 = vld [vmem:[%s25061_s5 + $0x3f4] ss:$8 sps:$4 sm:$0xff]  }
 0x5e7   : > { %10945 = vmatprep.subr.bf16.mxu0 %v19045_v20  ;;  %v19081_v20 = vld [vmem:[%s25061_s5 + $0xd4] ss:$8 sps:$4 sm:$0xff]  }
 0x5e8   : > { %17597 = vmatprep.subr.bf16.mxu1 %v17596_v49  ;;  %v10162_v49 = vld [vmem:[%s25063_s7 + $0xd0] sm:$0xff] }
 0x5ea   : > { %10946 = vmatpush1.bf16.msra.mxu0 %v19043_v10  ;;  %v10137_v10 = vld [vmem:[%s25063_s7 + $0x8] sm:$0xff] }
 0x5eb   : > { %10947 = vmatprep.subr.bf16.mxu0 %v19048_v19  ;;  %v17598_v19 = vpack.c.bf16 %v10137_v10, %v10136_v17  ;;  %v10163_v10 = vld [vmem:[%s25063_s7 + $0xd8] sm:$0xff] }
 0x5ed   : > { %17599 = vmatpush3.bf16.msra.mxu1 %v17598_v19  ;;  %v10146_v19 = vld [vmem:[%s25063_s7 + $0x50] sm:$0xff] }
 0x5ee   : > { %10948 = vmatpush1.bf16.msra.mxu0 %v19046_v57  ;;  %v19079_v57 = vld [vmem:[%s25061_s5 + $0xd0] ss:$8 sps:$4 sm:$0xff]  }
 0x5ef   : > { %10949 = vmatprep.subr.bf16.mxu0 %v19051_v21  ;;  %v10154_v21 = vld [vmem:[%s25063_s7 + $0x90] sm:$0xff] }
 0x5f0   : > { %v8578_v22 = vpop.f32.mrb[36].mxu0 }
 0x5f1   : > { %v8619_v25 = vpop.f32.mrb[64].mxu1  ;;  %v8580_v24 = vpop.f32.mrb[37].mxu0 }
 0x5f2   : > { %v8620_v26 = vadd.f32 %v8619_v25, %v8578_v22  ;;  %v8621_v13 = vpop.f32.mrb[65].mxu1  ;;  %v8582_v27 = vpop.f32.mrb[38].mxu0  ;;  %10950 = vmatpush1.bf16.msra.mxu0 %v19049_v45  ;;  %v10155_v45 = vld [vmem:[%s25063_s7 + $0x98] sm:$0xff]  ;;  %v19084_v22 = vld [vmem:[%s25061_s5 + $0xe4] ss:$8 sps:$4 sm:$0xff]  }
 0x5f3   : > { %v8622_v16 = vadd.f32 %v8621_v13, %v8580_v24  ;;  %v8623_v30 = vpop.f32.mrb[66].mxu1  ;;  %v8583_v32 = vpop.f32.mrb[39].mxu0  ;;  %10951 = vmatprep.subr.bf16.mxu0 %v19054_v53  ;;  %v10138_v53 = vld [vmem:[%s25063_s7 + $0x10] sm:$0xff]  ;;  %v17600_v25 = vpack.c.bf16 %v10155_v45, %v10154_v21  ;;  %v10139_v24 = vld [vmem:[%s25063_s7 + $0x18] sm:$0xff]  ;;  %v19082_v13 = vld [vmem:[%s25061_s5 + $0xe0] ss:$8 sps:$4 sm:$0xff]   ;;  %v17616_v21 = vpack.c.bf16 %v10163_v10, %v10162_v49 }
 0x5f4   : > { %v23254_v34 = vadd.f32 %v8620_v26, %v8260_v14  ;;  %v8624_v37 = vpop.f32.mrb[67].mxu1  ;;  %v19073_v14 = vld [vmem:[%s25061_s5 + $0xb0] ss:$8 sps:$4 sm:$0xff]   ;;  %v17602_v26 = vpack.c.bf16 %v10139_v24, %v10138_v53  ;;  %v10156_v27 = vld [vmem:[%s25063_s7 + $0xa0] sm:$0xff]  ;;  %v19087_v30 = vld [vmem:[%s25061_s5 + $0xf4] ss:$8 sps:$4 sm:$0xff]  }
 0x5f5   : > { %v23256_v38 = vadd.f32 %v8622_v16, %v8261_v18  ;;  %v19076_v18 = vld [vmem:[%s25061_s5 + $0xc0] ss:$8 sps:$4 sm:$0xff]   ;;  %17601 = vmatprep.subr.bf16.mxu1 %v17600_v25  ;;  %v19097_v53 = vld [vmem:[%s25061_s5 + $0x3f0] ss:$8 sps:$4 sm:$0xff]   ;;  %v19102_v25 = vld [vmem:[%s25061_s5 + $0x404] ss:$8 sps:$4 sm:$0xff]  }
 0x5f6   : > { %10952 = vmatpush1.bf16.msra.mxu0 %v19052_v29  ;;  %17603 = vmatpush3.bf16.msra.mxu1 %v17602_v26  ;;  %v10157_v29 = vld [vmem:[%s25063_s7 + $0xa8] sm:$0xff]  ;;  %v10140_v16 = vld [vmem:[%s25063_s7 + $0x20] sm:$0xff] }
 0x5f7   : > { %10953 = vmatprep.subr.bf16.mxu0 %v19057_v33  ;;  %v17604_v32 = vpack.c.bf16 %v10157_v29, %v10156_v27  ;;  %v10141_v33 = vld [vmem:[%s25063_s7 + $0x28] sm:$0xff]  ;;  %v10164_v45 = vld [vmem:[%s25063_s7 + $0xe0] sm:$0xff] }
 0x5f8   : > { %v17606_v37 = vpack.c.bf16 %v10141_v33, %v10140_v16  ;;  %v10149_v27 = vld [vmem:[%s25063_s7 + $0x68] sm:$0xff]  ;;  %v10166_v16 = vld [vmem:[%s25063_s7 + $0xf0] sm:$0xff] }
 0x5f9   : > { %17605 = vmatprep.subr.bf16.mxu1 %v17604_v32 }
 0x5fa   : > { %10954 = vmatpush1.bf16.msra.mxu0 %v19055_v39  ;;  %v19085_v39 = vld [vmem:[%s25061_s5 + $0xf0] ss:$8 sps:$4 sm:$0xff]   ;;  %17607 = vmatpush3.bf16.msra.mxu1 %v17606_v37  ;;  %v19100_v37 = vld [vmem:[%s25061_s5 + $0x400] ss:$8 sps:$4 sm:$0xff]  }
 0x5fb   : > { %10955 = vmatprep.subr.bf16.mxu0 %v19060_v40  ;;  %v10158_v40 = vld [vmem:[%s25063_s7 + $0xb0] sm:$0xff] }
 0x5fe   : > { %10956 = vmatpush1.bf16.msra.mxu0 %v19058_v44  ;;  %v10159_v44 = vld [vmem:[%s25063_s7 + $0xb8] sm:$0xff] }
 0x5ff   : > { %10957 = vmatprep.subr.bf16.mxu0 %v19063_v47  ;;  %v19090_v47 = vld [vmem:[%s25061_s5 + $0x3c4] ss:$8 sps:$4 sm:$0xff]  }
 0x602   : > { %10958 = vmatpush1.bf16.msra.mxu0 %v19061_v50  ;;  %v17608_v50 = vpack.c.bf16 %v10159_v44, %v10158_v40  ;;  %v19105_v44 = vld [vmem:[%s25061_s5 + $0x414] ss:$8 sps:$4 sm:$0xff]  }
 0x603   : > { %10959 = vmatprep.subr.bf16.mxu0 %v19066_v51  ;;  %v10711_v51 = vpop.permute.xlu1 %10710 }
 0x604   : > { %17609 = vmatprep.subr.bf16.mxu1 %v17608_v50 }
 0x606   : > { %10960 = vmatpush1.bf16.msra.mxu0 %v19064_v8  ;;  %v19088_v8 = vld [vmem:[%s25061_s5 + $0x3c0] ss:$8 sps:$4 sm:$0xff]  }
 0x607   : > { %10961 = vmatprep.subr.bf16.mxu0 %v19069_v54  ;;  %v19093_v54 = vld [vmem:[%s25061_s5 + $0x3d4] ss:$8 sps:$4 sm:$0xff]  }
 0x608   : > { %v23288_v61 = vpop.f32.mrb[40].mxu0 }
 0x609   : > { %v23290_v63 = vpop.f32.mrb[41].mxu0 }
 0x60a   : > { %v9010_v1 = vpop.f32.mrb[42].mxu0  ;;  %10962 = vmatpush1.bf16.msra.mxu0 %v19067_v56  ;;  %v10716_v56 = vsel %vm6371_vm15, %v10711_v51, %v22141_v52  ;;  %v10143_v52 = vld [vmem:[%s25063_s7 + $0x38] sm:$0xff] }
 0x60b   : > { %v9011_v3 = vpop.f32.mrb[43].mxu0  ;;  %10963 = vmatprep.subr.bf16.mxu0 %v19072_v60  ;;  %v19091_v60 = vld [vmem:[%s25061_s5 + $0x3d0] ss:$8 sps:$4 sm:$0xff]   ;;  %v19096_v1 = vld [vmem:[%s25061_s5 + $0x3e4] ss:$8 sps:$4 sm:$0xff]  }
 0x60c   : > { %v19094_v3 = vld [vmem:[%s25061_s5 + $0x3e0] ss:$8 sps:$4 sm:$0xff]  }
 0x60e   : > { %10964 = vmatpush1.bf16.msra.mxu0 %v19070_v2  ;;  %v10142_v2 = vld [vmem:[%s25063_s7 + $0x30] sm:$0xff] }
 0x60f   : > { %10965 = vmatprep.subr.bf16.mxu0 %v19075_v7  ;;  %v17610_v7 = vpack.c.bf16 %v10143_v52, %v10142_v2  ;;  %v19198_v2 = vld [vmem:[%s25061_s5 + $0x164] ss:$8 sps:$4 sm:$0xff]   ;;  %v19111_v52 = vld [vmem:[%s25061_s5 + $0x434] ss:$8 sps:$4 sm:$0xff]  }
 0x611   : > { %17611 = vmatpush3.bf16.msra.mxu1 %v17610_v7 }
 0x612   : > { %10966 = vmatpush1.bf16.msra.mxu0 %v19073_v14  ;;  %v10160_v14 = vld [vmem:[%s25063_s7 + $0xc0] sm:$0xff] }
 0x613   : > { %10967 = vmatprep.subr.bf16.mxu0 %v19078_v41  ;;  %v10161_v41 = vld [vmem:[%s25063_s7 + $0xc8] sm:$0xff] }
 0x614   : > { %v17612_v17 = vpack.c.bf16 %v10161_v41, %v10160_v14  ;;  %v19109_v14 = vld [vmem:[%s25061_s5 + $0x430] ss:$8 sps:$4 sm:$0xff]   ;;  %v19114_v41 = vld [vmem:[%s25061_s5 + $0x444] ss:$8 sps:$4 sm:$0xff]  }
 0x616   : > { %10968 = vmatpush1.bf16.msra.mxu0 %v19076_v18  ;;  %v10144_v18 = vld [vmem:[%s25063_s7 + $0x40] sm:$0xff]  ;;  %17613 = vmatprep.subr.bf16.mxu1 %v17612_v17 }
 0x617   : > { %10969 = vmatprep.subr.bf16.mxu0 %v19081_v20  ;;  %v17614_v20 = vpack.c.bf16 %v10145_v15, %v10144_v18  ;;  %v19112_v18 = vld [vmem:[%s25061_s5 + $0x440] ss:$8 sps:$4 sm:$0xff]   ;;  %v19117_v15 = vld [vmem:[%s25061_s5 + $0x454] ss:$8 sps:$4 sm:$0xff]   ;;  %v19120_v17 = vld [vmem:[%s25061_s5 + $0x464] ss:$8 sps:$4 sm:$0xff]  }
 0x619   : > { %17615 = vmatpush3.bf16.msra.mxu1 %v17614_v20 }
 0x61a   : > { %10970 = vmatpush1.bf16.msra.mxu0 %v19079_v57  ;;  %v10147_v57 = vld [vmem:[%s25063_s7 + $0x58] sm:$0xff]  ;;  %17617 = vmatprep.subr.bf16.mxu1 %v17616_v21 }
 0x61b   : > { %10971 = vmatprep.subr.bf16.mxu0 %v19084_v22  ;;  %v10165_v22 = vld [vmem:[%s25063_s7 + $0xe8] sm:$0xff]  ;;  %v17618_v24 = vpack.c.bf16 %v10147_v57, %v10146_v19 }
 0x61c   : > { %v17620_v26 = vpack.c.bf16 %v10165_v22, %v10164_v45  ;;  %v19118_v45 = vld [vmem:[%s25061_s5 + $0x460] ss:$8 sps:$4 sm:$0xff]  }
 0x61d   : > { %17619 = vmatpush3.bf16.msra.mxu1 %v17618_v24  ;;  %v19123_v24 = vld [vmem:[%s25061_s5 + $0x474] ss:$8 sps:$4 sm:$0xff]  }
 0x61e   : > { %10972 = vmatpush1.bf16.msra.mxu0 %v19082_v13  ;;  %v10148_v13 = vld [vmem:[%s25063_s7 + $0x60] sm:$0xff]  ;;  %17621 = vmatprep.subr.bf16.mxu1 %v17620_v26 }
 0x61f   : > { %10973 = vmatprep.subr.bf16.mxu0 %v19087_v30  ;;  %v10167_v30 = vld [vmem:[%s25063_s7 + $0xf8] sm:$0xff] }
 0x622   : > { %10974 = vmatpush1.bf16.msra.mxu0 %v19085_v39 }
 0x623   : > { %11355 = vmatprep.subr.bf16.mxu0 %v19090_v47  ;;  %v17622_v47 = vpack.c.bf16 %v10149_v27, %v10148_v13 }
 0x625   : > { %10976 = vmatmul.mubr.bf16.vlgmr.msra.gmra.mrb[60].mxu0 %v10716_v56  ;;  %v23461_v56 = vpop.permute.xlu1 %11085  ;;  %17623 = vmatpush3.bf16.msra.mxu1 %v17622_v47  ;;  %v19138_v47 = vld [vmem:[%s25061_s5 + $0x4c4] ss:$8 sps:$4 sm:$0xff]  }
 0x626   : > { %11356 = vmatpush1.bf16.msra.mxu0 %v19088_v8  ;;  %11387 = vmatprep.mubr.bf16.mxu0 %v19878_v35  ;;  %v10150_v8 = vld [vmem:[%s25063_s7 + $0x70] sm:$0xff] }
 0x627   : > { %11357 = vmatprep.subr.bf16.mxu0 %v19093_v54 }
 0x62a   : > { %11358 = vmatpush1.bf16.msra.mxu0 %v19091_v60  ;;  %v19108_v60 = vld [vmem:[%s25061_s5 + $0x424] ss:$8 sps:$4 sm:$0xff]  }
 0x62b   : > { %11359 = vmatprep.subr.bf16.mxu0 %v19096_v1 }
 0x62e   : > { %11360 = vmatpush1.bf16.msra.mxu0 %v19094_v3  ;;  %v23478_v3 = vpop.permute.xlu1 %11476 }
 0x62f   : > { %11361 = vmatprep.subr.bf16.mxu0 %v19099_v59  ;;  %v11479_v7 = vsel %vm6371_vm15, %v22185_v4, %v23478_v3  ;;  %v19115_v59 = vld [vmem:[%s25061_s5 + $0x450] ss:$8 sps:$4 sm:$0xff]  }
 0x631   : > { %v8965_v29 = vpop.f32.mrb[68].mxu1 }
 0x632   : > { %v9007_v32 = vadd.f32 %v23288_v61, %v8965_v29  ;;  %v8967_v33 = vpop.f32.mrb[69].mxu1  ;;  %11362 = vmatpush1.bf16.msra.mxu0 %v19097_v53  ;;  %v17624_v61 = vpack.c.bf16 %v10167_v30, %v10166_v16  ;;  %v19121_v29 = vld [vmem:[%s25061_s5 + $0x470] ss:$8 sps:$4 sm:$0xff]   ;;  %v19126_v16 = vld [vmem:[%s25061_s5 + $0x484] ss:$8 sps:$4 sm:$0xff]  }
 0x633   : > { %v9009_v39 = vadd.f32 %v23290_v63, %v8967_v33  ;;  %v8969_v40 = vpop.f32.mrb[70].mxu1  ;;  %11363 = vmatprep.subr.bf16.mxu0 %v19102_v25  ;;  %v10151_v63 = vld [vmem:[%s25063_s7 + $0x78] sm:$0xff]  ;;  %v19124_v30 = vld [vmem:[%s25061_s5 + $0x480] ss:$8 sps:$4 sm:$0xff]  }
 0x634   : > { %v9013_v50 = vadd.f32 %v9007_v32, %v23254_v34  ;;  %v8970_v51 = vpop.f32.mrb[71].mxu1  ;;  %v19103_v34 = vld [vmem:[%s25061_s5 + $0x410] ss:$8 sps:$4 sm:$0xff]   ;;  %v17626_v1 = vpack.c.bf16 %v10151_v63, %v10150_v8  ;;  %17625 = vmatprep.subr.bf16.mxu1 %v17624_v61  ;;  %v19129_v32 = vld [vmem:[%s25061_s5 + $0x494] ss:$8 sps:$4 sm:$0xff]  }
 0x635   : > { %v9014_v54 = vadd.f32 %v9009_v39, %v23256_v38  ;;  %v19106_v38 = vld [vmem:[%s25061_s5 + $0x420] ss:$8 sps:$4 sm:$0xff]   ;;  %v19127_v33 = vld [vmem:[%s25061_s5 + $0x490] ss:$8 sps:$4 sm:$0xff]   ;;  %v19135_v40 = vld [vmem:[%s25061_s5 + $0x4b4] ss:$8 sps:$4 sm:$0xff]  }
 0x636   : > { %11364 = vmatpush1.bf16.msra.mxu0 %v19100_v37  ;;  %17627 = vmatpush3.bf16.msra.mxu1 %v17626_v1  ;;  %v19132_v37 = vld [vmem:[%s25061_s5 + $0x4a4] ss:$8 sps:$4 sm:$0xff]   ;;  %v19130_v39 = vld [vmem:[%s25061_s5 + $0x4a0] ss:$8 sps:$4 sm:$0xff]  }
 0x637   : > { %11365 = vmatprep.subr.bf16.mxu0 %v19105_v44  ;;  %10625 = vmatprep.subr.bf16.mxu1 %v19198_v2  ;;  %v19133_v44 = vld [vmem:[%s25061_s5 + $0x4b0] ss:$8 sps:$4 sm:$0xff]   ;;  %v19136_v8 = vld [vmem:[%s25061_s5 + $0x4c0] ss:$8 sps:$4 sm:$0xff]   ;;  %v19147_v2 = vld [vmem:[%s25061_s5 + $0x4f4] ss:$8 sps:$4 sm:$0xff]  }
 0x638   : > { %v19142_v1 = vld [vmem:[%s25061_s5 + $0x4e0] ss:$8 sps:$4 sm:$0xff]  }
 0x63a   : > { %11366 = vmatpush1.bf16.msra.mxu0 %v19103_v34  ;;  %v19139_v34 = vld [vmem:[%s25061_s5 + $0x4d0] ss:$8 sps:$4 sm:$0xff]  }
 0x63b   : > { %11705 = vmatprep.subr.bf16.mxu0 %v19108_v60  ;;  %v19144_v60 = vld [vmem:[%s25061_s5 + $0x4e4] ss:$8 sps:$4 sm:$0xff]  }
 0x63d   : > { %16810 = vmatmul.mubr.msk.bf16.vlgmr.msra.gmra.mrb[64].mxu0 %vm6371_vm15, %v23461_v56 }
 0x63e   : > { %11706 = vmatpush1.bf16.msra.mxu0 %v19106_v38  ;;  %11737 = vmatprep.mubr.bf16.mxu0 %v11479_v7  ;;  %v19145_v38 = vld [vmem:[%s25061_s5 + $0x4f0] ss:$8 sps:$4 sm:$0xff]   ;;  %v19148_v7 = vld [vmem:[%s25061_s5 + $0x500] ss:$8 sps:$4 sm:$0xff]  }
 0x63f   : > { %11707 = vmatprep.subr.bf16.mxu0 %v19111_v52  ;;  %v19150_v52 = vld [vmem:[%s25061_s5 + $0x504] ss:$8 sps:$4 sm:$0xff]  }
 0x642   : > { %11708 = vmatpush1.bf16.msra.mxu0 %v19109_v14  ;;  %v19153_v14 = vld [vmem:[%s25061_s5 + $0x514] ss:$8 sps:$4 sm:$0xff]  }
 0x643   : > { %11709 = vmatprep.subr.bf16.mxu0 %v19114_v41  ;;  %v19151_v41 = vld [vmem:[%s25061_s5 + $0x510] ss:$8 sps:$4 sm:$0xff]  }
 0x646   : > { %11710 = vmatpush1.bf16.msra.mxu0 %v19112_v18  ;;  %v19156_v18 = vld [vmem:[%s25061_s5 + $0x684] ss:$8 sps:$4 sm:$0xff]  }
 0x647   : > { %11711 = vmatprep.subr.bf16.mxu0 %v19117_v15  ;;  %v11473_v15 = vpop.permute.xlu1 %11472 }
 0x648   : > { %v9323_v20 = vpop.f32.mrb[44].mxu0 }
 0x649   : > { %v9364_v49 = vpop.f32.mrb[72].mxu1  ;;  %v9325_v10 = vpop.f32.mrb[45].mxu0 }
 0x64a   : > { %v9365_v19 = vadd.f32 %v9364_v49, %v9323_v20  ;;  %v9366_v57 = vpop.f32.mrb[73].mxu1  ;;  %v9327_v21 = vpop.f32.mrb[46].mxu0  ;;  %11712 = vmatpush1.bf16.msra.mxu0 %v19115_v59  ;;  %v19154_v59 = vld [vmem:[%s25061_s5 + $0x680] ss:$8 sps:$4 sm:$0xff]   ;;  %v11478_v20 = vsel %vm6371_vm15, %v11473_v15, %v22185_v4  ;;  %v19157_v49 = vld [vmem:[%s25061_s5 + $0x690] ss:$8 sps:$4 sm:$0xff]  }
 0x64b   : > { %v9367_v53 = vadd.f32 %v9366_v57, %v9325_v10  ;;  %v9368_v22 = vpop.f32.mrb[74].mxu1  ;;  %v9328_v25 = vpop.f32.mrb[47].mxu0  ;;  %11713 = vmatprep.subr.bf16.mxu0 %v19120_v17  ;;  %v19159_v17 = vld [vmem:[%s25061_s5 + $0x694] ss:$8 sps:$4 sm:$0xff]   ;;  %v19162_v10 = vld [vmem:[%s25061_s5 + $0x6a4] ss:$8 sps:$4 sm:$0xff]  }
 0x64c   : > { %v23509_v26 = vadd.f32 %v9365_v19, %v9013_v50  ;;  %v9369_v13 = vpop.f32.mrb[75].mxu1  ;;  %v19160_v19 = vld [vmem:[%s25061_s5 + $0x6a0] ss:$8 sps:$4 sm:$0xff]   ;;  %v19165_v4 = vld [vmem:[%s25061_s5 + $0x6b4] ss:$8 sps:$4 sm:$0xff]  }
 0x64d   : > { %v23511_v27 = vadd.f32 %v9367_v53, %v9014_v54  ;;  %v19141_v54 = vld [vmem:[%s25061_s5 + $0x4d4] ss:$8 sps:$4 sm:$0xff]   ;;  %v19163_v57 = vld [vmem:[%s25061_s5 + $0x6b0] ss:$8 sps:$4 sm:$0xff]   ;;  %v19168_v21 = vld [vmem:[%s25061_s5 + $0x6c4] ss:$8 sps:$4 sm:$0xff]  }
 0x64e   : > { %11714 = vmatpush1.bf16.msra.mxu0 %v19118_v45  ;;  %v19166_v25 = vld [vmem:[%s25061_s5 + $0x6c0] ss:$8 sps:$4 sm:$0xff]  }
 0x64f   : > { %11715 = vmatprep.subr.bf16.mxu0 %v19123_v24 }
 0x652   : > { %11716 = vmatpush1.bf16.msra.mxu0 %v19121_v29  ;;  %v19171_v29 = vld [vmem:[%s25061_s5 + $0x6d4] ss:$8 sps:$4 sm:$0xff]  }
 0x653   : > { %11717 = vmatprep.subr.bf16.mxu0 %v19126_v16 }
 0x656   : > { %11718 = vmatpush1.bf16.msra.mxu0 %v19124_v30 }
 0x657   : > { %11719 = vmatprep.subr.bf16.mxu0 %v19129_v32 }
 0x65a   : > { %11720 = vmatpush1.bf16.msra.mxu0 %v19127_v33  ;;  %v23614_v33 = vpop.permute.xlu1 %11849 }
 0x65b   : > { %11721 = vmatprep.subr.bf16.mxu0 %v19132_v37  ;;  %v19169_v37 = vld [vmem:[%s25061_s5 + $0x6d0] ss:$8 sps:$4 sm:$0xff]  }
 0x65e   : > { %11722 = vmatpush1.bf16.msra.mxu0 %v19130_v39  ;;  %v19174_v39 = vld [vmem:[%s25061_s5 + $0x6e4] ss:$8 sps:$4 sm:$0xff]  }
 0x65f   : > { %11723 = vmatprep.subr.bf16.mxu0 %v19135_v40  ;;  %v23628_v40 = vpop.permute.xlu1 %12240 }
 0x660   : > { %v9745_v50 = vpop.f32.mrb[48].mxu0 }
 0x661   : > { %v9747_v51 = vpop.f32.mrb[49].mxu0 }
 0x662   : > { %v9749_v61 = vpop.f32.mrb[50].mxu0  ;;  %11724 = vmatpush1.bf16.msra.mxu0 %v19133_v44  ;;  %v12243_v44 = vsel %vm6371_vm15, %v22229_v28, %v23628_v40 }
 0x663   : > { %v9750_v63 = vpop.f32.mrb[51].mxu0  ;;  %11725 = vmatprep.subr.bf16.mxu0 %v19138_v47  ;;  %v19175_v47 = vld [vmem:[%s25061_s5 + $0x6f0] ss:$8 sps:$4 sm:$0xff]   ;;  %v19183_v61 = vld [vmem:[%s25061_s5 + $0x714] ss:$8 sps:$4 sm:$0xff]  }
 0x664   : > { %v10120_v63 = vld [vmem:[%s25062_s6] sm:$0x3] }
 0x666   : > { %11726 = vmatpush1.bf16.msra.mxu0 %v19136_v8  ;;  %v19181_v8 = vld [vmem:[%s25061_s5 + $0x710] ss:$8 sps:$4 sm:$0xff]  }
 0x667   : > { %11727 = vmatprep.subr.bf16.mxu0 %v19141_v54  ;;  %v19186_v54 = vld [vmem:[%s25061_s5 + $0x724] ss:$8 sps:$4 sm:$0xff]  }
 0x66a   : > { %11728 = vmatpush1.bf16.msra.mxu0 %v19139_v34 }
 0x66b   : > { %11729 = vmatprep.subr.bf16.mxu0 %v19144_v60 }
 0x66e   : > { %11730 = vmatpush1.bf16.msra.mxu0 %v19142_v1 }
 0x66f   : > { %11731 = vmatprep.subr.bf16.mxu0 %v19147_v2 }
 0x672   : > { %11732 = vmatpush1.bf16.msra.mxu0 %v19145_v38  ;;  %v10125_v38 = vrot.slane %v10120_v63, %v20554_v11 }
 0x673   : > { %11733 = vmatprep.subr.bf16.mxu0 %v19150_v52 }
 0x676   : > { %11734 = vmatpush1.bf16.msra.mxu0 %v19148_v7 }
 0x677   : > { %11735 = vmatprep.subr.bf16.mxu0 %v19153_v14  ;;  %v19184_v14 = vld [vmem:[%s25061_s5 + $0x720] ss:$8 sps:$4 sm:$0xff]  }
 0x67a   : > { %11736 = vmatpush1.bf16.msra.mxu0 %v19151_v41 }
 0x67b   : > { %12119 = vmatprep.subr.bf16.mxu0 %v19156_v18  ;;  %v10129_v18 = vrot.slane %v10120_v63, %v20557_v12  ;;  %v19219_v63 = vld [vmem:[%s25061_s5 + $0x794] ss:$8 sps:$4 sm:$0xff]  }
 0x67d   : > { %11738 = vmatmul.mubr.bf16.vlgmr.msra.gmra.mrb[68].mxu0 %v11478_v20 }
 0x67e   : > { %12120 = vmatpush1.bf16.msra.mxu0 %v19154_v59  ;;  %12151 = vmatprep.mubr.bf16.mxu0 %v19878_v35 }
 0x67f   : > { %12121 = vmatprep.subr.bf16.mxu0 %v19159_v17  ;;  %v19189_v17 = vld [vmem:[%s25061_s5 + $0x734] ss:$8 sps:$4 sm:$0xff]  }
 0x682   : > { %12122 = vmatpush1.bf16.msra.mxu0 %v19157_v49 }
 0x683   : > { %12123 = vmatprep.subr.bf16.mxu0 %v19162_v10 }
 0x686   : > { %12124 = vmatpush1.bf16.msra.mxu0 %v19160_v19 }
 0x687   : > { %12125 = vmatprep.subr.bf16.mxu0 %v19165_v4  ;;  %v19187_v4 = vld [vmem:[%s25061_s5 + $0x730] ss:$8 sps:$4 sm:$0xff]  }
 0x689   : > { %v9704_v45 = vpop.f32.mrb[76].mxu1 }
 0x68a   : > { %v9746_v53 = vadd.f32 %v9745_v50, %v9704_v45  ;;  %v9706_v22 = vpop.f32.mrb[77].mxu1  ;;  %12126 = vmatpush1.bf16.msra.mxu0 %v19163_v57  ;;  %v19180_v50 = vld [vmem:[%s25061_s5 + $0x704] ss:$8 sps:$4 sm:$0xff]   ;;  %v19190_v45 = vld [vmem:[%s25061_s5 + $0x740] ss:$8 sps:$4 sm:$0xff]  }
 0x68b   : > { %v9748_v24 = vadd.f32 %v9747_v51, %v9706_v22  ;;  %v9708_v13 = vpop.f32.mrb[78].mxu1  ;;  %12127 = vmatprep.subr.bf16.mxu0 %v19168_v21  ;;  %v19178_v51 = vld [vmem:[%s25061_s5 + $0x700] ss:$8 sps:$4 sm:$0xff]   ;;  %v19192_v21 = vld [vmem:[%s25061_s5 + $0x744] ss:$8 sps:$4 sm:$0xff]  }
 0x68c   : > { %v9752_v16 = vadd.f32 %v9746_v53, %v23509_v26  ;;  %v9709_v30 = vpop.f32.mrb[79].mxu1  ;;  %v19172_v26 = vld [vmem:[%s25061_s5 + $0x6e0] ss:$8 sps:$4 sm:$0xff]   ;;  %v19195_v53 = vld [vmem:[%s25061_s5 + $0x754] ss:$8 sps:$4 sm:$0xff]  }
 0x68d   : > { %v9753_v32 = vadd.f32 %v9748_v24, %v23511_v27  ;;  %v19177_v27 = vld [vmem:[%s25061_s5 + $0x6f4] ss:$8 sps:$4 sm:$0xff]   ;;  %v19193_v22 = vld [vmem:[%s25061_s5 + $0x750] ss:$8 sps:$4 sm:$0xff]   ;;  %v19196_v24 = vld [vmem:[%s25061_s5 + $0x160] ss:$8 sps:$4 sm:$0xff]  }
 0x68e   : > { %12128 = vmatpush1.bf16.msra.mxu0 %v19166_v25  ;;  %v19201_v25 = vld [vmem:[%s25061_s5 + $0x764] ss:$8 sps:$4 sm:$0xff]  }
 0x68f   : > { %12129 = vmatprep.subr.bf16.mxu0 %v19171_v29  ;;  %v19199_v29 = vld [vmem:[%s25061_s5 + $0x760] ss:$8 sps:$4 sm:$0xff]  }
 0x692   : > { %12130 = vmatpush1.bf16.msra.mxu0 %v19169_v37  ;;  %v10399_v37 = vsel %vm6371_vm15, %v22109_v42, %v22127_v48  ;;  %v19213_v42 = vld [vmem:[%s25061_s5 + $0x784] ss:$8 sps:$4 sm:$0xff]  }
 0x693   : > { %12469 = vmatprep.subr.bf16.mxu0 %v19174_v39  ;;  %v19202_v39 = vld [vmem:[%s25061_s5 + $0x170] ss:$8 sps:$4 sm:$0xff]  }
 0x695   : > { %16988 = vmatmul.mubr.msk.bf16.vlgmr.msra.gmra.mrb[72].mxu0 %vm6371_vm15, %v23614_v33 }
 0x696   : > { %12470 = vmatpush1.bf16.msra.mxu0 %v19172_v26  ;;  %12501 = vmatprep.mubr.bf16.mxu0 %v12243_v44  ;;  %v19205_v26 = vld [vmem:[%s25061_s5 + $0x770] ss:$8 sps:$4 sm:$0xff]  }
 0x697   : > { %12471 = vmatprep.subr.bf16.mxu0 %v19177_v27  ;;  %v19210_v27 = vld [vmem:[%s25061_s5 + $0x184] ss:$8 sps:$4 sm:$0xff]  }
 0x69a   : > { %12472 = vmatpush1.bf16.msra.mxu0 %v19175_v47 }
 0x69b   : > { %12473 = vmatprep.subr.bf16.mxu0 %v19180_v50  ;;  %v19208_v50 = vld [vmem:[%s25061_s5 + $0x180] ss:$8 sps:$4 sm:$0xff]  }
 0x69e   : > { %12474 = vmatpush1.bf16.msra.mxu0 %v19178_v51 }
 0x69f   : > { %12475 = vmatprep.subr.bf16.mxu0 %v19183_v61  ;;  %v19211_v61 = vld [vmem:[%s25061_s5 + $0x780] ss:$8 sps:$4 sm:$0xff]  }
 0x6a0   : > { %v10070_v34 = vpop.f32.mrb[52].mxu0 }
 0x6a1   : > { %v10111_v60 = vpop.f32.mrb[80].mxu1  ;;  %v10072_v1 = vpop.f32.mrb[53].mxu0 }
 0x6a2   : > { %v10112_v2 = vadd.f32 %v10111_v60, %v10070_v34  ;;  %v10113_v52 = vpop.f32.mrb[81].mxu1  ;;  %v10074_v7 = vpop.f32.mrb[54].mxu0  ;;  %12476 = vmatpush1.bf16.msra.mxu0 %v19181_v8  ;;  %v19216_v8 = vld [vmem:[%s25061_s5 + $0x194] ss:$8 sps:$4 sm:$0xff]   ;;  %v19217_v34 = vld [vmem:[%s25061_s5 + $0x790] ss:$8 sps:$4 sm:$0xff]  }
 0x6a3   : > { %v10114_v41 = vadd.f32 %v10113_v52, %v10072_v1  ;;  %v10115_v15 = vpop.f32.mrb[82].mxu1  ;;  %v10075_v59 = vpop.f32.mrb[55].mxu0  ;;  %12477 = vmatprep.subr.bf16.mxu0 %v19186_v54  ;;  %v19214_v54 = vld [vmem:[%s25061_s5 + $0x190] ss:$8 sps:$4 sm:$0xff]   ;;  %v19222_v60 = vld [vmem:[%s25061_s5 + $0x1a4] ss:$8 sps:$4 sm:$0xff]  }
 0x6a4   : > { %v10118_v20 = vadd.f32 %v10112_v2, %v9752_v16  ;;  %v10116_v49 = vpop.f32.mrb[83].mxu1  ;;  %v19204_v16 = vld [vmem:[%s25061_s5 + $0x174] ss:$8 sps:$4 sm:$0xff]   ;;  %v19225_v1 = vld [vmem:[%s25061_s5 + $0x7a4] ss:$8 sps:$4 sm:$0xff]  }
 0x6a5   : > { %v10119_v10 = vadd.f32 %v10114_v41, %v9753_v32  ;;  %v19207_v32 = vld [vmem:[%s25061_s5 + $0x774] ss:$8 sps:$4 sm:$0xff]   ;;  %v19220_v2 = vld [vmem:[%s25061_s5 + $0x1a0] ss:$8 sps:$4 sm:$0xff]   ;;  %v19229_v41 = vld [vmem:[%s25061_s5 + $0x7b0] ss:$8 sps:$4 sm:$0xff]  }
 0x6a6   : > { %v10132_v19 = vadd.f32 %v10125_v38, %v10118_v20  ;;  %12478 = vmatpush1.bf16.msra.mxu0 %v19184_v14  ;;  %v19223_v38 = vld [vmem:[%s25061_s5 + $0x7a0] ss:$8 sps:$4 sm:$0xff]   ;;  %v19228_v52 = vld [vmem:[%s25061_s5 + $0x1b4] ss:$8 sps:$4 sm:$0xff]   ;;  %v19226_v14 = vld [vmem:[%s25061_s5 + $0x1b0] ss:$8 sps:$4 sm:$0xff]  }
 0x6a7   : > { %v10133_v57 = vadd.f32 %v10129_v18, %v10119_v10  ;;  %12479 = vmatprep.subr.bf16.mxu0 %v19189_v17  ;;  %v19231_v7 = vld [vmem:[%s25061_s5 + $0x7b4] ss:$8 sps:$4 sm:$0xff]   ;;  %v19234_v18 = vld [vmem:[%s25061_s5 + $0x1c4] ss:$8 sps:$4 sm:$0xff]   ;;  %v19232_v59 = vld [vmem:[%s25061_s5 + $0x1c0] ss:$8 sps:$4 sm:$0xff]  }
 0x6a8   : > { %v19237_v15 = vld [vmem:[%s25061_s5 + $0x7c4] ss:$8 sps:$4 sm:$0xff]   ;;  %v19235_v17 = vld [vmem:[%s25061_s5 + $0x7c0] ss:$8 sps:$4 sm:$0xff]   ;;  %v19240_v20 = vld [vmem:[%s25061_s5 + $0x1d4] ss:$8 sps:$4 sm:$0xff]  }
 0x6a9   : > { %19792 = vtanh.f32 %v10133_v57  ;;  %v19243_v49 = vld [vmem:[%s25061_s5 + $0x7d4] ss:$8 sps:$4 sm:$0xff]   ;;  %v19238_v10 = vld [vmem:[%s25061_s5 + $0x1d0] ss:$8 sps:$4 sm:$0xff]   ;;  %v19249_v57 = vld [vmem:[%s25061_s5 + $0x944] ss:$8 sps:$4 sm:$0xff]  }
 0x6aa   : > { %19794 = vtanh.f32 %v10132_v19  ;;  %12480 = vmatpush1.bf16.msra.mxu0 %v19187_v4  ;;  %v19241_v19 = vld [vmem:[%s25061_s5 + $0x7d0] ss:$8 sps:$4 sm:$0xff]   ;;  %v19246_v4 = vld [vmem:[%s25061_s5 + $0x1e4] ss:$8 sps:$4 sm:$0xff]  }
 0x6ab   : > { %12481 = vmatprep.subr.bf16.mxu0 %v19192_v21  ;;  %v12237_v21 = vpop.permute.xlu1 %12236 }
 0x6ae   : > { %12482 = vmatpush1.bf16.msra.mxu0 %v19190_v45  ;;  %v19244_v45 = vld [vmem:[%s25061_s5 + $0x1e0] ss:$8 sps:$4 sm:$0xff]  }
 0x6af   : > { %12483 = vmatprep.subr.bf16.mxu0 %v19195_v53  ;;  %v19247_v53 = vld [vmem:[%s25061_s5 + $0x940] ss:$8 sps:$4 sm:$0xff]  }
 0x6b2   : > { %12484 = vmatpush1.bf16.msra.mxu0 %v19193_v22  ;;  %v19252_v22 = vld [vmem:[%s25061_s5 + $0x1f4] ss:$8 sps:$4 sm:$0xff]  }
 0x6b3   : > { %v19793_v13 = vpop.eup %19792  ;;  %12485 = vmatprep.subr.bf16.mxu0 %v19201_v25  ;;  %v19255_v25 = vld [vmem:[%s25061_s5 + $0x954] ss:$8 sps:$4 sm:$0xff]  }
 0x6b4   : > { %v19795_v30 = vpop.eup %19794  ;;  %10239 = vmatprep.mubr.f32.mxu1 %v19793_v13  ;;  %v19250_v13 = vld [vmem:[%s25061_s5 + $0x1f0] ss:$8 sps:$4 sm:$0xff]  }
 0x6b5   : > { %10240 = vmatmul.mubr.f32.vlgmr.msra.gmra.mrb[84].mxu1 %v19795_v30  ;;  %v19256_v30 = vld [vmem:[%s25061_s5 + $0x200] ss:$8 sps:$4 sm:$0xff]  }
 0x6b6   : > { %10626 = vmatpush1.bf16.msra.mxu1 %v19196_v24  ;;  %10657 = vmatprep.mubr.bf16.mxu1 %v10399_v37  ;;  %v12242_v24 = vsel %vm6371_vm15, %v12237_v21, %v22229_v28  ;;  %v19261_v28 = vld [vmem:[%s25061_s5 + $0x964] ss:$8 sps:$4 sm:$0xff]   ;;  %v19264_v37 = vld [vmem:[%s25061_s5 + $0x214] ss:$8 sps:$4 sm:$0xff]  }
 0x6b7   : > { %12486 = vmatpush1.bf16.msra.mxu0 %v19199_v29  ;;  %10627 = vmatprep.subr.bf16.mxu1 %v19204_v16  ;;  %v19253_v29 = vld [vmem:[%s25061_s5 + $0x950] ss:$8 sps:$4 sm:$0xff]   ;;  %v19258_v16 = vld [vmem:[%s25061_s5 + $0x204] ss:$8 sps:$4 sm:$0xff]  }
 0x6b8   : > { %v23706_v44 = vpop.f32.mrb[56].mxu0  ;;  %12487 = vmatprep.subr.bf16.mxu0 %v19207_v32  ;;  %v19259_v32 = vld [vmem:[%s25061_s5 + $0x960] ss:$8 sps:$4 sm:$0xff]   ;;  %v19306_v21 = vld [vmem:[%s25061_s5 + $0x124] ss:$8 sps:$4 sm:$0xff]  }
 0x6b9   : > { %v23711_v48 = vpop.f32.mrb[57].mxu0 }
 0x6ba   : > { %10628 = vmatpush1.bf16.msra.mxu1 %v19202_v39  ;;  %v10704_v47 = vpop.f32.mrb[58].mxu0  ;;  %v19267_v39 = vld [vmem:[%s25061_s5 + $0x974] ss:$8 sps:$4 sm:$0xff]  }
 0x6bb   : > { %12488 = vmatpush1.bf16.msra.mxu0 %v19205_v26  ;;  %10629 = vmatprep.subr.bf16.mxu1 %v19210_v27  ;;  %v10705_v51 = vpop.f32.mrb[59].mxu0  ;;  %v19262_v26 = vld [vmem:[%s25061_s5 + $0x210] ss:$8 sps:$4 sm:$0xff]   ;;  %v19273_v47 = vld [vmem:[%s25061_s5 + $0x984] ss:$8 sps:$4 sm:$0xff]  }
 0x6bc   : > { %12489 = vmatprep.subr.bf16.mxu0 %v19213_v42  ;;  %v19265_v27 = vld [vmem:[%s25061_s5 + $0x970] ss:$8 sps:$4 sm:$0xff]   ;;  %v19270_v42 = vld [vmem:[%s25061_s5 + $0x224] ss:$8 sps:$4 sm:$0xff]   ;;  %v19271_v51 = vld [vmem:[%s25061_s5 + $0x980] ss:$8 sps:$4 sm:$0xff]  }
 0x6be   : > { %10630 = vmatpush1.bf16.msra.mxu1 %v19208_v50  ;;  %v19268_v50 = vld [vmem:[%s25061_s5 + $0x220] ss:$8 sps:$4 sm:$0xff]  }
 0x6bf   : > { %12490 = vmatpush1.bf16.msra.mxu0 %v19211_v61  ;;  %10631 = vmatprep.subr.bf16.mxu1 %v19216_v8  ;;  %v19276_v61 = vld [vmem:[%s25061_s5 + $0x234] ss:$8 sps:$4 sm:$0xff]  }
 0x6c0   : > { %12491 = vmatprep.subr.bf16.mxu0 %v19219_v63  ;;  %v19279_v8 = vld [vmem:[%s25061_s5 + $0x994] ss:$8 sps:$4 sm:$0xff]   ;;  %v19274_v63 = vld [vmem:[%s25061_s5 + $0x230] ss:$8 sps:$4 sm:$0xff]  }
 0x6c2   : > { %10632 = vmatpush1.bf16.msra.mxu1 %v19214_v54  ;;  %v23851_v54 = vpop.permute.xlu1 %12613 }
 0x6c3   : > { %12492 = vmatpush1.bf16.msra.mxu0 %v19217_v34  ;;  %10633 = vmatprep.subr.bf16.mxu1 %v19222_v60  ;;  %v19277_v34 = vld [vmem:[%s25061_s5 + $0x990] ss:$8 sps:$4 sm:$0xff]   ;;  %v19282_v60 = vld [vmem:[%s25061_s5 + $0x244] ss:$8 sps:$4 sm:$0xff]  }
 0x6c4   : > { %12493 = vmatprep.subr.bf16.mxu0 %v19225_v1  ;;  %v19285_v1 = vld [vmem:[%s25061_s5 + $0x9a4] ss:$8 sps:$4 sm:$0xff]  }
 0x6c6   : > { %10634 = vmatpush1.bf16.msra.mxu1 %v19220_v2  ;;  %v19280_v2 = vld [vmem:[%s25061_s5 + $0x240] ss:$8 sps:$4 sm:$0xff]  }
 0x6c7   : > { %12494 = vmatpush1.bf16.msra.mxu0 %v19223_v38  ;;  %10635 = vmatprep.subr.bf16.mxu1 %v19228_v52  ;;  %v19283_v38 = vld [vmem:[%s25061_s5 + $0x9a0] ss:$8 sps:$4 sm:$0xff]   ;;  %v19288_v52 = vld [vmem:[%s25061_s5 + $0x254] ss:$8 sps:$4 sm:$0xff]  }
 0x6c8   : > { %12495 = vmatprep.subr.bf16.mxu0 %v19231_v7  ;;  %v19291_v7 = vld [vmem:[%s25061_s5 + $0x9b4] ss:$8 sps:$4 sm:$0xff]  }
 0x6ca   : > { %10636 = vmatpush1.bf16.msra.mxu1 %v19226_v14  ;;  %v23874_v14 = vpop.permute.xlu1 %13007 }
 0x6cb   : > { %12496 = vmatpush1.bf16.msra.mxu0 %v19229_v41  ;;  %10637 = vmatprep.subr.bf16.mxu1 %v19234_v18  ;;  %v13010_v41 = vsel %vm6371_vm15, %v22277_v5, %v23874_v14  ;;  %v19286_v18 = vld [vmem:[%s25061_s5 + $0x250] ss:$8 sps:$4 sm:$0xff]  }
 0x6cc   : > { %12497 = vmatprep.subr.bf16.mxu0 %v19237_v15  ;;  %v19289_v15 = vld [vmem:[%s25061_s5 + $0x9b0] ss:$8 sps:$4 sm:$0xff]  }
 0x6ce   : > { %10638 = vmatpush1.bf16.msra.mxu1 %v19232_v59  ;;  %v19294_v59 = vld [vmem:[%s25061_s5 + $0x104] ss:$8 sps:$4 sm:$0xff]  }
 0x6cf   : > { %12498 = vmatpush1.bf16.msra.mxu0 %v19235_v17  ;;  %10639 = vmatprep.subr.bf16.mxu1 %v19240_v20  ;;  %v19297_v17 = vld [vmem:[%s25061_s5 + $0x9c4] ss:$8 sps:$4 sm:$0xff]   ;;  %v19292_v20 = vld [vmem:[%s25061_s5 + $0x100] ss:$8 sps:$4 sm:$0xff]  }
 0x6d0   : > { %12499 = vmatprep.subr.bf16.mxu0 %v19243_v49  ;;  %v19295_v49 = vld [vmem:[%s25061_s5 + $0x9c0] ss:$8 sps:$4 sm:$0xff]  }
 0x6d2   : > { %10640 = vmatpush1.bf16.msra.mxu1 %v19238_v10  ;;  %v19300_v10 = vld [vmem:[%s25061_s5 + $0x114] ss:$8 sps:$4 sm:$0xff]  }
 0x6d3   : > { %12500 = vmatpush1.bf16.msra.mxu0 %v19241_v19  ;;  %10641 = vmatprep.subr.bf16.mxu1 %v19246_v4  ;;  %v19303_v19 = vld [vmem:[%s25061_s5 + $0x9d4] ss:$8 sps:$4 sm:$0xff]   ;;  %v19298_v4 = vld [vmem:[%s25061_s5 + $0x110] ss:$8 sps:$4 sm:$0xff]  }
 0x6d4   : > { %12883 = vmatprep.subr.bf16.mxu0 %v19249_v57  ;;  %v19301_v57 = vld [vmem:[%s25061_s5 + $0x9d0] ss:$8 sps:$4 sm:$0xff]  }
 0x6d6   : > { %10642 = vmatpush1.bf16.msra.mxu1 %v19244_v45  ;;  %12502 = vmatmul.mubr.bf16.vlgmr.msra.gmra.mrb[76].mxu0 %v12242_v24 }
 0x6d7   : > { %12884 = vmatpush1.bf16.msra.mxu0 %v19247_v53  ;;  %10643 = vmatprep.subr.bf16.mxu1 %v19252_v22 }
 0x6d8   : > { %12885 = vmatprep.subr.bf16.mxu0 %v19255_v25  ;;  %12915 = vmatprep.mubr.bf16.mxu0 %v19878_v35  ;;  %v19304_v25 = vld [vmem:[%s25061_s5 + $0x120] ss:$8 sps:$4 sm:$0xff]  }
 0x6da   : > { %10644 = vmatpush1.bf16.msra.mxu1 %v19250_v13  ;;  %v19307_v13 = vld [vmem:[%s25061_s5 + $0x9e0] ss:$8 sps:$4 sm:$0xff]  }
 0x6db   : > { %12886 = vmatpush1.bf16.msra.mxu0 %v19253_v29  ;;  %10645 = vmatprep.subr.bf16.mxu1 %v19258_v16  ;;  %v19312_v29 = vld [vmem:[%s25061_s5 + $0x134] ss:$8 sps:$4 sm:$0xff]  }
 0x6dc   : > { %12887 = vmatprep.subr.bf16.mxu0 %v19261_v28  ;;  %v19315_v16 = vld [vmem:[%s25061_s5 + $0x9f4] ss:$8 sps:$4 sm:$0xff]   ;;  %v19310_v28 = vld [vmem:[%s25061_s5 + $0x130] ss:$8 sps:$4 sm:$0xff]  }
 0x6de   : > { %10646 = vmatpush1.bf16.msra.mxu1 %v19256_v30  ;;  %v19313_v30 = vld [vmem:[%s25061_s5 + $0x9f0] ss:$8 sps:$4 sm:$0xff]  }
 0x6df   : > { %12888 = vmatpush1.bf16.msra.mxu0 %v19259_v32  ;;  %10647 = vmatprep.subr.bf16.mxu1 %v19264_v37  ;;  %v19318_v32 = vld [vmem:[%s25061_s5 + $0x144] ss:$8 sps:$4 sm:$0xff]  }
 0x6e0   : > { %12889 = vmatprep.subr.bf16.mxu0 %v19267_v39  ;;  %v19321_v37 = vld [vmem:[%s25061_s5 + $0xa04] ss:$8 sps:$4 sm:$0xff]   ;;  %v19316_v39 = vld [vmem:[%s25061_s5 + $0x140] ss:$8 sps:$4 sm:$0xff]  }
 0x6e2   : > { %10648 = vmatpush1.bf16.msra.mxu1 %v19262_v26  ;;  %v19319_v26 = vld [vmem:[%s25061_s5 + $0xa00] ss:$8 sps:$4 sm:$0xff]  }
 0x6e3   : > { %12890 = vmatpush1.bf16.msra.mxu0 %v19265_v27  ;;  %10649 = vmatprep.subr.bf16.mxu1 %v19270_v42  ;;  %v19324_v27 = vld [vmem:[%s25061_s5 + $0x154] ss:$8 sps:$4 sm:$0xff]  }
 0x6e4   : > { %12891 = vmatprep.subr.bf16.mxu0 %v19273_v47  ;;  %v19327_v42 = vld [vmem:[%s25061_s5 + $0xa14] ss:$8 sps:$4 sm:$0xff]   ;;  %v19322_v47 = vld [vmem:[%s25061_s5 + $0x150] ss:$8 sps:$4 sm:$0xff]  }
 0x6e6   : > { %10650 = vmatpush1.bf16.msra.mxu1 %v19268_v50  ;;  %v19325_v50 = vld [vmem:[%s25061_s5 + $0xa10] ss:$8 sps:$4 sm:$0xff]  }
 0x6e7   : > { %12892 = vmatpush1.bf16.msra.mxu0 %v19271_v51  ;;  %10651 = vmatprep.subr.bf16.mxu1 %v19276_v61  ;;  %v19330_v51 = vld [vmem:[%s25061_s5 + $0x2c4] ss:$8 sps:$4 sm:$0xff]  }
 0x6e8   : > { %12893 = vmatprep.subr.bf16.mxu0 %v19279_v8  ;;  %v19333_v61 = vld [vmem:[%s25061_s5 + $0xa24] ss:$8 sps:$4 sm:$0xff]   ;;  %v19328_v8 = vld [vmem:[%s25061_s5 + $0x2c0] ss:$8 sps:$4 sm:$0xff]  }
 0x6ea   : > { %10652 = vmatpush1.bf16.msra.mxu1 %v19274_v63  ;;  %v19331_v63 = vld [vmem:[%s25061_s5 + $0xa20] ss:$8 sps:$4 sm:$0xff]  }
 0x6eb   : > { %12894 = vmatpush1.bf16.msra.mxu0 %v19277_v34  ;;  %10653 = vmatprep.subr.bf16.mxu1 %v19282_v60  ;;  %v19336_v34 = vld [vmem:[%s25061_s5 + $0x2d4] ss:$8 sps:$4 sm:$0xff]  }
 0x6ec   : > { %13236 = vmatprep.subr.bf16.mxu0 %v19285_v1  ;;  %v19339_v60 = vld [vmem:[%s25061_s5 + $0xa34] ss:$8 sps:$4 sm:$0xff]   ;;  %v11088_v1 = vsel %vm6371_vm15, %v22155_v55, %v23461_v56  ;;  %v19345_v55 = vld [vmem:[%s25061_s5 + $0xa44] ss:$8 sps:$4 sm:$0xff]  }
 0x6ee   : > { %10654 = vmatpush1.bf16.msra.mxu1 %v19280_v2  ;;  %17166 = vmatmul.mubr.msk.bf16.vlgmr.msra.gmra.mrb[80].mxu0 %vm6371_vm15, %v23851_v54  ;;  %v19334_v2 = vld [vmem:[%s25061_s5 + $0x2d0] ss:$8 sps:$4 sm:$0xff]  }
 0x6ef   : > { %13237 = vmatpush1.bf16.msra.mxu0 %v19283_v38  ;;  %13268 = vmatprep.mubr.bf16.mxu0 %v13010_v41  ;;  %v19337_v38 = vld [vmem:[%s25061_s5 + $0xa30] ss:$8 sps:$4 sm:$0xff]   ;;  %v19340_v41 = vld [vmem:[%s25061_s5 + $0x2e0] ss:$8 sps:$4 sm:$0xff]  }
 0x6f0   : > { %10655 = vmatprep.subr.bf16.mxu1 %v19288_v52  ;;  %13238 = vmatprep.subr.bf16.mxu0 %v19291_v7 }
 0x6f2   : > { %10656 = vmatpush1.bf16.msra.mxu1 %v19286_v18 }
 0x6f3   : > { %13239 = vmatpush1.bf16.msra.mxu0 %v19289_v15  ;;  %10984 = vmatprep.subr.bf16.mxu1 %v19294_v59  ;;  %v19343_v15 = vld [vmem:[%s25061_s5 + $0xa40] ss:$8 sps:$4 sm:$0xff]   ;;  %v19348_v59 = vld [vmem:[%s25061_s5 + $0x2f4] ss:$8 sps:$4 sm:$0xff]  }
 0x6f4   : > { %13240 = vmatprep.subr.bf16.mxu0 %v19297_v17  ;;  %v19351_v17 = vld [vmem:[%s25061_s5 + $0xa54] ss:$8 sps:$4 sm:$0xff]  }
 0x6f5   : > { %10658 = vmatmul.mubr.bf16.vlgmr.msra.gmra.mrb[88].mxu1 %v22113_v43  ;;  %v19309_v43 = vld [vmem:[%s25061_s5 + $0x9e4] ss:$8 sps:$4 sm:$0xff]  }
 0x6f6   : > { %10985 = vmatpush1.bf16.msra.mxu1 %v19292_v20  ;;  %11016 = vmatprep.mubr.bf16.mxu1 %v19878_v35  ;;  %v19346_v20 = vld [vmem:[%s25061_s5 + $0x2f0] ss:$8 sps:$4 sm:$0xff]  }
 0x6f7   : > { %13241 = vmatpush1.bf16.msra.mxu0 %v19295_v49  ;;  %10986 = vmatprep.subr.bf16.mxu1 %v19300_v10  ;;  %v19349_v49 = vld [vmem:[%s25061_s5 + $0xa50] ss:$8 sps:$4 sm:$0xff]   ;;  %v19354_v10 = vld [vmem:[%s25061_s5 + $0x304] ss:$8 sps:$4 sm:$0xff]  }
 0x6f8   : > { %v23916_v45 = vpop.f32.mrb[60].mxu0  ;;  %13242 = vmatprep.subr.bf16.mxu0 %v19303_v19  ;;  %v19357_v19 = vld [vmem:[%s25061_s5 + $0xa64] ss:$8 sps:$4 sm:$0xff]  }
 0x6f9   : > { %v23921_v53 = vpop.f32.mrb[61].mxu0 }
 0x6fa   : > { %10987 = vmatpush1.bf16.msra.mxu1 %v19298_v4  ;;  %v10981_v22 = vpop.f32.mrb[62].mxu0  ;;  %v19352_v4 = vld [vmem:[%s25061_s5 + $0x300] ss:$8 sps:$4 sm:$0xff]  }
 0x6fb   : > { %13243 = vmatpush1.bf16.msra.mxu0 %v19301_v57  ;;  %v10982_v24 = vpop.f32.mrb[63].mxu0  ;;  %10988 = vmatprep.subr.bf16.mxu1 %v19306_v21  ;;  %v19355_v57 = vld [vmem:[%s25061_s5 + $0xa60] ss:$8 sps:$4 sm:$0xff]   ;;  %v19360_v21 = vld [vmem:[%s25061_s5 + $0x314] ss:$8 sps:$4 sm:$0xff]  }
 0x6fc   : > { %13244 = vmatprep.subr.bf16.mxu0 %v19309_v43  ;;  %v19363_v43 = vld [vmem:[%s25061_s5 + $0xa74] ss:$8 sps:$4 sm:$0xff]   ;;  %v19358_v22 = vld [vmem:[%s25061_s5 + $0x310] ss:$8 sps:$4 sm:$0xff]   ;;  %v19366_v24 = vld [vmem:[%s25061_s5 + $0x324] ss:$8 sps:$4 sm:$0xff]  }
 0x6fe   : > { %10989 = vmatpush1.bf16.msra.mxu1 %v19304_v25  ;;  %v19361_v25 = vld [vmem:[%s25061_s5 + $0xa70] ss:$8 sps:$4 sm:$0xff]  }
 0x6ff   : > { %13245 = vmatpush1.bf16.msra.mxu0 %v19307_v13  ;;  %10990 = vmatprep.subr.bf16.mxu1 %v19312_v29  ;;  %v19369_v13 = vld [vmem:[%s25061_s5 + $0xa84] ss:$8 sps:$4 sm:$0xff]   ;;  %v19364_v29 = vld [vmem:[%s25061_s5 + $0x320] ss:$8 sps:$4 sm:$0xff]  }
 0x700   : > { %13246 = vmatprep.subr.bf16.mxu0 %v19315_v16  ;;  %v19367_v16 = vld [vmem:[%s25061_s5 + $0xa80] ss:$8 sps:$4 sm:$0xff]  }
 0x702   : > { %10991 = vmatpush1.bf16.msra.mxu1 %v19310_v28  ;;  %v19372_v28 = vld [vmem:[%s25061_s5 + $0x334] ss:$8 sps:$4 sm:$0xff]  }
 0x703   : > { %13247 = vmatpush1.bf16.msra.mxu0 %v19313_v30  ;;  %10992 = vmatprep.subr.bf16.mxu1 %v19318_v32  ;;  %v19375_v30 = vld [vmem:[%s25061_s5 + $0xa94] ss:$8 sps:$4 sm:$0xff]   ;;  %v19370_v32 = vld [vmem:[%s25061_s5 + $0x330] ss:$8 sps:$4 sm:$0xff]  }
 0x704   : > { %13248 = vmatprep.subr.bf16.mxu0 %v19321_v37  ;;  %v19373_v37 = vld [vmem:[%s25061_s5 + $0xa90] ss:$8 sps:$4 sm:$0xff]  }
 0x706   : > { %10993 = vmatpush1.bf16.msra.mxu1 %v19316_v39  ;;  %v19378_v39 = vld [vmem:[%s25061_s5 + $0x344] ss:$8 sps:$4 sm:$0xff]  }
 0x707   : > { %13249 = vmatpush1.bf16.msra.mxu0 %v19319_v26  ;;  %10994 = vmatprep.subr.bf16.mxu1 %v19324_v27  ;;  %v19381_v26 = vld [vmem:[%s25061_s5 + $0xc04] ss:$8 sps:$4 sm:$0xff]   ;;  %v13004_v27 = vpop.permute.xlu1 %13003 }
 0x708   : > { %13250 = vmatprep.subr.bf16.mxu0 %v19327_v42  ;;  %v19376_v42 = vld [vmem:[%s25061_s5 + $0x340] ss:$8 sps:$4 sm:$0xff]  }
 0x70a   : > { %10995 = vmatpush1.bf16.msra.mxu1 %v19322_v47  ;;  %v19379_v47 = vld [vmem:[%s25061_s5 + $0xc00] ss:$8 sps:$4 sm:$0xff]  }
 0x70b   : > { %13251 = vmatpush1.bf16.msra.mxu0 %v19325_v50  ;;  %11314 = vmatprep.subr.bf16.mxu1 %v19330_v51  ;;  %v19384_v50 = vld [vmem:[%s25061_s5 + $0x354] ss:$8 sps:$4 sm:$0xff]  }
 0x70c   : > { %13252 = vmatprep.subr.bf16.mxu0 %v19333_v61  ;;  %v19387_v51 = vld [vmem:[%s25061_s5 + $0xc14] ss:$8 sps:$4 sm:$0xff]   ;;  %v13009_v61 = vsel %vm6371_vm15, %v13004_v27, %v22277_v5  ;;  %v19393_v5 = vld [vmem:[%s25061_s5 + $0xc24] ss:$8 sps:$4 sm:$0xff]   ;;  %v19430_v27 = vld [vmem:[%s25061_s5 + $0x530] ss:$8 sps:$4 sm:$0xff]  }
 0x70d   : > { %16721 = vmatmul.mubr.msk.bf16.vlgmr.msra.gmra.mrb[92].mxu1 %vm6371_vm15, %v23223_v31  ;;  %v19342_v31 = vld [vmem:[%s25061_s5 + $0x2e4] ss:$8 sps:$4 sm:$0xff]  }
 0x70e   : > { %11315 = vmatpush1.bf16.msra.mxu1 %v19328_v8  ;;  %11346 = vmatprep.mubr.bf16.mxu1 %v11088_v1  ;;  %v19382_v8 = vld [vmem:[%s25061_s5 + $0x350] ss:$8 sps:$4 sm:$0xff]   ;;  %v19391_v1 = vld [vmem:[%s25061_s5 + $0xc20] ss:$8 sps:$4 sm:$0xff]  }
 0x70f   : > { %13253 = vmatpush1.bf16.msra.mxu0 %v19331_v63  ;;  %11316 = vmatprep.subr.bf16.mxu1 %v19336_v34  ;;  %v19385_v63 = vld [vmem:[%s25061_s5 + $0xc10] ss:$8 sps:$4 sm:$0xff]   ;;  %v19390_v34 = vld [vmem:[%s25061_s5 + $0x364] ss:$8 sps:$4 sm:$0xff]  }
 0x710   : > { %v23997_v52 = vpop.f32.mrb[64].mxu0  ;;  %13254 = vmatprep.subr.bf16.mxu0 %v19339_v60  ;;  %v19388_v60 = vld [vmem:[%s25061_s5 + $0x360] ss:$8 sps:$4 sm:$0xff]  }
 0x711   : > { %v24002_v56 = vpop.f32.mrb[65].mxu0 }
 0x712   : > { %11317 = vmatpush1.bf16.msra.mxu1 %v19334_v2  ;;  %v11393_v7 = vpop.f32.mrb[66].mxu0  ;;  %v19396_v2 = vld [vmem:[%s25061_s5 + $0x374] ss:$8 sps:$4 sm:$0xff]  }
 0x713   : > { %13255 = vmatpush1.bf16.msra.mxu0 %v19337_v38  ;;  %11318 = vmatprep.subr.bf16.mxu1 %v19342_v31  ;;  %v11394_v18 = vpop.f32.mrb[67].mxu0  ;;  %v19399_v38 = vld [vmem:[%s25061_s5 + $0xc34] ss:$8 sps:$4 sm:$0xff]   ;;  %v19394_v31 = vld [vmem:[%s25061_s5 + $0x370] ss:$8 sps:$4 sm:$0xff]  }
 0x714   : > { %13256 = vmatprep.subr.bf16.mxu0 %v19345_v55  ;;  %v19397_v55 = vld [vmem:[%s25061_s5 + $0xc30] ss:$8 sps:$4 sm:$0xff]   ;;  %v19402_v7 = vld [vmem:[%s25061_s5 + $0x384] ss:$8 sps:$4 sm:$0xff]   ;;  %v19400_v18 = vld [vmem:[%s25061_s5 + $0x380] ss:$8 sps:$4 sm:$0xff]  }
 0x716   : > { %11319 = vmatpush1.bf16.msra.mxu1 %v19340_v41  ;;  %v19405_v41 = vld [vmem:[%s25061_s5 + $0xc44] ss:$8 sps:$4 sm:$0xff]  }
 0x717   : > { %13257 = vmatpush1.bf16.msra.mxu0 %v19343_v15  ;;  %11320 = vmatprep.subr.bf16.mxu1 %v19348_v59  ;;  %v19403_v15 = vld [vmem:[%s25061_s5 + $0xc40] ss:$8 sps:$4 sm:$0xff]   ;;  %v19408_v59 = vld [vmem:[%s25061_s5 + $0x394] ss:$8 sps:$4 sm:$0xff]  }
 0x718   : > { %13258 = vmatprep.subr.bf16.mxu0 %v19351_v17  ;;  %v19411_v17 = vld [vmem:[%s25061_s5 + $0xc54] ss:$8 sps:$4 sm:$0xff]  }
 0x71a   : > { %11321 = vmatpush1.bf16.msra.mxu1 %v19346_v20  ;;  %v19406_v20 = vld [vmem:[%s25061_s5 + $0x390] ss:$8 sps:$4 sm:$0xff]  }
 0x71b   : > { %13259 = vmatpush1.bf16.msra.mxu0 %v19349_v49  ;;  %11322 = vmatprep.subr.bf16.mxu1 %v19354_v10  ;;  %v24142_v49 = vpop.permute.xlu1 %13377  ;;  %v19409_v10 = vld [vmem:[%s25061_s5 + $0xc50] ss:$8 sps:$4 sm:$0xff]  }
 0x71c   : > { %13260 = vmatprep.subr.bf16.mxu0 %v19357_v19  ;;  %v19414_v19 = vld [vmem:[%s25061_s5 + $0x3a4] ss:$8 sps:$4 sm:$0xff]  }
 0x71e   : > { %11323 = vmatpush1.bf16.msra.mxu1 %v19352_v4  ;;  %v19417_v4 = vld [vmem:[%s25061_s5 + $0xc64] ss:$8 sps:$4 sm:$0xff]  }
 0x71f   : > { %13261 = vmatpush1.bf16.msra.mxu0 %v19355_v57  ;;  %11324 = vmatprep.subr.bf16.mxu1 %v19360_v21  ;;  %v19412_v57 = vld [vmem:[%s25061_s5 + $0x3a0] ss:$8 sps:$4 sm:$0xff]   ;;  %v24156_v21 = vpop.permute.xlu0 %13763 }
 0x720   : > { %13262 = vmatprep.subr.bf16.mxu0 %v19363_v43  ;;  %v19415_v43 = vld [vmem:[%s25061_s5 + $0xc60] ss:$8 sps:$4 sm:$0xff]  }
 0x722   : > { %11325 = vmatpush1.bf16.msra.mxu1 %v19358_v22  ;;  %v19420_v22 = vld [vmem:[%s25061_s5 + $0x3b4] ss:$8 sps:$4 sm:$0xff]  }
 0x723   : > { %13263 = vmatpush1.bf16.msra.mxu0 %v19361_v25  ;;  %11326 = vmatprep.subr.bf16.mxu1 %v19366_v24  ;;  %v19423_v25 = vld [vmem:[%s25061_s5 + $0xc74] ss:$8 sps:$4 sm:$0xff]   ;;  %v24167_v24 = vpop.permute.xlu1 %13765 }
 0x724   : > { %13264 = vmatprep.subr.bf16.mxu0 %v19369_v13  ;;  %v13768_v13 = vsel %vm6371_vm15, %v24156_v21, %v24167_v24 }
 0x726   : > { %11327 = vmatpush1.bf16.msra.mxu1 %v19364_v29  ;;  %v19418_v29 = vld [vmem:[%s25061_s5 + $0x3b0] ss:$8 sps:$4 sm:$0xff]  }
 0x727   : > { %13265 = vmatpush1.bf16.msra.mxu0 %v19367_v16  ;;  %11328 = vmatprep.subr.bf16.mxu1 %v19372_v28  ;;  %v19421_v16 = vld [vmem:[%s25061_s5 + $0xc70] ss:$8 sps:$4 sm:$0xff]   ;;  %v19426_v28 = vld [vmem:[%s25061_s5 + $0x524] ss:$8 sps:$4 sm:$0xff]  }
 0x728   : > { %13266 = vmatprep.subr.bf16.mxu0 %v19375_v30  ;;  %v19429_v30 = vld [vmem:[%s25061_s5 + $0xc84] ss:$8 sps:$4 sm:$0xff]  }
 0x72a   : > { %11329 = vmatpush1.bf16.msra.mxu1 %v19370_v32  ;;  %v19424_v32 = vld [vmem:[%s25061_s5 + $0x520] ss:$8 sps:$4 sm:$0xff]  }
 0x72b   : > { %13267 = vmatpush1.bf16.msra.mxu0 %v19373_v37  ;;  %11330 = vmatprep.subr.bf16.mxu1 %v19378_v39  ;;  %v19427_v37 = vld [vmem:[%s25061_s5 + $0xc80] ss:$8 sps:$4 sm:$0xff]   ;;  %v19432_v39 = vld [vmem:[%s25061_s5 + $0x534] ss:$8 sps:$4 sm:$0xff]  }
 0x72c   : > { %13647 = vmatprep.subr.bf16.mxu0 %v19381_v26  ;;  %v19435_v26 = vld [vmem:[%s25061_s5 + $0xc94] ss:$8 sps:$4 sm:$0xff]  }
 0x72e   : > { %11331 = vmatpush1.bf16.msra.mxu1 %v19376_v42  ;;  %13269 = vmatmul.mubr.bf16.vlgmr.msra.gmra.mrb[84].mxu0 %v13009_v61  ;;  %v19433_v42 = vld [vmem:[%s25061_s5 + $0xc90] ss:$8 sps:$4 sm:$0xff]  }
 0x72f   : > { %13648 = vmatpush1.bf16.msra.mxu0 %v19379_v47  ;;  %11332 = vmatprep.subr.bf16.mxu1 %v19384_v50  ;;  %v19438_v47 = vld [vmem:[%s25061_s5 + $0x544] ss:$8 sps:$4 sm:$0xff]  }
 0x730   : > { %13649 = vmatprep.subr.bf16.mxu0 %v19387_v51  ;;  %13679 = vmatprep.mubr.bf16.mxu0 %v19878_v35 }
 0x732   : > { %11333 = vmatpush1.bf16.msra.mxu1 %v19382_v8  ;;  %v19436_v8 = vld [vmem:[%s25061_s5 + $0x540] ss:$8 sps:$4 sm:$0xff]  }
 0x733   : > { %13650 = vmatpush1.bf16.msra.mxu0 %v19385_v63  ;;  %11334 = vmatprep.subr.bf16.mxu1 %v19390_v34  ;;  %v19439_v34 = vld [vmem:[%s25061_s5 + $0xca0] ss:$8 sps:$4 sm:$0xff]  }
 0x734   : > { %13651 = vmatprep.subr.bf16.mxu0 %v19393_v5  ;;  %v19444_v5 = vld [vmem:[%s25061_s5 + $0x554] ss:$8 sps:$4 sm:$0xff]  }
 0x736   : > { %11335 = vmatpush1.bf16.msra.mxu1 %v19388_v60  ;;  %v19447_v60 = vld [vmem:[%s25061_s5 + $0xcb4] ss:$8 sps:$4 sm:$0xff]  }
 0x737   : > { %13652 = vmatpush1.bf16.msra.mxu0 %v19391_v1  ;;  %11336 = vmatprep.subr.bf16.mxu1 %v19396_v2  ;;  %v19442_v1 = vld [vmem:[%s25061_s5 + $0x550] ss:$8 sps:$4 sm:$0xff]  }
 0x738   : > { %13653 = vmatprep.subr.bf16.mxu0 %v19399_v38  ;;  %v19445_v2 = vld [vmem:[%s25061_s5 + $0xcb0] ss:$8 sps:$4 sm:$0xff]   ;;  %v19450_v38 = vld [vmem:[%s25061_s5 + $0x564] ss:$8 sps:$4 sm:$0xff]  }
 0x73a   : > { %11337 = vmatpush1.bf16.msra.mxu1 %v19394_v31  ;;  %v19453_v31 = vld [vmem:[%s25061_s5 + $0xcc4] ss:$8 sps:$4 sm:$0xff]  }
 0x73b   : > { %13654 = vmatpush1.bf16.msra.mxu0 %v19397_v55  ;;  %11338 = vmatprep.subr.bf16.mxu1 %v19402_v7  ;;  %v19448_v55 = vld [vmem:[%s25061_s5 + $0x560] ss:$8 sps:$4 sm:$0xff]  }
 0x73c   : > { %13655 = vmatprep.subr.bf16.mxu0 %v19405_v41  ;;  %v19451_v7 = vld [vmem:[%s25061_s5 + $0xcc0] ss:$8 sps:$4 sm:$0xff]   ;;  %v19456_v41 = vld [vmem:[%s25061_s5 + $0x574] ss:$8 sps:$4 sm:$0xff]  }
 0x73e   : > { %11339 = vmatpush1.bf16.msra.mxu1 %v19400_v18  ;;  %v19459_v18 = vld [vmem:[%s25061_s5 + $0xcd4] ss:$8 sps:$4 sm:$0xff]  }
 0x73f   : > { %13656 = vmatpush1.bf16.msra.mxu0 %v19403_v15  ;;  %11340 = vmatprep.subr.bf16.mxu1 %v19408_v59  ;;  %v19454_v15 = vld [vmem:[%s25061_s5 + $0x570] ss:$8 sps:$4 sm:$0xff]  }
 0x740   : > { %13657 = vmatprep.subr.bf16.mxu0 %v19411_v17  ;;  %v19457_v59 = vld [vmem:[%s25061_s5 + $0xcd0] ss:$8 sps:$4 sm:$0xff]   ;;  %v19462_v17 = vld [vmem:[%s25061_s5 + $0x584] ss:$8 sps:$4 sm:$0xff]  }
 0x742   : > { %11341 = vmatpush1.bf16.msra.mxu1 %v19406_v20  ;;  %v19465_v20 = vld [vmem:[%s25061_s5 + $0xce4] ss:$8 sps:$4 sm:$0xff]  }
 0x743   : > { %13658 = vmatpush1.bf16.msra.mxu0 %v19409_v10  ;;  %11342 = vmatprep.subr.bf16.mxu1 %v19414_v19  ;;  %v19460_v10 = vld [vmem:[%s25061_s5 + $0x580] ss:$8 sps:$4 sm:$0xff]  }
 0x744   : > { %13994 = vmatprep.subr.bf16.mxu0 %v19417_v4  ;;  %v19463_v19 = vld [vmem:[%s25061_s5 + $0xce0] ss:$8 sps:$4 sm:$0xff]   ;;  %v19468_v4 = vld [vmem:[%s25061_s5 + $0x594] ss:$8 sps:$4 sm:$0xff]  }
 0x746   : > { %11343 = vmatpush1.bf16.msra.mxu1 %v19412_v57  ;;  %17344 = vmatmul.mubr.msk.bf16.vlgmr.msra.gmra.mrb[88].mxu0 %vm6371_vm15, %v24142_v49  ;;  %v19471_v57 = vld [vmem:[%s25061_s5 + $0xcf4] ss:$8 sps:$4 sm:$0xff]  }
 0x747   : > { %13995 = vmatpush1.bf16.msra.mxu0 %v19415_v43  ;;  %14026 = vmatprep.mubr.bf16.mxu0 %v13768_v13  ;;  %v11852_v43 = vsel %vm6371_vm15, %v22199_v6, %v23614_v33  ;;  %v19477_v6 = vld [vmem:[%s25061_s5 + $0xd04] ss:$8 sps:$4 sm:$0xff]  }
 0x748   : > { %11344 = vmatprep.subr.bf16.mxu1 %v19420_v22  ;;  %13996 = vmatprep.subr.bf16.mxu0 %v19423_v25  ;;  %v19466_v22 = vld [vmem:[%s25061_s5 + $0x590] ss:$8 sps:$4 sm:$0xff]  }
 0x749   : > { %v19469_v25 = vld [vmem:[%s25061_s5 + $0xcf0] ss:$8 sps:$4 sm:$0xff]  }
 0x74a   : > { %11345 = vmatpush1.bf16.msra.mxu1 %v19418_v29 }
 0x74b   : > { %13997 = vmatpush1.bf16.msra.mxu0 %v19421_v16  ;;  %11746 = vmatprep.subr.bf16.mxu1 %v19426_v28  ;;  %v19472_v16 = vld [vmem:[%s25061_s5 + $0x5a0] ss:$8 sps:$4 sm:$0xff]  }
 0x74c   : > { %13998 = vmatprep.subr.bf16.mxu0 %v19429_v30  ;;  %v19475_v30 = vld [vmem:[%s25061_s5 + $0xd00] ss:$8 sps:$4 sm:$0xff]  }
 0x74d   : > { %11347 = vmatmul.mubr.bf16.vlgmr.msra.gmra.mrb[96].mxu1 %v22174_v0  ;;  %v19441_v0 = vld [vmem:[%s25061_s5 + $0xca4] ss:$8 sps:$4 sm:$0xff]  }
 0x74e   : > { %11747 = vmatpush1.bf16.msra.mxu1 %v19424_v32  ;;  %11778 = vmatprep.mubr.bf16.mxu1 %v19878_v35  ;;  %v19480_v32 = vld [vmem:[%s25061_s5 + $0x5b4] ss:$8 sps:$4 sm:$0xff]  }
 0x74f   : > { %13999 = vmatpush1.bf16.msra.mxu0 %v19427_v37  ;;  %11748 = vmatprep.subr.bf16.mxu1 %v19432_v39  ;;  %v19483_v37 = vld [vmem:[%s25061_s5 + $0xd14] ss:$8 sps:$4 sm:$0xff]   ;;  %v19478_v39 = vld [vmem:[%s25061_s5 + $0x5b0] ss:$8 sps:$4 sm:$0xff]  }
 0x750   : > { %v24209_v50 = vpop.f32.mrb[68].mxu0  ;;  %14000 = vmatprep.subr.bf16.mxu0 %v19435_v26  ;;  %v19481_v26 = vld [vmem:[%s25061_s5 + $0xd10] ss:$8 sps:$4 sm:$0xff]  }
 0x751   : > { %v24214_v51 = vpop.f32.mrb[69].mxu0 }
 0x752   : > { %11749 = vmatpush1.bf16.msra.mxu1 %v19430_v27  ;;  %v11743_v61 = vpop.f32.mrb[70].mxu0  ;;  %v19486_v27 = vld [vmem:[%s25061_s5 + $0x5c4] ss:$8 sps:$4 sm:$0xff]  }
 0x753   : > { %14001 = vmatpush1.bf16.msra.mxu0 %v19433_v42  ;;  %v11744_v63 = vpop.f32.mrb[71].mxu0  ;;  %11750 = vmatprep.subr.bf16.mxu1 %v19438_v47  ;;  %v19489_v42 = vld [vmem:[%s25061_s5 + $0xd24] ss:$8 sps:$4 sm:$0xff]   ;;  %v19484_v47 = vld [vmem:[%s25061_s5 + $0x5c0] ss:$8 sps:$4 sm:$0xff]  }
 0x754   : > { %14002 = vmatprep.subr.bf16.mxu0 %v19441_v0  ;;  %v19487_v0 = vld [vmem:[%s25061_s5 + $0xd20] ss:$8 sps:$4 sm:$0xff]   ;;  %v19492_v61 = vld [vmem:[%s25061_s5 + $0x5d4] ss:$8 sps:$4 sm:$0xff]   ;;  %v19490_v63 = vld [vmem:[%s25061_s5 + $0x5d0] ss:$8 sps:$4 sm:$0xff]  }
 0x756   : > { %11751 = vmatpush1.bf16.msra.mxu1 %v19436_v8  ;;  %v19495_v8 = vld [vmem:[%s25061_s5 + $0xd34] ss:$8 sps:$4 sm:$0xff]  }
 0x757   : > { %14003 = vmatpush1.bf16.msra.mxu0 %v19439_v34  ;;  %11752 = vmatprep.subr.bf16.mxu1 %v19444_v5  ;;  %v19493_v34 = vld [vmem:[%s25061_s5 + $0xd30] ss:$8 sps:$4 sm:$0xff]   ;;  %v19498_v5 = vld [vmem:[%s25061_s5 + $0x5e4] ss:$8 sps:$4 sm:$0xff]  }
 0x758   : > { %14004 = vmatprep.subr.bf16.mxu0 %v19447_v60  ;;  %v19501_v60 = vld [vmem:[%s25061_s5 + $0xd44] ss:$8 sps:$4 sm:$0xff]  }
 0x75a   : > { %11753 = vmatpush1.bf16.msra.mxu1 %v19442_v1  ;;  %v19496_v1 = vld [vmem:[%s25061_s5 + $0x5e0] ss:$8 sps:$4 sm:$0xff]  }
 0x75b   : > { %14005 = vmatpush1.bf16.msra.mxu0 %v19445_v2  ;;  %11754 = vmatprep.subr.bf16.mxu1 %v19450_v38  ;;  %v19499_v2 = vld [vmem:[%s25061_s5 + $0xd40] ss:$8 sps:$4 sm:$0xff]   ;;  %v19504_v38 = vld [vmem:[%s25061_s5 + $0x5f4] ss:$8 sps:$4 sm:$0xff]  }
 0x75c   : > { %14006 = vmatprep.subr.bf16.mxu0 %v19453_v31  ;;  %v19507_v31 = vld [vmem:[%s25061_s5 + $0xd54] ss:$8 sps:$4 sm:$0xff]  }
 0x75e   : > { %11755 = vmatpush1.bf16.msra.mxu1 %v19448_v55  ;;  %v19502_v55 = vld [vmem:[%s25061_s5 + $0x5f0] ss:$8 sps:$4 sm:$0xff]  }
 0x75f   : > { %14007 = vmatpush1.bf16.msra.mxu0 %v19451_v7  ;;  %11756 = vmatprep.subr.bf16.mxu1 %v19456_v41  ;;  %v19505_v7 = vld [vmem:[%s25061_s5 + $0xd50] ss:$8 sps:$4 sm:$0xff]   ;;  %v19510_v41 = vld [vmem:[%s25061_s5 + $0x604] ss:$8 sps:$4 sm:$0xff]  }
 0x760   : > { %14008 = vmatprep.subr.bf16.mxu0 %v19459_v18  ;;  %v19513_v18 = vld [vmem:[%s25061_s5 + $0xec4] ss:$8 sps:$4 sm:$0xff]  }
 0x762   : > { %11757 = vmatpush1.bf16.msra.mxu1 %v19454_v15  ;;  %v13762_v15 = vpop.permute.xlu1 %13761 }
 0x763   : > { %14009 = vmatpush1.bf16.msra.mxu0 %v19457_v59  ;;  %12078 = vmatprep.subr.bf16.mxu1 %v19462_v17  ;;  %v19508_v59 = vld [vmem:[%s25061_s5 + $0x600] ss:$8 sps:$4 sm:$0xff]  }
 0x764   : > { %14010 = vmatprep.subr.bf16.mxu0 %v19465_v20  ;;  %v19511_v17 = vld [vmem:[%s25061_s5 + $0xec0] ss:$8 sps:$4 sm:$0xff]   ;;  %v19516_v20 = vld [vmem:[%s25061_s5 + $0x614] ss:$8 sps:$4 sm:$0xff]  }
 0x765   : > { %16899 = vmatmul.mubr.msk.bf16.vlgmr.msra.gmra.mrb[100].mxu1 %vm6371_vm15, %v23478_v3  ;;  %v19474_v3 = vld [vmem:[%s25061_s5 + $0x5a4] ss:$8 sps:$4 sm:$0xff]  }
 0x766   : > { %12079 = vmatpush1.bf16.msra.mxu1 %v19460_v10  ;;  %12110 = vmatprep.mubr.bf16.mxu1 %v11852_v43  ;;  %v19519_v10 = vld [vmem:[%s25061_s5 + $0xed4] ss:$8 sps:$4 sm:$0xff]   ;;  %v19522_v43 = vld [vmem:[%s25061_s5 + $0x624] ss:$8 sps:$4 sm:$0xff]  }
 0x767   : > { %14011 = vmatpush1.bf16.msra.mxu0 %v19463_v19  ;;  %12080 = vmatprep.subr.bf16.mxu1 %v19468_v4  ;;  %v13767_v19 = vsel %vm6371_vm15, %v13762_v15, %v24156_v21  ;;  %v19514_v4 = vld [vmem:[%s25061_s5 + $0x610] ss:$8 sps:$4 sm:$0xff]   ;;  %v19525_v21 = vld [vmem:[%s25061_s5 + $0xee4] ss:$8 sps:$4 sm:$0xff]  }
 0x768   : > { %v24290_v13 = vpop.f32.mrb[72].mxu0  ;;  %14012 = vmatprep.subr.bf16.mxu0 %v19471_v57  ;;  %v19517_v57 = vld [vmem:[%s25061_s5 + $0xed0] ss:$8 sps:$4 sm:$0xff]  }
 0x769   : > { %v24295_v33 = vpop.f32.mrb[73].mxu0 }
 0x76a   : > { %12081 = vmatpush1.bf16.msra.mxu1 %v19466_v22  ;;  %v12157_v29 = vpop.f32.mrb[74].mxu0 }
 0x76b   : > { %14013 = vmatpush1.bf16.msra.mxu0 %v19469_v25  ;;  %12082 = vmatprep.subr.bf16.mxu1 %v19474_v3  ;;  %v12158_v28 = vpop.f32.mrb[75].mxu0  ;;  %v16587_v3 = vld [vmem:[%s25064_s8] ss:$0 sm:$0xff] }
 0x76c   : > { %14014 = vmatprep.subr.bf16.mxu0 %v19477_v6  ;;  %v19520_v29 = vld [vmem:[%s25061_s5 + $0x620] ss:$8 sps:$4 sm:$0xff]  }
 0x76e   : > { %12083 = vmatpush1.bf16.msra.mxu1 %v19472_v16  ;;  %v19523_v16 = vld [vmem:[%s25061_s5 + $0xee0] ss:$8 sps:$4 sm:$0xff]  }
 0x76f   : > { %14015 = vmatpush1.bf16.msra.mxu0 %v19475_v30  ;;  %12084 = vmatprep.subr.bf16.mxu1 %v19480_v32  ;;  %v19528_v30 = vld [vmem:[%s25061_s5 + $0x634] ss:$8 sps:$4 sm:$0xff]  }
 0x770   : > { %14016 = vmatprep.subr.bf16.mxu0 %v19483_v37  ;;  %v19531_v32 = vld [vmem:[%s25061_s5 + $0xef4] ss:$8 sps:$4 sm:$0xff]  }
 0x772   : > { %12085 = vmatpush1.bf16.msra.mxu1 %v19478_v39  ;;  %v19526_v39 = vld [vmem:[%s25061_s5 + $0x630] ss:$8 sps:$4 sm:$0xff]  }
 0x773   : > { %14017 = vmatpush1.bf16.msra.mxu0 %v19481_v26  ;;  %12086 = vmatprep.subr.bf16.mxu1 %v19486_v27  ;;  %v19529_v26 = vld [vmem:[%s25061_s5 + $0xef0] ss:$8 sps:$4 sm:$0xff]   ;;  %v19534_v27 = vld [vmem:[%s25061_s5 + $0x644] ss:$8 sps:$4 sm:$0xff]  }
 0x774   : > { %14018 = vmatprep.subr.bf16.mxu0 %v19489_v42  ;;  %v19537_v42 = vld [vmem:[%s25061_s5 + $0xf04] ss:$8 sps:$4 sm:$0xff]  }
 0x776   : > { %12087 = vmatpush1.bf16.msra.mxu1 %v19484_v47  ;;  %v19532_v47 = vld [vmem:[%s25061_s5 + $0x640] ss:$8 sps:$4 sm:$0xff]  }
 0x777   : > { %14019 = vmatpush1.bf16.msra.mxu0 %v19487_v0  ;;  %12088 = vmatprep.subr.bf16.mxu1 %v19492_v61  ;;  %v19535_v0 = vld [vmem:[%s25061_s5 + $0xf00] ss:$8 sps:$4 sm:$0xff]   ;;  %v19540_v61 = vld [vmem:[%s25061_s5 + $0x654] ss:$8 sps:$4 sm:$0xff]  }
 0x778   : > { %14020 = vmatprep.subr.bf16.mxu0 %v19495_v8  ;;  %v19543_v8 = vld [vmem:[%s25061_s5 + $0xf14] ss:$8 sps:$4 sm:$0xff]  }
 0x77a   : > { %12089 = vmatpush1.bf16.msra.mxu1 %v19490_v63  ;;  %v19538_v63 = vld [vmem:[%s25061_s5 + $0x650] ss:$8 sps:$4 sm:$0xff]  }
 0x77b   : > { %14021 = vmatpush1.bf16.msra.mxu0 %v19493_v34  ;;  %12090 = vmatprep.subr.bf16.mxu1 %v19498_v5  ;;  %v19541_v34 = vld [vmem:[%s25061_s5 + $0xf10] ss:$8 sps:$4 sm:$0xff]   ;;  %v19546_v5 = vld [vmem:[%s25061_s5 + $0x664] ss:$8 sps:$4 sm:$0xff]  }
 0x77c   : > { %14022 = vmatprep.subr.bf16.mxu0 %v19501_v60  ;;  %v19544_v60 = vld [vmem:[%s25061_s5 + $0x660] ss:$8 sps:$4 sm:$0xff]  }
 0x77e   : > { %12091 = vmatpush1.bf16.msra.mxu1 %v19496_v1  ;;  %v19549_v1 = vld [vmem:[%s25061_s5 + $0x674] ss:$8 sps:$4 sm:$0xff]  }
 0x77f   : > { %14023 = vmatpush1.bf16.msra.mxu0 %v19499_v2  ;;  %12092 = vmatprep.subr.bf16.mxu1 %v19504_v38  ;;  %v24454_v2 = vpop.permute.xlu1 %14138  ;;  %v19547_v38 = vld [vmem:[%s25061_s5 + $0x670] ss:$8 sps:$4 sm:$0xff]  }
 0x780   : > { %14024 = vmatprep.subr.bf16.mxu0 %v19507_v31  ;;  %v19552_v31 = vld [vmem:[%s25061_s5 + $0x7e4] ss:$8 sps:$4 sm:$0xff]  }
 0x782   : > { %12093 = vmatpush1.bf16.msra.mxu1 %v19502_v55  ;;  %v19550_v55 = vld [vmem:[%s25061_s5 + $0x7e0] ss:$8 sps:$4 sm:$0xff]  }
 0x783   : > { %14025 = vmatpush1.bf16.msra.mxu0 %v19505_v7  ;;  %12094 = vmatprep.subr.bf16.mxu1 %v19510_v41  ;;  %v19555_v7 = vld [vmem:[%s25061_s5 + $0x7f4] ss:$8 sps:$4 sm:$0xff]   ;;  %v19553_v41 = vld [vmem:[%s25061_s5 + $0x7f0] ss:$8 sps:$4 sm:$0xff]  }
 0x784   : > { %14408 = vmatprep.subr.bf16.mxu0 %v19513_v18  ;;  %v19558_v18 = vld [vmem:[%s25061_s5 + $0x804] ss:$8 sps:$4 sm:$0xff]  }
 0x786   : > { %12095 = vmatpush1.bf16.msra.mxu1 %v19508_v59  ;;  %14027 = vmatmul.mubr.bf16.vlgmr.msra.gmra.mrb[92].mxu0 %v13767_v19  ;;  %v19559_v19 = vld [vmem:[%s25061_s5 + $0x810] ss:$8 sps:$4 sm:$0xff]  }
 0x787   : > { %14409 = vmatpush1.bf16.msra.mxu0 %v19511_v17  ;;  %12096 = vmatprep.subr.bf16.mxu1 %v19516_v20  ;;  %v19561_v20 = vld [vmem:[%s25061_s5 + $0x814] ss:$8 sps:$4 sm:$0xff]  }
 0x788   : > { %v17558_v22 = vpop.f32.mrb[84].mxu1  ;;  %14410 = vmatprep.subr.bf16.mxu0 %v19519_v10  ;;  %14440 = vmatprep.mubr.bf16.mxu0 %v19878_v35 }
 0x789   : > { %v17559_v25 = vpop.f32.mrb[85].mxu1 }
 0x78a   : > { %v17560_v6 = vadd.f32 %v17559_v25, %v17558_v22  ;;  %12097 = vmatpush1.bf16.msra.mxu1 %v19514_v4  ;;  %v19564_v4 = vld [vmem:[%s25061_s5 + $0x824] ss:$8 sps:$4 sm:$0xff]   ;;  %v19565_v22 = vld [vmem:[%s25061_s5 + $0x830] ss:$8 sps:$4 sm:$0xff]   ;;  %v19568_v25 = vld [vmem:[%s25061_s5 + $0x840] ss:$8 sps:$4 sm:$0xff]  }
 0x78b   : > { %14411 = vmatpush1.bf16.msra.mxu0 %v19517_v57  ;;  %12098 = vmatprep.subr.bf16.mxu1 %v19522_v43  ;;  %v19562_v57 = vld [vmem:[%s25061_s5 + $0x820] ss:$8 sps:$4 sm:$0xff]   ;;  %v19567_v43 = vld [vmem:[%s25061_s5 + $0x834] ss:$8 sps:$4 sm:$0xff]  }
 0x78c   : > { %14412 = vmatprep.subr.bf16.mxu0 %v19525_v21  ;;  %v24405_v28 = vadd.f32 %v17560_v6, %v16587_v3  ;;  %v19570_v21 = vld [vmem:[%s25061_s5 + $0x844] ss:$8 sps:$4 sm:$0xff]   ;;  %v19573_v3 = vld [vmem:[%s25061_s5 + $0x854] ss:$8 sps:$4 sm:$0xff]   ;;  %v12616_v6 = vsel %vm6371_vm15, %v22243_v36, %v23851_v54  ;;  %v19574_v36 = vld [vmem:[%s25061_s5 + $0x860] ss:$8 sps:$4 sm:$0xff]  }
 0x78d   : > { %v19579_v54 = vld [vmem:[%s25061_s5 + $0x874] ss:$8 sps:$4 sm:$0xff]  }
 0x78e   : > { %12099 = vmatpush1.bf16.msra.mxu1 %v19520_v29  ;;  %v10248_v37 = vsel %vm10247_vm0, %v24405_v28, -inf  ;;  %v19571_v29 = vld [vmem:[%s25061_s5 + $0x850] ss:$8 sps:$4 sm:$0xff]  }
 0x78f   : > { %14413 = vmatpush1.bf16.msra.mxu0 %v19523_v16  ;;  %10249 = vmax.xlane.f32.xlu1 %v10248_v37  ;;  %v19576_v16 = vld [vmem:[%s25061_s5 + $0x864] ss:$8 sps:$4 sm:$0xff]  }
 0x790   : > { %12100 = vmatprep.subr.bf16.mxu1 %v19528_v30  ;;  %14414 = vmatprep.subr.bf16.mxu0 %v19531_v32 }
 0x792   : > { %12101 = vmatpush1.bf16.msra.mxu1 %v19526_v39  ;;  %v19577_v39 = vld [vmem:[%s25061_s5 + $0x870] ss:$8 sps:$4 sm:$0xff]  }
 0x793   : > { %14415 = vmatpush1.bf16.msra.mxu0 %v19529_v26  ;;  %12102 = vmatprep.subr.bf16.mxu1 %v19534_v27  ;;  %v19582_v26 = vld [vmem:[%s25061_s5 + $0x884] ss:$8 sps:$4 sm:$0xff]  }
 0x794   : > { %14416 = vmatprep.subr.bf16.mxu0 %v19537_v42 }
 0x796   : > { %12103 = vmatpush1.bf16.msra.mxu1 %v19532_v47 }
 0x797   : > { %14417 = vmatpush1.bf16.msra.mxu0 %v19535_v0  ;;  %12104 = vmatprep.subr.bf16.mxu1 %v19540_v61 }
 0x798   : > { %14418 = vmatprep.subr.bf16.mxu0 %v19543_v8  ;;  %v19580_v8 = vld [vmem:[%s25061_s5 + $0x880] ss:$8 sps:$4 sm:$0xff]  }
 0x79a   : > { %12105 = vmatpush1.bf16.msra.mxu1 %v19538_v63 }
 0x79b   : > { %14419 = vmatpush1.bf16.msra.mxu0 %v19541_v34  ;;  %12106 = vmatprep.subr.bf16.mxu1 %v19546_v5  ;;  %v19585_v34 = vld [vmem:[%s25061_s5 + $0x894] ss:$8 sps:$4 sm:$0xff]  }
 0x79e   : > { %12107 = vmatpush1.bf16.msra.mxu1 %v19544_v60  ;;  %17522 = vmatmul.mubr.msk.bf16.vlgmr.msra.gmra.mrb[96].mxu0 %vm6371_vm15, %v24454_v2 }
 0x79f   : > { %12108 = vmatprep.subr.bf16.mxu1 %v19549_v1  ;;  %v19586_v1 = vld [vmem:[%s25061_s5 + $0x8a0] ss:$8 sps:$4 sm:$0xff]  }
 0x7a2   : > { %12109 = vmatpush1.bf16.msra.mxu1 %v19547_v38  ;;  %v19594_v38 = vld [vmem:[%s25061_s5 + $0x8c4] ss:$8 sps:$4 sm:$0xff]  }
 0x7a3   : > { %12510 = vmatprep.subr.bf16.mxu1 %v19552_v31  ;;  %v19592_v31 = vld [vmem:[%s25061_s5 + $0x8c0] ss:$8 sps:$4 sm:$0xff]  }
 0x7a5   : > { %12111 = vmatmul.mubr.bf16.vlgmr.msra.gmra.mrb[104].mxu1 %v22218_v23  ;;  %v19556_v23 = vld [vmem:[%s25061_s5 + $0x800] ss:$8 sps:$4 sm:$0xff]  }
 0x7a6   : > { %12511 = vmatpush1.bf16.msra.mxu1 %v19550_v55  ;;  %12542 = vmatprep.mubr.bf16.mxu1 %v19878_v35  ;;  %v19597_v55 = vld [vmem:[%s25061_s5 + $0x8d4] ss:$8 sps:$4 sm:$0xff]  }
 0x7a7   : > { %12512 = vmatprep.subr.bf16.mxu1 %v19555_v7  ;;  %v19595_v7 = vld [vmem:[%s25061_s5 + $0x8d0] ss:$8 sps:$4 sm:$0xff]  }
 0x7a9   : > { %v24478_v15 = vpop.f32.mrb[76].mxu0 }
 0x7aa   : > { %12513 = vmatpush1.bf16.msra.mxu1 %v19553_v41  ;;  %v24480_v59 = vpop.f32.mrb[77].mxu0  ;;  %v19600_v41 = vld [vmem:[%s25061_s5 + $0x8e4] ss:$8 sps:$4 sm:$0xff]  }
 0x7ab   : > { %v12507_v17 = vpop.f32.mrb[78].mxu0  ;;  %12514 = vmatprep.subr.bf16.mxu1 %v19558_v18 }
 0x7ac   : > { %v12508_v10 = vpop.f32.mrb[79].mxu0 }
 0x7ae   : > { %12515 = vmatpush1.bf16.msra.mxu1 %v19556_v23 }
 0x7af   : > { %12516 = vmatprep.subr.bf16.mxu1 %v19561_v20 }
 0x7b2   : > { %12517 = vmatpush1.bf16.msra.mxu1 %v19559_v19  ;;  %v19598_v19 = vld [vmem:[%s25061_s5 + $0x8e0] ss:$8 sps:$4 sm:$0xff]  }
 0x7b3   : > { %12518 = vmatprep.subr.bf16.mxu1 %v19564_v4 }
 0x7b6   : > { %12519 = vmatpush1.bf16.msra.mxu1 %v19562_v57  ;;  %v19603_v57 = vld [vmem:[%s25061_s5 + $0x8f4] ss:$8 sps:$4 sm:$0xff]  }
 0x7b7   : > { %12520 = vmatprep.subr.bf16.mxu1 %v19567_v43  ;;  %v19601_v43 = vld [vmem:[%s25061_s5 + $0x8f0] ss:$8 sps:$4 sm:$0xff]  }
 0x7ba   : > { %12521 = vmatpush1.bf16.msra.mxu1 %v19565_v22  ;;  %v19606_v22 = vld [vmem:[%s25061_s5 + $0x904] ss:$8 sps:$4 sm:$0xff]  }
 0x7bb   : > { %12842 = vmatprep.subr.bf16.mxu1 %v19570_v21  ;;  %v19604_v21 = vld [vmem:[%s25061_s5 + $0x900] ss:$8 sps:$4 sm:$0xff]  }
 0x7bd   : > { %17077 = vmatmul.mubr.msk.bf16.vlgmr.msra.gmra.mrb[108].mxu1 %vm6371_vm15, %v23628_v40 }
 0x7be   : > { %12843 = vmatpush1.bf16.msra.mxu1 %v19568_v25  ;;  %12874 = vmatprep.mubr.bf16.mxu1 %v12616_v6  ;;  %v19609_v25 = vld [vmem:[%s25061_s5 + $0x914] ss:$8 sps:$4 sm:$0xff]   ;;  %v19612_v6 = vld [vmem:[%s25061_s5 + $0x924] ss:$8 sps:$4 sm:$0xff]  }
 0x7bf   : > { %12844 = vmatprep.subr.bf16.mxu1 %v19573_v3  ;;  %v19607_v3 = vld [vmem:[%s25061_s5 + $0x910] ss:$8 sps:$4 sm:$0xff]  }
 0x7c1   : > { %v24523_v30 = vpop.f32.mrb[80].mxu0 }
 0x7c2   : > { %12845 = vmatpush1.bf16.msra.mxu1 %v19571_v29  ;;  %v24525_v32 = vpop.f32.mrb[81].mxu0  ;;  %v19610_v29 = vld [vmem:[%s25061_s5 + $0x920] ss:$8 sps:$4 sm:$0xff]  }
 0x7c3   : > { %v12921_v40 = vpop.f32.mrb[82].mxu0  ;;  %12846 = vmatprep.subr.bf16.mxu1 %v19576_v16  ;;  %v19615_v16 = vld [vmem:[%s25061_s5 + $0x934] ss:$8 sps:$4 sm:$0xff]  }
 0x7c4   : > { %v12922_v37 = vpop.f32.mrb[83].mxu0  ;;  %v19618_v40 = vld [vmem:[%s25061_s5 + $0xaa4] ss:$8 sps:$4 sm:$0xff]  }
 0x7c5   : > { %v19621_v37 = vld [vmem:[%s25061_s5 + $0xab4] ss:$8 sps:$4 sm:$0xff]  }
 0x7c6   : > { %12847 = vmatpush1.bf16.msra.mxu1 %v19574_v36  ;;  %v19613_v36 = vld [vmem:[%s25061_s5 + $0x930] ss:$8 sps:$4 sm:$0xff]  }
 0x7c7   : > { %12848 = vmatprep.subr.bf16.mxu1 %v19579_v54  ;;  %v19616_v54 = vld [vmem:[%s25061_s5 + $0xaa0] ss:$8 sps:$4 sm:$0xff]  }
 0x7c8   : > { %v10659_v27 = vpop.f32.mrb[88].mxu1 }
 0x7c9   : > { %v10701_v42 = vadd.f32 %v23706_v44, %v10659_v27  ;;  %v10661_v47 = vpop.f32.mrb[89].mxu1  ;;  %v19583_v44 = vld [vmem:[%s25061_s5 + $0x890] ss:$8 sps:$4 sm:$0xff]  }
 0x7ca   : > { %v10703_v0 = vadd.f32 %v23711_v48, %v10661_v47  ;;  %v10663_v61 = vpop.f32.mrb[90].mxu1  ;;  %12849 = vmatpush1.bf16.msra.mxu1 %v19577_v39  ;;  %v19588_v48 = vld [vmem:[%s25061_s5 + $0x8a4] ss:$8 sps:$4 sm:$0xff]   ;;  %v19619_v39 = vld [vmem:[%s25061_s5 + $0xab0] ss:$8 sps:$4 sm:$0xff]  }
 0x7cb   : > { %v10664_v63 = vpop.f32.mrb[91].mxu1  ;;  %12850 = vmatprep.subr.bf16.mxu1 %v19582_v26  ;;  %v10978_v5 = vadd.f32 %v23916_v45, %v10701_v42  ;;  %v19591_v45 = vld [vmem:[%s25061_s5 + $0x8b4] ss:$8 sps:$4 sm:$0xff]   ;;  %v19624_v26 = vld [vmem:[%s25061_s5 + $0xac4] ss:$8 sps:$4 sm:$0xff]  }
 0x7cc   : > { %v10980_v60 = vadd.f32 %v23921_v53, %v10703_v0  ;;  %v19589_v53 = vld [vmem:[%s25061_s5 + $0x8b0] ss:$8 sps:$4 sm:$0xff]   ;;  %v19627_v0 = vld [vmem:[%s25061_s5 + $0xad4] ss:$8 sps:$4 sm:$0xff]   ;;  %v19630_v63 = vld [vmem:[%s25061_s5 + $0xae4] ss:$8 sps:$4 sm:$0xff]  }
 0x7ce   : > { %12851 = vmatpush1.bf16.msra.mxu1 %v19580_v8  ;;  %v19625_v8 = vld [vmem:[%s25061_s5 + $0xad0] ss:$8 sps:$4 sm:$0xff]  }
 0x7cf   : > { %12852 = vmatprep.subr.bf16.mxu1 %v19585_v34  ;;  %v19628_v34 = vld [vmem:[%s25061_s5 + $0xae0] ss:$8 sps:$4 sm:$0xff]  }
 0x7d2   : > { %12853 = vmatpush1.bf16.msra.mxu1 %v19583_v44  ;;  %v19636_v44 = vld [vmem:[%s25061_s5 + $0xb04] ss:$8 sps:$4 sm:$0xff]  }
 0x7d3   : > { %12854 = vmatprep.subr.bf16.mxu1 %v19588_v48  ;;  %v19634_v48 = vld [vmem:[%s25061_s5 + $0xb00] ss:$8 sps:$4 sm:$0xff]  }
 0x7d6   : > { %12855 = vmatpush1.bf16.msra.mxu1 %v19586_v1  ;;  %v19639_v1 = vld [vmem:[%s25061_s5 + $0xb14] ss:$8 sps:$4 sm:$0xff]  }
 0x7d7   : > { %12856 = vmatprep.subr.bf16.mxu1 %v19591_v45  ;;  %v13380_v45 = vsel %vm6371_vm15, %v22291_v58, %v24142_v49  ;;  %v19640_v58 = vld [vmem:[%s25061_s5 + $0xb20] ss:$8 sps:$4 sm:$0xff]   ;;  %v19645_v49 = vld [vmem:[%s25061_s5 + $0xb34] ss:$8 sps:$4 sm:$0xff]  }
 0x7da   : > { %12857 = vmatpush1.bf16.msra.mxu1 %v19589_v53  ;;  %v19637_v53 = vld [vmem:[%s25061_s5 + $0xb10] ss:$8 sps:$4 sm:$0xff]  }
 0x7db   : > { %12858 = vmatprep.subr.bf16.mxu1 %v19594_v38  ;;  %v19642_v38 = vld [vmem:[%s25061_s5 + $0xb24] ss:$8 sps:$4 sm:$0xff]  }
 0x7de   : > { %12859 = vmatpush1.bf16.msra.mxu1 %v19592_v31 }
 0x7df   : > { %12860 = vmatprep.subr.bf16.mxu1 %v19597_v55 }
 0x7e0   : > { %v11018_v18 = vpop.f32.mrb[92].mxu1 }
 0x7e1   : > { %v24579_v23 = vadd.f32 %v11018_v18, %v10978_v5  ;;  %v11020_v17 = vpop.f32.mrb[93].mxu1  ;;  %v19633_v5 = vld [vmem:[%s25061_s5 + $0xaf4] ss:$8 sps:$4 sm:$0xff]   ;;  %v19648_v18 = vld [vmem:[%s25061_s5 + $0xb44] ss:$8 sps:$4 sm:$0xff]  }
 0x7e2   : > { %v24581_v20 = vadd.f32 %v11020_v17, %v10980_v60  ;;  %v11022_v10 = vpop.f32.mrb[94].mxu1  ;;  %12861 = vmatpush1.bf16.msra.mxu1 %v19595_v7  ;;  %v19631_v60 = vld [vmem:[%s25061_s5 + $0xaf0] ss:$8 sps:$4 sm:$0xff]  }
 0x7e3   : > { %v11023_v4 = vpop.f32.mrb[95].mxu1  ;;  %12862 = vmatprep.subr.bf16.mxu1 %v19600_v41  ;;  %v19643_v41 = vld [vmem:[%s25061_s5 + $0xb30] ss:$8 sps:$4 sm:$0xff]  }
 0x7e6   : > { %12863 = vmatpush1.bf16.msra.mxu1 %v19598_v19 }
 0x7e7   : > { %12864 = vmatprep.subr.bf16.mxu1 %v19603_v57 }
 0x7ea   : > { %12865 = vmatpush1.bf16.msra.mxu1 %v19601_v43  ;;  %v19646_v43 = vld [vmem:[%s25061_s5 + $0xb40] ss:$8 sps:$4 sm:$0xff]  }
 0x7eb   : > { %12866 = vmatprep.subr.bf16.mxu1 %v19606_v22 }
 0x7ee   : > { %12867 = vmatpush1.bf16.msra.mxu1 %v19604_v21 }
 0x7ef   : > { %12868 = vmatprep.subr.bf16.mxu1 %v19609_v25  ;;  %v19651_v25 = vld [vmem:[%s25061_s5 + $0xb54] ss:$8 sps:$4 sm:$0xff]  }
 0x7f2   : > { %12869 = vmatpush1.bf16.msra.mxu1 %v19607_v3 }
 0x7f3   : > { %12870 = vmatprep.subr.bf16.mxu1 %v19612_v6  ;;  %v19655_v6 = vld [vmem:[%s25061_s5 + $0xb70] ss:$8 sps:$4 sm:$0xff]  }
 0x7f6   : > { %12871 = vmatpush1.bf16.msra.mxu1 %v19610_v29  ;;  %v19660_v29 = vld [vmem:[%s25061_s5 + $0xb84] ss:$8 sps:$4 sm:$0xff]  }
 0x7f7   : > { %12872 = vmatprep.subr.bf16.mxu1 %v19615_v16  ;;  %v19658_v16 = vld [vmem:[%s25061_s5 + $0xb80] ss:$8 sps:$4 sm:$0xff]  }
 0x7fa   : > { %12873 = vmatpush1.bf16.msra.mxu1 %v19613_v36  ;;  %v19663_v36 = vld [vmem:[%s25061_s5 + $0xb94] ss:$8 sps:$4 sm:$0xff]  }
 0x7fb   : > { %13277 = vmatprep.subr.bf16.mxu1 %v19618_v40  ;;  %v19661_v40 = vld [vmem:[%s25061_s5 + $0xb90] ss:$8 sps:$4 sm:$0xff]  }
 0x7fd   : > { %12875 = vmatmul.mubr.bf16.vlgmr.msra.gmra.mrb[112].mxu1 %v22262_v46  ;;  %v19622_v46 = vld [vmem:[%s25061_s5 + $0xac0] ss:$8 sps:$4 sm:$0xff]  }
 0x7fe   : > { %13278 = vmatpush1.bf16.msra.mxu1 %v19616_v54  ;;  %13309 = vmatprep.mubr.bf16.mxu1 %v19878_v35  ;;  %v19666_v54 = vld [vmem:[%s25061_s5 + $0xba4] ss:$8 sps:$4 sm:$0xff]  }
 0x7ff   : > { %13279 = vmatprep.subr.bf16.mxu1 %v19621_v37 }
 0x801   : > { %v24633_v27 = vpop.f32.mrb[84].mxu0 }
 0x802   : > { %13280 = vmatpush1.bf16.msra.mxu1 %v19619_v39  ;;  %v24635_v42 = vpop.f32.mrb[85].mxu0 }
 0x803   : > { %v13274_v47 = vpop.f32.mrb[86].mxu0  ;;  %13281 = vmatprep.subr.bf16.mxu1 %v19624_v26 }
 0x804   : > { %v13275_v61 = vpop.f32.mrb[87].mxu0 }
 0x806   : > { %13282 = vmatpush1.bf16.msra.mxu1 %v19622_v46 }
 0x807   : > { %13283 = vmatprep.subr.bf16.mxu1 %v19627_v0  ;;  %v19664_v0 = vld [vmem:[%s25061_s5 + $0xba0] ss:$8 sps:$4 sm:$0xff]  }
 0x80a   : > { %13284 = vmatpush1.bf16.msra.mxu1 %v19625_v8 }
 0x80b   : > { %13285 = vmatprep.subr.bf16.mxu1 %v19630_v63  ;;  %v19669_v63 = vld [vmem:[%s25061_s5 + $0xbb4] ss:$8 sps:$4 sm:$0xff]  }
 0x80e   : > { %13286 = vmatpush1.bf16.msra.mxu1 %v19628_v34 }
 0x80f   : > { %13287 = vmatprep.subr.bf16.mxu1 %v19633_v5  ;;  %v19670_v5 = vld [vmem:[%s25061_s5 + $0xbc0] ss:$8 sps:$4 sm:$0xff]  }
 0x812   : > { %13288 = vmatpush1.bf16.msra.mxu1 %v19631_v60  ;;  %v19675_v60 = vld [vmem:[%s25061_s5 + $0xbd4] ss:$8 sps:$4 sm:$0xff]  }
 0x813   : > { %13606 = vmatprep.subr.bf16.mxu1 %v19636_v44  ;;  %v19673_v44 = vld [vmem:[%s25061_s5 + $0xbd0] ss:$8 sps:$4 sm:$0xff]  }
 0x815   : > { %17255 = vmatmul.mubr.msk.bf16.vlgmr.msra.gmra.mrb[116].mxu1 %vm6371_vm15, %v23874_v14 }
 0x816   : > { %13607 = vmatpush1.bf16.msra.mxu1 %v19634_v48  ;;  %13638 = vmatprep.mubr.bf16.mxu1 %v13380_v45  ;;  %v19678_v48 = vld [vmem:[%s25061_s5 + $0xbe4] ss:$8 sps:$4 sm:$0xff]   ;;  %v19681_v45 = vld [vmem:[%s25061_s5 + $0xbf4] ss:$8 sps:$4 sm:$0xff]  }
 0x817   : > { %13608 = vmatprep.subr.bf16.mxu1 %v19639_v1  ;;  %v19676_v1 = vld [vmem:[%s25061_s5 + $0xbe0] ss:$8 sps:$4 sm:$0xff]  }
 0x819   : > { %v24678_v31 = vpop.f32.mrb[88].mxu0 }
 0x81a   : > { %13609 = vmatpush1.bf16.msra.mxu1 %v19637_v53  ;;  %v24680_v55 = vpop.f32.mrb[89].mxu0  ;;  %v19679_v53 = vld [vmem:[%s25061_s5 + $0xbf0] ss:$8 sps:$4 sm:$0xff]  }
 0x81b   : > { %v13685_v14 = vpop.f32.mrb[90].mxu0  ;;  %13610 = vmatprep.subr.bf16.mxu1 %v19642_v38  ;;  %v19684_v38 = vld [vmem:[%s25061_s5 + $0xd64] ss:$8 sps:$4 sm:$0xff]  }
 0x81c   : > { %v13686_v7 = vpop.f32.mrb[91].mxu0  ;;  %v19687_v14 = vld [vmem:[%s25061_s5 + $0xd74] ss:$8 sps:$4 sm:$0xff]  }
 0x81d   : > { %v19690_v7 = vld [vmem:[%s25061_s5 + $0xd84] ss:$8 sps:$4 sm:$0xff]  }
 0x81e   : > { %13611 = vmatpush1.bf16.msra.mxu1 %v19640_v58  ;;  %v19682_v58 = vld [vmem:[%s25061_s5 + $0xd60] ss:$8 sps:$4 sm:$0xff]  }
 0x81f   : > { %13612 = vmatprep.subr.bf16.mxu1 %v19645_v49  ;;  %v19685_v49 = vld [vmem:[%s25061_s5 + $0xd70] ss:$8 sps:$4 sm:$0xff]  }
 0x820   : > { %v11348_v17 = vpop.f32.mrb[96].mxu1 }
 0x821   : > { %v11390_v10 = vadd.f32 %v23997_v52, %v11348_v17  ;;  %v11350_v19 = vpop.f32.mrb[97].mxu1  ;;  %v19649_v52 = vld [vmem:[%s25061_s5 + $0xb50] ss:$8 sps:$4 sm:$0xff]  }
 0x822   : > { %v11392_v4 = vadd.f32 %v24002_v56, %v11350_v19  ;;  %v11352_v57 = vpop.f32.mrb[98].mxu1  ;;  %13613 = vmatpush1.bf16.msra.mxu1 %v19643_v41  ;;  %v19654_v56 = vld [vmem:[%s25061_s5 + $0xb64] ss:$8 sps:$4 sm:$0xff]   ;;  %v19691_v19 = vld [vmem:[%s25061_s5 + $0xd90] ss:$8 sps:$4 sm:$0xff]  }
 0x823   : > { %v11396_v22 = vadd.f32 %v11390_v10, %v24579_v23  ;;  %v11353_v21 = vpop.f32.mrb[99].mxu1  ;;  %13614 = vmatprep.subr.bf16.mxu1 %v19648_v18  ;;  %v19652_v23 = vld [vmem:[%s25061_s5 + $0xb60] ss:$8 sps:$4 sm:$0xff]  }
 0x824   : > { %v11397_v3 = vadd.f32 %v11392_v4, %v24581_v20  ;;  %v19657_v20 = vld [vmem:[%s25061_s5 + $0xb74] ss:$8 sps:$4 sm:$0xff]   ;;  %v19696_v4 = vld [vmem:[%s25061_s5 + $0xda4] ss:$8 sps:$4 sm:$0xff]   ;;  %v19694_v57 = vld [vmem:[%s25061_s5 + $0xda0] ss:$8 sps:$4 sm:$0xff]  }
 0x825   : > { %v19702_v21 = vld [vmem:[%s25061_s5 + $0xdc4] ss:$8 sps:$4 sm:$0xff]  }
 0x826   : > { %13615 = vmatpush1.bf16.msra.mxu1 %v19646_v43  ;;  %v19699_v43 = vld [vmem:[%s25061_s5 + $0xdb4] ss:$8 sps:$4 sm:$0xff]  }
 0x827   : > { %13616 = vmatprep.subr.bf16.mxu1 %v19651_v25  ;;  %v24818_v25 = vpop.permute.xlu0 %14136 }
 0x82a   : > { %13617 = vmatpush1.bf16.msra.mxu1 %v19649_v52  ;;  %v19705_v52 = vld [vmem:[%s25061_s5 + $0xdd4] ss:$8 sps:$4 sm:$0xff]  }
 0x82b   : > { %13618 = vmatprep.subr.bf16.mxu1 %v19654_v56  ;;  %v14141_v56 = vsel %vm6371_vm15, %v24818_v25, %v24454_v2 }
 0x82e   : > { %13619 = vmatpush1.bf16.msra.mxu1 %v19652_v23  ;;  %v19703_v23 = vld [vmem:[%s25061_s5 + $0xdd0] ss:$8 sps:$4 sm:$0xff]  }
 0x82f   : > { %13620 = vmatprep.subr.bf16.mxu1 %v19657_v20  ;;  %v19708_v20 = vld [vmem:[%s25061_s5 + $0xde4] ss:$8 sps:$4 sm:$0xff]  }
 0x832   : > { %13621 = vmatpush1.bf16.msra.mxu1 %v19655_v6 }
 0x833   : > { %13622 = vmatprep.subr.bf16.mxu1 %v19660_v29 }
 0x836   : > { %13623 = vmatpush1.bf16.msra.mxu1 %v19658_v16  ;;  %v19711_v16 = vld [vmem:[%s25061_s5 + $0xdf4] ss:$8 sps:$4 sm:$0xff]  }
 0x837   : > { %13624 = vmatprep.subr.bf16.mxu1 %v19663_v36 }
 0x838   : > { %v11780_v37 = vpop.f32.mrb[100].mxu1 }
 0x839   : > { %v11781_v39 = vadd.f32 %v11780_v37, %v24209_v50  ;;  %v11782_v26 = vpop.f32.mrb[101].mxu1  ;;  %v19667_v50 = vld [vmem:[%s25061_s5 + $0xbb0] ss:$8 sps:$4 sm:$0xff]  }
 0x83a   : > { %v11783_v46 = vadd.f32 %v11782_v26, %v24214_v51  ;;  %v11784_v47 = vpop.f32.mrb[102].mxu1  ;;  %13625 = vmatpush1.bf16.msra.mxu1 %v19661_v40  ;;  %v19672_v51 = vld [vmem:[%s25061_s5 + $0xbc4] ss:$8 sps:$4 sm:$0xff]   ;;  %v19709_v40 = vld [vmem:[%s25061_s5 + $0xdf0] ss:$8 sps:$4 sm:$0xff]  }
 0x83b   : > { %v24739_v61 = vadd.f32 %v11781_v39, %v11396_v22  ;;  %v11785_v8 = vpop.f32.mrb[103].mxu1  ;;  %13626 = vmatprep.subr.bf16.mxu1 %v19666_v54  ;;  %v19697_v22 = vld [vmem:[%s25061_s5 + $0xdb0] ss:$8 sps:$4 sm:$0xff]   ;;  %v19714_v54 = vld [vmem:[%s25061_s5 + $0xe04] ss:$8 sps:$4 sm:$0xff]  }
 0x83c   : > { %v24744_v34 = vadd.f32 %v11783_v46, %v11397_v3  ;;  %v19700_v3 = vld [vmem:[%s25061_s5 + $0xdc0] ss:$8 sps:$4 sm:$0xff]  }
 0x83e   : > { %13627 = vmatpush1.bf16.msra.mxu1 %v19664_v0  ;;  %v19712_v0 = vld [vmem:[%s25061_s5 + $0xe00] ss:$8 sps:$4 sm:$0xff]  }
 0x83f   : > { %13628 = vmatprep.subr.bf16.mxu1 %v19669_v63 }
 0x842   : > { %13629 = vmatpush1.bf16.msra.mxu1 %v19667_v50  ;;  %v19717_v50 = vld [vmem:[%s25061_s5 + $0xe14] ss:$8 sps:$4 sm:$0xff]  }
 0x843   : > { %13630 = vmatprep.subr.bf16.mxu1 %v19672_v51 }
 0x846   : > { %13631 = vmatpush1.bf16.msra.mxu1 %v19670_v5  ;;  %v19721_v5 = vld [vmem:[%s25061_s5 + $0xe30] ss:$8 sps:$4 sm:$0xff]  }
 0x847   : > { %13632 = vmatprep.subr.bf16.mxu1 %v19675_v60  ;;  %v19726_v60 = vld [vmem:[%s25061_s5 + $0xe44] ss:$8 sps:$4 sm:$0xff]  }
 0x84a   : > { %13633 = vmatpush1.bf16.msra.mxu1 %v19673_v44  ;;  %v19724_v44 = vld [vmem:[%s25061_s5 + $0xe40] ss:$8 sps:$4 sm:$0xff]  }
 0x84b   : > { %13634 = vmatprep.subr.bf16.mxu1 %v19678_v48  ;;  %v19729_v48 = vld [vmem:[%s25061_s5 + $0xe54] ss:$8 sps:$4 sm:$0xff]  }
 0x84e   : > { %13635 = vmatpush1.bf16.msra.mxu1 %v19676_v1  ;;  %v19727_v1 = vld [vmem:[%s25061_s5 + $0xe50] ss:$8 sps:$4 sm:$0xff]  }
 0x84f   : > { %13636 = vmatprep.subr.bf16.mxu1 %v19681_v45  ;;  %v19732_v45 = vld [vmem:[%s25061_s5 + $0xe64] ss:$8 sps:$4 sm:$0xff]  }
 0x852   : > { %13637 = vmatpush1.bf16.msra.mxu1 %v19679_v53 }
 0x853   : > { %14035 = vmatprep.subr.bf16.mxu1 %v19684_v38 }
 0x855   : > { %13639 = vmatmul.mubr.bf16.vlgmr.msra.gmra.mrb[120].mxu1 %v22313_v9  ;;  %v19688_v9 = vld [vmem:[%s25061_s5 + $0xd80] ss:$8 sps:$4 sm:$0xff]  }
 0x856   : > { %14036 = vmatpush1.bf16.msra.mxu1 %v19682_v58  ;;  %14067 = vmatprep.mubr.bf16.mxu1 %v19878_v35  ;;  %v19693_v35 = vld [vmem:[%s25061_s5 + $0xd94] ss:$8 sps:$4 sm:$0xff]  }
 0x857   : > { %14037 = vmatprep.subr.bf16.mxu1 %v19687_v14 }
 0x859   : > { %v24790_v41 = vpop.f32.mrb[92].mxu0 }
 0x85a   : > { %14038 = vmatpush1.bf16.msra.mxu1 %v19685_v49  ;;  %v24792_v18 = vpop.f32.mrb[93].mxu0 }
 0x85b   : > { %v14032_v17 = vpop.f32.mrb[94].mxu0  ;;  %14039 = vmatprep.subr.bf16.mxu1 %v19690_v7  ;;  %v19730_v7 = vld [vmem:[%s25061_s5 + $0xe60] ss:$8 sps:$4 sm:$0xff]  }
 0x85c   : > { %v14033_v10 = vpop.f32.mrb[95].mxu0 }
 0x85e   : > { %14040 = vmatpush1.bf16.msra.mxu1 %v19688_v9 }
 0x85f   : > { %14041 = vmatprep.subr.bf16.mxu1 %v19693_v35  ;;  %v19735_v35 = vld [vmem:[%s25061_s5 + $0xe74] ss:$8 sps:$4 sm:$0xff]  }
 0x862   : > { %14042 = vmatpush1.bf16.msra.mxu1 %v19691_v19  ;;  %v19736_v19 = vld [vmem:[%s25061_s5 + $0xe80] ss:$8 sps:$4 sm:$0xff]  }
 0x863   : > { %14043 = vmatprep.subr.bf16.mxu1 %v19696_v4  ;;  %v19741_v4 = vld [vmem:[%s25061_s5 + $0xe94] ss:$8 sps:$4 sm:$0xff]  }
 0x866   : > { %14044 = vmatpush1.bf16.msra.mxu1 %v19694_v57  ;;  %v19739_v57 = vld [vmem:[%s25061_s5 + $0xe90] ss:$8 sps:$4 sm:$0xff]  }
 0x867   : > { %14045 = vmatprep.subr.bf16.mxu1 %v19699_v43  ;;  %v19744_v43 = vld [vmem:[%s25061_s5 + $0xea4] ss:$8 sps:$4 sm:$0xff]  }
 0x86a   : > { %14046 = vmatpush1.bf16.msra.mxu1 %v19697_v22  ;;  %v19742_v22 = vld [vmem:[%s25061_s5 + $0xea0] ss:$8 sps:$4 sm:$0xff]  }
 0x86b   : > { %14367 = vmatprep.subr.bf16.mxu1 %v19702_v21  ;;  %v19747_v21 = vld [vmem:[%s25061_s5 + $0xeb4] ss:$8 sps:$4 sm:$0xff]  }
 0x86d   : > { %17433 = vmatmul.mubr.msk.bf16.vlgmr.msra.gmra.mrb[124].mxu1 %vm6371_vm15, %v24167_v24  ;;  %v19706_v24 = vld [vmem:[%s25061_s5 + $0xde0] ss:$8 sps:$4 sm:$0xff]  }
 0x86e   : > { %14368 = vmatpush1.bf16.msra.mxu1 %v19700_v3  ;;  %14399 = vmatprep.mubr.bf16.mxu1 %v14141_v56  ;;  %v19745_v3 = vld [vmem:[%s25061_s5 + $0xeb0] ss:$8 sps:$4 sm:$0xff]  }
 0x86f   : > { %14369 = vmatprep.subr.bf16.mxu1 %v19705_v52  ;;  %v14135_v52 = vpop.permute.xlu0 %14134 }
 0x870   : > { %v14140_v56 = vsel %vm6371_vm15, %v14135_v52, %v24818_v25  ;;  %v14485_v25 = vld [vmem:[%s25063_s7 + $0x90] sm:$0xff]  ;;  %v14496_v52 = vld [vmem:[%s25063_s7 + $0xe8] sm:$0xff] }
 0x871   : > { %v24837_v6 = vpop.f32.mrb[96].mxu0 }
 0x872   : > { %14370 = vmatpush1.bf16.msra.mxu1 %v19703_v23  ;;  %v24839_v29 = vpop.f32.mrb[97].mxu0  ;;  %v14483_v23 = vld [vmem:[%s25063_s7 + $0x80] sm:$0xff] }
 0x873   : > { %v14446_v2 = vpop.f32.mrb[98].mxu0  ;;  %14371 = vmatprep.subr.bf16.mxu1 %v19708_v20  ;;  %v14484_v20 = vld [vmem:[%s25063_s7 + $0x88] sm:$0xff] }
 0x874   : > { %v14447_v36 = vpop.f32.mrb[99].mxu0  ;;  %v17628_v2 = vpack.c.bf16 %v14484_v20, %v14483_v23  ;;  %v14479_v20 = vld [vmem:[%s25063_s7 + $0x60] sm:$0xff] }
 0x875   : > { %v14486_v36 = vld [vmem:[%s25063_s7 + $0x98] sm:$0xff] }
 0x876   : > { %14372 = vmatpush1.bf16.msra.mxu1 %v19706_v24  ;;  %v14467_v24 = vld [vmem:[%s25063_s7] sm:$0xff]  ;;  %17629 = vmatprep.subr.bf16.mxu0 %v17628_v2  ;;  %v14497_v2 = vld [vmem:[%s25063_s7 + $0xf0] sm:$0xff] }
 0x877   : > { %14373 = vmatprep.subr.bf16.mxu1 %v19711_v16  ;;  %v14468_v16 = vld [vmem:[%s25063_s7 + $0x8] sm:$0xff] }
 0x878   : > { %v12112_v37 = vpop.f32.mrb[104].mxu1 }
 0x879   : > { %v12154_v39 = vadd.f32 %v24290_v13, %v12112_v37  ;;  %v12114_v26 = vpop.f32.mrb[105].mxu1  ;;  %v19715_v13 = vld [vmem:[%s25061_s5 + $0xe10] ss:$8 sps:$4 sm:$0xff]  }
 0x87a   : > { %v12156_v46 = vadd.f32 %v24295_v33, %v12114_v26  ;;  %v12116_v47 = vpop.f32.mrb[106].mxu1  ;;  %14374 = vmatpush1.bf16.msra.mxu1 %v19709_v40  ;;  %v19720_v33 = vld [vmem:[%s25061_s5 + $0xe24] ss:$8 sps:$4 sm:$0xff]   ;;  %v17630_v40 = vpack.c.bf16 %v14468_v16, %v14467_v24  ;;  %v14469_v37 = vld [vmem:[%s25063_s7 + $0x10] sm:$0xff]  ;;  %v14498_v16 = vld [vmem:[%s25063_s7 + $0xf8] sm:$0xff] }
 0x87b   : > { %v12160_v8 = vadd.f32 %v12154_v39, %v24739_v61  ;;  %v12117_v63 = vpop.f32.mrb[107].mxu1  ;;  %14375 = vmatprep.subr.bf16.mxu1 %v19714_v54  ;;  %v19718_v61 = vld [vmem:[%s25061_s5 + $0xe20] ss:$8 sps:$4 sm:$0xff]   ;;  %v17632_v54 = vpack.c.bf16 %v14486_v36, %v14485_v25  ;;  %v14470_v39 = vld [vmem:[%s25063_s7 + $0x18] sm:$0xff]  ;;  %v17656_v36 = vpack.c.bf16 %v14498_v16, %v14497_v2 }
 0x87c   : > { %v12161_v51 = vadd.f32 %v12156_v46, %v24744_v34  ;;  %v19723_v34 = vld [vmem:[%s25061_s5 + $0xe34] ss:$8 sps:$4 sm:$0xff]   ;;  %v14487_v26 = vld [vmem:[%s25063_s7 + $0xa0] sm:$0xff]  ;;  %v14488_v46 = vld [vmem:[%s25063_s7 + $0xa8] sm:$0xff]  ;;  %17631 = vmatpush3.bf16.msra.mxu0 %v17630_v40  ;;  %v17634_v47 = vpack.c.bf16 %v14470_v39, %v14469_v37 }
 0x87d   : > { %17633 = vmatprep.subr.bf16.mxu0 %v17632_v54  ;;  %v14472_v63 = vld [vmem:[%s25063_s7 + $0x28] sm:$0xff]  ;;  %v14481_v40 = vld [vmem:[%s25063_s7 + $0x70] sm:$0xff]  ;;  %v14482_v54 = vld [vmem:[%s25063_s7 + $0x78] sm:$0xff] }
 0x87e   : > { %14376 = vmatpush1.bf16.msra.mxu1 %v19712_v0  ;;  %v17636_v0 = vpack.c.bf16 %v14488_v46, %v14487_v26  ;;  %v14480_v24 = vld [vmem:[%s25063_s7 + $0x68] sm:$0xff]  ;;  %v17658_v37 = vpack.c.bf16 %v14482_v54, %v14481_v40 }
 0x87f   : > { %14377 = vmatprep.subr.bf16.mxu1 %v19717_v50  ;;  %v17654_v25 = vpack.c.bf16 %v14480_v24, %v14479_v20 }
 0x880   : > { %17635 = vmatpush3.bf16.msra.mxu0 %v17634_v47 }
 0x881   : > { %17637 = vmatprep.subr.bf16.mxu0 %v17636_v0 }
 0x882   : > { %14378 = vmatpush1.bf16.msra.mxu1 %v19715_v13 }
 0x883   : > { %14379 = vmatprep.subr.bf16.mxu1 %v19720_v33 }
 0x886   : > { %14380 = vmatpush1.bf16.msra.mxu1 %v19718_v61 }
 0x887   : > { %14381 = vmatprep.subr.bf16.mxu1 %v19723_v34 }
 0x88a   : > { %14382 = vmatpush1.bf16.msra.mxu1 %v19721_v5 }
 0x88b   : > { %14383 = vmatprep.subr.bf16.mxu1 %v19726_v60 }
 0x88e   : > { %14384 = vmatpush1.bf16.msra.mxu1 %v19724_v44 }
 0x88f   : > { %14385 = vmatprep.subr.bf16.mxu1 %v19729_v48 }
 0x890   : > { %v12544_v53 = vpop.f32.mrb[108].mxu1 }
 0x891   : > { %v12545_v38 = vadd.f32 %v12544_v53, %v24478_v15  ;;  %v12546_v58 = vpop.f32.mrb[109].mxu1  ;;  %v19733_v15 = vld [vmem:[%s25061_s5 + $0xe70] ss:$8 sps:$4 sm:$0xff]  }
 0x892   : > { %v12547_v14 = vadd.f32 %v12546_v58, %v24480_v59  ;;  %v12548_v49 = vpop.f32.mrb[110].mxu1  ;;  %14386 = vmatpush1.bf16.msra.mxu1 %v19727_v1  ;;  %v19738_v59 = vld [vmem:[%s25061_s5 + $0xe84] ss:$8 sps:$4 sm:$0xff]  }
 0x893   : > { %v12551_v9 = vadd.f32 %v12545_v38, %v12160_v8  ;;  %v12549_v17 = vpop.f32.mrb[111].mxu1  ;;  %14387 = vmatprep.subr.bf16.mxu1 %v19732_v45  ;;  %v14471_v8 = vld [vmem:[%s25063_s7 + $0x20] sm:$0xff] }
 0x894   : > { %v12552_v10 = vadd.f32 %v12547_v14, %v12161_v51  ;;  %v17638_v50 = vpack.c.bf16 %v14472_v63, %v14471_v8 }
 0x896   : > { %14388 = vmatpush1.bf16.msra.mxu1 %v19730_v7  ;;  %17639 = vmatpush3.bf16.msra.mxu0 %v17638_v50 }
 0x897   : > { %14389 = vmatprep.subr.bf16.mxu1 %v19735_v35  ;;  %v14492_v35 = vld [vmem:[%s25063_s7 + $0xc8] sm:$0xff] }
 0x89a   : > { %14390 = vmatpush1.bf16.msra.mxu1 %v19733_v15  ;;  %v14476_v15 = vld [vmem:[%s25063_s7 + $0x48] sm:$0xff] }
 0x89b   : > { %14391 = vmatprep.subr.bf16.mxu1 %v19738_v59 }
 0x89e   : > { %14392 = vmatpush1.bf16.msra.mxu1 %v19736_v19  ;;  %v14493_v19 = vld [vmem:[%s25063_s7 + $0xd0] sm:$0xff] }
 0x89f   : > { %14393 = vmatprep.subr.bf16.mxu1 %v19741_v4  ;;  %v14494_v4 = vld [vmem:[%s25063_s7 + $0xd8] sm:$0xff] }
 0x8a2   : > { %14394 = vmatpush1.bf16.msra.mxu1 %v19739_v57 }
 0x8a3   : > { %14395 = vmatprep.subr.bf16.mxu1 %v19744_v43  ;;  %v17648_v43 = vpack.c.bf16 %v14494_v4, %v14493_v19 }
 0x8a6   : > { %14396 = vmatpush1.bf16.msra.mxu1 %v19742_v22  ;;  %v14477_v22 = vld [vmem:[%s25063_s7 + $0x50] sm:$0xff] }
 0x8a7   : > { %14397 = vmatprep.subr.bf16.mxu1 %v19747_v21  ;;  %v14478_v21 = vld [vmem:[%s25063_s7 + $0x58] sm:$0xff] }
 0x8aa   : > { %14398 = vmatpush1.bf16.msra.mxu1 %v19745_v3  ;;  %v14495_v3 = vld [vmem:[%s25063_s7 + $0xe0] sm:$0xff] }
 0x8ab   : > { %v17652_v23 = vpack.c.bf16 %v14496_v52, %v14495_v3 }
 0x8ad   : > { %14400 = vmatmul.mubr.bf16.vlgmr.msra.gmra.mrb[128].mxu1 %v14140_v56  ;;  %v17650_v56 = vpack.c.bf16 %v14478_v21, %v14477_v22 }
 0x8d0   : > { %v12876_v51 = vpop.f32.mrb[112].mxu1 }
 0x8d1   : > { %v12918_v13 = vadd.f32 %v24523_v30, %v12876_v51  ;;  %v12878_v33 = vpop.f32.mrb[113].mxu1  ;;  %v14489_v30 = vld [vmem:[%s25063_s7 + $0xb0] sm:$0xff] }
 0x8d2   : > { %v12920_v61 = vadd.f32 %v24525_v32, %v12878_v33  ;;  %v12880_v34 = vpop.f32.mrb[114].mxu1  ;;  %v14490_v32 = vld [vmem:[%s25063_s7 + $0xb8] sm:$0xff] }
 0x8d3   : > { %v12924_v5 = vadd.f32 %v12918_v13, %v12551_v9  ;;  %v12881_v60 = vpop.f32.mrb[115].mxu1  ;;  %v17640_v7 = vpack.c.bf16 %v14490_v32, %v14489_v30  ;;  %v14491_v9 = vld [vmem:[%s25063_s7 + $0xc0] sm:$0xff] }
 0x8d4   : > { %v12925_v44 = vadd.f32 %v12920_v61, %v12552_v10  ;;  %v14475_v10 = vld [vmem:[%s25063_s7 + $0x40] sm:$0xff]  ;;  %v17644_v59 = vpack.c.bf16 %v14492_v35, %v14491_v9 }
 0x8d5   : > { %17641 = vmatprep.subr.bf16.mxu0 %v17640_v7  ;;  %v17646_v57 = vpack.c.bf16 %v14476_v15, %v14475_v10 }
 0x8e8   : > { %v13311_v48 = vpop.f32.mrb[116].mxu1 }
 0x8e9   : > { %v13312_v1 = vadd.f32 %v13311_v48, %v24633_v27  ;;  %v13313_v45 = vpop.f32.mrb[117].mxu1  ;;  %v14473_v27 = vld [vmem:[%s25063_s7 + $0x30] sm:$0xff] }
 0x8ea   : > { %v13314_v53 = vadd.f32 %v13313_v45, %v24635_v42  ;;  %v13315_v38 = vpop.f32.mrb[118].mxu1  ;;  %v14474_v42 = vld [vmem:[%s25063_s7 + $0x38] sm:$0xff] }
 0x8eb   : > { %v13318_v58 = vadd.f32 %v13312_v1, %v12924_v5  ;;  %v13316_v14 = vpop.f32.mrb[119].mxu1  ;;  %v17642_v17 = vpack.c.bf16 %v14474_v42, %v14473_v27  ;;  %v17523_v42 = vld [vmem:[%s25064_s8] ss:$0 sm:$0xff] }
 0x8ec   : > { %v13319_v49 = vadd.f32 %v13314_v53, %v12925_v44 }
 0x8ed   : > { %17643 = vmatpush3.bf16.msra.mxu0 %v17642_v17 }
 0x8ee   : > { %17645 = vmatprep.subr.bf16.mxu0 %v17644_v59 }
 0x8f1   : > { %17647 = vmatpush3.bf16.msra.mxu0 %v17646_v57 }
 0x8f2   : > { %17649 = vmatprep.subr.bf16.mxu0 %v17648_v43 }
 0x8f5   : > { %17651 = vmatpush3.bf16.msra.mxu0 %v17650_v56 }
 0x8f6   : > { %17653 = vmatprep.subr.bf16.mxu0 %v17652_v23 }
 0x8f9   : > { %17655 = vmatpush3.bf16.msra.mxu0 %v17654_v25 }
 0x8fa   : > { %17657 = vmatprep.subr.bf16.mxu0 %v17656_v36 }
 0x8fd   : > { %17659 = vmatpush3.bf16.msra.mxu0 %v17658_v37 }
 0x928   : > { %v13640_v39 = vpop.f32.mrb[120].mxu1 }
 0x929   : > { %v13682_v26 = vadd.f32 %v24678_v31, %v13640_v39  ;;  %v13642_v46 = vpop.f32.mrb[121].mxu1  ;;  %v14451_v31 = vld [vmem:[%s25062_s6] sm:$0x3] }
 0x92a   : > { %v13684_v47 = vadd.f32 %v24680_v55, %v13642_v46  ;;  %v13644_v0 = vpop.f32.mrb[122].mxu1  ;;  %v14456_v1 = vrot.slane %v14451_v31, %v20554_v11  ;;  %v10246_v11 = vand.u32 127, %v422_v62 }
 0x92b   : > { %v13688_v8 = vadd.f32 %v13682_v26, %v13318_v58  ;;  %v13645_v63 = vpop.f32.mrb[123].mxu1 }
 0x92c   : > { %v13689_v50 = vadd.f32 %v13684_v47, %v13319_v49 }
 0x940   : > { %v14069_v51 = vpop.f32.mrb[124].mxu1 }
 0x941   : > { %v14070_v13 = vadd.f32 %v14069_v51, %v24790_v41  ;;  %v14071_v33 = vpop.f32.mrb[125].mxu1  ;;  %v14460_v41 = vrot.slane %v14451_v31, %v20557_v12 }
 0x942   : > { %v14072_v61 = vadd.f32 %v14071_v33, %v24792_v18  ;;  %v14073_v34 = vpop.f32.mrb[126].mxu1 }
 0x943   : > { %v14076_v5 = vadd.f32 %v14070_v13, %v13688_v8  ;;  %v14074_v60 = vpop.f32.mrb[127].mxu1 }
 0x944   : > { %v14077_v44 = vadd.f32 %v14072_v61, %v13689_v50 }
 0x980   : > { %v14401_v48 = vpop.f32.mrb[128].mxu1 }
 0x981   : > { %v14443_v55 = vadd.f32 %v24837_v6, %v14401_v48  ;;  %v14403_v45 = vpop.f32.mrb[129].mxu1  ;;  %v10250_v6 = vpop.xlane.xlu1 %10249 }
 0x982   : > { %v14445_v53 = vadd.f32 %v24839_v29, %v14403_v45  ;;  %v14405_v38 = vpop.f32.mrb[130].mxu1  ;;  %vm10251_vm1 = vcmp.eq.f32.partialorder %v24405_v28, %v10250_v6 }
 0x983   : > { %v14449_v18 = vadd.f32 %v14443_v55, %v14076_v5  ;;  %v14406_v58 = vpop.f32.mrb[131].mxu1  ;;  %v10252_v29 = vsel %vm10251_vm1, %v10246_v11, 4 }
 0x984   : > { %v14450_v14 = vadd.f32 %v14445_v53, %v14077_v44  ;;  %v10253_v9 = vsel %vm10247_vm0, %v10252_v29, 2147483647 }
 0x985   : > { %v14463_v49 = vadd.f32 %v14456_v1, %v14449_v18  ;;  %v10255_v10 = vshra.s32 %v10253_v9, 16  ;;  %v10254_v28 = vand.u32 65535, %v10253_v9 }
 0x986   : > { %v14464_v30 = vadd.f32 %v14460_v41, %v14450_v14 }
 0x987   : > { %v10257_v59 = vcvt.s32.f32 %v10255_v10  ;;  %v10256_v43 = vcvt.s32.f32 %v10254_v28 }
 0x988   : > { %19796 = vtanh.f32 %v14464_v30 }
 0x989   : > { %19798 = vtanh.f32 %v14463_v49 }
 0x992   : > { %v19797_v32 = vpop.eup %19796 }
 0x993   : > { %v19799_v7 = vpop.eup %19798  ;;  %14570 = vmatprep.mubr.f32.mxu0 %v19797_v32 }
 0x994   : > { %14571 = vmatmul.mubr.f32.vlgmr.msra.gmra.mrb[100].mxu0 %v19799_v7 }
 0xa67   : > { %v17593_v27 = vpop.f32.mrb[100].mxu0 }
 0xa68   : > { %v17594_v12 = vpop.f32.mrb[101].mxu0 }
 0xa69   : > { %v17595_v17 = vadd.f32 %v17594_v12, %v17593_v27 }
 0xa6b   : > { %v14573_v35 = vadd.f32 %v17595_v17, %v17523_v42 }
 0xa6d   : > { %v14576_v15 = vsel %vm10247_vm0, %v14573_v35, -inf }
 0xa6e   : > { %14577 = vmax.xlane.f32.xlu0 %v14576_v15 }
 0xa72   : > { %10258 = vmin.xlane.f32.xlu0 %v10257_v59 }
 0xafb   : > { %v14578_v62 = vpop.xlane.xlu0 %14577 }
 0xafc   : > { %vm14579_vm2 = vcmp.eq.f32.partialorder %v14573_v35, %v14578_v62 }
 0xafd   : > { %v14580_v19 = vsel %vm14579_vm2, %v10246_v11, 4 }
 0xafe   : > { %v14581_v4 = vsel %vm10247_vm0, %v14580_v19, 2147483647 }
 0xaff   : > { %v10259_v57 = vpop.xlane.xlu0 %10258  ;;  %v14583_v22 = vshra.s32 %v14581_v4, 16  ;;  %v14582_v56 = vand.u32 65535, %v14581_v4 }
 0xb00   : > { %vm10260_vm3 = vcmp.eq.f32.partialorder %v10257_v59, %v10259_v57  ;;  %v10265_v52 = vcvt.f32.s32 %v10259_v57 }
 0xb01   : > { %v10261_v21 = vsel %vm10260_vm3, %v10256_v43, inf  ;;  %v14585_v3 = vcvt.s32.f32 %v14583_v22  ;;  %v14584_v16 = vcvt.s32.f32 %v14582_v56 }
 0xb02   : > { %10262 = vmin.xlane.f32.xlu0 %v10261_v21  ;;  %v10266_v20 = vshll.u32 %v10265_v52, 16 }
 0xb03   : > { %14586 = vmin.xlane.f32.xlu1 %v14585_v3 }
 0xb8f   : > { %v10263_v23 = vpop.xlane.xlu0 %10262 }
 0xb90   : > { %v10264_v24 = vcvt.f32.s32 %v10263_v23  ;;  %v14587_v2 = vpop.xlane.xlu1 %14586 }
 0xb91   : > { %vm14588_vm5 = vcmp.eq.f32.partialorder %v14585_v3, %v14587_v2  ;;  %v14593_v40 = vcvt.f32.s32 %v14587_v2 }
 0xb92   : > { %v10267_v25 = vadd.s32 %v10266_v20, %v10264_v24  ;;  %v14589_v36 = vsel %vm14588_vm5, %v14584_v16, inf }
 0xb93   : > { %14590 = vmin.xlane.f32.xlu1 %v14589_v36  ;;  %v14594_v37 = vshll.u32 %v14593_v40, 16 }
 0xb94   : > { %10269 = vst.msk [vmem:[%s330_s27] sm:$0x3] %vm10268_vm4, %v10267_v25 }
 0xc20   : > { %v14591_v54 = vpop.xlane.xlu1 %14590 }
 0xc21   : > { %v14592_v39 = vcvt.f32.s32 %v14591_v54 }
 0xc23   : > { %v14595_v26 = vadd.s32 %v14594_v37, %v14592_v39 }
 0xc25   : > { %14596 = vst.msk [vmem:[%s330_s27 + $0x2] sm:$0x3] %vm10268_vm4, %v14595_v26 }
 0xc26 PF: > { %s19_s30 = sadd.s32 1, %s19876_s30  }
 0xc27   : > { %p16_p4 = scmp.ge.s32.totalorder %s19_s30, 4  }
 0xc29   :  { %18 = sbr.rel (!%p16_p4) target bundleno = 1 (0x1), region = 107 }

</bundles_post_ra>
